<compile_context>
chip_gen: v7x
topology: tpu7x:2x2x1
jax: 0.10.0
libtpu: 0.0.40
codegen_flags: <defaults>
</compile_context>

<pallas_src>
import functools
import numpy as np
import jax
import jax.numpy as jnp
from jax import lax
from jax.experimental import pallas as pl
from jax.experimental.pallas import tpu as pltpu


# ----------------------------------------------------------------------------
# Pallas kernel 1: CBAM_Enhanced + AdaptiveAvgPool2d((1,1)), fused, F frames/step.
# Input block  f: (F, HW, C) bf16  (F frames, spatially flattened, channels-last)
# Output block  : (F, C)     f32   (pooled feature vectors, lane-dense)
# ----------------------------------------------------------------------------
def cbam_pool_kernel(f_ref, w1_ref, b1_ref, w2_ref, b2_ref,
                     wspa_ref, wspm_ref, bsp_ref, out_ref):
    F, HW, C = f_ref.shape
    # bf16 DMA stream, f32 compute (portable; v5e has no bf16 VALU/EUP).
    # TODO(synk): on v6e/v7x the elementwise math could stay bf16 for more VPU tput.
    f = f_ref[...].astype(jnp.float32)                  # (F, HW, C)

    # channel attention: GAP -> 1x1 conv (C->C/r) -> ReLU -> 1x1 conv -> sigmoid
    # (avg-pool branch only, matching the reference CBAM_Enhanced module)
    gap = jnp.mean(f, axis=1)                           # (F, C)
    h1 = jnp.maximum(
        jnp.dot(gap, w1_ref[...], preferred_element_type=jnp.float32) + b1_ref[...],
        0.0)                                            # (F, Cr)
    ca = jax.nn.sigmoid(
        jnp.dot(h1, w2_ref[...], preferred_element_type=jnp.float32) + b2_ref[...])
    chn = f * ca[:, None, :]                            # (F, HW, C)

    # spatial attention.  Channel-sum moved onto the (otherwise idle) MXU:
    #   sum_c chn[f,h,c] = sum_c f[f,h,c]*ca[f,c]  ==  einsum('fhc,fxc->fhx')
    avg_c = jnp.sum(
        jnp.einsum('fhc,fxc->fhx', f, ca[:, None, :],
                   preferred_element_type=jnp.float32), axis=2) * (1.0 / C)  # (F, HW)
    max_c = jnp.max(chn, axis=2)                        # (F, HW)   (XLU)
    # 7x7 conv expressed exactly as (F,HW)x(HW,HW) matmuls (weights pre-scattered
    # and pre-transposed at init time); scalar bias lives in SMEM.
    s = (jnp.dot(avg_c, wspa_ref[...], preferred_element_type=jnp.float32)
         + jnp.dot(max_c, wspm_ref[...], preferred_element_type=jnp.float32)
         + bsp_ref[0])                                  # (F, HW)
    sa = jax.nn.sigmoid(s)

    # sa * chn and AdaptiveAvgPool2d((1,1)) fused into one MXU contraction:
    #   pooled[f,c] = (1/HW) * sum_h sa[f,h] * chn[f,h,c]
    pooled = jnp.sum(
        jnp.einsum('fxh,fhc->fxc', sa[:, None, :], chn,
                   preferred_element_type=jnp.float32), axis=1) * (1.0 / HW)
    out_ref[...] = pooled                               # (F, C)


def _frames_per_step(bt, target=128):
    """Largest 8-aligned divisor of bt up to `target` (falls back to full bt so the
    block stays layout-legal); prefer >=2 grid steps so v7x dual-TC / DMA
    pipelining have work to split.  (v6e could use target=256.)"""
    best = bt
    f = 8
    while f <= min(target, bt):
        if bt % f == 0:
            best = f
        f += 8
    if best == bt and bt >= 16 and bt % 16 == 0:
        best = bt // 2
    return best


def cbam_pool_call(f, cb, wspa_t, wspm_t):
    BT, HW, C = f.shape
    Cr = cb["w1"].shape[1]
    F = _frames_per_step(BT)
    return pl.pallas_call(
        cbam_pool_kernel,
        out_shape=jax.ShapeDtypeStruct((BT, C), jnp.float32),
        grid=(BT // F,),
        in_specs=[
            pl.BlockSpec((F, HW, C), lambda i: (i, 0, 0)),
            pl.BlockSpec((C, Cr), lambda i: (0, 0)),
            pl.BlockSpec((1, Cr), lambda i: (0, 0)),
            pl.BlockSpec((Cr, C), lambda i: (0, 0)),
            pl.BlockSpec((1, C), lambda i: (0, 0)),
            pl.BlockSpec((HW, HW), lambda i: (0, 0)),
            pl.BlockSpec((HW, HW), lambda i: (0, 0)),
            pl.BlockSpec(memory_space=pltpu.MemorySpace.SMEM),   # scalar conv bias
        ],
        out_specs=pl.BlockSpec((F, C), lambda i: (i, 0)),
        compiler_params=pltpu.CompilerParams(
            dimension_semantics=("parallel",),
            vmem_limit_bytes=56 * 1024 * 1024),
    )(f, cb["w1"], cb["b1"], cb["w2"], cb["b2"], wspa_t, wspm_t, cb["bsp"])


# ----------------------------------------------------------------------------
# Pallas kernel 2: temporal MultiheadAttention (batch_first) + mean over T +
# Linear(512,1) + sigmoid.  Gridded over batch; weights resident (constant maps).
# ----------------------------------------------------------------------------
def mha_head_kernel(feats_ref, wqkv_ref, bqkv_ref, wo_ref, bo_ref,
                    wfc_ref, bfc_ref, out_ref, *, num_heads):
    _, T, E = feats_ref.shape
    hd = E // num_heads
    scale = 1.0 / float(hd) ** 0.5

    x = feats_ref[...].reshape(T, E)                    # squeeze leading batch dim

    # fused QKV projection: one (T, E) x (E, 3E) bf16 MXU matmul, f32 accum
    qkv = (jnp.dot(x.astype(jnp.bfloat16), wqkv_ref[...],
                   preferred_element_type=jnp.float32) + bqkv_ref[...])    # (T, 3E)

    # per-head attention (tiny static unroll).  Each head's context is folded
    # directly into the output projection, so no lane-axis concatenate / extra
    # (T, E) copy is materialized.
    attn = jnp.zeros((T, E), jnp.float32)
    for h in range(num_heads):
        lo = h * hd
        qh = (qkv[:, lo:lo + hd] * scale).astype(jnp.bfloat16)             # (T, hd)
        kh = qkv[:, E + lo:E + lo + hd].astype(jnp.bfloat16)               # (T, hd)
        vh = qkv[:, 2 * E + lo:2 * E + lo + hd].astype(jnp.bfloat16)       # (T, hd)
        s = jnp.einsum('td,sd->ts', qh, kh,
                       preferred_element_type=jnp.float32)                 # (T, T)
        s = s - jnp.max(s, axis=-1, keepdims=True)
        p = jnp.exp(s)
        p = p * pl.reciprocal(jnp.sum(p, axis=-1, keepdims=True), approx=True)
        ctx_h = jnp.einsum('ts,sd->td', p.astype(jnp.bfloat16), vh,
                           preferred_element_type=jnp.float32)             # (T, hd)
        attn = attn + jnp.dot(ctx_h.astype(jnp.bfloat16), wo_ref[lo:lo + hd, :],
                              preferred_element_type=jnp.float32)          # (T, E)
    attn = attn + bo_ref[...]

    m = jnp.mean(attn, axis=0, keepdims=True)            # (1, E)  mean over T
    # final Linear(512,1) as an MXU matvec (keeps the XLU free)
    logit = jnp.dot(m, wfc_ref[...], preferred_element_type=jnp.float32) + bfc_ref[...]
    out_ref[...] = jax.nn.sigmoid(logit).reshape(1, 1, 1)  # per-batch probability


def mha_head_call(feats, hd_params, num_heads):
    B, T, E = feats.shape
    kern = functools.partial(mha_head_kernel, num_heads=num_heads)

    def const(shape):
        return pl.BlockSpec(shape, lambda b, _s=shape: (0,) * len(_s))

    probs = pl.pallas_call(
        kern,
        out_shape=jax.ShapeDtypeStruct((B, 1, 1), jnp.float32),
        grid=(B,),
        in_specs=[
            pl.BlockSpec((1, T, E), lambda b: (b, 0, 0)),
            const((E, 3 * E)), const((1, 3 * E)),
            const((E, E)), const((1, E)),
            const((E, 1)), const((1, 1)),
        ],
        out_specs=pl.BlockSpec((1, 1, 1), lambda b: (b, 0, 0)),
        compiler_params=pltpu.CompilerParams(dimension_semantics=("parallel",)),
    )(feats, hd_params["wqkv"], hd_params["bqkv"], hd_params["wo"],
      hd_params["bo"], hd_params["wfc"], hd_params["bfc"])
    return jnp.mean(probs)                               # mean over batch (wrapper)


# ----------------------------------------------------------------------------
# Plain-JAX resnet18 backbone (eval-mode batchnorm), NHWC (TPU-native layout).
# ----------------------------------------------------------------------------
RESNET18_CFG = [(64, 64, 1), (64, 64, 1), (64, 128, 2), (128, 128, 1),
                (128, 256, 2), (256, 256, 1), (256, 512, 2), (512, 512, 1)]
RESNET18_STRIDES = tuple(s for _, _, s in RESNET18_CFG)   # static (jit-safe)


def conv2d(x, w, stride=1, padding=0):
    return lax.conv_general_dilated(
        x, w, window_strides=(stride, stride),
        padding=[(padding, padding), (padding, padding)],
        dimension_numbers=("NHWC", "HWIO", "NHWC"))


def bn_params(c):
    return dict(gamma=jnp.ones((c,), jnp.float32), beta=jnp.zeros((c,), jnp.float32),
                mean=jnp.zeros((c,), jnp.float32), var=jnp.ones((c,), jnp.float32))


def apply_bn(x, p, eps=1e-5):
    inv = p["gamma"] / jnp.sqrt(p["var"] + eps)
    return x * inv + (p["beta"] - p["mean"] * inv)       # channels-last broadcast


def init_conv(key, out_c, in_c, k):
    std = (2.0 / (in_c * k * k)) ** 0.5
    return jax.random.normal(key, (k, k, in_c, out_c), jnp.float32) * std  # HWIO


def init_basic_block(key, in_c, out_c, stride):
    k0, k1, k2 = jax.random.split(key, 3)
    p = dict(conv1=init_conv(k0, out_c, in_c, 3), bn1=bn_params(out_c),
             conv2=init_conv(k1, out_c, out_c, 3), bn2=bn_params(out_c))
    if stride != 1 or in_c != out_c:
        p["down_conv"] = init_conv(k2, out_c, in_c, 1)
        p["down_bn"] = bn_params(out_c)
    return p


def basic_block(x, p, stride):
    out = conv2d(x, p["conv1"], stride=stride, padding=1)
    out = jnp.maximum(apply_bn(out, p["bn1"]), 0.0)
    out = conv2d(out, p["conv2"], stride=1, padding=1)
    out = apply_bn(out, p["bn2"])
    if "down_conv" in p:
        identity = apply_bn(conv2d(x, p["down_conv"], stride=stride, padding=0),
                            p["down_bn"])
    else:
        identity = x
    return jnp.maximum(out + identity, 0.0)


def init_resnet18(key):
    ks = jax.random.split(key, 10)
    blocks = [init_basic_block(ks[i + 1], ic, oc, s)
              for i, (ic, oc, s) in enumerate(RESNET18_CFG)]
    return dict(conv1=init_conv(ks[0], 64, 3, 7), bn1=bn_params(64), blocks=blocks)


def resnet18_backbone(x, p):                              # x: (N, H, W, 3)
    out = conv2d(x, p["conv1"], stride=2, padding=3)
    out = jnp.maximum(apply_bn(out, p["bn1"]), 0.0)
    out = lax.reduce_window(out, -jnp.inf, lax.max, (1, 3, 3, 1), (1, 2, 2, 1),
                            [(0, 0), (1, 1), (1, 1), (0, 0)])
    for blk, stride in zip(p["blocks"], RESNET18_STRIDES):
        out = basic_block(out, blk, stride)
    return out                                            # (N, H/32, W/32, 512)


# ----------------------------------------------------------------------------
# Parameter init for CBAM and the attention head (deterministic, synthetic).
# ----------------------------------------------------------------------------
def init_cbam(key, C=512, reduction=16):
    Cr = C // reduction
    k = jax.random.split(key, 6)
    return dict(
        w1=jax.random.normal(k[0], (C, Cr), jnp.float32) * (1.0 / C) ** 0.5,
        b1=jax.random.normal(k[1], (1, Cr), jnp.float32) * 0.01,
        w2=jax.random.normal(k[2], (Cr, C), jnp.float32) * (1.0 / Cr) ** 0.5,
        b2=jax.random.normal(k[3], (1, C), jnp.float32) * 0.01,
        w_sp=np.asarray(jax.random.normal(k[4], (1, 2, 7, 7), jnp.float32)
                        * (1.0 / 98.0) ** 0.5),
        bsp=jax.random.normal(k[5], (1,), jnp.float32) * 0.01,   # scalar (SMEM)
    )


def build_spatial_matrices(w_sp, Hf, Wf):
    """Scatter the 7x7 (padding=3) conv weights into exact (HW, HW) matmul form,
    pre-transposed so the kernel computes s = x_flat @ W_T.  Runs ONCE at init."""
    HW = Hf * Wf
    A = np.zeros((HW, HW), np.float32)
    M = np.zeros((HW, HW), np.float32)
    for io in range(Hf):
        for jo in range(Wf):
            po = io * Wf + jo
            for ki in range(7):
                for kj in range(7):
                    ii, jj = io + ki - 3, jo + kj - 3
                    if 0 <= ii < Hf and 0 <= jj < Wf:
                        pi = ii * Wf + jj
                        A[po, pi] += w_sp[0, 0, ki, kj]
                        M[po, pi] += w_sp[0, 1, ki, kj]
    return jnp.asarray(A.T), jnp.asarray(M.T)


def init_head(key, E=512):
    # NOTE: synthetic weights; jnp.dot(x, w) convention == PyTorch x @ W^T with
    # w = W^T (verify when loading real nn.MultiheadAttention checkpoints).
    k = jax.random.split(key, 10)
    s = (1.0 / E) ** 0.5
    wq = jax.random.normal(k[0], (E, E), jnp.float32) * s
    wk = jax.random.normal(k[2], (E, E), jnp.float32) * s
    wv = jax.random.normal(k[4], (E, E), jnp.float32) * s
    bq = jax.random.normal(k[1], (1, E), jnp.float32) * 0.01
    bk = jax.random.normal(k[3], (1, E), jnp.float32) * 0.01
    bv = jax.random.normal(k[5], (1, E), jnp.float32) * 0.01
    return dict(
        wqkv=jnp.concatenate([wq, wk, wv], axis=1).astype(jnp.bfloat16),  # (E, 3E)
        bqkv=jnp.concatenate([bq, bk, bv], axis=1),                       # (1, 3E)
        wo=(jax.random.normal(k[6], (E, E), jnp.float32) * s).astype(jnp.bfloat16),
        bo=jax.random.normal(k[7], (1, E), jnp.float32) * 0.01,
        wfc=jax.random.normal(k[8], (E, 1), jnp.float32) * s,   # Linear(512,1).weight^T
        bfc=jax.random.normal(k[9], (1, 1), jnp.float32) * 0.01,
    )


# ----------------------------------------------------------------------------
# Full forward pass (matches CNN_TSM_Attn_Enhanced.forward).
# ----------------------------------------------------------------------------
def cnn_tsm_attn_forward(x, params, num_heads=2):
    B, C, T, H, W = x.shape
    # batch ALL frames through the backbone in one NHWC call (no per-frame loop)
    frames = x.transpose(0, 2, 3, 4, 1).reshape(B * T, H, W, C)
    fmap = resnet18_backbone(frames, params["backbone"])      # (B*T, Hf, Wf, 512)
    BT, Hf, Wf, Cf = fmap.shape
    HW = Hf * Wf
    assert params["wspa_t"].shape == (HW, HW), "spatial matrices built for wrong HW"

    # channels-last flatten is free in NHWC; stream to the kernel in bf16
    # (halves HBM DMA for the dominant tensor; kernel computes in f32)
    f = fmap.reshape(BT, HW, Cf).astype(jnp.bfloat16)          # (B*T, HW, C)
    pooled = cbam_pool_call(f, params["cbam"], params["wspa_t"], params["wspm_t"])
    feats_seq = pooled.reshape(B, T, Cf)                        # (B, T, 512)

    return mha_head_call(feats_seq, params["head"], num_heads)  # scalar


if __name__ == "__main__":
    key = jax.random.PRNGKey(0)
    kx, kb, kc, kh = jax.random.split(key, 4)

    B, Cin, T, H, W = 2, 3, 8, 64, 64                    # small but resnet-valid
    x = jax.random.normal(kx, (B, Cin, T, H, W), jnp.float32)

    cbam = init_cbam(kc)
    Hf, Wf = H // 32, W // 32                            # resnet18 total stride 32
    wspa_t, wspm_t = build_spatial_matrices(cbam["w_sp"], Hf, Wf)  # hoisted to init
    params = dict(backbone=init_resnet18(kb), cbam=cbam, head=init_head(kh),
                  wspa_t=wspa_t, wspm_t=wspm_t)

    fwd = jax.jit(functools.partial(cnn_tsm_attn_forward, num_heads=2))
    result = fwd(x, params)
    result = jax.block_until_ready(result)
    assert result.shape == () and jnp.isfinite(result)
    print("KERNEL_OK")
</pallas_src>

<mosaic_0001>
module attributes {stable_mosaic.version = 11 : i64} {
  func.func @cbam_pool_kernel(%arg0: i32, %arg1: memref<8x4x512xbf16, #tpu.memory_space<vmem>>, %arg2: memref<512x32xf32, #tpu.memory_space<vmem>>, %arg3: memref<1x32xf32, #tpu.memory_space<vmem>>, %arg4: memref<32x512xf32, #tpu.memory_space<vmem>>, %arg5: memref<1x512xf32, #tpu.memory_space<vmem>>, %arg6: memref<4x4xf32, #tpu.memory_space<vmem>>, %arg7: memref<4x4xf32, #tpu.memory_space<vmem>>, %arg8: memref<1xf32, #tpu.memory_space<smem>>, %arg9: memref<8x512xf32, #tpu.memory_space<vmem>>) attributes {dimension_semantics = [#tpu.dimension_semantics<parallel>], iteration_bounds = array<i64: 2>, scalar_prefetch = 0 : i64, scratch_operands = 0 : i64, tpu.core_type = #tpu.core_type<tc>, window_params = [{transform_indices = @transform_0, window_bounds = array<i64: 8, 4, 512>}, {pipeline_mode = #tpu.pipeline_mode<synchronous>, transform_indices = @transform_1, window_bounds = array<i64: 512, 32>}, {pipeline_mode = #tpu.pipeline_mode<synchronous>, transform_indices = @transform_2, window_bounds = array<i64: 1, 32>}, {pipeline_mode = #tpu.pipeline_mode<synchronous>, transform_indices = @transform_3, window_bounds = array<i64: 32, 512>}, {pipeline_mode = #tpu.pipeline_mode<synchronous>, transform_indices = @transform_4, window_bounds = array<i64: 1, 512>}, {pipeline_mode = #tpu.pipeline_mode<synchronous>, transform_indices = @transform_5, window_bounds = array<i64: 4, 4>}, {pipeline_mode = #tpu.pipeline_mode<synchronous>, transform_indices = @transform_6, window_bounds = array<i64: 4, 4>}, {transform_indices = @transform_7, window_bounds = array<i64: 1>}, {transform_indices = @transform_8, window_bounds = array<i64: 8, 512>}]} {
    %c0 = arith.constant 0 : index
    %c0_0 = arith.constant 0 : index
    %c0_1 = arith.constant 0 : index
    %0 = vector.load %arg1[%c0, %c0_0, %c0_1] : memref<8x4x512xbf16, #tpu.memory_space<vmem>>, vector<8x4x512xbf16>
    %1 = arith.extf %0 : vector<8x4x512xbf16> to vector<8x4x512xf32>
    %cst = arith.constant dense<0.000000e+00> : vector<8x512xf32>
    %2 = vector.multi_reduction <add>, %1, %cst [1] : vector<8x4x512xf32> to vector<8x512xf32>
    %cst_2 = arith.constant 4.000000e+00 : f32
    %3 = vector.broadcast %cst_2 : f32 to vector<8x512xf32>
    %4 = arith.divf %2, %3 : vector<8x512xf32>
    %c0_3 = arith.constant 0 : index
    %c0_4 = arith.constant 0 : index
    %5 = vector.load %arg2[%c0_3, %c0_4] : memref<512x32xf32, #tpu.memory_space<vmem>>, vector<512x32xf32>
    %cst_5 = arith.constant dense<0.000000e+00> : vector<8x32xf32>
    %6 = tpu.matmul %4, %5, %cst_5 {dimension_numbers = #tpu.dot_dimension_numbers<[1], [0], [0], [1], [0, 0, 1, 1], [], []>} : vector<8x512xf32>, vector<512x32xf32>, vector<8x32xf32> -> vector<8x32xf32>
    %c0_6 = arith.constant 0 : index
    %c0_7 = arith.constant 0 : index
    %7 = vector.load %arg3[%c0_6, %c0_7] : memref<1x32xf32, #tpu.memory_space<vmem>>, vector<1x32xf32>
    %8 = vector.broadcast %7 : vector<1x32xf32> to vector<8x32xf32>
    %9 = arith.addf %6, %8 : vector<8x32xf32>
    %cst_8 = arith.constant 0.000000e+00 : f32
    %10 = vector.broadcast %cst_8 : f32 to vector<8x32xf32>
    %11 = arith.maximumf %9, %10 : vector<8x32xf32>
    %c0_9 = arith.constant 0 : index
    %c0_10 = arith.constant 0 : index
    %12 = vector.load %arg4[%c0_9, %c0_10] : memref<32x512xf32, #tpu.memory_space<vmem>>, vector<32x512xf32>
    %cst_11 = arith.constant dense<0.000000e+00> : vector<8x512xf32>
    %13 = tpu.matmul %11, %12, %cst_11 {dimension_numbers = #tpu.dot_dimension_numbers<[1], [0], [0], [1], [0, 0, 1, 1], [], []>} : vector<8x32xf32>, vector<32x512xf32>, vector<8x512xf32> -> vector<8x512xf32>
    %c0_12 = arith.constant 0 : index
    %c0_13 = arith.constant 0 : index
    %14 = vector.load %arg5[%c0_12, %c0_13] : memref<1x512xf32, #tpu.memory_space<vmem>>, vector<1x512xf32>
    %15 = vector.broadcast %14 : vector<1x512xf32> to vector<8x512xf32>
    %16 = arith.addf %13, %15 : vector<8x512xf32>
    %17 = arith.negf %16 : vector<8x512xf32>
    %18 = math.exp %17 : vector<8x512xf32>
    %cst_14 = arith.constant 1.000000e+00 : f32
    %19 = vector.broadcast %cst_14 : f32 to vector<8x512xf32>
    %20 = arith.addf %19, %18 : vector<8x512xf32>
    %21 = arith.divf %19, %20 : vector<8x512xf32>
    %22 = vector.shape_cast %21 : vector<8x512xf32> to vector<8x1x512xf32>
    %23 = vector.broadcast %22 : vector<8x1x512xf32> to vector<8x4x512xf32>
    %24 = arith.mulf %1, %23 : vector<8x4x512xf32>
    %25 = vector.shape_cast %21 : vector<8x512xf32> to vector<8x1x512xf32>
    "tpu.trace_start"() <{level = 10 : i32, message = "fhc,fxc->fhx"}> : () -> ()
    %cst_15 = arith.constant dense<0.000000e+00> : vector<8x4x1xf32>
    %26 = tpu.matmul %1, %25, %cst_15 {dimension_numbers = #tpu.dot_dimension_numbers<[2], [2], [1], [1], [0, 0, 0, 1, 1, 1], [0], [0]>} : vector<8x4x512xf32>, vector<8x1x512xf32>, vector<8x4x1xf32> -> vector<8x4x1xf32>
    "tpu.trace_stop"() : () -> ()
    %cst_16 = arith.constant dense<0.000000e+00> : vector<8x4xf32>
    %27 = vector.multi_reduction <add>, %26, %cst_16 [2] : vector<8x4x1xf32> to vector<8x4xf32>
    %cst_17 = arith.constant 0.001953125 : f32
    %28 = vector.broadcast %cst_17 : f32 to vector<8x4xf32>
    %29 = arith.mulf %27, %28 : vector<8x4xf32>
    %cst_18 = arith.constant dense<0xFF800000> : vector<8x4xf32>
    %30 = vector.multi_reduction <maximumf>, %24, %cst_18 [2] : vector<8x4x512xf32> to vector<8x4xf32>
    %c0_19 = arith.constant 0 : index
    %c0_20 = arith.constant 0 : index
    %31 = vector.load %arg6[%c0_19, %c0_20] : memref<4x4xf32, #tpu.memory_space<vmem>>, vector<4x4xf32>
    %cst_21 = arith.constant dense<0.000000e+00> : vector<8x4xf32>
    %32 = tpu.matmul %29, %31, %cst_21 {dimension_numbers = #tpu.dot_dimension_numbers<[1], [0], [0], [1], [0, 0, 1, 1], [], []>} : vector<8x4xf32>, vector<4x4xf32>, vector<8x4xf32> -> vector<8x4xf32>
    %c0_22 = arith.constant 0 : index
    %c0_23 = arith.constant 0 : index
    %33 = vector.load %arg7[%c0_22, %c0_23] : memref<4x4xf32, #tpu.memory_space<vmem>>, vector<4x4xf32>
    %cst_24 = arith.constant dense<0.000000e+00> : vector<8x4xf32>
    %34 = tpu.matmul %30, %33, %cst_24 {dimension_numbers = #tpu.dot_dimension_numbers<[1], [0], [0], [1], [0, 0, 1, 1], [], []>} : vector<8x4xf32>, vector<4x4xf32>, vector<8x4xf32> -> vector<8x4xf32>
    %35 = arith.addf %32, %34 : vector<8x4xf32>
    %c0_25 = arith.constant 0 : index
    %36 = memref.load %arg8[%c0_25] : memref<1xf32, #tpu.memory_space<smem>>
    %37 = vector.broadcast %36 : f32 to vector<8x4xf32>
    %38 = arith.addf %35, %37 : vector<8x4xf32>
    %39 = arith.negf %38 : vector<8x4xf32>
    %40 = math.exp %39 : vector<8x4xf32>
    %cst_26 = arith.constant 1.000000e+00 : f32
    %41 = vector.broadcast %cst_26 : f32 to vector<8x4xf32>
    %42 = arith.addf %41, %40 : vector<8x4xf32>
    %43 = arith.divf %41, %42 : vector<8x4xf32>
    %44 = vector.shape_cast %43 : vector<8x4xf32> to vector<8x1x4xf32>
    "tpu.trace_start"() <{level = 10 : i32, message = "fxh,fhc->fxc"}> : () -> ()
    %cst_27 = arith.constant dense<0.000000e+00> : vector<8x1x512xf32>
    %45 = tpu.matmul %44, %24, %cst_27 {dimension_numbers = #tpu.dot_dimension_numbers<[2], [1], [1], [2], [0, 0, 0, 1, 1, 2], [0], [0]>} : vector<8x1x4xf32>, vector<8x4x512xf32>, vector<8x1x512xf32> -> vector<8x1x512xf32>
    "tpu.trace_stop"() : () -> ()
    %cst_28 = arith.constant dense<0.000000e+00> : vector<8x512xf32>
    %46 = vector.multi_reduction <add>, %45, %cst_28 [1] : vector<8x1x512xf32> to vector<8x512xf32>
    %cst_29 = arith.constant 2.500000e-01 : f32
    %47 = vector.broadcast %cst_29 : f32 to vector<8x512xf32>
    %48 = arith.mulf %46, %47 : vector<8x512xf32>
    %c0_30 = arith.constant 0 : index
    %c0_31 = arith.constant 0 : index
    %49 = vector.load %arg9[%c0_30, %c0_31] : memref<8x512xf32, #tpu.memory_space<vmem>>, vector<8x512xf32>
    tpu.vector_store %arg9[%c0_30, %c0_31], %48 {strides = array<i32>} : memref<8x512xf32, #tpu.memory_space<vmem>>, vector<8x512xf32>,
    return
  }
  func.func @transform_0(%arg0: i32) -> (i32, i32, i32) {
    %c0_i32 = arith.constant 0 : i32
    %c0_i32_0 = arith.constant 0 : i32
    %c0_i32_1 = arith.constant 0 : i32
    return %arg0, %c0_i32, %c0_i32_0 : i32, i32, i32
  }
  func.func @transform_1(%arg0: i32) -> (i32, i32) {
    %c0_i32 = arith.constant 0 : i32
    %c0_i32_0 = arith.constant 0 : i32
    %c0_i32_1 = arith.constant 0 : i32
    return %c0_i32, %c0_i32_0 : i32, i32
  }
  func.func @transform_2(%arg0: i32) -> (i32, i32) {
    %c0_i32 = arith.constant 0 : i32
    %c0_i32_0 = arith.constant 0 : i32
    %c0_i32_1 = arith.constant 0 : i32
    return %c0_i32, %c0_i32_0 : i32, i32
  }
  func.func @transform_3(%arg0: i32) -> (i32, i32) {
    %c0_i32 = arith.constant 0 : i32
    %c0_i32_0 = arith.constant 0 : i32
    %c0_i32_1 = arith.constant 0 : i32
    return %c0_i32, %c0_i32_0 : i32, i32
  }
  func.func @transform_4(%arg0: i32) -> (i32, i32) {
    %c0_i32 = arith.constant 0 : i32
    %c0_i32_0 = arith.constant 0 : i32
    %c0_i32_1 = arith.constant 0 : i32
    return %c0_i32, %c0_i32_0 : i32, i32
  }
  func.func @transform_5(%arg0: i32) -> (i32, i32) {
    %c0_i32 = arith.constant 0 : i32
    %c0_i32_0 = arith.constant 0 : i32
    %c0_i32_1 = arith.constant 0 : i32
    return %c0_i32, %c0_i32_0 : i32, i32
  }
  func.func @transform_6(%arg0: i32) -> (i32, i32) {
    %c0_i32 = arith.constant 0 : i32
    %c0_i32_0 = arith.constant 0 : i32
    %c0_i32_1 = arith.constant 0 : i32
    return %c0_i32, %c0_i32_0 : i32, i32
  }
  func.func @transform_7(%arg0: i32) -> i32 {
    %c0_i32 = arith.constant 0 : i32
    %c0_i32_0 = arith.constant 0 : i32
    return %c0_i32 : i32
  }
  func.func @transform_8(%arg0: i32) -> (i32, i32) {
    %c0_i32 = arith.constant 0 : i32
    %c0_i32_0 = arith.constant 0 : i32
    return %arg0, %c0_i32 : i32, i32
  }
}

module attributes {stable_mosaic.version = 11 : i64} {
  func.func @mha_head_kernel(%arg0: i32, %arg1: memref<1x8x512xf32, #tpu.memory_space<vmem>>, %arg2: memref<512x1536xbf16, #tpu.memory_space<vmem>>, %arg3: memref<1x1536xf32, #tpu.memory_space<vmem>>, %arg4: memref<512x512xbf16, #tpu.memory_space<vmem>>, %arg5: memref<1x512xf32, #tpu.memory_space<vmem>>, %arg6: memref<512x1xf32, #tpu.memory_space<vmem>>, %arg7: memref<1x1xf32, #tpu.memory_space<vmem>>, %arg8: memref<1x1x1xf32, #tpu.memory_space<vmem>>) attributes {dimension_semantics = [#tpu.dimension_semantics<parallel>], iteration_bounds = array<i64: 2>, scalar_prefetch = 0 : i64, scratch_operands = 0 : i64, tpu.core_type = #tpu.core_type<tc>, window_params = [{transform_indices = @transform_0, window_bounds = array<i64: 1, 8, 512>}, {pipeline_mode = #tpu.pipeline_mode<synchronous>, transform_indices = @transform_1, window_bounds = array<i64: 512, 1536>}, {pipeline_mode = #tpu.pipeline_mode<synchronous>, transform_indices = @transform_2, window_bounds = array<i64: 1, 1536>}, {pipeline_mode = #tpu.pipeline_mode<synchronous>, transform_indices = @transform_3, window_bounds = array<i64: 512, 512>}, {pipeline_mode = #tpu.pipeline_mode<synchronous>, transform_indices = @transform_4, window_bounds = array<i64: 1, 512>}, {pipeline_mode = #tpu.pipeline_mode<synchronous>, transform_indices = @transform_5, window_bounds = array<i64: 512, 1>}, {pipeline_mode = #tpu.pipeline_mode<synchronous>, transform_indices = @transform_6, window_bounds = array<i64: 1, 1>}, {transform_indices = @transform_7, window_bounds = array<i64: 1, 1, 1>}]} {
    %c0 = arith.constant 0 : index
    %c0_0 = arith.constant 0 : index
    %c0_1 = arith.constant 0 : index
    %0 = vector.load %arg1[%c0, %c0_0, %c0_1] : memref<1x8x512xf32, #tpu.memory_space<vmem>>, vector<1x8x512xf32>
    %1 = vector.shape_cast %0 : vector<1x8x512xf32> to vector<8x512xf32>
    %2 = arith.truncf %1 : vector<8x512xf32> to vector<8x512xbf16>
    %c0_2 = arith.constant 0 : index
    %c0_3 = arith.constant 0 : index
    %3 = vector.load %arg2[%c0_2, %c0_3] : memref<512x1536xbf16, #tpu.memory_space<vmem>>, vector<512x1536xbf16>
    %cst = arith.constant dense<0.000000e+00> : vector<8x1536xf32>
    %4 = tpu.matmul %2, %3, %cst {dimension_numbers = #tpu.dot_dimension_numbers<[1], [0], [0], [1], [0, 0, 1, 1], [], []>} : vector<8x512xbf16>, vector<512x1536xbf16>, vector<8x1536xf32> -> vector<8x1536xf32>
    %c0_4 = arith.constant 0 : index
    %c0_5 = arith.constant 0 : index
    %5 = vector.load %arg3[%c0_4, %c0_5] : memref<1x1536xf32, #tpu.memory_space<vmem>>, vector<1x1536xf32>
    %6 = vector.broadcast %5 : vector<1x1536xf32> to vector<8x1536xf32>
    %7 = arith.addf %4, %6 : vector<8x1536xf32>
    %cst_6 = arith.constant 0.000000e+00 : f32
    %8 = vector.broadcast %cst_6 : f32 to vector<8x512xf32>
    %9 = vector.extract_strided_slice %7 {offsets = [0, 0], sizes = [8, 256], strides = [1, 1]} : vector<8x1536xf32> to vector<8x256xf32>
    %cst_7 = arith.constant 6.250000e-02 : f32
    %10 = vector.broadcast %cst_7 : f32 to vector<8x256xf32>
    %11 = arith.mulf %9, %10 : vector<8x256xf32>
    %12 = arith.truncf %11 : vector<8x256xf32> to vector<8x256xbf16>
    %13 = vector.extract_strided_slice %7 {offsets = [0, 512], sizes = [8, 256], strides = [1, 1]} : vector<8x1536xf32> to vector<8x256xf32>
    %14 = arith.truncf %13 : vector<8x256xf32> to vector<8x256xbf16>
    %15 = vector.extract_strided_slice %7 {offsets = [0, 1024], sizes = [8, 256], strides = [1, 1]} : vector<8x1536xf32> to vector<8x256xf32>
    %16 = arith.truncf %15 : vector<8x256xf32> to vector<8x256xbf16>
    "tpu.trace_start"() <{level = 10 : i32, message = "td,sd->ts"}> : () -> ()
    %cst_8 = arith.constant dense<0.000000e+00> : vector<8x8xf32>
    %17 = tpu.matmul %12, %14, %cst_8 {dimension_numbers = #tpu.dot_dimension_numbers<[1], [1], [0], [0], [0, 0, 1, 0], [], []>} : vector<8x256xbf16>, vector<8x256xbf16>, vector<8x8xf32> -> vector<8x8xf32>
    "tpu.trace_stop"() : () -> ()
    %cst_9 = arith.constant dense<0xFF800000> : vector<8xf32>
    %18 = vector.multi_reduction <maximumf>, %17, %cst_9 [1] : vector<8x8xf32> to vector<8xf32>
    %19 = vector.shape_cast %18 : vector<8xf32> to vector<8x1xf32>
    %20 = vector.broadcast %19 : vector<8x1xf32> to vector<8x8xf32>
    %21 = arith.subf %17, %20 : vector<8x8xf32>
    %22 = math.exp %21 : vector<8x8xf32>
    %cst_10 = arith.constant dense<0.000000e+00> : vector<8xf32>
    %23 = vector.multi_reduction <add>, %22, %cst_10 [1] : vector<8x8xf32> to vector<8xf32>
    %24 = vector.shape_cast %23 : vector<8xf32> to vector<8x1xf32>
    %25 = tpu.reciprocal %24 {approx = true} : vector<8x1xf32> -> vector<8x1xf32>
    %26 = vector.broadcast %25 : vector<8x1xf32> to vector<8x8xf32>
    %27 = arith.mulf %22, %26 : vector<8x8xf32>
    %28 = arith.truncf %27 : vector<8x8xf32> to vector<8x8xbf16>
    "tpu.trace_start"() <{level = 10 : i32, message = "ts,sd->td"}> : () -> ()
    %cst_11 = arith.constant dense<0.000000e+00> : vector<8x256xf32>
    %29 = tpu.matmul %28, %16, %cst_11 {dimension_numbers = #tpu.dot_dimension_numbers<[1], [0], [0], [1], [0, 0, 1, 1], [], []>} : vector<8x8xbf16>, vector<8x256xbf16>, vector<8x256xf32> -> vector<8x256xf32>
    "tpu.trace_stop"() : () -> ()
    %30 = arith.truncf %29 : vector<8x256xf32> to vector<8x256xbf16>
    %c0_12 = arith.constant 0 : index
    %c0_13 = arith.constant 0 : index
    %31 = vector.load %arg4[%c0_12, %c0_13] : memref<512x512xbf16, #tpu.memory_space<vmem>>, vector<256x512xbf16>
    %cst_14 = arith.constant dense<0.000000e+00> : vector<8x512xf32>
    %32 = tpu.matmul %30, %31, %cst_14 {dimension_numbers = #tpu.dot_dimension_numbers<[1], [0], [0], [1], [0, 0, 1, 1], [], []>} : vector<8x256xbf16>, vector<256x512xbf16>, vector<8x512xf32> -> vector<8x512xf32>
    %33 = arith.addf %8, %32 : vector<8x512xf32>
    %34 = vector.extract_strided_slice %7 {offsets = [0, 256], sizes = [8, 256], strides = [1, 1]} : vector<8x1536xf32> to vector<8x256xf32>
    %cst_15 = arith.constant 6.250000e-02 : f32
    %35 = vector.broadcast %cst_15 : f32 to vector<8x256xf32>
    %36 = arith.mulf %34, %35 : vector<8x256xf32>
    %37 = arith.truncf %36 : vector<8x256xf32> to vector<8x256xbf16>
    %38 = vector.extract_strided_slice %7 {offsets = [0, 768], sizes = [8, 256], strides = [1, 1]} : vector<8x1536xf32> to vector<8x256xf32>
    %39 = arith.truncf %38 : vector<8x256xf32> to vector<8x256xbf16>
    %40 = vector.extract_strided_slice %7 {offsets = [0, 1280], sizes = [8, 256], strides = [1, 1]} : vector<8x1536xf32> to vector<8x256xf32>
    %41 = arith.truncf %40 : vector<8x256xf32> to vector<8x256xbf16>
    "tpu.trace_start"() <{level = 10 : i32, message = "td,sd->ts"}> : () -> ()
    %cst_16 = arith.constant dense<0.000000e+00> : vector<8x8xf32>
    %42 = tpu.matmul %37, %39, %cst_16 {dimension_numbers = #tpu.dot_dimension_numbers<[1], [1], [0], [0], [0, 0, 1, 0], [], []>} : vector<8x256xbf16>, vector<8x256xbf16>, vector<8x8xf32> -> vector<8x8xf32>
    "tpu.trace_stop"() : () -> ()
    %cst_17 = arith.constant dense<0xFF800000> : vector<8xf32>
    %43 = vector.multi_reduction <maximumf>, %42, %cst_17 [1] : vector<8x8xf32> to vector<8xf32>
    %44 = vector.shape_cast %43 : vector<8xf32> to vector<8x1xf32>
    %45 = vector.broadcast %44 : vector<8x1xf32> to vector<8x8xf32>
    %46 = arith.subf %42, %45 : vector<8x8xf32>
    %47 = math.exp %46 : vector<8x8xf32>
    %cst_18 = arith.constant dense<0.000000e+00> : vector<8xf32>
    %48 = vector.multi_reduction <add>, %47, %cst_18 [1] : vector<8x8xf32> to vector<8xf32>
    %49 = vector.shape_cast %48 : vector<8xf32> to vector<8x1xf32>
    %50 = tpu.reciprocal %49 {approx = true} : vector<8x1xf32> -> vector<8x1xf32>
    %51 = vector.broadcast %50 : vector<8x1xf32> to vector<8x8xf32>
    %52 = arith.mulf %47, %51 : vector<8x8xf32>
    %53 = arith.truncf %52 : vector<8x8xf32> to vector<8x8xbf16>
    "tpu.trace_start"() <{level = 10 : i32, message = "ts,sd->td"}> : () -> ()
    %cst_19 = arith.constant dense<0.000000e+00> : vector<8x256xf32>
    %54 = tpu.matmul %53, %41, %cst_19 {dimension_numbers = #tpu.dot_dimension_numbers<[1], [0], [0], [1], [0, 0, 1, 1], [], []>} : vector<8x8xbf16>, vector<8x256xbf16>, vector<8x256xf32> -> vector<8x256xf32>
    "tpu.trace_stop"() : () -> ()
    %55 = arith.truncf %54 : vector<8x256xf32> to vector<8x256xbf16>
    %c256 = arith.constant 256 : index
    %c0_20 = arith.constant 0 : index
    %56 = vector.load %arg4[%c256, %c0_20] : memref<512x512xbf16, #tpu.memory_space<vmem>>, vector<256x512xbf16>
    %cst_21 = arith.constant dense<0.000000e+00> : vector<8x512xf32>
    %57 = tpu.matmul %55, %56, %cst_21 {dimension_numbers = #tpu.dot_dimension_numbers<[1], [0], [0], [1], [0, 0, 1, 1], [], []>} : vector<8x256xbf16>, vector<256x512xbf16>, vector<8x512xf32> -> vector<8x512xf32>
    %58 = arith.addf %33, %57 : vector<8x512xf32>
    %c0_22 = arith.constant 0 : index
    %c0_23 = arith.constant 0 : index
    %59 = vector.load %arg5[%c0_22, %c0_23] : memref<1x512xf32, #tpu.memory_space<vmem>>, vector<1x512xf32>
    %60 = vector.broadcast %59 : vector<1x512xf32> to vector<8x512xf32>
    %61 = arith.addf %58, %60 : vector<8x512xf32>
    %cst_24 = arith.constant dense<0.000000e+00> : vector<512xf32>
    %62 = vector.multi_reduction <add>, %61, %cst_24 [0] : vector<8x512xf32> to vector<512xf32>
    %63 = vector.shape_cast %62 : vector<512xf32> to vector<1x512xf32>
    %cst_25 = arith.constant 8.000000e+00 : f32
    %64 = vector.broadcast %cst_25 : f32 to vector<1x512xf32>
    %65 = arith.divf %63, %64 : vector<1x512xf32>
    %c0_26 = arith.constant 0 : index
    %c0_27 = arith.constant 0 : index
    %66 = vector.load %arg6[%c0_26, %c0_27] : memref<512x1xf32, #tpu.memory_space<vmem>>, vector<512x1xf32>
    %cst_28 = arith.constant dense<0.000000e+00> : vector<1x1xf32>
    %67 = tpu.matmul %65, %66, %cst_28 {dimension_numbers = #tpu.dot_dimension_numbers<[1], [0], [0], [1], [0, 0, 1, 1], [], []>} : vector<1x512xf32>, vector<512x1xf32>, vector<1x1xf32> -> vector<1x1xf32>
    %c0_29 = arith.constant 0 : index
    %c0_30 = arith.constant 0 : index
    %68 = vector.load %arg7[%c0_29, %c0_30] : memref<1x1xf32, #tpu.memory_space<vmem>>, vector<1x1xf32>
    %69 = arith.addf %67, %68 : vector<1x1xf32>
    %70 = arith.negf %69 : vector<1x1xf32>
    %71 = math.exp %70 : vector<1x1xf32>
    %cst_31 = arith.constant 1.000000e+00 : f32
    %72 = vector.broadcast %cst_31 : f32 to vector<1x1xf32>
    %73 = arith.addf %72, %71 : vector<1x1xf32>
    %74 = arith.divf %72, %73 : vector<1x1xf32>
    %75 = vector.shape_cast %74 : vector<1x1xf32> to vector<1x1x1xf32>
    %c0_32 = arith.constant 0 : index
    %c0_33 = arith.constant 0 : index
    %c0_34 = arith.constant 0 : index
    %76 = vector.load %arg8[%c0_32, %c0_33, %c0_34] : memref<1x1x1xf32, #tpu.memory_space<vmem>>, vector<1x1x1xf32>
    tpu.vector_store %arg8[%c0_32, %c0_33, %c0_34], %75 {strides = array<i32>} : memref<1x1x1xf32, #tpu.memory_space<vmem>>, vector<1x1x1xf32>,
    return
  }
  func.func @transform_0(%arg0: i32) -> (i32, i32, i32) {
    %c0_i32 = arith.constant 0 : i32
    %c0_i32_0 = arith.constant 0 : i32
    %c0_i32_1 = arith.constant 0 : i32
    return %arg0, %c0_i32, %c0_i32_0 : i32, i32, i32
  }
  func.func @transform_1(%arg0: i32) -> (i32, i32) {
    %c0_i32 = arith.constant 0 : i32
    %c0_i32_0 = arith.constant 0 : i32
    %c0_i32_1 = arith.constant 0 : i32
    return %c0_i32, %c0_i32_0 : i32, i32
  }
  func.func @transform_2(%arg0: i32) -> (i32, i32) {
    %c0_i32 = arith.constant 0 : i32
    %c0_i32_0 = arith.constant 0 : i32
    %c0_i32_1 = arith.constant 0 : i32
    return %c0_i32, %c0_i32_0 : i32, i32
  }
  func.func @transform_3(%arg0: i32) -> (i32, i32) {
    %c0_i32 = arith.constant 0 : i32
    %c0_i32_0 = arith.constant 0 : i32
    %c0_i32_1 = arith.constant 0 : i32
    return %c0_i32, %c0_i32_0 : i32, i32
  }
  func.func @transform_4(%arg0: i32) -> (i32, i32) {
    %c0_i32 = arith.constant 0 : i32
    %c0_i32_0 = arith.constant 0 : i32
    %c0_i32_1 = arith.constant 0 : i32
    return %c0_i32, %c0_i32_0 : i32, i32
  }
  func.func @transform_5(%arg0: i32) -> (i32, i32) {
    %c0_i32 = arith.constant 0 : i32
    %c0_i32_0 = arith.constant 0 : i32
    %c0_i32_1 = arith.constant 0 : i32
    return %c0_i32, %c0_i32_0 : i32, i32
  }
  func.func @transform_6(%arg0: i32) -> (i32, i32) {
    %c0_i32 = arith.constant 0 : i32
    %c0_i32_0 = arith.constant 0 : i32
    %c0_i32_1 = arith.constant 0 : i32
    return %c0_i32, %c0_i32_0 : i32, i32
  }
  func.func @transform_7(%arg0: i32) -> (i32, i32, i32) {
    %c0_i32 = arith.constant 0 : i32
    %c0_i32_0 = arith.constant 0 : i32
    %c0_i32_1 = arith.constant 0 : i32
    return %arg0, %c0_i32, %c0_i32_0 : i32, i32, i32
  }
}

</mosaic_0001>

<bundles_post_ra>
// kernel: reverse
= control target key start
LH: loop header
LB: loop body
LE: loop exit
PB: predicated region body
PF: predicated region fallthrough
CT: control target
= control target key end

     0   :  { %s10166_s6 = smov 0   ;;  %s10168_s7 = smov 0   ;;  %s13587_s0 = inlined_call_operand.vmem [shape: f32[3,3,512,512], index: 0, kind: input, shape index: {}]   ;;  %s13588_s1 = inlined_call_operand.vmem [shape: bf16[3,3,512,512], index: 1, kind: output, shape index: {}]  }
   0x1   :  { %s10170_s8 = smov 0  }
   0x2 LB: > { %s25_s9 = sadd.s32 1, %s10150_s7  ;;  %p7794_p0 = scmp.ge.s32.totalorder %s10154_s8, 1  ;;  %s10154_s8 = sphi %s10170_s8, %s7_s8   ;;  %s10150_s7 = sphi %s10168_s7, %s13590_s7   ;;  %s10146_s6 = sphi %s10166_s6, %s13589_s6  }
   0x3   : > { %p27_p1 = scmp.ge.s32.totalorder %s25_s9, 2  ;;  %p77_p2 = scmp.lt.s32.totalorder %s10154_s8, 3 }
   0x5   : > { %s13592_s9 = smov (%p27_p1, %s25_s9), 0  ;;  %p78_p3 = pnand %p7794_p0, %p77_p2 }
   0x6   : > { %s7795_s10 = sshll.u32 (!%p78_p3), %s10146_s6, 5 }
   0x7   : > { %81 = sbr.rel (%p78_p3) target bundleno = 590 (0x24e), region = 20  ;;  %p139_p4 = scmp.lt.s32.totalorder (!%p78_p3), %s7795_s10, 63 }
   0xe   : > { %s13594_s10 = smov (!%p139_p4, %s7795_s10), 63 }
   0xf   : > { %s10106_s11 = sshll.u32 %s13594_s10, 5  ;;  %s10107_s15 = sshll.u32 %s13594_s10, 4 }
  0x10   : > { %s10187_s14 = scalar_lea.vmem %s13587_s0, %s10106_s11  ;;  %s10210_s18 = scalar_lea.vmem %s13588_s1, %s10107_s15 }
  0x11   : > { %v7801_v0 = vld [vmem:[%s10187_s14 + $0x4000] sm:$0xff]  ;;  %v8088_v15 = vld [vmem:[%s10187_s14 + $0x4008] sm:$0xff] }
  0x12   : > { %v7802_v1 = vld [vmem:[%s10187_s14 + $0x2800] sm:$0xff]  ;;  %v8091_v16 = vld [vmem:[%s10187_s14 + $0x2808] sm:$0xff]  ;;  %v1049_v21 = vpack.c.bf16 %v8088_v15, %v7801_v0 }
  0x13   : > { %v7803_v2 = vld [vmem:[%s10187_s14 + $0x1000] sm:$0xff]  ;;  %v8094_v17 = vld [vmem:[%s10187_s14 + $0x1008] sm:$0xff]  ;;  %v1057_v22 = vpack.c.bf16 %v8091_v16, %v7802_v1 }
  0x14   : > { %v7804_v3 = vld [vmem:[%s10187_s14 + $0x3800] sm:$0xff]  ;;  %v1065_v23 = vpack.c.bf16 %v8094_v17, %v7803_v2  ;;  %v8097_v24 = vld [vmem:[%s10187_s14 + $0x3808] sm:$0xff]  ;;  %8090 = vst [vmem:[%s10210_s18] sm:$0xff] %v1049_v21 }
  0x15   : > { %v7805_v4 = vld [vmem:[%s10187_s14 + $0x2000] sm:$0xff]  ;;  %v8100_v25 = vld [vmem:[%s10187_s14 + $0x2008] sm:$0xff]  ;;  %v1073_v30 = vpack.c.bf16 %v8097_v24, %v7804_v3  ;;  %8093 = vst [vmem:[%s10210_s18 + $0xc00] sm:$0xff] %v1057_v22 }
  0x16   : > { %v7806_v5 = vld [vmem:[%s10187_s14 + $0x800] sm:$0xff]  ;;  %v8103_v26 = vld [vmem:[%s10187_s14 + $0x808] sm:$0xff]  ;;  %v1081_v31 = vpack.c.bf16 %v8100_v25, %v7805_v4  ;;  %8096 = vst [vmem:[%s10210_s18 + $0x1800] sm:$0xff] %v1065_v23 }
  0x17   : > { %v7807_v6 = vld [vmem:[%s10187_s14 + $0x3000] sm:$0xff]  ;;  %v1089_v32 = vpack.c.bf16 %v8103_v26, %v7806_v5  ;;  %v8106_v33 = vld [vmem:[%s10187_s14 + $0x3008] sm:$0xff]  ;;  %8099 = vst [vmem:[%s10210_s18 + $0x400] sm:$0xff] %v1073_v30 }
  0x18   : > { %v7808_v7 = vld [vmem:[%s10187_s14 + $0x1800] sm:$0xff]  ;;  %v8109_v34 = vld [vmem:[%s10187_s14 + $0x1808] sm:$0xff]  ;;  %v1097_v39 = vpack.c.bf16 %v8106_v33, %v7807_v6  ;;  %8102 = vst [vmem:[%s10210_s18 + $0x1000] sm:$0xff] %v1081_v31 }
  0x19   : > { %v204_v8 = vld [vmem:[%s10187_s14] sm:$0xff]  ;;  %v8112_v35 = vld [vmem:[%s10187_s14 + $0x8] sm:$0xff]  ;;  %v1105_v40 = vpack.c.bf16 %v8109_v34, %v7808_v7  ;;  %8105 = vst [vmem:[%s10210_s18 + $0x1c00] sm:$0xff] %v1089_v32 }
  0x1a   : > { %v10199_v9 = vld [vmem:[%s10187_s14 + $0x4020] sm:$0xff]  ;;  %v1113_v41 = vpack.c.bf16 %v8112_v35, %v204_v8  ;;  %v8115_v42 = vld [vmem:[%s10187_s14 + $0x4028] sm:$0xff]  ;;  %8108 = vst [vmem:[%s10210_s18 + $0x800] sm:$0xff] %v1097_v39 }
  0x1b   : > { %v10202_v10 = vld [vmem:[%s10187_s14 + $0x2820] sm:$0xff]  ;;  %v8118_v43 = vld [vmem:[%s10187_s14 + $0x2828] sm:$0xff]  ;;  %v1121_v48 = vpack.c.bf16 %v8115_v42, %v10199_v9  ;;  %8111 = vst [vmem:[%s10210_s18 + $0x1400] sm:$0xff] %v1105_v40 }
  0x1c   : > { %v10205_v11 = vld [vmem:[%s10187_s14 + $0x1020] sm:$0xff]  ;;  %v8121_v44 = vld [vmem:[%s10187_s14 + $0x1028] sm:$0xff]  ;;  %v1129_v49 = vpack.c.bf16 %v8118_v43, %v10202_v10  ;;  %8114 = vst [vmem:[%s10210_s18 + $0x2000] sm:$0xff] %v1113_v41 }
  0x1d   : > { %v10213_v12 = vld [vmem:[%s10187_s14 + $0x3820] sm:$0xff]  ;;  %v1137_v50 = vpack.c.bf16 %v8121_v44, %v10205_v11  ;;  %v8124_v51 = vld [vmem:[%s10187_s14 + $0x3828] sm:$0xff]  ;;  %8117 = vst [vmem:[%s10210_s18 + $0x10] sm:$0xff] %v1121_v48 }
  0x1e   : > { %v10216_v13 = vld [vmem:[%s10187_s14 + $0x2020] sm:$0xff]  ;;  %v8127_v52 = vld [vmem:[%s10187_s14 + $0x2028] sm:$0xff]  ;;  %v1145_v57 = vpack.c.bf16 %v8124_v51, %v10213_v12  ;;  %8120 = vst [vmem:[%s10210_s18 + $0xc10] sm:$0xff] %v1129_v49 }
  0x1f   : > { %v10219_v14 = vld [vmem:[%s10187_s14 + $0x820] sm:$0xff]  ;;  %v8130_v53 = vld [vmem:[%s10187_s14 + $0x828] sm:$0xff]  ;;  %v1153_v58 = vpack.c.bf16 %v8127_v52, %v10216_v13  ;;  %8123 = vst [vmem:[%s10210_s18 + $0x1810] sm:$0xff] %v1137_v50 }
  0x20   : > { %v10225_v18 = vld [vmem:[%s10187_s14 + $0x3020] sm:$0xff]  ;;  %v1161_v59 = vpack.c.bf16 %v8130_v53, %v10219_v14  ;;  %v8133_v60 = vld [vmem:[%s10187_s14 + $0x3028] sm:$0xff]  ;;  %8126 = vst [vmem:[%s10210_s18 + $0x410] sm:$0xff] %v1145_v57 }
  0x21   : > { %v10228_v19 = vld [vmem:[%s10187_s14 + $0x1820] sm:$0xff]  ;;  %v8136_v61 = vld [vmem:[%s10187_s14 + $0x1828] sm:$0xff]  ;;  %v1169_v2 = vpack.c.bf16 %v8133_v60, %v10225_v18  ;;  %8129 = vst [vmem:[%s10210_s18 + $0x1010] sm:$0xff] %v1153_v58 }
  0x22   : > { %v10231_v20 = vld [vmem:[%s10187_s14 + $0x20] sm:$0xff]  ;;  %v8139_v62 = vld [vmem:[%s10187_s14 + $0x28] sm:$0xff]  ;;  %v1177_v3 = vpack.c.bf16 %v8136_v61, %v10228_v19  ;;  %8132 = vst [vmem:[%s10210_s18 + $0x1c10] sm:$0xff] %v1161_v59 }
  0x23   : > { %v10237_v27 = vld [vmem:[%s10187_s14 + $0x4040] sm:$0xff]  ;;  %v1185_v4 = vpack.c.bf16 %v8139_v62, %v10231_v20  ;;  %v8142_v5 = vld [vmem:[%s10187_s14 + $0x4048] sm:$0xff]  ;;  %8135 = vst [vmem:[%s10210_s18 + $0x810] sm:$0xff] %v1169_v2 }
  0x24   : > { %v10240_v28 = vld [vmem:[%s10187_s14 + $0x2840] sm:$0xff]  ;;  %v8145_v6 = vld [vmem:[%s10187_s14 + $0x2848] sm:$0xff]  ;;  %v1193_v11 = vpack.c.bf16 %v8142_v5, %v10237_v27  ;;  %8138 = vst [vmem:[%s10210_s18 + $0x1410] sm:$0xff] %v1177_v3 }
  0x25   : > { %v10243_v29 = vld [vmem:[%s10187_s14 + $0x1040] sm:$0xff]  ;;  %v8148_v7 = vld [vmem:[%s10187_s14 + $0x1048] sm:$0xff]  ;;  %v1201_v12 = vpack.c.bf16 %v8145_v6, %v10240_v28  ;;  %8141 = vst [vmem:[%s10210_s18 + $0x2010] sm:$0xff] %v1185_v4 }
  0x26   : > { %v10249_v36 = vld [vmem:[%s10187_s14 + $0x3840] sm:$0xff]  ;;  %v1209_v13 = vpack.c.bf16 %v8148_v7, %v10243_v29  ;;  %v8151_v14 = vld [vmem:[%s10187_s14 + $0x3848] sm:$0xff]  ;;  %8144 = vst [vmem:[%s10210_s18 + $0x20] sm:$0xff] %v1193_v11 }
  0x27   : > { %v10252_v37 = vld [vmem:[%s10187_s14 + $0x2040] sm:$0xff]  ;;  %v8154_v15 = vld [vmem:[%s10187_s14 + $0x2048] sm:$0xff]  ;;  %v1217_v20 = vpack.c.bf16 %v8151_v14, %v10249_v36  ;;  %8147 = vst [vmem:[%s10210_s18 + $0xc20] sm:$0xff] %v1201_v12 }
  0x28   : > { %v10255_v38 = vld [vmem:[%s10187_s14 + $0x840] sm:$0xff]  ;;  %v8157_v16 = vld [vmem:[%s10187_s14 + $0x848] sm:$0xff]  ;;  %v1225_v21 = vpack.c.bf16 %v8154_v15, %v10252_v37  ;;  %8150 = vst [vmem:[%s10210_s18 + $0x1820] sm:$0xff] %v1209_v13 }
  0x29   : > { %v10264_v45 = vld [vmem:[%s10187_s14 + $0x3040] sm:$0xff]  ;;  %v1233_v22 = vpack.c.bf16 %v8157_v16, %v10255_v38  ;;  %v8160_v23 = vld [vmem:[%s10187_s14 + $0x3048] sm:$0xff]  ;;  %8153 = vst [vmem:[%s10210_s18 + $0x420] sm:$0xff] %v1217_v20 }
  0x2a   : > { %v10267_v46 = vld [vmem:[%s10187_s14 + $0x1840] sm:$0xff]  ;;  %v8163_v24 = vld [vmem:[%s10187_s14 + $0x1848] sm:$0xff]  ;;  %v1241_v29 = vpack.c.bf16 %v8160_v23, %v10264_v45  ;;  %8156 = vst [vmem:[%s10210_s18 + $0x1020] sm:$0xff] %v1225_v21 }
  0x2b   : > { %v10270_v47 = vld [vmem:[%s10187_s14 + $0x40] sm:$0xff]  ;;  %v8166_v25 = vld [vmem:[%s10187_s14 + $0x48] sm:$0xff]  ;;  %v1249_v30 = vpack.c.bf16 %v8163_v24, %v10267_v46  ;;  %8159 = vst [vmem:[%s10210_s18 + $0x1c20] sm:$0xff] %v1233_v22 }
  0x2c   : > { %v10282_v54 = vld [vmem:[%s10187_s14 + $0x4060] sm:$0xff]  ;;  %v1257_v31 = vpack.c.bf16 %v8166_v25, %v10270_v47  ;;  %v8169_v32 = vld [vmem:[%s10187_s14 + $0x4068] sm:$0xff]  ;;  %8162 = vst [vmem:[%s10210_s18 + $0x820] sm:$0xff] %v1241_v29 }
  0x2d   : > { %v10285_v55 = vld [vmem:[%s10187_s14 + $0x2860] sm:$0xff]  ;;  %v8172_v33 = vld [vmem:[%s10187_s14 + $0x2868] sm:$0xff]  ;;  %v1265_v38 = vpack.c.bf16 %v8169_v32, %v10282_v54  ;;  %8165 = vst [vmem:[%s10210_s18 + $0x1420] sm:$0xff] %v1249_v30 }
  0x2e   : > { %v10288_v56 = vld [vmem:[%s10187_s14 + $0x1060] sm:$0xff]  ;;  %v8175_v34 = vld [vmem:[%s10187_s14 + $0x1068] sm:$0xff]  ;;  %v1273_v39 = vpack.c.bf16 %v8172_v33, %v10285_v55  ;;  %8168 = vst [vmem:[%s10210_s18 + $0x2020] sm:$0xff] %v1257_v31 }
  0x2f   : > { %v10300_v63 = vld [vmem:[%s10187_s14 + $0x3860] sm:$0xff]  ;;  %v1281_v40 = vpack.c.bf16 %v8175_v34, %v10288_v56  ;;  %v8178_v41 = vld [vmem:[%s10187_s14 + $0x3868] sm:$0xff]  ;;  %8171 = vst [vmem:[%s10210_s18 + $0x30] sm:$0xff] %v1265_v38 }
  0x30   : > { %v10303_v0 = vld [vmem:[%s10187_s14 + $0x2060] sm:$0xff]  ;;  %v8181_v42 = vld [vmem:[%s10187_s14 + $0x2068] sm:$0xff]  ;;  %v1289_v47 = vpack.c.bf16 %v8178_v41, %v10300_v63  ;;  %8174 = vst [vmem:[%s10210_s18 + $0xc30] sm:$0xff] %v1273_v39 }
  0x31   : > { %v10306_v1 = vld [vmem:[%s10187_s14 + $0x860] sm:$0xff]  ;;  %v8184_v43 = vld [vmem:[%s10187_s14 + $0x868] sm:$0xff]  ;;  %v1297_v48 = vpack.c.bf16 %v8181_v42, %v10303_v0  ;;  %8177 = vst [vmem:[%s10210_s18 + $0x1830] sm:$0xff] %v1281_v40 }
  0x32   : > { %v10318_v8 = vld [vmem:[%s10187_s14 + $0x3060] sm:$0xff]  ;;  %v1305_v49 = vpack.c.bf16 %v8184_v43, %v10306_v1  ;;  %v8187_v50 = vld [vmem:[%s10187_s14 + $0x3068] sm:$0xff]  ;;  %8180 = vst [vmem:[%s10210_s18 + $0x430] sm:$0xff] %v1289_v47 }
  0x33   : > { %v10321_v9 = vld [vmem:[%s10187_s14 + $0x1860] sm:$0xff]  ;;  %v8190_v51 = vld [vmem:[%s10187_s14 + $0x1868] sm:$0xff]  ;;  %v1313_v56 = vpack.c.bf16 %v8187_v50, %v10318_v8  ;;  %8183 = vst [vmem:[%s10210_s18 + $0x1030] sm:$0xff] %v1297_v48 }
  0x34   : > { %v10324_v10 = vld [vmem:[%s10187_s14 + $0x60] sm:$0xff]  ;;  %v8193_v52 = vld [vmem:[%s10187_s14 + $0x68] sm:$0xff]  ;;  %v1321_v57 = vpack.c.bf16 %v8190_v51, %v10321_v9  ;;  %8186 = vst [vmem:[%s10210_s18 + $0x1c30] sm:$0xff] %v1305_v49 }
  0x35   : > { %v10336_v17 = vld [vmem:[%s10187_s14 + $0x4080] sm:$0xff]  ;;  %v1329_v58 = vpack.c.bf16 %v8193_v52, %v10324_v10  ;;  %v8196_v59 = vld [vmem:[%s10187_s14 + $0x4088] sm:$0xff]  ;;  %8189 = vst [vmem:[%s10210_s18 + $0x830] sm:$0xff] %v1313_v56 }
  0x36   : > { %v10339_v18 = vld [vmem:[%s10187_s14 + $0x2880] sm:$0xff]  ;;  %v8199_v60 = vld [vmem:[%s10187_s14 + $0x2888] sm:$0xff]  ;;  %v1337_v1 = vpack.c.bf16 %v8196_v59, %v10336_v17  ;;  %8192 = vst [vmem:[%s10210_s18 + $0x1430] sm:$0xff] %v1321_v57 }
  0x37   : > { %v10342_v19 = vld [vmem:[%s10187_s14 + $0x1080] sm:$0xff]  ;;  %v8202_v61 = vld [vmem:[%s10187_s14 + $0x1088] sm:$0xff]  ;;  %v1345_v2 = vpack.c.bf16 %v8199_v60, %v10339_v18  ;;  %8195 = vst [vmem:[%s10210_s18 + $0x2030] sm:$0xff] %v1329_v58 }
  0x38   : > { %v10354_v26 = vld [vmem:[%s10187_s14 + $0x3880] sm:$0xff]  ;;  %v1353_v3 = vpack.c.bf16 %v8202_v61, %v10342_v19  ;;  %v8205_v4 = vld [vmem:[%s10187_s14 + $0x3888] sm:$0xff]  ;;  %8198 = vst [vmem:[%s10210_s18 + $0x40] sm:$0xff] %v1337_v1 }
  0x39   : > { %v10357_v27 = vld [vmem:[%s10187_s14 + $0x2080] sm:$0xff]  ;;  %v8208_v5 = vld [vmem:[%s10187_s14 + $0x2088] sm:$0xff]  ;;  %v1361_v10 = vpack.c.bf16 %v8205_v4, %v10354_v26  ;;  %8201 = vst [vmem:[%s10210_s18 + $0xc40] sm:$0xff] %v1345_v2 }
  0x3a   : > { %v10360_v28 = vld [vmem:[%s10187_s14 + $0x880] sm:$0xff]  ;;  %v8211_v6 = vld [vmem:[%s10187_s14 + $0x888] sm:$0xff]  ;;  %v1369_v11 = vpack.c.bf16 %v8208_v5, %v10357_v27  ;;  %8204 = vst [vmem:[%s10210_s18 + $0x1840] sm:$0xff] %v1353_v3 }
  0x3b   : > { %v10372_v35 = vld [vmem:[%s10187_s14 + $0x3080] sm:$0xff]  ;;  %v1377_v12 = vpack.c.bf16 %v8211_v6, %v10360_v28  ;;  %v8214_v13 = vld [vmem:[%s10187_s14 + $0x3088] sm:$0xff]  ;;  %8207 = vst [vmem:[%s10210_s18 + $0x440] sm:$0xff] %v1361_v10 }
  0x3c   : > { %v10375_v36 = vld [vmem:[%s10187_s14 + $0x1880] sm:$0xff]  ;;  %v8217_v14 = vld [vmem:[%s10187_s14 + $0x1888] sm:$0xff]  ;;  %v1385_v19 = vpack.c.bf16 %v8214_v13, %v10372_v35  ;;  %8210 = vst [vmem:[%s10210_s18 + $0x1040] sm:$0xff] %v1369_v11 }
  0x3d   : > { %v10378_v37 = vld [vmem:[%s10187_s14 + $0x80] sm:$0xff]  ;;  %v8220_v15 = vld [vmem:[%s10187_s14 + $0x88] sm:$0xff]  ;;  %v1393_v20 = vpack.c.bf16 %v8217_v14, %v10375_v36  ;;  %8213 = vst [vmem:[%s10210_s18 + $0x1c40] sm:$0xff] %v1377_v12 }
  0x3e   : > { %v10390_v44 = vld [vmem:[%s10187_s14 + $0x40a0] sm:$0xff]  ;;  %v1401_v21 = vpack.c.bf16 %v8220_v15, %v10378_v37  ;;  %v8223_v22 = vld [vmem:[%s10187_s14 + $0x40a8] sm:$0xff]  ;;  %8216 = vst [vmem:[%s10210_s18 + $0x840] sm:$0xff] %v1385_v19 }
  0x3f   : > { %v10393_v45 = vld [vmem:[%s10187_s14 + $0x28a0] sm:$0xff]  ;;  %v8226_v23 = vld [vmem:[%s10187_s14 + $0x28a8] sm:$0xff]  ;;  %v1409_v28 = vpack.c.bf16 %v8223_v22, %v10390_v44  ;;  %8219 = vst [vmem:[%s10210_s18 + $0x1440] sm:$0xff] %v1393_v20 }
  0x40   : > { %v10396_v46 = vld [vmem:[%s10187_s14 + $0x10a0] sm:$0xff]  ;;  %v8229_v24 = vld [vmem:[%s10187_s14 + $0x10a8] sm:$0xff]  ;;  %v1417_v29 = vpack.c.bf16 %v8226_v23, %v10393_v45  ;;  %8222 = vst [vmem:[%s10210_s18 + $0x2040] sm:$0xff] %v1401_v21 }
  0x41   : > { %v10408_v53 = vld [vmem:[%s10187_s14 + $0x38a0] sm:$0xff]  ;;  %v1425_v30 = vpack.c.bf16 %v8229_v24, %v10396_v46  ;;  %v8232_v31 = vld [vmem:[%s10187_s14 + $0x38a8] sm:$0xff]  ;;  %8225 = vst [vmem:[%s10210_s18 + $0x50] sm:$0xff] %v1409_v28 }
  0x42   : > { %v10411_v54 = vld [vmem:[%s10187_s14 + $0x20a0] sm:$0xff]  ;;  %v8235_v32 = vld [vmem:[%s10187_s14 + $0x20a8] sm:$0xff]  ;;  %v1433_v37 = vpack.c.bf16 %v8232_v31, %v10408_v53  ;;  %8228 = vst [vmem:[%s10210_s18 + $0xc50] sm:$0xff] %v1417_v29 }
  0x43   : > { %v10414_v55 = vld [vmem:[%s10187_s14 + $0x8a0] sm:$0xff]  ;;  %v8238_v33 = vld [vmem:[%s10187_s14 + $0x8a8] sm:$0xff]  ;;  %v1441_v38 = vpack.c.bf16 %v8235_v32, %v10411_v54  ;;  %8231 = vst [vmem:[%s10210_s18 + $0x1850] sm:$0xff] %v1425_v30 }
  0x44   : > { %v10426_v62 = vld [vmem:[%s10187_s14 + $0x30a0] sm:$0xff]  ;;  %v1449_v39 = vpack.c.bf16 %v8238_v33, %v10414_v55  ;;  %v8241_v40 = vld [vmem:[%s10187_s14 + $0x30a8] sm:$0xff]  ;;  %8234 = vst [vmem:[%s10210_s18 + $0x450] sm:$0xff] %v1433_v37 }
  0x45   : > { %v10429_v63 = vld [vmem:[%s10187_s14 + $0x18a0] sm:$0xff]  ;;  %v8244_v41 = vld [vmem:[%s10187_s14 + $0x18a8] sm:$0xff]  ;;  %v1457_v46 = vpack.c.bf16 %v8241_v40, %v10426_v62  ;;  %8237 = vst [vmem:[%s10210_s18 + $0x1050] sm:$0xff] %v1441_v38 }
  0x46   : > { %v10432_v0 = vld [vmem:[%s10187_s14 + $0xa0] sm:$0xff]  ;;  %v8247_v42 = vld [vmem:[%s10187_s14 + $0xa8] sm:$0xff]  ;;  %v1465_v47 = vpack.c.bf16 %v8244_v41, %v10429_v63  ;;  %8240 = vst [vmem:[%s10210_s18 + $0x1c50] sm:$0xff] %v1449_v39 }
  0x47   : > { %v10444_v7 = vld [vmem:[%s10187_s14 + $0x40c0] sm:$0xff]  ;;  %v1473_v48 = vpack.c.bf16 %v8247_v42, %v10432_v0  ;;  %v8250_v49 = vld [vmem:[%s10187_s14 + $0x40c8] sm:$0xff]  ;;  %8243 = vst [vmem:[%s10210_s18 + $0x850] sm:$0xff] %v1457_v46 }
  0x48   : > { %v10447_v8 = vld [vmem:[%s10187_s14 + $0x28c0] sm:$0xff]  ;;  %v8253_v50 = vld [vmem:[%s10187_s14 + $0x28c8] sm:$0xff]  ;;  %v1481_v55 = vpack.c.bf16 %v8250_v49, %v10444_v7  ;;  %8246 = vst [vmem:[%s10210_s18 + $0x1450] sm:$0xff] %v1465_v47 }
  0x49   : > { %v10450_v9 = vld [vmem:[%s10187_s14 + $0x10c0] sm:$0xff]  ;;  %v8256_v51 = vld [vmem:[%s10187_s14 + $0x10c8] sm:$0xff]  ;;  %v1489_v56 = vpack.c.bf16 %v8253_v50, %v10447_v8  ;;  %8249 = vst [vmem:[%s10210_s18 + $0x2050] sm:$0xff] %v1473_v48 }
  0x4a   : > { %v10462_v16 = vld [vmem:[%s10187_s14 + $0x38c0] sm:$0xff]  ;;  %v1497_v57 = vpack.c.bf16 %v8256_v51, %v10450_v9  ;;  %v8259_v58 = vld [vmem:[%s10187_s14 + $0x38c8] sm:$0xff]  ;;  %8252 = vst [vmem:[%s10210_s18 + $0x60] sm:$0xff] %v1481_v55 }
  0x4b   : > { %v10465_v17 = vld [vmem:[%s10187_s14 + $0x20c0] sm:$0xff]  ;;  %v8262_v59 = vld [vmem:[%s10187_s14 + $0x20c8] sm:$0xff]  ;;  %v1505_v0 = vpack.c.bf16 %v8259_v58, %v10462_v16  ;;  %8255 = vst [vmem:[%s10210_s18 + $0xc60] sm:$0xff] %v1489_v56 }
  0x4c   : > { %v10468_v18 = vld [vmem:[%s10187_s14 + $0x8c0] sm:$0xff]  ;;  %v8265_v60 = vld [vmem:[%s10187_s14 + $0x8c8] sm:$0xff]  ;;  %v1513_v1 = vpack.c.bf16 %v8262_v59, %v10465_v17  ;;  %8258 = vst [vmem:[%s10210_s18 + $0x1860] sm:$0xff] %v1497_v57 }
  0x4d   : > { %v10480_v25 = vld [vmem:[%s10187_s14 + $0x30c0] sm:$0xff]  ;;  %v1521_v2 = vpack.c.bf16 %v8265_v60, %v10468_v18  ;;  %v8268_v3 = vld [vmem:[%s10187_s14 + $0x30c8] sm:$0xff]  ;;  %8261 = vst [vmem:[%s10210_s18 + $0x460] sm:$0xff] %v1505_v0 }
  0x4e   : > { %v10483_v26 = vld [vmem:[%s10187_s14 + $0x18c0] sm:$0xff]  ;;  %v8271_v4 = vld [vmem:[%s10187_s14 + $0x18c8] sm:$0xff]  ;;  %v1529_v9 = vpack.c.bf16 %v8268_v3, %v10480_v25  ;;  %8264 = vst [vmem:[%s10210_s18 + $0x1060] sm:$0xff] %v1513_v1 }
  0x4f   : > { %v10486_v27 = vld [vmem:[%s10187_s14 + $0xc0] sm:$0xff]  ;;  %v8274_v5 = vld [vmem:[%s10187_s14 + $0xc8] sm:$0xff]  ;;  %v1537_v10 = vpack.c.bf16 %v8271_v4, %v10483_v26  ;;  %8267 = vst [vmem:[%s10210_s18 + $0x1c60] sm:$0xff] %v1521_v2 }
  0x50   : > { %v10498_v34 = vld [vmem:[%s10187_s14 + $0x40e0] sm:$0xff]  ;;  %v1545_v11 = vpack.c.bf16 %v8274_v5, %v10486_v27  ;;  %v8277_v12 = vld [vmem:[%s10187_s14 + $0x40e8] sm:$0xff]  ;;  %8270 = vst [vmem:[%s10210_s18 + $0x860] sm:$0xff] %v1529_v9 }
  0x51   : > { %v10501_v35 = vld [vmem:[%s10187_s14 + $0x28e0] sm:$0xff]  ;;  %v8280_v13 = vld [vmem:[%s10187_s14 + $0x28e8] sm:$0xff]  ;;  %v1553_v18 = vpack.c.bf16 %v8277_v12, %v10498_v34  ;;  %8273 = vst [vmem:[%s10210_s18 + $0x1460] sm:$0xff] %v1537_v10 }
  0x52   : > { %v10504_v36 = vld [vmem:[%s10187_s14 + $0x10e0] sm:$0xff]  ;;  %v8283_v14 = vld [vmem:[%s10187_s14 + $0x10e8] sm:$0xff]  ;;  %v1561_v19 = vpack.c.bf16 %v8280_v13, %v10501_v35  ;;  %8276 = vst [vmem:[%s10210_s18 + $0x2060] sm:$0xff] %v1545_v11 }
  0x53   : > { %v10516_v43 = vld [vmem:[%s10187_s14 + $0x38e0] sm:$0xff]  ;;  %v1569_v20 = vpack.c.bf16 %v8283_v14, %v10504_v36  ;;  %v8286_v21 = vld [vmem:[%s10187_s14 + $0x38e8] sm:$0xff]  ;;  %8279 = vst [vmem:[%s10210_s18 + $0x70] sm:$0xff] %v1553_v18 }
  0x54   : > { %v10519_v44 = vld [vmem:[%s10187_s14 + $0x20e0] sm:$0xff]  ;;  %v8289_v22 = vld [vmem:[%s10187_s14 + $0x20e8] sm:$0xff]  ;;  %v1577_v27 = vpack.c.bf16 %v8286_v21, %v10516_v43  ;;  %8282 = vst [vmem:[%s10210_s18 + $0xc70] sm:$0xff] %v1561_v19 }
  0x55   : > { %v10522_v45 = vld [vmem:[%s10187_s14 + $0x8e0] sm:$0xff]  ;;  %v8292_v23 = vld [vmem:[%s10187_s14 + $0x8e8] sm:$0xff]  ;;  %v1585_v28 = vpack.c.bf16 %v8289_v22, %v10519_v44  ;;  %8285 = vst [vmem:[%s10210_s18 + $0x1870] sm:$0xff] %v1569_v20 }
  0x56   : > { %v10534_v52 = vld [vmem:[%s10187_s14 + $0x30e0] sm:$0xff]  ;;  %v1593_v29 = vpack.c.bf16 %v8292_v23, %v10522_v45  ;;  %v8295_v30 = vld [vmem:[%s10187_s14 + $0x30e8] sm:$0xff]  ;;  %8288 = vst [vmem:[%s10210_s18 + $0x470] sm:$0xff] %v1577_v27 }
  0x57   : > { %v10537_v53 = vld [vmem:[%s10187_s14 + $0x18e0] sm:$0xff]  ;;  %v8298_v31 = vld [vmem:[%s10187_s14 + $0x18e8] sm:$0xff]  ;;  %v1601_v36 = vpack.c.bf16 %v8295_v30, %v10534_v52  ;;  %8291 = vst [vmem:[%s10210_s18 + $0x1070] sm:$0xff] %v1585_v28 }
  0x58   : > { %v10540_v54 = vld [vmem:[%s10187_s14 + $0xe0] sm:$0xff]  ;;  %v8301_v32 = vld [vmem:[%s10187_s14 + $0xe8] sm:$0xff]  ;;  %v1609_v37 = vpack.c.bf16 %v8298_v31, %v10537_v53  ;;  %8294 = vst [vmem:[%s10210_s18 + $0x1c70] sm:$0xff] %v1593_v29 }
  0x59   : > { %v10552_v61 = vld [vmem:[%s10187_s14 + $0x4100] sm:$0xff]  ;;  %v1617_v38 = vpack.c.bf16 %v8301_v32, %v10540_v54  ;;  %v8304_v39 = vld [vmem:[%s10187_s14 + $0x4108] sm:$0xff]  ;;  %8297 = vst [vmem:[%s10210_s18 + $0x870] sm:$0xff] %v1601_v36 }
  0x5a   : > { %v10555_v62 = vld [vmem:[%s10187_s14 + $0x2900] sm:$0xff]  ;;  %v8307_v40 = vld [vmem:[%s10187_s14 + $0x2908] sm:$0xff]  ;;  %v1625_v45 = vpack.c.bf16 %v8304_v39, %v10552_v61  ;;  %8300 = vst [vmem:[%s10210_s18 + $0x1470] sm:$0xff] %v1609_v37 }
  0x5b   : > { %v10558_v63 = vld [vmem:[%s10187_s14 + $0x1100] sm:$0xff]  ;;  %v8310_v41 = vld [vmem:[%s10187_s14 + $0x1108] sm:$0xff]  ;;  %v1633_v46 = vpack.c.bf16 %v8307_v40, %v10555_v62  ;;  %8303 = vst [vmem:[%s10210_s18 + $0x2070] sm:$0xff] %v1617_v38 }
  0x5c   : > { %v10570_v6 = vld [vmem:[%s10187_s14 + $0x3900] sm:$0xff]  ;;  %v1641_v47 = vpack.c.bf16 %v8310_v41, %v10558_v63  ;;  %v8313_v48 = vld [vmem:[%s10187_s14 + $0x3908] sm:$0xff]  ;;  %8306 = vst [vmem:[%s10210_s18 + $0x80] sm:$0xff] %v1625_v45 }
  0x5d   : > { %v10573_v7 = vld [vmem:[%s10187_s14 + $0x2100] sm:$0xff]  ;;  %v8316_v49 = vld [vmem:[%s10187_s14 + $0x2108] sm:$0xff]  ;;  %v1649_v54 = vpack.c.bf16 %v8313_v48, %v10570_v6  ;;  %8309 = vst [vmem:[%s10210_s18 + $0xc80] sm:$0xff] %v1633_v46 }
  0x5e   : > { %v10576_v8 = vld [vmem:[%s10187_s14 + $0x900] sm:$0xff]  ;;  %v8319_v50 = vld [vmem:[%s10187_s14 + $0x908] sm:$0xff]  ;;  %v1657_v55 = vpack.c.bf16 %v8316_v49, %v10573_v7  ;;  %8312 = vst [vmem:[%s10210_s18 + $0x1880] sm:$0xff] %v1641_v47 }
  0x5f   : > { %v10588_v15 = vld [vmem:[%s10187_s14 + $0x3100] sm:$0xff]  ;;  %v1665_v56 = vpack.c.bf16 %v8319_v50, %v10576_v8  ;;  %v8322_v57 = vld [vmem:[%s10187_s14 + $0x3108] sm:$0xff]  ;;  %8315 = vst [vmem:[%s10210_s18 + $0x480] sm:$0xff] %v1649_v54 }
  0x60   : > { %v10591_v16 = vld [vmem:[%s10187_s14 + $0x1900] sm:$0xff]  ;;  %v8325_v58 = vld [vmem:[%s10187_s14 + $0x1908] sm:$0xff]  ;;  %v1673_v63 = vpack.c.bf16 %v8322_v57, %v10588_v15  ;;  %8318 = vst [vmem:[%s10210_s18 + $0x1080] sm:$0xff] %v1657_v55 }
  0x61   : > { %v10594_v17 = vld [vmem:[%s10187_s14 + $0x100] sm:$0xff]  ;;  %v8328_v59 = vld [vmem:[%s10187_s14 + $0x108] sm:$0xff]  ;;  %v1681_v0 = vpack.c.bf16 %v8325_v58, %v10591_v16  ;;  %8321 = vst [vmem:[%s10210_s18 + $0x1c80] sm:$0xff] %v1665_v56 }
  0x62   : > { %v10606_v24 = vld [vmem:[%s10187_s14 + $0x4120] sm:$0xff]  ;;  %v1689_v1 = vpack.c.bf16 %v8328_v59, %v10594_v17  ;;  %v8331_v2 = vld [vmem:[%s10187_s14 + $0x4128] sm:$0xff]  ;;  %8324 = vst [vmem:[%s10210_s18 + $0x880] sm:$0xff] %v1673_v63 }
  0x63   : > { %v10609_v25 = vld [vmem:[%s10187_s14 + $0x2920] sm:$0xff]  ;;  %v8334_v3 = vld [vmem:[%s10187_s14 + $0x2928] sm:$0xff]  ;;  %v1697_v8 = vpack.c.bf16 %v8331_v2, %v10606_v24  ;;  %8327 = vst [vmem:[%s10210_s18 + $0x1480] sm:$0xff] %v1681_v0 }
  0x64   : > { %v10612_v26 = vld [vmem:[%s10187_s14 + $0x1120] sm:$0xff]  ;;  %v8337_v4 = vld [vmem:[%s10187_s14 + $0x1128] sm:$0xff]  ;;  %v1705_v9 = vpack.c.bf16 %v8334_v3, %v10609_v25  ;;  %8330 = vst [vmem:[%s10210_s18 + $0x2080] sm:$0xff] %v1689_v1 }
  0x65   : > { %v10624_v33 = vld [vmem:[%s10187_s14 + $0x3920] sm:$0xff]  ;;  %v1713_v10 = vpack.c.bf16 %v8337_v4, %v10612_v26  ;;  %v8340_v11 = vld [vmem:[%s10187_s14 + $0x3928] sm:$0xff]  ;;  %8333 = vst [vmem:[%s10210_s18 + $0x90] sm:$0xff] %v1697_v8 }
  0x66   : > { %v10627_v34 = vld [vmem:[%s10187_s14 + $0x2120] sm:$0xff]  ;;  %v8343_v12 = vld [vmem:[%s10187_s14 + $0x2128] sm:$0xff]  ;;  %v1721_v17 = vpack.c.bf16 %v8340_v11, %v10624_v33  ;;  %8336 = vst [vmem:[%s10210_s18 + $0xc90] sm:$0xff] %v1705_v9 }
  0x67   : > { %v10630_v35 = vld [vmem:[%s10187_s14 + $0x920] sm:$0xff]  ;;  %v8346_v13 = vld [vmem:[%s10187_s14 + $0x928] sm:$0xff]  ;;  %v1729_v18 = vpack.c.bf16 %v8343_v12, %v10627_v34  ;;  %8339 = vst [vmem:[%s10210_s18 + $0x1890] sm:$0xff] %v1713_v10 }
  0x68   : > { %v10642_v42 = vld [vmem:[%s10187_s14 + $0x3120] sm:$0xff]  ;;  %v1737_v19 = vpack.c.bf16 %v8346_v13, %v10630_v35  ;;  %v8349_v20 = vld [vmem:[%s10187_s14 + $0x3128] sm:$0xff]  ;;  %8342 = vst [vmem:[%s10210_s18 + $0x490] sm:$0xff] %v1721_v17 }
  0x69   : > { %v10645_v43 = vld [vmem:[%s10187_s14 + $0x1920] sm:$0xff]  ;;  %v8352_v21 = vld [vmem:[%s10187_s14 + $0x1928] sm:$0xff]  ;;  %v1745_v26 = vpack.c.bf16 %v8349_v20, %v10642_v42  ;;  %8345 = vst [vmem:[%s10210_s18 + $0x1090] sm:$0xff] %v1729_v18 }
  0x6a   : > { %v10648_v44 = vld [vmem:[%s10187_s14 + $0x120] sm:$0xff]  ;;  %v8355_v22 = vld [vmem:[%s10187_s14 + $0x128] sm:$0xff]  ;;  %v1753_v27 = vpack.c.bf16 %v8352_v21, %v10645_v43  ;;  %8348 = vst [vmem:[%s10210_s18 + $0x1c90] sm:$0xff] %v1737_v19 }
  0x6b   : > { %v10660_v51 = vld [vmem:[%s10187_s14 + $0x4140] sm:$0xff]  ;;  %v1761_v28 = vpack.c.bf16 %v8355_v22, %v10648_v44  ;;  %v8358_v29 = vld [vmem:[%s10187_s14 + $0x4148] sm:$0xff]  ;;  %8351 = vst [vmem:[%s10210_s18 + $0x890] sm:$0xff] %v1745_v26 }
  0x6c   : > { %v10663_v52 = vld [vmem:[%s10187_s14 + $0x2940] sm:$0xff]  ;;  %v8361_v30 = vld [vmem:[%s10187_s14 + $0x2948] sm:$0xff]  ;;  %v1769_v35 = vpack.c.bf16 %v8358_v29, %v10660_v51  ;;  %8354 = vst [vmem:[%s10210_s18 + $0x1490] sm:$0xff] %v1753_v27 }
  0x6d   : > { %v10666_v53 = vld [vmem:[%s10187_s14 + $0x1140] sm:$0xff]  ;;  %v8364_v31 = vld [vmem:[%s10187_s14 + $0x1148] sm:$0xff]  ;;  %v1777_v36 = vpack.c.bf16 %v8361_v30, %v10663_v52  ;;  %8357 = vst [vmem:[%s10210_s18 + $0x2090] sm:$0xff] %v1761_v28 }
  0x6e   : > { %v10678_v60 = vld [vmem:[%s10187_s14 + $0x3940] sm:$0xff]  ;;  %v1785_v37 = vpack.c.bf16 %v8364_v31, %v10666_v53  ;;  %v8367_v38 = vld [vmem:[%s10187_s14 + $0x3948] sm:$0xff]  ;;  %8360 = vst [vmem:[%s10210_s18 + $0xa0] sm:$0xff] %v1769_v35 }
  0x6f   : > { %v10681_v61 = vld [vmem:[%s10187_s14 + $0x2140] sm:$0xff]  ;;  %v8370_v39 = vld [vmem:[%s10187_s14 + $0x2148] sm:$0xff]  ;;  %v1793_v44 = vpack.c.bf16 %v8367_v38, %v10678_v60  ;;  %8363 = vst [vmem:[%s10210_s18 + $0xca0] sm:$0xff] %v1777_v36 }
  0x70   : > { %v10684_v62 = vld [vmem:[%s10187_s14 + $0x940] sm:$0xff]  ;;  %v8373_v40 = vld [vmem:[%s10187_s14 + $0x948] sm:$0xff]  ;;  %v1801_v45 = vpack.c.bf16 %v8370_v39, %v10681_v61  ;;  %8366 = vst [vmem:[%s10210_s18 + $0x18a0] sm:$0xff] %v1785_v37 }
  0x71   : > { %v10696_v5 = vld [vmem:[%s10187_s14 + $0x3140] sm:$0xff]  ;;  %v1809_v46 = vpack.c.bf16 %v8373_v40, %v10684_v62  ;;  %v8376_v47 = vld [vmem:[%s10187_s14 + $0x3148] sm:$0xff]  ;;  %8369 = vst [vmem:[%s10210_s18 + $0x4a0] sm:$0xff] %v1793_v44 }
  0x72   : > { %v10699_v6 = vld [vmem:[%s10187_s14 + $0x1940] sm:$0xff]  ;;  %v8379_v48 = vld [vmem:[%s10187_s14 + $0x1948] sm:$0xff]  ;;  %v1817_v53 = vpack.c.bf16 %v8376_v47, %v10696_v5  ;;  %8372 = vst [vmem:[%s10210_s18 + $0x10a0] sm:$0xff] %v1801_v45 }
  0x73   : > { %v10702_v7 = vld [vmem:[%s10187_s14 + $0x140] sm:$0xff]  ;;  %v8382_v49 = vld [vmem:[%s10187_s14 + $0x148] sm:$0xff]  ;;  %v1825_v54 = vpack.c.bf16 %v8379_v48, %v10699_v6  ;;  %8375 = vst [vmem:[%s10210_s18 + $0x1ca0] sm:$0xff] %v1809_v46 }
  0x74   : > { %v10714_v14 = vld [vmem:[%s10187_s14 + $0x4160] sm:$0xff]  ;;  %v1833_v55 = vpack.c.bf16 %v8382_v49, %v10702_v7  ;;  %v8385_v56 = vld [vmem:[%s10187_s14 + $0x4168] sm:$0xff]  ;;  %8378 = vst [vmem:[%s10210_s18 + $0x8a0] sm:$0xff] %v1817_v53 }
  0x75   : > { %v10717_v15 = vld [vmem:[%s10187_s14 + $0x2960] sm:$0xff]  ;;  %v8388_v57 = vld [vmem:[%s10187_s14 + $0x2968] sm:$0xff]  ;;  %v1841_v62 = vpack.c.bf16 %v8385_v56, %v10714_v14  ;;  %8381 = vst [vmem:[%s10210_s18 + $0x14a0] sm:$0xff] %v1825_v54 }
  0x76   : > { %v10720_v16 = vld [vmem:[%s10187_s14 + $0x1160] sm:$0xff]  ;;  %v8391_v58 = vld [vmem:[%s10187_s14 + $0x1168] sm:$0xff]  ;;  %v1849_v63 = vpack.c.bf16 %v8388_v57, %v10717_v15  ;;  %8384 = vst [vmem:[%s10210_s18 + $0x20a0] sm:$0xff] %v1833_v55 }
  0x77   : > { %v10732_v23 = vld [vmem:[%s10187_s14 + $0x3960] sm:$0xff]  ;;  %v1857_v0 = vpack.c.bf16 %v8391_v58, %v10720_v16  ;;  %v8394_v1 = vld [vmem:[%s10187_s14 + $0x3968] sm:$0xff]  ;;  %8387 = vst [vmem:[%s10210_s18 + $0xb0] sm:$0xff] %v1841_v62 }
  0x78   : > { %v10735_v24 = vld [vmem:[%s10187_s14 + $0x2160] sm:$0xff]  ;;  %v8397_v2 = vld [vmem:[%s10187_s14 + $0x2168] sm:$0xff]  ;;  %v1865_v7 = vpack.c.bf16 %v8394_v1, %v10732_v23  ;;  %8390 = vst [vmem:[%s10210_s18 + $0xcb0] sm:$0xff] %v1849_v63 }
  0x79   : > { %v10738_v25 = vld [vmem:[%s10187_s14 + $0x960] sm:$0xff]  ;;  %v8400_v3 = vld [vmem:[%s10187_s14 + $0x968] sm:$0xff]  ;;  %v1873_v8 = vpack.c.bf16 %v8397_v2, %v10735_v24  ;;  %8393 = vst [vmem:[%s10210_s18 + $0x18b0] sm:$0xff] %v1857_v0 }
  0x7a   : > { %v10750_v32 = vld [vmem:[%s10187_s14 + $0x3160] sm:$0xff]  ;;  %v1881_v9 = vpack.c.bf16 %v8400_v3, %v10738_v25  ;;  %v8403_v10 = vld [vmem:[%s10187_s14 + $0x3168] sm:$0xff]  ;;  %8396 = vst [vmem:[%s10210_s18 + $0x4b0] sm:$0xff] %v1865_v7 }
  0x7b   : > { %v10753_v33 = vld [vmem:[%s10187_s14 + $0x1960] sm:$0xff]  ;;  %v8406_v11 = vld [vmem:[%s10187_s14 + $0x1968] sm:$0xff]  ;;  %v1889_v16 = vpack.c.bf16 %v8403_v10, %v10750_v32  ;;  %8399 = vst [vmem:[%s10210_s18 + $0x10b0] sm:$0xff] %v1873_v8 }
  0x7c   : > { %v10756_v34 = vld [vmem:[%s10187_s14 + $0x160] sm:$0xff]  ;;  %v8409_v12 = vld [vmem:[%s10187_s14 + $0x168] sm:$0xff]  ;;  %v1897_v17 = vpack.c.bf16 %v8406_v11, %v10753_v33  ;;  %8402 = vst [vmem:[%s10210_s18 + $0x1cb0] sm:$0xff] %v1881_v9 }
  0x7d   : > { %v10768_v41 = vld [vmem:[%s10187_s14 + $0x4180] sm:$0xff]  ;;  %v1905_v18 = vpack.c.bf16 %v8409_v12, %v10756_v34  ;;  %v8412_v19 = vld [vmem:[%s10187_s14 + $0x4188] sm:$0xff]  ;;  %8405 = vst [vmem:[%s10210_s18 + $0x8b0] sm:$0xff] %v1889_v16 }
  0x7e   : > { %v10771_v42 = vld [vmem:[%s10187_s14 + $0x2980] sm:$0xff]  ;;  %v8415_v20 = vld [vmem:[%s10187_s14 + $0x2988] sm:$0xff]  ;;  %v1913_v25 = vpack.c.bf16 %v8412_v19, %v10768_v41  ;;  %8408 = vst [vmem:[%s10210_s18 + $0x14b0] sm:$0xff] %v1897_v17 }
  0x7f   : > { %v10774_v43 = vld [vmem:[%s10187_s14 + $0x1180] sm:$0xff]  ;;  %v8418_v21 = vld [vmem:[%s10187_s14 + $0x1188] sm:$0xff]  ;;  %v1921_v26 = vpack.c.bf16 %v8415_v20, %v10771_v42  ;;  %8411 = vst [vmem:[%s10210_s18 + $0x20b0] sm:$0xff] %v1905_v18 }
  0x80   : > { %v10786_v50 = vld [vmem:[%s10187_s14 + $0x3980] sm:$0xff]  ;;  %v1929_v27 = vpack.c.bf16 %v8418_v21, %v10774_v43  ;;  %v8421_v28 = vld [vmem:[%s10187_s14 + $0x3988] sm:$0xff]  ;;  %8414 = vst [vmem:[%s10210_s18 + $0xc0] sm:$0xff] %v1913_v25 }
  0x81   : > { %v10789_v51 = vld [vmem:[%s10187_s14 + $0x2180] sm:$0xff]  ;;  %v8424_v29 = vld [vmem:[%s10187_s14 + $0x2188] sm:$0xff]  ;;  %v1937_v34 = vpack.c.bf16 %v8421_v28, %v10786_v50  ;;  %8417 = vst [vmem:[%s10210_s18 + $0xcc0] sm:$0xff] %v1921_v26 }
  0x82   : > { %v10792_v52 = vld [vmem:[%s10187_s14 + $0x980] sm:$0xff]  ;;  %v8427_v30 = vld [vmem:[%s10187_s14 + $0x988] sm:$0xff]  ;;  %v1945_v35 = vpack.c.bf16 %v8424_v29, %v10789_v51  ;;  %8420 = vst [vmem:[%s10210_s18 + $0x18c0] sm:$0xff] %v1929_v27 }
  0x83   : > { %v10804_v59 = vld [vmem:[%s10187_s14 + $0x3180] sm:$0xff]  ;;  %v1953_v36 = vpack.c.bf16 %v8427_v30, %v10792_v52  ;;  %v8430_v37 = vld [vmem:[%s10187_s14 + $0x3188] sm:$0xff]  ;;  %8423 = vst [vmem:[%s10210_s18 + $0x4c0] sm:$0xff] %v1937_v34 }
  0x84   : > { %v10807_v60 = vld [vmem:[%s10187_s14 + $0x1980] sm:$0xff]  ;;  %v8433_v38 = vld [vmem:[%s10187_s14 + $0x1988] sm:$0xff]  ;;  %v1961_v43 = vpack.c.bf16 %v8430_v37, %v10804_v59  ;;  %8426 = vst [vmem:[%s10210_s18 + $0x10c0] sm:$0xff] %v1945_v35 }
  0x85   : > { %v10810_v61 = vld [vmem:[%s10187_s14 + $0x180] sm:$0xff]  ;;  %v8436_v39 = vld [vmem:[%s10187_s14 + $0x188] sm:$0xff]  ;;  %v1969_v44 = vpack.c.bf16 %v8433_v38, %v10807_v60  ;;  %8429 = vst [vmem:[%s10210_s18 + $0x1cc0] sm:$0xff] %v1953_v36 }
  0x86   : > { %v10822_v4 = vld [vmem:[%s10187_s14 + $0x41a0] sm:$0xff]  ;;  %v1977_v45 = vpack.c.bf16 %v8436_v39, %v10810_v61  ;;  %v8439_v46 = vld [vmem:[%s10187_s14 + $0x41a8] sm:$0xff]  ;;  %8432 = vst [vmem:[%s10210_s18 + $0x8c0] sm:$0xff] %v1961_v43 }
  0x87   : > { %v10825_v5 = vld [vmem:[%s10187_s14 + $0x29a0] sm:$0xff]  ;;  %v8442_v47 = vld [vmem:[%s10187_s14 + $0x29a8] sm:$0xff]  ;;  %v1985_v52 = vpack.c.bf16 %v8439_v46, %v10822_v4  ;;  %8435 = vst [vmem:[%s10210_s18 + $0x14c0] sm:$0xff] %v1969_v44 }
  0x88   : > { %v10828_v6 = vld [vmem:[%s10187_s14 + $0x11a0] sm:$0xff]  ;;  %v8445_v48 = vld [vmem:[%s10187_s14 + $0x11a8] sm:$0xff]  ;;  %v1993_v53 = vpack.c.bf16 %v8442_v47, %v10825_v5  ;;  %8438 = vst [vmem:[%s10210_s18 + $0x20c0] sm:$0xff] %v1977_v45 }
  0x89   : > { %v10840_v13 = vld [vmem:[%s10187_s14 + $0x39a0] sm:$0xff]  ;;  %v2001_v54 = vpack.c.bf16 %v8445_v48, %v10828_v6  ;;  %v8448_v55 = vld [vmem:[%s10187_s14 + $0x39a8] sm:$0xff]  ;;  %8441 = vst [vmem:[%s10210_s18 + $0xd0] sm:$0xff] %v1985_v52 }
  0x8a   : > { %v10843_v14 = vld [vmem:[%s10187_s14 + $0x21a0] sm:$0xff]  ;;  %v8451_v56 = vld [vmem:[%s10187_s14 + $0x21a8] sm:$0xff]  ;;  %v2009_v61 = vpack.c.bf16 %v8448_v55, %v10840_v13  ;;  %8444 = vst [vmem:[%s10210_s18 + $0xcd0] sm:$0xff] %v1993_v53 }
  0x8b   : > { %v10846_v15 = vld [vmem:[%s10187_s14 + $0x9a0] sm:$0xff]  ;;  %v8454_v57 = vld [vmem:[%s10187_s14 + $0x9a8] sm:$0xff]  ;;  %v2017_v62 = vpack.c.bf16 %v8451_v56, %v10843_v14  ;;  %8447 = vst [vmem:[%s10210_s18 + $0x18d0] sm:$0xff] %v2001_v54 }
  0x8c   : > { %v10858_v22 = vld [vmem:[%s10187_s14 + $0x31a0] sm:$0xff]  ;;  %v2025_v63 = vpack.c.bf16 %v8454_v57, %v10846_v15  ;;  %v8457_v0 = vld [vmem:[%s10187_s14 + $0x31a8] sm:$0xff]  ;;  %8450 = vst [vmem:[%s10210_s18 + $0x4d0] sm:$0xff] %v2009_v61 }
  0x8d   : > { %v10861_v23 = vld [vmem:[%s10187_s14 + $0x19a0] sm:$0xff]  ;;  %v8460_v1 = vld [vmem:[%s10187_s14 + $0x19a8] sm:$0xff]  ;;  %v2033_v6 = vpack.c.bf16 %v8457_v0, %v10858_v22  ;;  %8453 = vst [vmem:[%s10210_s18 + $0x10d0] sm:$0xff] %v2017_v62 }
  0x8e   : > { %v10864_v24 = vld [vmem:[%s10187_s14 + $0x1a0] sm:$0xff]  ;;  %v8463_v2 = vld [vmem:[%s10187_s14 + $0x1a8] sm:$0xff]  ;;  %v2041_v7 = vpack.c.bf16 %v8460_v1, %v10861_v23  ;;  %8456 = vst [vmem:[%s10210_s18 + $0x1cd0] sm:$0xff] %v2025_v63 }
  0x8f   : > { %v10876_v31 = vld [vmem:[%s10187_s14 + $0x41c0] sm:$0xff]  ;;  %v2049_v8 = vpack.c.bf16 %v8463_v2, %v10864_v24  ;;  %v8466_v9 = vld [vmem:[%s10187_s14 + $0x41c8] sm:$0xff]  ;;  %8459 = vst [vmem:[%s10210_s18 + $0x8d0] sm:$0xff] %v2033_v6 }
  0x90   : > { %v10879_v32 = vld [vmem:[%s10187_s14 + $0x29c0] sm:$0xff]  ;;  %v8469_v10 = vld [vmem:[%s10187_s14 + $0x29c8] sm:$0xff]  ;;  %v2057_v15 = vpack.c.bf16 %v8466_v9, %v10876_v31  ;;  %8462 = vst [vmem:[%s10210_s18 + $0x14d0] sm:$0xff] %v2041_v7 }
  0x91   : > { %v10882_v33 = vld [vmem:[%s10187_s14 + $0x11c0] sm:$0xff]  ;;  %v8472_v11 = vld [vmem:[%s10187_s14 + $0x11c8] sm:$0xff]  ;;  %v2065_v16 = vpack.c.bf16 %v8469_v10, %v10879_v32  ;;  %8465 = vst [vmem:[%s10210_s18 + $0x20d0] sm:$0xff] %v2049_v8 }
  0x92   : > { %v10894_v40 = vld [vmem:[%s10187_s14 + $0x39c0] sm:$0xff]  ;;  %v2073_v17 = vpack.c.bf16 %v8472_v11, %v10882_v33  ;;  %v8475_v18 = vld [vmem:[%s10187_s14 + $0x39c8] sm:$0xff]  ;;  %8468 = vst [vmem:[%s10210_s18 + $0xe0] sm:$0xff] %v2057_v15 }
  0x93   : > { %v10897_v41 = vld [vmem:[%s10187_s14 + $0x21c0] sm:$0xff]  ;;  %v8478_v19 = vld [vmem:[%s10187_s14 + $0x21c8] sm:$0xff]  ;;  %v2081_v24 = vpack.c.bf16 %v8475_v18, %v10894_v40  ;;  %8471 = vst [vmem:[%s10210_s18 + $0xce0] sm:$0xff] %v2065_v16 }
  0x94   : > { %v10900_v42 = vld [vmem:[%s10187_s14 + $0x9c0] sm:$0xff]  ;;  %v8481_v20 = vld [vmem:[%s10187_s14 + $0x9c8] sm:$0xff]  ;;  %v2089_v25 = vpack.c.bf16 %v8478_v19, %v10897_v41  ;;  %8474 = vst [vmem:[%s10210_s18 + $0x18e0] sm:$0xff] %v2073_v17 }
  0x95   : > { %v10912_v49 = vld [vmem:[%s10187_s14 + $0x31c0] sm:$0xff]  ;;  %v2097_v26 = vpack.c.bf16 %v8481_v20, %v10900_v42  ;;  %v8484_v27 = vld [vmem:[%s10187_s14 + $0x31c8] sm:$0xff]  ;;  %8477 = vst [vmem:[%s10210_s18 + $0x4e0] sm:$0xff] %v2081_v24 }
  0x96   : > { %v10915_v50 = vld [vmem:[%s10187_s14 + $0x19c0] sm:$0xff]  ;;  %v8487_v28 = vld [vmem:[%s10187_s14 + $0x19c8] sm:$0xff]  ;;  %v2105_v33 = vpack.c.bf16 %v8484_v27, %v10912_v49  ;;  %8480 = vst [vmem:[%s10210_s18 + $0x10e0] sm:$0xff] %v2089_v25 }
  0x97   : > { %v10918_v51 = vld [vmem:[%s10187_s14 + $0x1c0] sm:$0xff]  ;;  %v8490_v29 = vld [vmem:[%s10187_s14 + $0x1c8] sm:$0xff]  ;;  %v2113_v34 = vpack.c.bf16 %v8487_v28, %v10915_v50  ;;  %8483 = vst [vmem:[%s10210_s18 + $0x1ce0] sm:$0xff] %v2097_v26 }
  0x98   : > { %v10930_v58 = vld [vmem:[%s10187_s14 + $0x41e0] sm:$0xff]  ;;  %v2121_v35 = vpack.c.bf16 %v8490_v29, %v10918_v51  ;;  %v8493_v36 = vld [vmem:[%s10187_s14 + $0x41e8] sm:$0xff]  ;;  %8486 = vst [vmem:[%s10210_s18 + $0x8e0] sm:$0xff] %v2105_v33 }
  0x99   : > { %v10933_v59 = vld [vmem:[%s10187_s14 + $0x29e0] sm:$0xff]  ;;  %v8496_v37 = vld [vmem:[%s10187_s14 + $0x29e8] sm:$0xff]  ;;  %v2129_v42 = vpack.c.bf16 %v8493_v36, %v10930_v58  ;;  %8489 = vst [vmem:[%s10210_s18 + $0x14e0] sm:$0xff] %v2113_v34 }
  0x9a   : > { %v10936_v60 = vld [vmem:[%s10187_s14 + $0x11e0] sm:$0xff]  ;;  %v8499_v38 = vld [vmem:[%s10187_s14 + $0x11e8] sm:$0xff]  ;;  %v2137_v43 = vpack.c.bf16 %v8496_v37, %v10933_v59  ;;  %8492 = vst [vmem:[%s10210_s18 + $0x20e0] sm:$0xff] %v2121_v35 }
  0x9b   : > { %v10948_v3 = vld [vmem:[%s10187_s14 + $0x39e0] sm:$0xff]  ;;  %v2145_v44 = vpack.c.bf16 %v8499_v38, %v10936_v60  ;;  %v8502_v45 = vld [vmem:[%s10187_s14 + $0x39e8] sm:$0xff]  ;;  %8495 = vst [vmem:[%s10210_s18 + $0xf0] sm:$0xff] %v2129_v42 }
  0x9c   : > { %v10951_v4 = vld [vmem:[%s10187_s14 + $0x21e0] sm:$0xff]  ;;  %v8505_v46 = vld [vmem:[%s10187_s14 + $0x21e8] sm:$0xff]  ;;  %v2153_v51 = vpack.c.bf16 %v8502_v45, %v10948_v3  ;;  %8498 = vst [vmem:[%s10210_s18 + $0xcf0] sm:$0xff] %v2137_v43 }
  0x9d   : > { %v10954_v5 = vld [vmem:[%s10187_s14 + $0x9e0] sm:$0xff]  ;;  %v8508_v47 = vld [vmem:[%s10187_s14 + $0x9e8] sm:$0xff]  ;;  %v2161_v52 = vpack.c.bf16 %v8505_v46, %v10951_v4  ;;  %8501 = vst [vmem:[%s10210_s18 + $0x18f0] sm:$0xff] %v2145_v44 }
  0x9e   : > { %v10966_v12 = vld [vmem:[%s10187_s14 + $0x31e0] sm:$0xff]  ;;  %v2169_v53 = vpack.c.bf16 %v8508_v47, %v10954_v5  ;;  %v8511_v54 = vld [vmem:[%s10187_s14 + $0x31e8] sm:$0xff]  ;;  %8504 = vst [vmem:[%s10210_s18 + $0x4f0] sm:$0xff] %v2153_v51 }
  0x9f   : > { %v10969_v13 = vld [vmem:[%s10187_s14 + $0x19e0] sm:$0xff]  ;;  %v8514_v55 = vld [vmem:[%s10187_s14 + $0x19e8] sm:$0xff]  ;;  %v2177_v60 = vpack.c.bf16 %v8511_v54, %v10966_v12  ;;  %8507 = vst [vmem:[%s10210_s18 + $0x10f0] sm:$0xff] %v2161_v52 }
  0xa0   : > { %v10972_v14 = vld [vmem:[%s10187_s14 + $0x1e0] sm:$0xff]  ;;  %v8517_v56 = vld [vmem:[%s10187_s14 + $0x1e8] sm:$0xff]  ;;  %v2185_v61 = vpack.c.bf16 %v8514_v55, %v10969_v13  ;;  %8510 = vst [vmem:[%s10210_s18 + $0x1cf0] sm:$0xff] %v2169_v53 }
  0xa1   : > { %v10984_v21 = vld [vmem:[%s10187_s14 + $0x4200] sm:$0xff]  ;;  %v2193_v62 = vpack.c.bf16 %v8517_v56, %v10972_v14  ;;  %v8520_v63 = vld [vmem:[%s10187_s14 + $0x4208] sm:$0xff]  ;;  %8513 = vst [vmem:[%s10210_s18 + $0x8f0] sm:$0xff] %v2177_v60 }
  0xa2   : > { %v10987_v22 = vld [vmem:[%s10187_s14 + $0x2a00] sm:$0xff]  ;;  %v8523_v0 = vld [vmem:[%s10187_s14 + $0x2a08] sm:$0xff]  ;;  %v2201_v5 = vpack.c.bf16 %v8520_v63, %v10984_v21  ;;  %8516 = vst [vmem:[%s10210_s18 + $0x14f0] sm:$0xff] %v2185_v61 }
  0xa3   : > { %v10990_v23 = vld [vmem:[%s10187_s14 + $0x1200] sm:$0xff]  ;;  %v8526_v1 = vld [vmem:[%s10187_s14 + $0x1208] sm:$0xff]  ;;  %v2209_v6 = vpack.c.bf16 %v8523_v0, %v10987_v22  ;;  %8519 = vst [vmem:[%s10210_s18 + $0x20f0] sm:$0xff] %v2193_v62 }
  0xa4   : > { %v11002_v30 = vld [vmem:[%s10187_s14 + $0x3a00] sm:$0xff]  ;;  %v2217_v7 = vpack.c.bf16 %v8526_v1, %v10990_v23  ;;  %v8529_v8 = vld [vmem:[%s10187_s14 + $0x3a08] sm:$0xff]  ;;  %8522 = vst [vmem:[%s10210_s18 + $0x100] sm:$0xff] %v2201_v5 }
  0xa5   : > { %v11005_v31 = vld [vmem:[%s10187_s14 + $0x2200] sm:$0xff]  ;;  %v8532_v9 = vld [vmem:[%s10187_s14 + $0x2208] sm:$0xff]  ;;  %v2225_v14 = vpack.c.bf16 %v8529_v8, %v11002_v30  ;;  %8525 = vst [vmem:[%s10210_s18 + $0xd00] sm:$0xff] %v2209_v6 }
  0xa6   : > { %v11008_v32 = vld [vmem:[%s10187_s14 + $0xa00] sm:$0xff]  ;;  %v8535_v10 = vld [vmem:[%s10187_s14 + $0xa08] sm:$0xff]  ;;  %v2233_v15 = vpack.c.bf16 %v8532_v9, %v11005_v31  ;;  %8528 = vst [vmem:[%s10210_s18 + $0x1900] sm:$0xff] %v2217_v7 }
  0xa7   : > { %v11020_v39 = vld [vmem:[%s10187_s14 + $0x3200] sm:$0xff]  ;;  %v2241_v16 = vpack.c.bf16 %v8535_v10, %v11008_v32  ;;  %v8538_v17 = vld [vmem:[%s10187_s14 + $0x3208] sm:$0xff]  ;;  %8531 = vst [vmem:[%s10210_s18 + $0x500] sm:$0xff] %v2225_v14 }
  0xa8   : > { %v11023_v40 = vld [vmem:[%s10187_s14 + $0x1a00] sm:$0xff]  ;;  %v8541_v18 = vld [vmem:[%s10187_s14 + $0x1a08] sm:$0xff]  ;;  %v2249_v23 = vpack.c.bf16 %v8538_v17, %v11020_v39  ;;  %8534 = vst [vmem:[%s10210_s18 + $0x1100] sm:$0xff] %v2233_v15 }
  0xa9   : > { %v11026_v41 = vld [vmem:[%s10187_s14 + $0x200] sm:$0xff]  ;;  %v8544_v19 = vld [vmem:[%s10187_s14 + $0x208] sm:$0xff]  ;;  %v2257_v24 = vpack.c.bf16 %v8541_v18, %v11023_v40  ;;  %8537 = vst [vmem:[%s10210_s18 + $0x1d00] sm:$0xff] %v2241_v16 }
  0xaa   : > { %v11038_v48 = vld [vmem:[%s10187_s14 + $0x4220] sm:$0xff]  ;;  %v2265_v25 = vpack.c.bf16 %v8544_v19, %v11026_v41  ;;  %v8547_v26 = vld [vmem:[%s10187_s14 + $0x4228] sm:$0xff]  ;;  %8540 = vst [vmem:[%s10210_s18 + $0x900] sm:$0xff] %v2249_v23 }
  0xab   : > { %v11041_v49 = vld [vmem:[%s10187_s14 + $0x2a20] sm:$0xff]  ;;  %v8550_v27 = vld [vmem:[%s10187_s14 + $0x2a28] sm:$0xff]  ;;  %v2273_v32 = vpack.c.bf16 %v8547_v26, %v11038_v48  ;;  %8543 = vst [vmem:[%s10210_s18 + $0x1500] sm:$0xff] %v2257_v24 }
  0xac   : > { %v11044_v50 = vld [vmem:[%s10187_s14 + $0x1220] sm:$0xff]  ;;  %v8553_v28 = vld [vmem:[%s10187_s14 + $0x1228] sm:$0xff]  ;;  %v2281_v33 = vpack.c.bf16 %v8550_v27, %v11041_v49  ;;  %8546 = vst [vmem:[%s10210_s18 + $0x2100] sm:$0xff] %v2265_v25 }
  0xad   : > { %v11056_v57 = vld [vmem:[%s10187_s14 + $0x3a20] sm:$0xff]  ;;  %v2289_v34 = vpack.c.bf16 %v8553_v28, %v11044_v50  ;;  %v8556_v35 = vld [vmem:[%s10187_s14 + $0x3a28] sm:$0xff]  ;;  %8549 = vst [vmem:[%s10210_s18 + $0x110] sm:$0xff] %v2273_v32 }
  0xae   : > { %v11059_v58 = vld [vmem:[%s10187_s14 + $0x2220] sm:$0xff]  ;;  %v8559_v36 = vld [vmem:[%s10187_s14 + $0x2228] sm:$0xff]  ;;  %v2297_v41 = vpack.c.bf16 %v8556_v35, %v11056_v57  ;;  %8552 = vst [vmem:[%s10210_s18 + $0xd10] sm:$0xff] %v2281_v33 }
  0xaf   : > { %v11062_v59 = vld [vmem:[%s10187_s14 + $0xa20] sm:$0xff]  ;;  %v8562_v37 = vld [vmem:[%s10187_s14 + $0xa28] sm:$0xff]  ;;  %v2305_v42 = vpack.c.bf16 %v8559_v36, %v11059_v58  ;;  %8555 = vst [vmem:[%s10210_s18 + $0x1910] sm:$0xff] %v2289_v34 }
  0xb0   : > { %v11074_v2 = vld [vmem:[%s10187_s14 + $0x3220] sm:$0xff]  ;;  %v2313_v43 = vpack.c.bf16 %v8562_v37, %v11062_v59  ;;  %v8565_v44 = vld [vmem:[%s10187_s14 + $0x3228] sm:$0xff]  ;;  %8558 = vst [vmem:[%s10210_s18 + $0x510] sm:$0xff] %v2297_v41 }
  0xb1   : > { %v11077_v3 = vld [vmem:[%s10187_s14 + $0x1a20] sm:$0xff]  ;;  %v8568_v45 = vld [vmem:[%s10187_s14 + $0x1a28] sm:$0xff]  ;;  %v2321_v50 = vpack.c.bf16 %v8565_v44, %v11074_v2  ;;  %8561 = vst [vmem:[%s10210_s18 + $0x1110] sm:$0xff] %v2305_v42 }
  0xb2   : > { %v11080_v4 = vld [vmem:[%s10187_s14 + $0x220] sm:$0xff]  ;;  %v8571_v46 = vld [vmem:[%s10187_s14 + $0x228] sm:$0xff]  ;;  %v2329_v51 = vpack.c.bf16 %v8568_v45, %v11077_v3  ;;  %8564 = vst [vmem:[%s10210_s18 + $0x1d10] sm:$0xff] %v2313_v43 }
  0xb3   : > { %v11092_v11 = vld [vmem:[%s10187_s14 + $0x4240] sm:$0xff]  ;;  %v2337_v52 = vpack.c.bf16 %v8571_v46, %v11080_v4  ;;  %v8574_v53 = vld [vmem:[%s10187_s14 + $0x4248] sm:$0xff]  ;;  %8567 = vst [vmem:[%s10210_s18 + $0x910] sm:$0xff] %v2321_v50 }
  0xb4   : > { %v11095_v12 = vld [vmem:[%s10187_s14 + $0x2a40] sm:$0xff]  ;;  %v8577_v54 = vld [vmem:[%s10187_s14 + $0x2a48] sm:$0xff]  ;;  %v2345_v59 = vpack.c.bf16 %v8574_v53, %v11092_v11  ;;  %8570 = vst [vmem:[%s10210_s18 + $0x1510] sm:$0xff] %v2329_v51 }
  0xb5   : > { %v11098_v13 = vld [vmem:[%s10187_s14 + $0x1240] sm:$0xff]  ;;  %v8580_v55 = vld [vmem:[%s10187_s14 + $0x1248] sm:$0xff]  ;;  %v2353_v60 = vpack.c.bf16 %v8577_v54, %v11095_v12  ;;  %8573 = vst [vmem:[%s10210_s18 + $0x2110] sm:$0xff] %v2337_v52 }
  0xb6   : > { %v11110_v20 = vld [vmem:[%s10187_s14 + $0x3a40] sm:$0xff]  ;;  %v2361_v61 = vpack.c.bf16 %v8580_v55, %v11098_v13  ;;  %v8583_v62 = vld [vmem:[%s10187_s14 + $0x3a48] sm:$0xff]  ;;  %8576 = vst [vmem:[%s10210_s18 + $0x120] sm:$0xff] %v2345_v59 }
  0xb7   : > { %v11113_v21 = vld [vmem:[%s10187_s14 + $0x2240] sm:$0xff]  ;;  %v8586_v63 = vld [vmem:[%s10187_s14 + $0x2248] sm:$0xff]  ;;  %v2369_v4 = vpack.c.bf16 %v8583_v62, %v11110_v20  ;;  %8579 = vst [vmem:[%s10210_s18 + $0xd20] sm:$0xff] %v2353_v60 }
  0xb8   : > { %v11116_v22 = vld [vmem:[%s10187_s14 + $0xa40] sm:$0xff]  ;;  %v8589_v0 = vld [vmem:[%s10187_s14 + $0xa48] sm:$0xff]  ;;  %v2377_v5 = vpack.c.bf16 %v8586_v63, %v11113_v21  ;;  %8582 = vst [vmem:[%s10210_s18 + $0x1920] sm:$0xff] %v2361_v61 }
  0xb9   : > { %v11128_v29 = vld [vmem:[%s10187_s14 + $0x3240] sm:$0xff]  ;;  %v2385_v6 = vpack.c.bf16 %v8589_v0, %v11116_v22  ;;  %v8592_v7 = vld [vmem:[%s10187_s14 + $0x3248] sm:$0xff]  ;;  %8585 = vst [vmem:[%s10210_s18 + $0x520] sm:$0xff] %v2369_v4 }
  0xba   : > { %v11131_v30 = vld [vmem:[%s10187_s14 + $0x1a40] sm:$0xff]  ;;  %v8595_v8 = vld [vmem:[%s10187_s14 + $0x1a48] sm:$0xff]  ;;  %v2393_v13 = vpack.c.bf16 %v8592_v7, %v11128_v29  ;;  %8588 = vst [vmem:[%s10210_s18 + $0x1120] sm:$0xff] %v2377_v5 }
  0xbb   : > { %v11134_v31 = vld [vmem:[%s10187_s14 + $0x240] sm:$0xff]  ;;  %v8598_v9 = vld [vmem:[%s10187_s14 + $0x248] sm:$0xff]  ;;  %v2401_v14 = vpack.c.bf16 %v8595_v8, %v11131_v30  ;;  %8591 = vst [vmem:[%s10210_s18 + $0x1d20] sm:$0xff] %v2385_v6 }
  0xbc   : > { %v11146_v38 = vld [vmem:[%s10187_s14 + $0x4260] sm:$0xff]  ;;  %v2409_v15 = vpack.c.bf16 %v8598_v9, %v11134_v31  ;;  %v8601_v16 = vld [vmem:[%s10187_s14 + $0x4268] sm:$0xff]  ;;  %8594 = vst [vmem:[%s10210_s18 + $0x920] sm:$0xff] %v2393_v13 }
  0xbd   : > { %v11149_v39 = vld [vmem:[%s10187_s14 + $0x2a60] sm:$0xff]  ;;  %v8604_v17 = vld [vmem:[%s10187_s14 + $0x2a68] sm:$0xff]  ;;  %v2417_v22 = vpack.c.bf16 %v8601_v16, %v11146_v38  ;;  %8597 = vst [vmem:[%s10210_s18 + $0x1520] sm:$0xff] %v2401_v14 }
  0xbe   : > { %v11152_v40 = vld [vmem:[%s10187_s14 + $0x1260] sm:$0xff]  ;;  %v8607_v18 = vld [vmem:[%s10187_s14 + $0x1268] sm:$0xff]  ;;  %v2425_v23 = vpack.c.bf16 %v8604_v17, %v11149_v39  ;;  %8600 = vst [vmem:[%s10210_s18 + $0x2120] sm:$0xff] %v2409_v15 }
  0xbf   : > { %v11164_v47 = vld [vmem:[%s10187_s14 + $0x3a60] sm:$0xff]  ;;  %v2433_v24 = vpack.c.bf16 %v8607_v18, %v11152_v40  ;;  %v8610_v25 = vld [vmem:[%s10187_s14 + $0x3a68] sm:$0xff]  ;;  %8603 = vst [vmem:[%s10210_s18 + $0x130] sm:$0xff] %v2417_v22 }
  0xc0   : > { %v11167_v48 = vld [vmem:[%s10187_s14 + $0x2260] sm:$0xff]  ;;  %v8613_v26 = vld [vmem:[%s10187_s14 + $0x2268] sm:$0xff]  ;;  %v2441_v31 = vpack.c.bf16 %v8610_v25, %v11164_v47  ;;  %8606 = vst [vmem:[%s10210_s18 + $0xd30] sm:$0xff] %v2425_v23 }
  0xc1   : > { %v11170_v49 = vld [vmem:[%s10187_s14 + $0xa60] sm:$0xff]  ;;  %v8616_v27 = vld [vmem:[%s10187_s14 + $0xa68] sm:$0xff]  ;;  %v2449_v32 = vpack.c.bf16 %v8613_v26, %v11167_v48  ;;  %8609 = vst [vmem:[%s10210_s18 + $0x1930] sm:$0xff] %v2433_v24 }
  0xc2   : > { %v11182_v56 = vld [vmem:[%s10187_s14 + $0x3260] sm:$0xff]  ;;  %v2457_v33 = vpack.c.bf16 %v8616_v27, %v11170_v49  ;;  %v8619_v34 = vld [vmem:[%s10187_s14 + $0x3268] sm:$0xff]  ;;  %8612 = vst [vmem:[%s10210_s18 + $0x530] sm:$0xff] %v2441_v31 }
  0xc3   : > { %v11185_v57 = vld [vmem:[%s10187_s14 + $0x1a60] sm:$0xff]  ;;  %v8622_v35 = vld [vmem:[%s10187_s14 + $0x1a68] sm:$0xff]  ;;  %v2465_v40 = vpack.c.bf16 %v8619_v34, %v11182_v56  ;;  %8615 = vst [vmem:[%s10210_s18 + $0x1130] sm:$0xff] %v2449_v32 }
  0xc4   : > { %v11188_v58 = vld [vmem:[%s10187_s14 + $0x260] sm:$0xff]  ;;  %v8625_v36 = vld [vmem:[%s10187_s14 + $0x268] sm:$0xff]  ;;  %v2473_v41 = vpack.c.bf16 %v8622_v35, %v11185_v57  ;;  %8618 = vst [vmem:[%s10210_s18 + $0x1d30] sm:$0xff] %v2457_v33 }
  0xc5   : > { %v11200_v1 = vld [vmem:[%s10187_s14 + $0x4280] sm:$0xff]  ;;  %v2481_v42 = vpack.c.bf16 %v8625_v36, %v11188_v58  ;;  %v8628_v43 = vld [vmem:[%s10187_s14 + $0x4288] sm:$0xff]  ;;  %8621 = vst [vmem:[%s10210_s18 + $0x930] sm:$0xff] %v2465_v40 }
  0xc6   : > { %v11203_v2 = vld [vmem:[%s10187_s14 + $0x2a80] sm:$0xff]  ;;  %v8631_v44 = vld [vmem:[%s10187_s14 + $0x2a88] sm:$0xff]  ;;  %v2489_v49 = vpack.c.bf16 %v8628_v43, %v11200_v1  ;;  %8624 = vst [vmem:[%s10210_s18 + $0x1530] sm:$0xff] %v2473_v41 }
  0xc7   : > { %v11206_v3 = vld [vmem:[%s10187_s14 + $0x1280] sm:$0xff]  ;;  %v8634_v45 = vld [vmem:[%s10187_s14 + $0x1288] sm:$0xff]  ;;  %v2497_v50 = vpack.c.bf16 %v8631_v44, %v11203_v2  ;;  %8627 = vst [vmem:[%s10210_s18 + $0x2130] sm:$0xff] %v2481_v42 }
  0xc8   : > { %v11218_v10 = vld [vmem:[%s10187_s14 + $0x3a80] sm:$0xff]  ;;  %v2505_v51 = vpack.c.bf16 %v8634_v45, %v11206_v3  ;;  %v8637_v52 = vld [vmem:[%s10187_s14 + $0x3a88] sm:$0xff]  ;;  %8630 = vst [vmem:[%s10210_s18 + $0x140] sm:$0xff] %v2489_v49 }
  0xc9   : > { %v11221_v11 = vld [vmem:[%s10187_s14 + $0x2280] sm:$0xff]  ;;  %v8640_v53 = vld [vmem:[%s10187_s14 + $0x2288] sm:$0xff]  ;;  %v2513_v58 = vpack.c.bf16 %v8637_v52, %v11218_v10  ;;  %8633 = vst [vmem:[%s10210_s18 + $0xd40] sm:$0xff] %v2497_v50 }
  0xca   : > { %v11224_v12 = vld [vmem:[%s10187_s14 + $0xa80] sm:$0xff]  ;;  %v8643_v54 = vld [vmem:[%s10187_s14 + $0xa88] sm:$0xff]  ;;  %v2521_v59 = vpack.c.bf16 %v8640_v53, %v11221_v11  ;;  %8636 = vst [vmem:[%s10210_s18 + $0x1940] sm:$0xff] %v2505_v51 }
  0xcb   : > { %v11236_v19 = vld [vmem:[%s10187_s14 + $0x3280] sm:$0xff]  ;;  %v2529_v60 = vpack.c.bf16 %v8643_v54, %v11224_v12  ;;  %v8646_v61 = vld [vmem:[%s10187_s14 + $0x3288] sm:$0xff]  ;;  %8639 = vst [vmem:[%s10210_s18 + $0x540] sm:$0xff] %v2513_v58 }
  0xcc   : > { %v11239_v20 = vld [vmem:[%s10187_s14 + $0x1a80] sm:$0xff]  ;;  %v8649_v62 = vld [vmem:[%s10187_s14 + $0x1a88] sm:$0xff]  ;;  %v2537_v3 = vpack.c.bf16 %v8646_v61, %v11236_v19  ;;  %8642 = vst [vmem:[%s10210_s18 + $0x1140] sm:$0xff] %v2521_v59 }
  0xcd   : > { %v11242_v21 = vld [vmem:[%s10187_s14 + $0x280] sm:$0xff]  ;;  %v8652_v63 = vld [vmem:[%s10187_s14 + $0x288] sm:$0xff]  ;;  %v2545_v4 = vpack.c.bf16 %v8649_v62, %v11239_v20  ;;  %8645 = vst [vmem:[%s10210_s18 + $0x1d40] sm:$0xff] %v2529_v60 }
  0xce   : > { %v11254_v28 = vld [vmem:[%s10187_s14 + $0x42a0] sm:$0xff]  ;;  %v2553_v5 = vpack.c.bf16 %v8652_v63, %v11242_v21  ;;  %v8655_v6 = vld [vmem:[%s10187_s14 + $0x42a8] sm:$0xff]  ;;  %8648 = vst [vmem:[%s10210_s18 + $0x940] sm:$0xff] %v2537_v3 }
  0xcf   : > { %v11257_v29 = vld [vmem:[%s10187_s14 + $0x2aa0] sm:$0xff]  ;;  %v8658_v7 = vld [vmem:[%s10187_s14 + $0x2aa8] sm:$0xff]  ;;  %v2561_v12 = vpack.c.bf16 %v8655_v6, %v11254_v28  ;;  %8651 = vst [vmem:[%s10210_s18 + $0x1540] sm:$0xff] %v2545_v4 }
  0xd0   : > { %v11260_v30 = vld [vmem:[%s10187_s14 + $0x12a0] sm:$0xff]  ;;  %v8661_v8 = vld [vmem:[%s10187_s14 + $0x12a8] sm:$0xff]  ;;  %v2569_v13 = vpack.c.bf16 %v8658_v7, %v11257_v29  ;;  %8654 = vst [vmem:[%s10210_s18 + $0x2140] sm:$0xff] %v2553_v5 }
  0xd1   : > { %v11272_v37 = vld [vmem:[%s10187_s14 + $0x3aa0] sm:$0xff]  ;;  %v2577_v14 = vpack.c.bf16 %v8661_v8, %v11260_v30  ;;  %v8664_v15 = vld [vmem:[%s10187_s14 + $0x3aa8] sm:$0xff]  ;;  %8657 = vst [vmem:[%s10210_s18 + $0x150] sm:$0xff] %v2561_v12 }
  0xd2   : > { %v11275_v38 = vld [vmem:[%s10187_s14 + $0x22a0] sm:$0xff]  ;;  %v8667_v16 = vld [vmem:[%s10187_s14 + $0x22a8] sm:$0xff]  ;;  %v2585_v21 = vpack.c.bf16 %v8664_v15, %v11272_v37  ;;  %8660 = vst [vmem:[%s10210_s18 + $0xd50] sm:$0xff] %v2569_v13 }
  0xd3   : > { %v11278_v39 = vld [vmem:[%s10187_s14 + $0xaa0] sm:$0xff]  ;;  %v8670_v17 = vld [vmem:[%s10187_s14 + $0xaa8] sm:$0xff]  ;;  %v2593_v22 = vpack.c.bf16 %v8667_v16, %v11275_v38  ;;  %8663 = vst [vmem:[%s10210_s18 + $0x1950] sm:$0xff] %v2577_v14 }
  0xd4   : > { %v11290_v46 = vld [vmem:[%s10187_s14 + $0x32a0] sm:$0xff]  ;;  %v2601_v23 = vpack.c.bf16 %v8670_v17, %v11278_v39  ;;  %v8673_v24 = vld [vmem:[%s10187_s14 + $0x32a8] sm:$0xff]  ;;  %8666 = vst [vmem:[%s10210_s18 + $0x550] sm:$0xff] %v2585_v21 }
  0xd5   : > { %v11293_v47 = vld [vmem:[%s10187_s14 + $0x1aa0] sm:$0xff]  ;;  %v8676_v25 = vld [vmem:[%s10187_s14 + $0x1aa8] sm:$0xff]  ;;  %v2609_v30 = vpack.c.bf16 %v8673_v24, %v11290_v46  ;;  %8669 = vst [vmem:[%s10210_s18 + $0x1150] sm:$0xff] %v2593_v22 }
  0xd6   : > { %v11296_v48 = vld [vmem:[%s10187_s14 + $0x2a0] sm:$0xff]  ;;  %v8679_v26 = vld [vmem:[%s10187_s14 + $0x2a8] sm:$0xff]  ;;  %v2617_v31 = vpack.c.bf16 %v8676_v25, %v11293_v47  ;;  %8672 = vst [vmem:[%s10210_s18 + $0x1d50] sm:$0xff] %v2601_v23 }
  0xd7   : > { %v11308_v55 = vld [vmem:[%s10187_s14 + $0x42c0] sm:$0xff]  ;;  %v2625_v32 = vpack.c.bf16 %v8679_v26, %v11296_v48  ;;  %v8682_v33 = vld [vmem:[%s10187_s14 + $0x42c8] sm:$0xff]  ;;  %8675 = vst [vmem:[%s10210_s18 + $0x950] sm:$0xff] %v2609_v30 }
  0xd8   : > { %v11311_v56 = vld [vmem:[%s10187_s14 + $0x2ac0] sm:$0xff]  ;;  %v8685_v34 = vld [vmem:[%s10187_s14 + $0x2ac8] sm:$0xff]  ;;  %v2633_v39 = vpack.c.bf16 %v8682_v33, %v11308_v55  ;;  %8678 = vst [vmem:[%s10210_s18 + $0x1550] sm:$0xff] %v2617_v31 }
  0xd9   : > { %v11314_v57 = vld [vmem:[%s10187_s14 + $0x12c0] sm:$0xff]  ;;  %v8688_v35 = vld [vmem:[%s10187_s14 + $0x12c8] sm:$0xff]  ;;  %v2641_v40 = vpack.c.bf16 %v8685_v34, %v11311_v56  ;;  %8681 = vst [vmem:[%s10210_s18 + $0x2150] sm:$0xff] %v2625_v32 }
  0xda   : > { %v11326_v0 = vld [vmem:[%s10187_s14 + $0x3ac0] sm:$0xff]  ;;  %v2649_v41 = vpack.c.bf16 %v8688_v35, %v11314_v57  ;;  %v8691_v42 = vld [vmem:[%s10187_s14 + $0x3ac8] sm:$0xff]  ;;  %8684 = vst [vmem:[%s10210_s18 + $0x160] sm:$0xff] %v2633_v39 }
  0xdb   : > { %v11329_v1 = vld [vmem:[%s10187_s14 + $0x22c0] sm:$0xff]  ;;  %v8694_v43 = vld [vmem:[%s10187_s14 + $0x22c8] sm:$0xff]  ;;  %v2657_v48 = vpack.c.bf16 %v8691_v42, %v11326_v0  ;;  %8687 = vst [vmem:[%s10210_s18 + $0xd60] sm:$0xff] %v2641_v40 }
  0xdc   : > { %v11332_v2 = vld [vmem:[%s10187_s14 + $0xac0] sm:$0xff]  ;;  %v8697_v44 = vld [vmem:[%s10187_s14 + $0xac8] sm:$0xff]  ;;  %v2665_v49 = vpack.c.bf16 %v8694_v43, %v11329_v1  ;;  %8690 = vst [vmem:[%s10210_s18 + $0x1960] sm:$0xff] %v2649_v41 }
  0xdd   : > { %v11344_v9 = vld [vmem:[%s10187_s14 + $0x32c0] sm:$0xff]  ;;  %v2673_v50 = vpack.c.bf16 %v8697_v44, %v11332_v2  ;;  %v8700_v51 = vld [vmem:[%s10187_s14 + $0x32c8] sm:$0xff]  ;;  %8693 = vst [vmem:[%s10210_s18 + $0x560] sm:$0xff] %v2657_v48 }
  0xde   : > { %v11347_v10 = vld [vmem:[%s10187_s14 + $0x1ac0] sm:$0xff]  ;;  %v8703_v52 = vld [vmem:[%s10187_s14 + $0x1ac8] sm:$0xff]  ;;  %v2681_v57 = vpack.c.bf16 %v8700_v51, %v11344_v9  ;;  %8696 = vst [vmem:[%s10210_s18 + $0x1160] sm:$0xff] %v2665_v49 }
  0xdf   : > { %v11350_v11 = vld [vmem:[%s10187_s14 + $0x2c0] sm:$0xff]  ;;  %v8706_v53 = vld [vmem:[%s10187_s14 + $0x2c8] sm:$0xff]  ;;  %v2689_v58 = vpack.c.bf16 %v8703_v52, %v11347_v10  ;;  %8699 = vst [vmem:[%s10210_s18 + $0x1d60] sm:$0xff] %v2673_v50 }
  0xe0   : > { %v11362_v18 = vld [vmem:[%s10187_s14 + $0x42e0] sm:$0xff]  ;;  %v2697_v59 = vpack.c.bf16 %v8706_v53, %v11350_v11  ;;  %v8709_v60 = vld [vmem:[%s10187_s14 + $0x42e8] sm:$0xff]  ;;  %8702 = vst [vmem:[%s10210_s18 + $0x960] sm:$0xff] %v2681_v57 }
  0xe1   : > { %v11365_v19 = vld [vmem:[%s10187_s14 + $0x2ae0] sm:$0xff]  ;;  %v8712_v61 = vld [vmem:[%s10187_s14 + $0x2ae8] sm:$0xff]  ;;  %v2705_v2 = vpack.c.bf16 %v8709_v60, %v11362_v18  ;;  %8705 = vst [vmem:[%s10210_s18 + $0x1560] sm:$0xff] %v2689_v58 }
  0xe2   : > { %v11368_v20 = vld [vmem:[%s10187_s14 + $0x12e0] sm:$0xff]  ;;  %v8715_v62 = vld [vmem:[%s10187_s14 + $0x12e8] sm:$0xff]  ;;  %v2713_v3 = vpack.c.bf16 %v8712_v61, %v11365_v19  ;;  %8708 = vst [vmem:[%s10210_s18 + $0x2160] sm:$0xff] %v2697_v59 }
  0xe3   : > { %v11380_v27 = vld [vmem:[%s10187_s14 + $0x3ae0] sm:$0xff]  ;;  %v2721_v4 = vpack.c.bf16 %v8715_v62, %v11368_v20  ;;  %v8718_v5 = vld [vmem:[%s10187_s14 + $0x3ae8] sm:$0xff]  ;;  %8711 = vst [vmem:[%s10210_s18 + $0x170] sm:$0xff] %v2705_v2 }
  0xe4   : > { %v11383_v28 = vld [vmem:[%s10187_s14 + $0x22e0] sm:$0xff]  ;;  %v8721_v6 = vld [vmem:[%s10187_s14 + $0x22e8] sm:$0xff]  ;;  %v2729_v11 = vpack.c.bf16 %v8718_v5, %v11380_v27  ;;  %8714 = vst [vmem:[%s10210_s18 + $0xd70] sm:$0xff] %v2713_v3 }
  0xe5   : > { %v11386_v29 = vld [vmem:[%s10187_s14 + $0xae0] sm:$0xff]  ;;  %v8724_v7 = vld [vmem:[%s10187_s14 + $0xae8] sm:$0xff]  ;;  %v2737_v12 = vpack.c.bf16 %v8721_v6, %v11383_v28  ;;  %8717 = vst [vmem:[%s10210_s18 + $0x1970] sm:$0xff] %v2721_v4 }
  0xe6   : > { %v11398_v36 = vld [vmem:[%s10187_s14 + $0x32e0] sm:$0xff]  ;;  %v2745_v13 = vpack.c.bf16 %v8724_v7, %v11386_v29  ;;  %v8727_v14 = vld [vmem:[%s10187_s14 + $0x32e8] sm:$0xff]  ;;  %8720 = vst [vmem:[%s10210_s18 + $0x570] sm:$0xff] %v2729_v11 }
  0xe7   : > { %v11401_v37 = vld [vmem:[%s10187_s14 + $0x1ae0] sm:$0xff]  ;;  %v8730_v15 = vld [vmem:[%s10187_s14 + $0x1ae8] sm:$0xff]  ;;  %v2753_v20 = vpack.c.bf16 %v8727_v14, %v11398_v36  ;;  %8723 = vst [vmem:[%s10210_s18 + $0x1170] sm:$0xff] %v2737_v12 }
  0xe8   : > { %v11404_v38 = vld [vmem:[%s10187_s14 + $0x2e0] sm:$0xff]  ;;  %v8733_v16 = vld [vmem:[%s10187_s14 + $0x2e8] sm:$0xff]  ;;  %v2761_v21 = vpack.c.bf16 %v8730_v15, %v11401_v37  ;;  %8726 = vst [vmem:[%s10210_s18 + $0x1d70] sm:$0xff] %v2745_v13 }
  0xe9   : > { %v11416_v45 = vld [vmem:[%s10187_s14 + $0x4300] sm:$0xff]  ;;  %v2769_v22 = vpack.c.bf16 %v8733_v16, %v11404_v38  ;;  %v8736_v23 = vld [vmem:[%s10187_s14 + $0x4308] sm:$0xff]  ;;  %8729 = vst [vmem:[%s10210_s18 + $0x970] sm:$0xff] %v2753_v20 }
  0xea   : > { %v11419_v46 = vld [vmem:[%s10187_s14 + $0x2b00] sm:$0xff]  ;;  %v8739_v24 = vld [vmem:[%s10187_s14 + $0x2b08] sm:$0xff]  ;;  %v2777_v29 = vpack.c.bf16 %v8736_v23, %v11416_v45  ;;  %8732 = vst [vmem:[%s10210_s18 + $0x1570] sm:$0xff] %v2761_v21 }
  0xeb   : > { %v11422_v47 = vld [vmem:[%s10187_s14 + $0x1300] sm:$0xff]  ;;  %v8742_v25 = vld [vmem:[%s10187_s14 + $0x1308] sm:$0xff]  ;;  %v2785_v30 = vpack.c.bf16 %v8739_v24, %v11419_v46  ;;  %8735 = vst [vmem:[%s10210_s18 + $0x2170] sm:$0xff] %v2769_v22 }
  0xec   : > { %v11434_v54 = vld [vmem:[%s10187_s14 + $0x3b00] sm:$0xff]  ;;  %v2793_v31 = vpack.c.bf16 %v8742_v25, %v11422_v47  ;;  %v8745_v32 = vld [vmem:[%s10187_s14 + $0x3b08] sm:$0xff]  ;;  %8738 = vst [vmem:[%s10210_s18 + $0x180] sm:$0xff] %v2777_v29 }
  0xed   : > { %v11437_v55 = vld [vmem:[%s10187_s14 + $0x2300] sm:$0xff]  ;;  %v8748_v33 = vld [vmem:[%s10187_s14 + $0x2308] sm:$0xff]  ;;  %v2801_v38 = vpack.c.bf16 %v8745_v32, %v11434_v54  ;;  %8741 = vst [vmem:[%s10210_s18 + $0xd80] sm:$0xff] %v2785_v30 }
  0xee   : > { %v11440_v56 = vld [vmem:[%s10187_s14 + $0xb00] sm:$0xff]  ;;  %v8751_v34 = vld [vmem:[%s10187_s14 + $0xb08] sm:$0xff]  ;;  %v2809_v39 = vpack.c.bf16 %v8748_v33, %v11437_v55  ;;  %8744 = vst [vmem:[%s10210_s18 + $0x1980] sm:$0xff] %v2793_v31 }
  0xef   : > { %v11452_v63 = vld [vmem:[%s10187_s14 + $0x3300] sm:$0xff]  ;;  %v2817_v40 = vpack.c.bf16 %v8751_v34, %v11440_v56  ;;  %v8754_v41 = vld [vmem:[%s10187_s14 + $0x3308] sm:$0xff]  ;;  %8747 = vst [vmem:[%s10210_s18 + $0x580] sm:$0xff] %v2801_v38 }
  0xf0   : > { %v11455_v0 = vld [vmem:[%s10187_s14 + $0x1b00] sm:$0xff]  ;;  %v8757_v42 = vld [vmem:[%s10187_s14 + $0x1b08] sm:$0xff]  ;;  %v2825_v47 = vpack.c.bf16 %v8754_v41, %v11452_v63  ;;  %8750 = vst [vmem:[%s10210_s18 + $0x1180] sm:$0xff] %v2809_v39 }
  0xf1   : > { %v11458_v1 = vld [vmem:[%s10187_s14 + $0x300] sm:$0xff]  ;;  %v8760_v43 = vld [vmem:[%s10187_s14 + $0x308] sm:$0xff]  ;;  %v2833_v48 = vpack.c.bf16 %v8757_v42, %v11455_v0  ;;  %8753 = vst [vmem:[%s10210_s18 + $0x1d80] sm:$0xff] %v2817_v40 }
  0xf2   : > { %v11470_v8 = vld [vmem:[%s10187_s14 + $0x4320] sm:$0xff]  ;;  %v2841_v49 = vpack.c.bf16 %v8760_v43, %v11458_v1  ;;  %v8763_v50 = vld [vmem:[%s10187_s14 + $0x4328] sm:$0xff]  ;;  %8756 = vst [vmem:[%s10210_s18 + $0x980] sm:$0xff] %v2825_v47 }
  0xf3   : > { %v11473_v9 = vld [vmem:[%s10187_s14 + $0x2b20] sm:$0xff]  ;;  %v8766_v51 = vld [vmem:[%s10187_s14 + $0x2b28] sm:$0xff]  ;;  %v2849_v56 = vpack.c.bf16 %v8763_v50, %v11470_v8  ;;  %8759 = vst [vmem:[%s10210_s18 + $0x1580] sm:$0xff] %v2833_v48 }
  0xf4   : > { %v11476_v10 = vld [vmem:[%s10187_s14 + $0x1320] sm:$0xff]  ;;  %v8769_v52 = vld [vmem:[%s10187_s14 + $0x1328] sm:$0xff]  ;;  %v2857_v57 = vpack.c.bf16 %v8766_v51, %v11473_v9  ;;  %8762 = vst [vmem:[%s10210_s18 + $0x2180] sm:$0xff] %v2841_v49 }
  0xf5   : > { %v11488_v17 = vld [vmem:[%s10187_s14 + $0x3b20] sm:$0xff]  ;;  %v2865_v58 = vpack.c.bf16 %v8769_v52, %v11476_v10  ;;  %v8772_v59 = vld [vmem:[%s10187_s14 + $0x3b28] sm:$0xff]  ;;  %8765 = vst [vmem:[%s10210_s18 + $0x190] sm:$0xff] %v2849_v56 }
  0xf6   : > { %v11491_v18 = vld [vmem:[%s10187_s14 + $0x2320] sm:$0xff]  ;;  %v8775_v60 = vld [vmem:[%s10187_s14 + $0x2328] sm:$0xff]  ;;  %v2873_v1 = vpack.c.bf16 %v8772_v59, %v11488_v17  ;;  %8768 = vst [vmem:[%s10210_s18 + $0xd90] sm:$0xff] %v2857_v57 }
  0xf7   : > { %v11494_v19 = vld [vmem:[%s10187_s14 + $0xb20] sm:$0xff]  ;;  %v8778_v61 = vld [vmem:[%s10187_s14 + $0xb28] sm:$0xff]  ;;  %v2881_v2 = vpack.c.bf16 %v8775_v60, %v11491_v18  ;;  %8771 = vst [vmem:[%s10210_s18 + $0x1990] sm:$0xff] %v2865_v58 }
  0xf8   : > { %v11506_v26 = vld [vmem:[%s10187_s14 + $0x3320] sm:$0xff]  ;;  %v2889_v3 = vpack.c.bf16 %v8778_v61, %v11494_v19  ;;  %v8781_v4 = vld [vmem:[%s10187_s14 + $0x3328] sm:$0xff]  ;;  %8774 = vst [vmem:[%s10210_s18 + $0x590] sm:$0xff] %v2873_v1 }
  0xf9   : > { %v11509_v27 = vld [vmem:[%s10187_s14 + $0x1b20] sm:$0xff]  ;;  %v8784_v5 = vld [vmem:[%s10187_s14 + $0x1b28] sm:$0xff]  ;;  %v2897_v10 = vpack.c.bf16 %v8781_v4, %v11506_v26  ;;  %8777 = vst [vmem:[%s10210_s18 + $0x1190] sm:$0xff] %v2881_v2 }
  0xfa   : > { %v11512_v28 = vld [vmem:[%s10187_s14 + $0x320] sm:$0xff]  ;;  %v8787_v6 = vld [vmem:[%s10187_s14 + $0x328] sm:$0xff]  ;;  %v2905_v11 = vpack.c.bf16 %v8784_v5, %v11509_v27  ;;  %8780 = vst [vmem:[%s10210_s18 + $0x1d90] sm:$0xff] %v2889_v3 }
  0xfb   : > { %v11524_v35 = vld [vmem:[%s10187_s14 + $0x4340] sm:$0xff]  ;;  %v2913_v12 = vpack.c.bf16 %v8787_v6, %v11512_v28  ;;  %v8790_v13 = vld [vmem:[%s10187_s14 + $0x4348] sm:$0xff]  ;;  %8783 = vst [vmem:[%s10210_s18 + $0x990] sm:$0xff] %v2897_v10 }
  0xfc   : > { %v11527_v36 = vld [vmem:[%s10187_s14 + $0x2b40] sm:$0xff]  ;;  %v8793_v14 = vld [vmem:[%s10187_s14 + $0x2b48] sm:$0xff]  ;;  %v2921_v19 = vpack.c.bf16 %v8790_v13, %v11524_v35  ;;  %8786 = vst [vmem:[%s10210_s18 + $0x1590] sm:$0xff] %v2905_v11 }
  0xfd   : > { %v11530_v37 = vld [vmem:[%s10187_s14 + $0x1340] sm:$0xff]  ;;  %v8796_v15 = vld [vmem:[%s10187_s14 + $0x1348] sm:$0xff]  ;;  %v2929_v20 = vpack.c.bf16 %v8793_v14, %v11527_v36  ;;  %8789 = vst [vmem:[%s10210_s18 + $0x2190] sm:$0xff] %v2913_v12 }
  0xfe   : > { %v11542_v44 = vld [vmem:[%s10187_s14 + $0x3b40] sm:$0xff]  ;;  %v2937_v21 = vpack.c.bf16 %v8796_v15, %v11530_v37  ;;  %v8799_v22 = vld [vmem:[%s10187_s14 + $0x3b48] sm:$0xff]  ;;  %8792 = vst [vmem:[%s10210_s18 + $0x1a0] sm:$0xff] %v2921_v19 }
  0xff   : > { %v11545_v45 = vld [vmem:[%s10187_s14 + $0x2340] sm:$0xff]  ;;  %v8802_v23 = vld [vmem:[%s10187_s14 + $0x2348] sm:$0xff]  ;;  %v2945_v28 = vpack.c.bf16 %v8799_v22, %v11542_v44  ;;  %8795 = vst [vmem:[%s10210_s18 + $0xda0] sm:$0xff] %v2929_v20 }
 0x100   : > { %v11548_v46 = vld [vmem:[%s10187_s14 + $0xb40] sm:$0xff]  ;;  %v8805_v24 = vld [vmem:[%s10187_s14 + $0xb48] sm:$0xff]  ;;  %v2953_v29 = vpack.c.bf16 %v8802_v23, %v11545_v45  ;;  %8798 = vst [vmem:[%s10210_s18 + $0x19a0] sm:$0xff] %v2937_v21 }
 0x101   : > { %v11560_v53 = vld [vmem:[%s10187_s14 + $0x3340] sm:$0xff]  ;;  %v2961_v30 = vpack.c.bf16 %v8805_v24, %v11548_v46  ;;  %v8808_v31 = vld [vmem:[%s10187_s14 + $0x3348] sm:$0xff]  ;;  %8801 = vst [vmem:[%s10210_s18 + $0x5a0] sm:$0xff] %v2945_v28 }
 0x102   : > { %v11563_v54 = vld [vmem:[%s10187_s14 + $0x1b40] sm:$0xff]  ;;  %v8811_v32 = vld [vmem:[%s10187_s14 + $0x1b48] sm:$0xff]  ;;  %v2969_v37 = vpack.c.bf16 %v8808_v31, %v11560_v53  ;;  %8804 = vst [vmem:[%s10210_s18 + $0x11a0] sm:$0xff] %v2953_v29 }
 0x103   : > { %v11566_v55 = vld [vmem:[%s10187_s14 + $0x340] sm:$0xff]  ;;  %v8814_v33 = vld [vmem:[%s10187_s14 + $0x348] sm:$0xff]  ;;  %v2977_v38 = vpack.c.bf16 %v8811_v32, %v11563_v54  ;;  %8807 = vst [vmem:[%s10210_s18 + $0x1da0] sm:$0xff] %v2961_v30 }
 0x104   : > { %v11578_v62 = vld [vmem:[%s10187_s14 + $0x4360] sm:$0xff]  ;;  %v2985_v39 = vpack.c.bf16 %v8814_v33, %v11566_v55  ;;  %v8817_v40 = vld [vmem:[%s10187_s14 + $0x4368] sm:$0xff]  ;;  %8810 = vst [vmem:[%s10210_s18 + $0x9a0] sm:$0xff] %v2969_v37 }
 0x105   : > { %v11581_v63 = vld [vmem:[%s10187_s14 + $0x2b60] sm:$0xff]  ;;  %v8820_v41 = vld [vmem:[%s10187_s14 + $0x2b68] sm:$0xff]  ;;  %v2993_v46 = vpack.c.bf16 %v8817_v40, %v11578_v62  ;;  %8813 = vst [vmem:[%s10210_s18 + $0x15a0] sm:$0xff] %v2977_v38 }
 0x106   : > { %v11584_v0 = vld [vmem:[%s10187_s14 + $0x1360] sm:$0xff]  ;;  %v8823_v42 = vld [vmem:[%s10187_s14 + $0x1368] sm:$0xff]  ;;  %v3001_v47 = vpack.c.bf16 %v8820_v41, %v11581_v63  ;;  %8816 = vst [vmem:[%s10210_s18 + $0x21a0] sm:$0xff] %v2985_v39 }
 0x107   : > { %v11596_v7 = vld [vmem:[%s10187_s14 + $0x3b60] sm:$0xff]  ;;  %v3009_v48 = vpack.c.bf16 %v8823_v42, %v11584_v0  ;;  %v8826_v49 = vld [vmem:[%s10187_s14 + $0x3b68] sm:$0xff]  ;;  %8819 = vst [vmem:[%s10210_s18 + $0x1b0] sm:$0xff] %v2993_v46 }
 0x108   : > { %v11599_v8 = vld [vmem:[%s10187_s14 + $0x2360] sm:$0xff]  ;;  %v8829_v50 = vld [vmem:[%s10187_s14 + $0x2368] sm:$0xff]  ;;  %v3017_v55 = vpack.c.bf16 %v8826_v49, %v11596_v7  ;;  %8822 = vst [vmem:[%s10210_s18 + $0xdb0] sm:$0xff] %v3001_v47 }
 0x109   : > { %v11602_v9 = vld [vmem:[%s10187_s14 + $0xb60] sm:$0xff]  ;;  %v8832_v51 = vld [vmem:[%s10187_s14 + $0xb68] sm:$0xff]  ;;  %v3025_v56 = vpack.c.bf16 %v8829_v50, %v11599_v8  ;;  %8825 = vst [vmem:[%s10210_s18 + $0x19b0] sm:$0xff] %v3009_v48 }
 0x10a   : > { %v11614_v16 = vld [vmem:[%s10187_s14 + $0x3360] sm:$0xff]  ;;  %v3033_v57 = vpack.c.bf16 %v8832_v51, %v11602_v9  ;;  %v8835_v58 = vld [vmem:[%s10187_s14 + $0x3368] sm:$0xff]  ;;  %8828 = vst [vmem:[%s10210_s18 + $0x5b0] sm:$0xff] %v3017_v55 }
 0x10b   : > { %v11617_v17 = vld [vmem:[%s10187_s14 + $0x1b60] sm:$0xff]  ;;  %v8838_v59 = vld [vmem:[%s10187_s14 + $0x1b68] sm:$0xff]  ;;  %v3041_v0 = vpack.c.bf16 %v8835_v58, %v11614_v16  ;;  %8831 = vst [vmem:[%s10210_s18 + $0x11b0] sm:$0xff] %v3025_v56 }
 0x10c   : > { %v11620_v18 = vld [vmem:[%s10187_s14 + $0x360] sm:$0xff]  ;;  %v8841_v60 = vld [vmem:[%s10187_s14 + $0x368] sm:$0xff]  ;;  %v3049_v1 = vpack.c.bf16 %v8838_v59, %v11617_v17  ;;  %8834 = vst [vmem:[%s10210_s18 + $0x1db0] sm:$0xff] %v3033_v57 }
 0x10d   : > { %v11632_v25 = vld [vmem:[%s10187_s14 + $0x4380] sm:$0xff]  ;;  %v3057_v2 = vpack.c.bf16 %v8841_v60, %v11620_v18  ;;  %v8844_v3 = vld [vmem:[%s10187_s14 + $0x4388] sm:$0xff]  ;;  %8837 = vst [vmem:[%s10210_s18 + $0x9b0] sm:$0xff] %v3041_v0 }
 0x10e   : > { %v11635_v26 = vld [vmem:[%s10187_s14 + $0x2b80] sm:$0xff]  ;;  %v8847_v4 = vld [vmem:[%s10187_s14 + $0x2b88] sm:$0xff]  ;;  %v3065_v9 = vpack.c.bf16 %v8844_v3, %v11632_v25  ;;  %8840 = vst [vmem:[%s10210_s18 + $0x15b0] sm:$0xff] %v3049_v1 }
 0x10f   : > { %v11638_v27 = vld [vmem:[%s10187_s14 + $0x1380] sm:$0xff]  ;;  %v8850_v5 = vld [vmem:[%s10187_s14 + $0x1388] sm:$0xff]  ;;  %v3073_v10 = vpack.c.bf16 %v8847_v4, %v11635_v26  ;;  %8843 = vst [vmem:[%s10210_s18 + $0x21b0] sm:$0xff] %v3057_v2 }
 0x110   : > { %v11650_v34 = vld [vmem:[%s10187_s14 + $0x3b80] sm:$0xff]  ;;  %v3081_v11 = vpack.c.bf16 %v8850_v5, %v11638_v27  ;;  %v8853_v12 = vld [vmem:[%s10187_s14 + $0x3b88] sm:$0xff]  ;;  %8846 = vst [vmem:[%s10210_s18 + $0x1c0] sm:$0xff] %v3065_v9 }
 0x111   : > { %v11653_v35 = vld [vmem:[%s10187_s14 + $0x2380] sm:$0xff]  ;;  %v8856_v13 = vld [vmem:[%s10187_s14 + $0x2388] sm:$0xff]  ;;  %v3089_v18 = vpack.c.bf16 %v8853_v12, %v11650_v34  ;;  %8849 = vst [vmem:[%s10210_s18 + $0xdc0] sm:$0xff] %v3073_v10 }
 0x112   : > { %v11656_v36 = vld [vmem:[%s10187_s14 + $0xb80] sm:$0xff]  ;;  %v8859_v14 = vld [vmem:[%s10187_s14 + $0xb88] sm:$0xff]  ;;  %v3097_v19 = vpack.c.bf16 %v8856_v13, %v11653_v35  ;;  %8852 = vst [vmem:[%s10210_s18 + $0x19c0] sm:$0xff] %v3081_v11 }
 0x113   : > { %v11668_v43 = vld [vmem:[%s10187_s14 + $0x3380] sm:$0xff]  ;;  %v3105_v20 = vpack.c.bf16 %v8859_v14, %v11656_v36  ;;  %v8862_v21 = vld [vmem:[%s10187_s14 + $0x3388] sm:$0xff]  ;;  %8855 = vst [vmem:[%s10210_s18 + $0x5c0] sm:$0xff] %v3089_v18 }
 0x114   : > { %v11671_v44 = vld [vmem:[%s10187_s14 + $0x1b80] sm:$0xff]  ;;  %v8865_v22 = vld [vmem:[%s10187_s14 + $0x1b88] sm:$0xff]  ;;  %v3113_v27 = vpack.c.bf16 %v8862_v21, %v11668_v43  ;;  %8858 = vst [vmem:[%s10210_s18 + $0x11c0] sm:$0xff] %v3097_v19 }
 0x115   : > { %v11674_v45 = vld [vmem:[%s10187_s14 + $0x380] sm:$0xff]  ;;  %v8868_v23 = vld [vmem:[%s10187_s14 + $0x388] sm:$0xff]  ;;  %v3121_v28 = vpack.c.bf16 %v8865_v22, %v11671_v44  ;;  %8861 = vst [vmem:[%s10210_s18 + $0x1dc0] sm:$0xff] %v3105_v20 }
 0x116   : > { %v11686_v52 = vld [vmem:[%s10187_s14 + $0x43a0] sm:$0xff]  ;;  %v3129_v29 = vpack.c.bf16 %v8868_v23, %v11674_v45  ;;  %v8871_v30 = vld [vmem:[%s10187_s14 + $0x43a8] sm:$0xff]  ;;  %8864 = vst [vmem:[%s10210_s18 + $0x9c0] sm:$0xff] %v3113_v27 }
 0x117   : > { %v11689_v53 = vld [vmem:[%s10187_s14 + $0x2ba0] sm:$0xff]  ;;  %v8874_v31 = vld [vmem:[%s10187_s14 + $0x2ba8] sm:$0xff]  ;;  %v3137_v36 = vpack.c.bf16 %v8871_v30, %v11686_v52  ;;  %8867 = vst [vmem:[%s10210_s18 + $0x15c0] sm:$0xff] %v3121_v28 }
 0x118   : > { %v11692_v54 = vld [vmem:[%s10187_s14 + $0x13a0] sm:$0xff]  ;;  %v8877_v32 = vld [vmem:[%s10187_s14 + $0x13a8] sm:$0xff]  ;;  %v3145_v37 = vpack.c.bf16 %v8874_v31, %v11689_v53  ;;  %8870 = vst [vmem:[%s10210_s18 + $0x21c0] sm:$0xff] %v3129_v29 }
 0x119   : > { %v11704_v61 = vld [vmem:[%s10187_s14 + $0x3ba0] sm:$0xff]  ;;  %v3153_v38 = vpack.c.bf16 %v8877_v32, %v11692_v54  ;;  %v8880_v39 = vld [vmem:[%s10187_s14 + $0x3ba8] sm:$0xff]  ;;  %8873 = vst [vmem:[%s10210_s18 + $0x1d0] sm:$0xff] %v3137_v36  ;;  %v8952_v32 = vld [vmem:[%s10187_s14 + $0x4010] sm:$0xff] }
 0x11a   : > { %v11707_v62 = vld [vmem:[%s10187_s14 + $0x23a0] sm:$0xff]  ;;  %v8883_v40 = vld [vmem:[%s10187_s14 + $0x23a8] sm:$0xff]  ;;  %v3161_v45 = vpack.c.bf16 %v8880_v39, %v11704_v61  ;;  %8876 = vst [vmem:[%s10210_s18 + $0xdd0] sm:$0xff] %v3145_v37  ;;  %v8956_v36 = vld [vmem:[%s10187_s14 + $0x2010] sm:$0xff] }
 0x11b   : > { %v11710_v63 = vld [vmem:[%s10187_s14 + $0xba0] sm:$0xff]  ;;  %v8886_v41 = vld [vmem:[%s10187_s14 + $0xba8] sm:$0xff]  ;;  %v3169_v46 = vpack.c.bf16 %v8883_v40, %v11707_v62  ;;  %8879 = vst [vmem:[%s10210_s18 + $0x19d0] sm:$0xff] %v3153_v38  ;;  %v8957_v37 = vld [vmem:[%s10187_s14 + $0x810] sm:$0xff] }
 0x11c   : > { %v11722_v6 = vld [vmem:[%s10187_s14 + $0x33a0] sm:$0xff]  ;;  %v3177_v47 = vpack.c.bf16 %v8886_v41, %v11710_v63  ;;  %v8889_v48 = vld [vmem:[%s10187_s14 + $0x33a8] sm:$0xff]  ;;  %8882 = vst [vmem:[%s10210_s18 + $0x5d0] sm:$0xff] %v3161_v45  ;;  %v8958_v38 = vld [vmem:[%s10187_s14 + $0x3010] sm:$0xff] }
 0x11d   : > { %v11725_v7 = vld [vmem:[%s10187_s14 + $0x1ba0] sm:$0xff]  ;;  %v8892_v49 = vld [vmem:[%s10187_s14 + $0x1ba8] sm:$0xff]  ;;  %v3185_v54 = vpack.c.bf16 %v8889_v48, %v11722_v6  ;;  %8885 = vst [vmem:[%s10210_s18 + $0x11d0] sm:$0xff] %v3169_v46  ;;  %v8959_v39 = vld [vmem:[%s10187_s14 + $0x1810] sm:$0xff] }
 0x11e   : > { %v11728_v8 = vld [vmem:[%s10187_s14 + $0x3a0] sm:$0xff]  ;;  %v8895_v50 = vld [vmem:[%s10187_s14 + $0x3a8] sm:$0xff]  ;;  %v3193_v55 = vpack.c.bf16 %v8892_v49, %v11725_v7  ;;  %8888 = vst [vmem:[%s10210_s18 + $0x1dd0] sm:$0xff] %v3177_v47  ;;  %v8960_v40 = vld [vmem:[%s10187_s14 + $0x10] sm:$0xff] }
 0x11f   : > { %v11740_v15 = vld [vmem:[%s10187_s14 + $0x43c0] sm:$0xff]  ;;  %v3201_v56 = vpack.c.bf16 %v8895_v50, %v11728_v8  ;;  %v8898_v57 = vld [vmem:[%s10187_s14 + $0x43c8] sm:$0xff]  ;;  %8891 = vst [vmem:[%s10210_s18 + $0x9d0] sm:$0xff] %v3185_v54  ;;  %v11896_v41 = vld [vmem:[%s10187_s14 + $0x4030] sm:$0xff] }
 0x120   : > { %v11743_v16 = vld [vmem:[%s10187_s14 + $0x2bc0] sm:$0xff]  ;;  %v8901_v58 = vld [vmem:[%s10187_s14 + $0x2bc8] sm:$0xff]  ;;  %v3209_v63 = vpack.c.bf16 %v8898_v57, %v11740_v15  ;;  %8894 = vst [vmem:[%s10210_s18 + $0x15d0] sm:$0xff] %v3193_v55  ;;  %v11908_v45 = vld [vmem:[%s10187_s14 + $0x2030] sm:$0xff] }
 0x121   : > { %v11746_v17 = vld [vmem:[%s10187_s14 + $0x13c0] sm:$0xff]  ;;  %v8904_v59 = vld [vmem:[%s10187_s14 + $0x13c8] sm:$0xff]  ;;  %v3217_v0 = vpack.c.bf16 %v8901_v58, %v11743_v16  ;;  %8897 = vst [vmem:[%s10210_s18 + $0x21d0] sm:$0xff] %v3201_v56  ;;  %v11911_v46 = vld [vmem:[%s10187_s14 + $0x830] sm:$0xff] }
 0x122   : > { %v11758_v24 = vld [vmem:[%s10187_s14 + $0x3bc0] sm:$0xff]  ;;  %v3225_v1 = vpack.c.bf16 %v8904_v59, %v11746_v17  ;;  %v8907_v2 = vld [vmem:[%s10187_s14 + $0x3bc8] sm:$0xff]  ;;  %8900 = vst [vmem:[%s10210_s18 + $0x1e0] sm:$0xff] %v3209_v63  ;;  %v9240_v47 = vld [vmem:[%s10187_s14 + $0x4018] sm:$0xff] }
 0x123   : > { %v11761_v25 = vld [vmem:[%s10187_s14 + $0x23c0] sm:$0xff]  ;;  %v8910_v3 = vld [vmem:[%s10187_s14 + $0x23c8] sm:$0xff]  ;;  %v3233_v5 = vpack.c.bf16 %v8907_v2, %v11758_v24  ;;  %8903 = vst [vmem:[%s10210_s18 + $0xde0] sm:$0xff] %v3217_v0  ;;  %v9243_v48 = vld [vmem:[%s10187_s14 + $0x2818] sm:$0xff] }
 0x124   : > { %v11764_v26 = vld [vmem:[%s10187_s14 + $0xbc0] sm:$0xff]  ;;  %v8913_v4 = vld [vmem:[%s10187_s14 + $0xbc8] sm:$0xff]  ;;  %v3241_v6 = vpack.c.bf16 %v8910_v3, %v11761_v25  ;;  %8906 = vst [vmem:[%s10210_s18 + $0x19e0] sm:$0xff] %v3225_v1  ;;  %v9246_v49 = vld [vmem:[%s10187_s14 + $0x1018] sm:$0xff] }
 0x125   : > { %v11776_v33 = vld [vmem:[%s10187_s14 + $0x33c0] sm:$0xff]  ;;  %v3249_v7 = vpack.c.bf16 %v8913_v4, %v11764_v26  ;;  %v8916_v8 = vld [vmem:[%s10187_s14 + $0x33c8] sm:$0xff]  ;;  %8909 = vst [vmem:[%s10210_s18 + $0x5e0] sm:$0xff] %v3233_v5  ;;  %v11917_v50 = vld [vmem:[%s10187_s14 + $0x3030] sm:$0xff] }
 0x126   : > { %v11779_v34 = vld [vmem:[%s10187_s14 + $0x1bc0] sm:$0xff]  ;;  %v8919_v9 = vld [vmem:[%s10187_s14 + $0x1bc8] sm:$0xff]  ;;  %v3257_v11 = vpack.c.bf16 %v8916_v8, %v11776_v33  ;;  %8912 = vst [vmem:[%s10210_s18 + $0x11e0] sm:$0xff] %v3241_v6  ;;  %v8953_v33 = vld [vmem:[%s10187_s14 + $0x2810] sm:$0xff] }
 0x127   : > { %v11782_v35 = vld [vmem:[%s10187_s14 + $0x3c0] sm:$0xff]  ;;  %v8922_v10 = vld [vmem:[%s10187_s14 + $0x3c8] sm:$0xff]  ;;  %v3265_v12 = vpack.c.bf16 %v8919_v9, %v11779_v34  ;;  %8915 = vst [vmem:[%s10210_s18 + $0x1de0] sm:$0xff] %v3249_v7  ;;  %v8954_v34 = vld [vmem:[%s10187_s14 + $0x1010] sm:$0xff]  ;;  %v4225_v54 = vpack.c.bf16 %v9243_v48, %v8953_v33 }
 0x128   : > { %v11794_v42 = vld [vmem:[%s10187_s14 + $0x43e0] sm:$0xff]  ;;  %v3273_v13 = vpack.c.bf16 %v8922_v10, %v11782_v35  ;;  %v8925_v14 = vld [vmem:[%s10187_s14 + $0x43e8] sm:$0xff]  ;;  %8918 = vst [vmem:[%s10210_s18 + $0x9e0] sm:$0xff] %v3257_v11  ;;  %v8955_v35 = vld [vmem:[%s10187_s14 + $0x3810] sm:$0xff]  ;;  %v4233_v55 = vpack.c.bf16 %v9246_v49, %v8954_v34 }
 0x129   : > { %v11797_v43 = vld [vmem:[%s10187_s14 + $0x2be0] sm:$0xff]  ;;  %v8928_v15 = vld [vmem:[%s10187_s14 + $0x2be8] sm:$0xff]  ;;  %v3281_v17 = vpack.c.bf16 %v8925_v14, %v11794_v42  ;;  %8921 = vst [vmem:[%s10210_s18 + $0x15e0] sm:$0xff] %v3265_v12  ;;  %v11899_v42 = vld [vmem:[%s10187_s14 + $0x2830] sm:$0xff] }
 0x12a   : > { %v11800_v44 = vld [vmem:[%s10187_s14 + $0x13e0] sm:$0xff]  ;;  %v8931_v16 = vld [vmem:[%s10187_s14 + $0x13e8] sm:$0xff]  ;;  %v3289_v18 = vpack.c.bf16 %v8928_v15, %v11797_v43  ;;  %8924 = vst [vmem:[%s10210_s18 + $0x21e0] sm:$0xff] %v3273_v13  ;;  %v11902_v43 = vld [vmem:[%s10187_s14 + $0x1030] sm:$0xff] }
 0x12b   : > { %v11812_v51 = vld [vmem:[%s10187_s14 + $0x3be0] sm:$0xff]  ;;  %v3297_v19 = vpack.c.bf16 %v8931_v16, %v11800_v44  ;;  %v8934_v20 = vld [vmem:[%s10187_s14 + $0x3be8] sm:$0xff]  ;;  %8927 = vst [vmem:[%s10210_s18 + $0x1f0] sm:$0xff] %v3281_v17  ;;  %v11905_v44 = vld [vmem:[%s10187_s14 + $0x3830] sm:$0xff] }
 0x12c   : > { %v11815_v52 = vld [vmem:[%s10187_s14 + $0x23e0] sm:$0xff]  ;;  %v8937_v21 = vld [vmem:[%s10187_s14 + $0x23e8] sm:$0xff]  ;;  %v3305_v23 = vpack.c.bf16 %v8934_v20, %v11812_v51  ;;  %8930 = vst [vmem:[%s10210_s18 + $0xdf0] sm:$0xff] %v3289_v18  ;;  %v11920_v51 = vld [vmem:[%s10187_s14 + $0x1830] sm:$0xff] }
 0x12d   : > { %v11818_v53 = vld [vmem:[%s10187_s14 + $0xbe0] sm:$0xff]  ;;  %v8940_v22 = vld [vmem:[%s10187_s14 + $0xbe8] sm:$0xff]  ;;  %v3313_v24 = vpack.c.bf16 %v8937_v21, %v11815_v52  ;;  %8933 = vst [vmem:[%s10210_s18 + $0x19f0] sm:$0xff] %v3297_v19  ;;  %v11923_v52 = vld [vmem:[%s10187_s14 + $0x30] sm:$0xff] }
 0x12e   : > { %v8085_v60 = vld [vmem:[%s10187_s14 + $0x33e0] sm:$0xff]  ;;  %v3321_v25 = vpack.c.bf16 %v8940_v22, %v11818_v53  ;;  %v8943_v26 = vld [vmem:[%s10187_s14 + $0x33e8] sm:$0xff]  ;;  %8936 = vst [vmem:[%s10210_s18 + $0x5f0] sm:$0xff] %v3305_v23  ;;  %v4217_v53 = vpack.c.bf16 %v9240_v47, %v8952_v32  ;;  %v9249_v56 = vld [vmem:[%s10187_s14 + $0x3818] sm:$0xff] }
 0x12f   : > { %v8086_v61 = vld [vmem:[%s10187_s14 + $0x1be0] sm:$0xff]  ;;  %v8946_v27 = vld [vmem:[%s10187_s14 + $0x1be8] sm:$0xff]  ;;  %v3329_v29 = vpack.c.bf16 %v8943_v26, %v8085_v60  ;;  %8939 = vst [vmem:[%s10210_s18 + $0x11f0] sm:$0xff] %v3313_v24  ;;  %v9252_v57 = vld [vmem:[%s10187_s14 + $0x2018] sm:$0xff] }
 0x130   : > { %v8087_v62 = vld [vmem:[%s10187_s14 + $0x3e0] sm:$0xff]  ;;  %v8949_v28 = vld [vmem:[%s10187_s14 + $0x3e8] sm:$0xff]  ;;  %v3337_v30 = vpack.c.bf16 %v8946_v27, %v8086_v61  ;;  %8942 = vst [vmem:[%s10210_s18 + $0x1df0] sm:$0xff] %v3321_v25  ;;  %v9255_v58 = vld [vmem:[%s10187_s14 + $0x818] sm:$0xff]  ;;  %v4249_v63 = vpack.c.bf16 %v9252_v57, %v8956_v36 }
 0x131   : > { %v3345_v31 = vpack.c.bf16 %v8949_v28, %v8087_v62  ;;  %8945 = vst [vmem:[%s10210_s18 + $0x9f0] sm:$0xff] %v3329_v29  ;;  %v11929_v59 = vld [vmem:[%s10187_s14 + $0x4050] sm:$0xff]  ;;  %v4241_v62 = vpack.c.bf16 %v9249_v56, %v8955_v35  ;;  %v4257_v0 = vpack.c.bf16 %v9255_v58, %v8957_v37  ;;  %v9258_v1 = vld [vmem:[%s10187_s14 + $0x3018] sm:$0xff]  ;;  %9242 = vst [vmem:[%s10210_s18 + $0x8] sm:$0xff] %v4217_v53 }
 0x132   : > { %8948 = vst [vmem:[%s10210_s18 + $0x15f0] sm:$0xff] %v3337_v30  ;;  %v11932_v60 = vld [vmem:[%s10187_s14 + $0x2850] sm:$0xff]  ;;  %v9261_v2 = vld [vmem:[%s10187_s14 + $0x1818] sm:$0xff]  ;;  %9245 = vst [vmem:[%s10210_s18 + $0xc08] sm:$0xff] %v4225_v54  ;;  %v4265_v7 = vpack.c.bf16 %v9258_v1, %v8958_v38 }
 0x133   : > { %8951 = vst [vmem:[%s10210_s18 + $0x21f0] sm:$0xff] %v3345_v31  ;;  %v11935_v61 = vld [vmem:[%s10187_s14 + $0x1050] sm:$0xff]  ;;  %v9264_v3 = vld [vmem:[%s10187_s14 + $0x18] sm:$0xff]  ;;  %9248 = vst [vmem:[%s10210_s18 + $0x1808] sm:$0xff] %v4233_v55  ;;  %v4273_v8 = vpack.c.bf16 %v9261_v2, %v8959_v39 }
 0x134   : > { %v11941_v4 = vld [vmem:[%s10187_s14 + $0x3850] sm:$0xff]  ;;  %v4281_v9 = vpack.c.bf16 %v9264_v3, %v8960_v40  ;;  %v9267_v10 = vld [vmem:[%s10187_s14 + $0x4038] sm:$0xff]  ;;  %9251 = vst [vmem:[%s10210_s18 + $0x408] sm:$0xff] %v4241_v62  ;;  %9254 = vst [vmem:[%s10210_s18 + $0x1008] sm:$0xff] %v4249_v63 }
 0x135   : > { %v11944_v5 = vld [vmem:[%s10187_s14 + $0x2050] sm:$0xff]  ;;  %v9270_v11 = vld [vmem:[%s10187_s14 + $0x2838] sm:$0xff]  ;;  %9257 = vst [vmem:[%s10210_s18 + $0x1c08] sm:$0xff] %v4257_v0  ;;  %v4289_v16 = vpack.c.bf16 %v9267_v10, %v11896_v41  ;;  %9260 = vst [vmem:[%s10210_s18 + $0x808] sm:$0xff] %v4265_v7 }
 0x136   : > { %v11947_v6 = vld [vmem:[%s10187_s14 + $0x850] sm:$0xff]  ;;  %v9273_v12 = vld [vmem:[%s10187_s14 + $0x1038] sm:$0xff]  ;;  %v4297_v17 = vpack.c.bf16 %v9270_v11, %v11899_v42  ;;  %9263 = vst [vmem:[%s10210_s18 + $0x1408] sm:$0xff] %v4273_v8  ;;  %9266 = vst [vmem:[%s10210_s18 + $0x2008] sm:$0xff] %v4281_v9 }
 0x137   : > { %v11956_v13 = vld [vmem:[%s10187_s14 + $0x3050] sm:$0xff]  ;;  %v4305_v18 = vpack.c.bf16 %v9273_v12, %v11902_v43  ;;  %v9276_v19 = vld [vmem:[%s10187_s14 + $0x3838] sm:$0xff]  ;;  %9269 = vst [vmem:[%s10210_s18 + $0x18] sm:$0xff] %v4289_v16 }
 0x138   : > { %v11959_v14 = vld [vmem:[%s10187_s14 + $0x1850] sm:$0xff]  ;;  %v9279_v20 = vld [vmem:[%s10187_s14 + $0x2038] sm:$0xff]  ;;  %v4313_v25 = vpack.c.bf16 %v9276_v19, %v11905_v44  ;;  %9272 = vst [vmem:[%s10210_s18 + $0xc18] sm:$0xff] %v4297_v17 }
 0x139   : > { %v11962_v15 = vld [vmem:[%s10187_s14 + $0x50] sm:$0xff]  ;;  %v9282_v21 = vld [vmem:[%s10187_s14 + $0x838] sm:$0xff]  ;;  %v4321_v26 = vpack.c.bf16 %v9279_v20, %v11908_v45  ;;  %9275 = vst [vmem:[%s10210_s18 + $0x1818] sm:$0xff] %v4305_v18 }
 0x13a   : > { %v11974_v22 = vld [vmem:[%s10187_s14 + $0x4070] sm:$0xff]  ;;  %v4329_v27 = vpack.c.bf16 %v9282_v21, %v11911_v46  ;;  %v9285_v28 = vld [vmem:[%s10187_s14 + $0x3038] sm:$0xff]  ;;  %9278 = vst [vmem:[%s10210_s18 + $0x418] sm:$0xff] %v4313_v25 }
 0x13b   : > { %v11977_v23 = vld [vmem:[%s10187_s14 + $0x2870] sm:$0xff]  ;;  %v9288_v29 = vld [vmem:[%s10187_s14 + $0x1838] sm:$0xff]  ;;  %v4337_v34 = vpack.c.bf16 %v9285_v28, %v11917_v50  ;;  %9281 = vst [vmem:[%s10210_s18 + $0x1018] sm:$0xff] %v4321_v26 }
 0x13c   : > { %v11980_v24 = vld [vmem:[%s10187_s14 + $0x1070] sm:$0xff]  ;;  %v9291_v30 = vld [vmem:[%s10187_s14 + $0x38] sm:$0xff]  ;;  %v4345_v35 = vpack.c.bf16 %v9288_v29, %v11920_v51  ;;  %9284 = vst [vmem:[%s10210_s18 + $0x1c18] sm:$0xff] %v4329_v27 }
 0x13d   : > { %v11992_v31 = vld [vmem:[%s10187_s14 + $0x3870] sm:$0xff]  ;;  %v4353_v36 = vpack.c.bf16 %v9291_v30, %v11923_v52  ;;  %v9294_v37 = vld [vmem:[%s10187_s14 + $0x4058] sm:$0xff]  ;;  %9287 = vst [vmem:[%s10210_s18 + $0x818] sm:$0xff] %v4337_v34 }
 0x13e   : > { %v11995_v32 = vld [vmem:[%s10187_s14 + $0x2070] sm:$0xff]  ;;  %v9297_v38 = vld [vmem:[%s10187_s14 + $0x2858] sm:$0xff]  ;;  %v4361_v43 = vpack.c.bf16 %v9294_v37, %v11929_v59  ;;  %9290 = vst [vmem:[%s10210_s18 + $0x1418] sm:$0xff] %v4345_v35 }
 0x13f   : > { %v11998_v33 = vld [vmem:[%s10187_s14 + $0x870] sm:$0xff]  ;;  %v9300_v39 = vld [vmem:[%s10187_s14 + $0x1058] sm:$0xff]  ;;  %v4369_v44 = vpack.c.bf16 %v9297_v38, %v11932_v60  ;;  %9293 = vst [vmem:[%s10210_s18 + $0x2018] sm:$0xff] %v4353_v36 }
 0x140   : > { %v12010_v40 = vld [vmem:[%s10187_s14 + $0x3070] sm:$0xff]  ;;  %v4377_v45 = vpack.c.bf16 %v9300_v39, %v11935_v61  ;;  %v9303_v46 = vld [vmem:[%s10187_s14 + $0x3858] sm:$0xff]  ;;  %9296 = vst [vmem:[%s10210_s18 + $0x28] sm:$0xff] %v4361_v43 }
 0x141   : > { %v12013_v41 = vld [vmem:[%s10187_s14 + $0x1870] sm:$0xff]  ;;  %v9306_v47 = vld [vmem:[%s10187_s14 + $0x2058] sm:$0xff]  ;;  %v4385_v52 = vpack.c.bf16 %v9303_v46, %v11941_v4  ;;  %9299 = vst [vmem:[%s10210_s18 + $0xc28] sm:$0xff] %v4369_v44 }
 0x142   : > { %v12016_v42 = vld [vmem:[%s10187_s14 + $0x70] sm:$0xff]  ;;  %v9309_v48 = vld [vmem:[%s10187_s14 + $0x858] sm:$0xff]  ;;  %v4393_v53 = vpack.c.bf16 %v9306_v47, %v11944_v5  ;;  %9302 = vst [vmem:[%s10210_s18 + $0x1828] sm:$0xff] %v4377_v45 }
 0x143   : > { %v12028_v49 = vld [vmem:[%s10187_s14 + $0x4090] sm:$0xff]  ;;  %v4401_v54 = vpack.c.bf16 %v9309_v48, %v11947_v6  ;;  %v9312_v55 = vld [vmem:[%s10187_s14 + $0x3058] sm:$0xff]  ;;  %9305 = vst [vmem:[%s10210_s18 + $0x428] sm:$0xff] %v4385_v52 }
 0x144   : > { %v12031_v50 = vld [vmem:[%s10187_s14 + $0x2890] sm:$0xff]  ;;  %v9315_v56 = vld [vmem:[%s10187_s14 + $0x1858] sm:$0xff]  ;;  %v4409_v61 = vpack.c.bf16 %v9312_v55, %v11956_v13  ;;  %9308 = vst [vmem:[%s10210_s18 + $0x1028] sm:$0xff] %v4393_v53 }
 0x145   : > { %v12034_v51 = vld [vmem:[%s10187_s14 + $0x1090] sm:$0xff]  ;;  %v9318_v57 = vld [vmem:[%s10187_s14 + $0x58] sm:$0xff]  ;;  %v4417_v62 = vpack.c.bf16 %v9315_v56, %v11959_v14  ;;  %9311 = vst [vmem:[%s10210_s18 + $0x1c28] sm:$0xff] %v4401_v54 }
 0x146   : > { %v12046_v58 = vld [vmem:[%s10187_s14 + $0x3890] sm:$0xff]  ;;  %v4425_v63 = vpack.c.bf16 %v9318_v57, %v11962_v15  ;;  %v9321_v0 = vld [vmem:[%s10187_s14 + $0x4078] sm:$0xff]  ;;  %9314 = vst [vmem:[%s10210_s18 + $0x828] sm:$0xff] %v4409_v61 }
 0x147   : > { %v12049_v59 = vld [vmem:[%s10187_s14 + $0x2090] sm:$0xff]  ;;  %v9324_v1 = vld [vmem:[%s10187_s14 + $0x2878] sm:$0xff]  ;;  %v4433_v6 = vpack.c.bf16 %v9321_v0, %v11974_v22  ;;  %9317 = vst [vmem:[%s10210_s18 + $0x1428] sm:$0xff] %v4417_v62 }
 0x148   : > { %v12052_v60 = vld [vmem:[%s10187_s14 + $0x890] sm:$0xff]  ;;  %v9327_v2 = vld [vmem:[%s10187_s14 + $0x1078] sm:$0xff]  ;;  %v4441_v7 = vpack.c.bf16 %v9324_v1, %v11977_v23  ;;  %9320 = vst [vmem:[%s10210_s18 + $0x2028] sm:$0xff] %v4425_v63 }
 0x149   : > { %v12064_v3 = vld [vmem:[%s10187_s14 + $0x3090] sm:$0xff]  ;;  %v4449_v8 = vpack.c.bf16 %v9327_v2, %v11980_v24  ;;  %v9330_v9 = vld [vmem:[%s10187_s14 + $0x3878] sm:$0xff]  ;;  %9323 = vst [vmem:[%s10210_s18 + $0x38] sm:$0xff] %v4433_v6 }
 0x14a   : > { %v12067_v4 = vld [vmem:[%s10187_s14 + $0x1890] sm:$0xff]  ;;  %v9333_v10 = vld [vmem:[%s10187_s14 + $0x2078] sm:$0xff]  ;;  %v4457_v15 = vpack.c.bf16 %v9330_v9, %v11992_v31  ;;  %9326 = vst [vmem:[%s10210_s18 + $0xc38] sm:$0xff] %v4441_v7 }
 0x14b   : > { %v12070_v5 = vld [vmem:[%s10187_s14 + $0x90] sm:$0xff]  ;;  %v9336_v11 = vld [vmem:[%s10187_s14 + $0x878] sm:$0xff]  ;;  %v4465_v16 = vpack.c.bf16 %v9333_v10, %v11995_v32  ;;  %9329 = vst [vmem:[%s10210_s18 + $0x1838] sm:$0xff] %v4449_v8 }
 0x14c   : > { %v12082_v12 = vld [vmem:[%s10187_s14 + $0x40b0] sm:$0xff]  ;;  %v4473_v17 = vpack.c.bf16 %v9336_v11, %v11998_v33  ;;  %v9339_v18 = vld [vmem:[%s10187_s14 + $0x3078] sm:$0xff]  ;;  %9332 = vst [vmem:[%s10210_s18 + $0x438] sm:$0xff] %v4457_v15 }
 0x14d   : > { %v12085_v13 = vld [vmem:[%s10187_s14 + $0x28b0] sm:$0xff]  ;;  %v9342_v19 = vld [vmem:[%s10187_s14 + $0x1878] sm:$0xff]  ;;  %v4481_v24 = vpack.c.bf16 %v9339_v18, %v12010_v40  ;;  %9335 = vst [vmem:[%s10210_s18 + $0x1038] sm:$0xff] %v4465_v16 }
 0x14e   : > { %v12088_v14 = vld [vmem:[%s10187_s14 + $0x10b0] sm:$0xff]  ;;  %v9345_v20 = vld [vmem:[%s10187_s14 + $0x78] sm:$0xff]  ;;  %v4489_v25 = vpack.c.bf16 %v9342_v19, %v12013_v41  ;;  %9338 = vst [vmem:[%s10210_s18 + $0x1c38] sm:$0xff] %v4473_v17 }
 0x14f   : > { %v12100_v21 = vld [vmem:[%s10187_s14 + $0x38b0] sm:$0xff]  ;;  %v4497_v26 = vpack.c.bf16 %v9345_v20, %v12016_v42  ;;  %v9348_v27 = vld [vmem:[%s10187_s14 + $0x4098] sm:$0xff]  ;;  %9341 = vst [vmem:[%s10210_s18 + $0x838] sm:$0xff] %v4481_v24 }
 0x150   : > { %v12103_v22 = vld [vmem:[%s10187_s14 + $0x20b0] sm:$0xff]  ;;  %v9351_v28 = vld [vmem:[%s10187_s14 + $0x2898] sm:$0xff]  ;;  %v4505_v33 = vpack.c.bf16 %v9348_v27, %v12028_v49  ;;  %9344 = vst [vmem:[%s10210_s18 + $0x1438] sm:$0xff] %v4489_v25 }
 0x151   : > { %v12106_v23 = vld [vmem:[%s10187_s14 + $0x8b0] sm:$0xff]  ;;  %v9354_v29 = vld [vmem:[%s10187_s14 + $0x1098] sm:$0xff]  ;;  %v4513_v34 = vpack.c.bf16 %v9351_v28, %v12031_v50  ;;  %9347 = vst [vmem:[%s10210_s18 + $0x2038] sm:$0xff] %v4497_v26 }
 0x152   : > { %v12118_v30 = vld [vmem:[%s10187_s14 + $0x30b0] sm:$0xff]  ;;  %v4521_v35 = vpack.c.bf16 %v9354_v29, %v12034_v51  ;;  %v9357_v36 = vld [vmem:[%s10187_s14 + $0x3898] sm:$0xff]  ;;  %9350 = vst [vmem:[%s10210_s18 + $0x48] sm:$0xff] %v4505_v33 }
 0x153   : > { %v12121_v31 = vld [vmem:[%s10187_s14 + $0x18b0] sm:$0xff]  ;;  %v9360_v37 = vld [vmem:[%s10187_s14 + $0x2098] sm:$0xff]  ;;  %v4529_v42 = vpack.c.bf16 %v9357_v36, %v12046_v58  ;;  %9353 = vst [vmem:[%s10210_s18 + $0xc48] sm:$0xff] %v4513_v34 }
 0x154   : > { %v12124_v32 = vld [vmem:[%s10187_s14 + $0xb0] sm:$0xff]  ;;  %v9363_v38 = vld [vmem:[%s10187_s14 + $0x898] sm:$0xff]  ;;  %v4537_v43 = vpack.c.bf16 %v9360_v37, %v12049_v59  ;;  %9356 = vst [vmem:[%s10210_s18 + $0x1848] sm:$0xff] %v4521_v35 }
 0x155   : > { %v12136_v39 = vld [vmem:[%s10187_s14 + $0x40d0] sm:$0xff]  ;;  %v4545_v44 = vpack.c.bf16 %v9363_v38, %v12052_v60  ;;  %v9366_v45 = vld [vmem:[%s10187_s14 + $0x3098] sm:$0xff]  ;;  %9359 = vst [vmem:[%s10210_s18 + $0x448] sm:$0xff] %v4529_v42 }
 0x156   : > { %v12139_v40 = vld [vmem:[%s10187_s14 + $0x28d0] sm:$0xff]  ;;  %v9369_v46 = vld [vmem:[%s10187_s14 + $0x1898] sm:$0xff]  ;;  %v4553_v51 = vpack.c.bf16 %v9366_v45, %v12064_v3  ;;  %9362 = vst [vmem:[%s10210_s18 + $0x1048] sm:$0xff] %v4537_v43 }
 0x157   : > { %v12142_v41 = vld [vmem:[%s10187_s14 + $0x10d0] sm:$0xff]  ;;  %v9372_v47 = vld [vmem:[%s10187_s14 + $0x98] sm:$0xff]  ;;  %v4561_v52 = vpack.c.bf16 %v9369_v46, %v12067_v4  ;;  %9365 = vst [vmem:[%s10210_s18 + $0x1c48] sm:$0xff] %v4545_v44 }
 0x158   : > { %v12154_v48 = vld [vmem:[%s10187_s14 + $0x38d0] sm:$0xff]  ;;  %v4569_v53 = vpack.c.bf16 %v9372_v47, %v12070_v5  ;;  %v9375_v54 = vld [vmem:[%s10187_s14 + $0x40b8] sm:$0xff]  ;;  %9368 = vst [vmem:[%s10210_s18 + $0x848] sm:$0xff] %v4553_v51 }
 0x159   : > { %v12157_v49 = vld [vmem:[%s10187_s14 + $0x20d0] sm:$0xff]  ;;  %v9378_v55 = vld [vmem:[%s10187_s14 + $0x28b8] sm:$0xff]  ;;  %v4577_v60 = vpack.c.bf16 %v9375_v54, %v12082_v12  ;;  %9371 = vst [vmem:[%s10210_s18 + $0x1448] sm:$0xff] %v4561_v52 }
 0x15a   : > { %v12160_v50 = vld [vmem:[%s10187_s14 + $0x8d0] sm:$0xff]  ;;  %v9381_v56 = vld [vmem:[%s10187_s14 + $0x10b8] sm:$0xff]  ;;  %v4585_v61 = vpack.c.bf16 %v9378_v55, %v12085_v13  ;;  %9374 = vst [vmem:[%s10210_s18 + $0x2048] sm:$0xff] %v4569_v53 }
 0x15b   : > { %v12172_v57 = vld [vmem:[%s10187_s14 + $0x30d0] sm:$0xff]  ;;  %v4593_v62 = vpack.c.bf16 %v9381_v56, %v12088_v14  ;;  %v9384_v63 = vld [vmem:[%s10187_s14 + $0x38b8] sm:$0xff]  ;;  %9377 = vst [vmem:[%s10210_s18 + $0x58] sm:$0xff] %v4577_v60 }
 0x15c   : > { %v12175_v58 = vld [vmem:[%s10187_s14 + $0x18d0] sm:$0xff]  ;;  %v9387_v0 = vld [vmem:[%s10187_s14 + $0x20b8] sm:$0xff]  ;;  %v4601_v5 = vpack.c.bf16 %v9384_v63, %v12100_v21  ;;  %9380 = vst [vmem:[%s10210_s18 + $0xc58] sm:$0xff] %v4585_v61 }
 0x15d   : > { %v12178_v59 = vld [vmem:[%s10187_s14 + $0xd0] sm:$0xff]  ;;  %v9390_v1 = vld [vmem:[%s10187_s14 + $0x8b8] sm:$0xff]  ;;  %v4609_v6 = vpack.c.bf16 %v9387_v0, %v12103_v22  ;;  %9383 = vst [vmem:[%s10210_s18 + $0x1858] sm:$0xff] %v4593_v62 }
 0x15e   : > { %v12190_v2 = vld [vmem:[%s10187_s14 + $0x40f0] sm:$0xff]  ;;  %v4617_v7 = vpack.c.bf16 %v9390_v1, %v12106_v23  ;;  %v9393_v8 = vld [vmem:[%s10187_s14 + $0x30b8] sm:$0xff]  ;;  %9386 = vst [vmem:[%s10210_s18 + $0x458] sm:$0xff] %v4601_v5 }
 0x15f   : > { %v12193_v3 = vld [vmem:[%s10187_s14 + $0x28f0] sm:$0xff]  ;;  %v9396_v9 = vld [vmem:[%s10187_s14 + $0x18b8] sm:$0xff]  ;;  %v4625_v14 = vpack.c.bf16 %v9393_v8, %v12118_v30  ;;  %9389 = vst [vmem:[%s10210_s18 + $0x1058] sm:$0xff] %v4609_v6 }
 0x160   : > { %v12196_v4 = vld [vmem:[%s10187_s14 + $0x10f0] sm:$0xff]  ;;  %v9399_v10 = vld [vmem:[%s10187_s14 + $0xb8] sm:$0xff]  ;;  %v4633_v15 = vpack.c.bf16 %v9396_v9, %v12121_v31  ;;  %9392 = vst [vmem:[%s10210_s18 + $0x1c58] sm:$0xff] %v4617_v7 }
 0x161   : > { %v12208_v11 = vld [vmem:[%s10187_s14 + $0x38f0] sm:$0xff]  ;;  %v4641_v16 = vpack.c.bf16 %v9399_v10, %v12124_v32  ;;  %v9402_v17 = vld [vmem:[%s10187_s14 + $0x40d8] sm:$0xff]  ;;  %9395 = vst [vmem:[%s10210_s18 + $0x858] sm:$0xff] %v4625_v14 }
 0x162   : > { %v12211_v12 = vld [vmem:[%s10187_s14 + $0x20f0] sm:$0xff]  ;;  %v9405_v18 = vld [vmem:[%s10187_s14 + $0x28d8] sm:$0xff]  ;;  %v4649_v23 = vpack.c.bf16 %v9402_v17, %v12136_v39  ;;  %9398 = vst [vmem:[%s10210_s18 + $0x1458] sm:$0xff] %v4633_v15 }
 0x163   : > { %v12214_v13 = vld [vmem:[%s10187_s14 + $0x8f0] sm:$0xff]  ;;  %v9408_v19 = vld [vmem:[%s10187_s14 + $0x10d8] sm:$0xff]  ;;  %v4657_v24 = vpack.c.bf16 %v9405_v18, %v12139_v40  ;;  %9401 = vst [vmem:[%s10210_s18 + $0x2058] sm:$0xff] %v4641_v16 }
 0x164   : > { %v12226_v20 = vld [vmem:[%s10187_s14 + $0x30f0] sm:$0xff]  ;;  %v4665_v25 = vpack.c.bf16 %v9408_v19, %v12142_v41  ;;  %v9411_v26 = vld [vmem:[%s10187_s14 + $0x38d8] sm:$0xff]  ;;  %9404 = vst [vmem:[%s10210_s18 + $0x68] sm:$0xff] %v4649_v23 }
 0x165   : > { %v12229_v21 = vld [vmem:[%s10187_s14 + $0x18f0] sm:$0xff]  ;;  %v9414_v27 = vld [vmem:[%s10187_s14 + $0x20d8] sm:$0xff]  ;;  %v4673_v32 = vpack.c.bf16 %v9411_v26, %v12154_v48  ;;  %9407 = vst [vmem:[%s10210_s18 + $0xc68] sm:$0xff] %v4657_v24 }
 0x166   : > { %v12232_v22 = vld [vmem:[%s10187_s14 + $0xf0] sm:$0xff]  ;;  %v9417_v28 = vld [vmem:[%s10187_s14 + $0x8d8] sm:$0xff]  ;;  %v4681_v33 = vpack.c.bf16 %v9414_v27, %v12157_v49  ;;  %9410 = vst [vmem:[%s10210_s18 + $0x1868] sm:$0xff] %v4665_v25 }
 0x167   : > { %v12244_v29 = vld [vmem:[%s10187_s14 + $0x4110] sm:$0xff]  ;;  %v4689_v34 = vpack.c.bf16 %v9417_v28, %v12160_v50  ;;  %v9420_v35 = vld [vmem:[%s10187_s14 + $0x30d8] sm:$0xff]  ;;  %9413 = vst [vmem:[%s10210_s18 + $0x468] sm:$0xff] %v4673_v32 }
 0x168   : > { %v12247_v30 = vld [vmem:[%s10187_s14 + $0x2910] sm:$0xff]  ;;  %v9423_v36 = vld [vmem:[%s10187_s14 + $0x18d8] sm:$0xff]  ;;  %v4697_v41 = vpack.c.bf16 %v9420_v35, %v12172_v57  ;;  %9416 = vst [vmem:[%s10210_s18 + $0x1068] sm:$0xff] %v4681_v33 }
 0x169   : > { %v12250_v31 = vld [vmem:[%s10187_s14 + $0x1110] sm:$0xff]  ;;  %v9426_v37 = vld [vmem:[%s10187_s14 + $0xd8] sm:$0xff]  ;;  %v4705_v42 = vpack.c.bf16 %v9423_v36, %v12175_v58  ;;  %9419 = vst [vmem:[%s10210_s18 + $0x1c68] sm:$0xff] %v4689_v34 }
 0x16a   : > { %v12262_v38 = vld [vmem:[%s10187_s14 + $0x3910] sm:$0xff]  ;;  %v4713_v43 = vpack.c.bf16 %v9426_v37, %v12178_v59  ;;  %v9429_v44 = vld [vmem:[%s10187_s14 + $0x40f8] sm:$0xff]  ;;  %9422 = vst [vmem:[%s10210_s18 + $0x868] sm:$0xff] %v4697_v41 }
 0x16b   : > { %v12265_v39 = vld [vmem:[%s10187_s14 + $0x2110] sm:$0xff]  ;;  %v9432_v45 = vld [vmem:[%s10187_s14 + $0x28f8] sm:$0xff]  ;;  %v4721_v50 = vpack.c.bf16 %v9429_v44, %v12190_v2  ;;  %9425 = vst [vmem:[%s10210_s18 + $0x1468] sm:$0xff] %v4705_v42 }
 0x16c   : > { %v12268_v40 = vld [vmem:[%s10187_s14 + $0x910] sm:$0xff]  ;;  %v9435_v46 = vld [vmem:[%s10187_s14 + $0x10f8] sm:$0xff]  ;;  %v4729_v51 = vpack.c.bf16 %v9432_v45, %v12193_v3  ;;  %9428 = vst [vmem:[%s10210_s18 + $0x2068] sm:$0xff] %v4713_v43 }
 0x16d   : > { %v12280_v47 = vld [vmem:[%s10187_s14 + $0x3110] sm:$0xff]  ;;  %v4737_v52 = vpack.c.bf16 %v9435_v46, %v12196_v4  ;;  %v9438_v53 = vld [vmem:[%s10187_s14 + $0x38f8] sm:$0xff]  ;;  %9431 = vst [vmem:[%s10210_s18 + $0x78] sm:$0xff] %v4721_v50 }
 0x16e   : > { %v12283_v48 = vld [vmem:[%s10187_s14 + $0x1910] sm:$0xff]  ;;  %v9441_v54 = vld [vmem:[%s10187_s14 + $0x20f8] sm:$0xff]  ;;  %v4745_v59 = vpack.c.bf16 %v9438_v53, %v12208_v11  ;;  %9434 = vst [vmem:[%s10210_s18 + $0xc78] sm:$0xff] %v4729_v51 }
 0x16f   : > { %v12286_v49 = vld [vmem:[%s10187_s14 + $0x110] sm:$0xff]  ;;  %v9444_v55 = vld [vmem:[%s10187_s14 + $0x8f8] sm:$0xff]  ;;  %v4753_v60 = vpack.c.bf16 %v9441_v54, %v12211_v12  ;;  %9437 = vst [vmem:[%s10210_s18 + $0x1878] sm:$0xff] %v4737_v52 }
 0x170   : > { %v12298_v56 = vld [vmem:[%s10187_s14 + $0x4130] sm:$0xff]  ;;  %v4761_v61 = vpack.c.bf16 %v9444_v55, %v12214_v13  ;;  %v9447_v62 = vld [vmem:[%s10187_s14 + $0x30f8] sm:$0xff]  ;;  %9440 = vst [vmem:[%s10210_s18 + $0x478] sm:$0xff] %v4745_v59 }
 0x171   : > { %v12301_v57 = vld [vmem:[%s10187_s14 + $0x2930] sm:$0xff]  ;;  %v9450_v63 = vld [vmem:[%s10187_s14 + $0x18f8] sm:$0xff]  ;;  %v4769_v4 = vpack.c.bf16 %v9447_v62, %v12226_v20  ;;  %9443 = vst [vmem:[%s10210_s18 + $0x1078] sm:$0xff] %v4753_v60 }
 0x172   : > { %v12304_v58 = vld [vmem:[%s10187_s14 + $0x1130] sm:$0xff]  ;;  %v9453_v0 = vld [vmem:[%s10187_s14 + $0xf8] sm:$0xff]  ;;  %v4777_v5 = vpack.c.bf16 %v9450_v63, %v12229_v21  ;;  %9446 = vst [vmem:[%s10210_s18 + $0x1c78] sm:$0xff] %v4761_v61 }
 0x173   : > { %v12316_v1 = vld [vmem:[%s10187_s14 + $0x3930] sm:$0xff]  ;;  %v4785_v6 = vpack.c.bf16 %v9453_v0, %v12232_v22  ;;  %v9456_v7 = vld [vmem:[%s10187_s14 + $0x4118] sm:$0xff]  ;;  %9449 = vst [vmem:[%s10210_s18 + $0x878] sm:$0xff] %v4769_v4 }
 0x174   : > { %v12319_v2 = vld [vmem:[%s10187_s14 + $0x2130] sm:$0xff]  ;;  %v9459_v8 = vld [vmem:[%s10187_s14 + $0x2918] sm:$0xff]  ;;  %v4793_v13 = vpack.c.bf16 %v9456_v7, %v12244_v29  ;;  %9452 = vst [vmem:[%s10210_s18 + $0x1478] sm:$0xff] %v4777_v5 }
 0x175   : > { %v12322_v3 = vld [vmem:[%s10187_s14 + $0x930] sm:$0xff]  ;;  %v9462_v9 = vld [vmem:[%s10187_s14 + $0x1118] sm:$0xff]  ;;  %v4801_v14 = vpack.c.bf16 %v9459_v8, %v12247_v30  ;;  %9455 = vst [vmem:[%s10210_s18 + $0x2078] sm:$0xff] %v4785_v6 }
 0x176   : > { %v12334_v10 = vld [vmem:[%s10187_s14 + $0x3130] sm:$0xff]  ;;  %v4809_v15 = vpack.c.bf16 %v9462_v9, %v12250_v31  ;;  %v9465_v16 = vld [vmem:[%s10187_s14 + $0x3918] sm:$0xff]  ;;  %9458 = vst [vmem:[%s10210_s18 + $0x88] sm:$0xff] %v4793_v13 }
 0x177   : > { %v12337_v11 = vld [vmem:[%s10187_s14 + $0x1930] sm:$0xff]  ;;  %v9468_v17 = vld [vmem:[%s10187_s14 + $0x2118] sm:$0xff]  ;;  %v4817_v22 = vpack.c.bf16 %v9465_v16, %v12262_v38  ;;  %9461 = vst [vmem:[%s10210_s18 + $0xc88] sm:$0xff] %v4801_v14 }
 0x178   : > { %v12340_v12 = vld [vmem:[%s10187_s14 + $0x130] sm:$0xff]  ;;  %v9471_v18 = vld [vmem:[%s10187_s14 + $0x918] sm:$0xff]  ;;  %v4825_v23 = vpack.c.bf16 %v9468_v17, %v12265_v39  ;;  %9464 = vst [vmem:[%s10210_s18 + $0x1888] sm:$0xff] %v4809_v15 }
 0x179   : > { %v12352_v19 = vld [vmem:[%s10187_s14 + $0x4150] sm:$0xff]  ;;  %v4833_v24 = vpack.c.bf16 %v9471_v18, %v12268_v40  ;;  %v9474_v25 = vld [vmem:[%s10187_s14 + $0x3118] sm:$0xff]  ;;  %9467 = vst [vmem:[%s10210_s18 + $0x488] sm:$0xff] %v4817_v22 }
 0x17a   : > { %v12355_v20 = vld [vmem:[%s10187_s14 + $0x2950] sm:$0xff]  ;;  %v9477_v26 = vld [vmem:[%s10187_s14 + $0x1918] sm:$0xff]  ;;  %v4841_v31 = vpack.c.bf16 %v9474_v25, %v12280_v47  ;;  %9470 = vst [vmem:[%s10210_s18 + $0x1088] sm:$0xff] %v4825_v23 }
 0x17b   : > { %v12358_v21 = vld [vmem:[%s10187_s14 + $0x1150] sm:$0xff]  ;;  %v9480_v27 = vld [vmem:[%s10187_s14 + $0x118] sm:$0xff]  ;;  %v4849_v32 = vpack.c.bf16 %v9477_v26, %v12283_v48  ;;  %9473 = vst [vmem:[%s10210_s18 + $0x1c88] sm:$0xff] %v4833_v24 }
 0x17c   : > { %v12370_v28 = vld [vmem:[%s10187_s14 + $0x3950] sm:$0xff]  ;;  %v4857_v33 = vpack.c.bf16 %v9480_v27, %v12286_v49  ;;  %v9483_v34 = vld [vmem:[%s10187_s14 + $0x4138] sm:$0xff]  ;;  %9476 = vst [vmem:[%s10210_s18 + $0x888] sm:$0xff] %v4841_v31 }
 0x17d   : > { %v12373_v29 = vld [vmem:[%s10187_s14 + $0x2150] sm:$0xff]  ;;  %v9486_v35 = vld [vmem:[%s10187_s14 + $0x2938] sm:$0xff]  ;;  %v4865_v40 = vpack.c.bf16 %v9483_v34, %v12298_v56  ;;  %9479 = vst [vmem:[%s10210_s18 + $0x1488] sm:$0xff] %v4849_v32 }
 0x17e   : > { %v12376_v30 = vld [vmem:[%s10187_s14 + $0x950] sm:$0xff]  ;;  %v9489_v36 = vld [vmem:[%s10187_s14 + $0x1138] sm:$0xff]  ;;  %v4873_v41 = vpack.c.bf16 %v9486_v35, %v12301_v57  ;;  %9482 = vst [vmem:[%s10210_s18 + $0x2088] sm:$0xff] %v4857_v33 }
 0x17f   : > { %v12388_v37 = vld [vmem:[%s10187_s14 + $0x3150] sm:$0xff]  ;;  %v4881_v42 = vpack.c.bf16 %v9489_v36, %v12304_v58  ;;  %v9492_v43 = vld [vmem:[%s10187_s14 + $0x3938] sm:$0xff]  ;;  %9485 = vst [vmem:[%s10210_s18 + $0x98] sm:$0xff] %v4865_v40 }
 0x180   : > { %v12391_v38 = vld [vmem:[%s10187_s14 + $0x1950] sm:$0xff]  ;;  %v9495_v44 = vld [vmem:[%s10187_s14 + $0x2138] sm:$0xff]  ;;  %v4889_v49 = vpack.c.bf16 %v9492_v43, %v12316_v1  ;;  %9488 = vst [vmem:[%s10210_s18 + $0xc98] sm:$0xff] %v4873_v41 }
 0x181   : > { %v12394_v39 = vld [vmem:[%s10187_s14 + $0x150] sm:$0xff]  ;;  %v9498_v45 = vld [vmem:[%s10187_s14 + $0x938] sm:$0xff]  ;;  %v4897_v50 = vpack.c.bf16 %v9495_v44, %v12319_v2  ;;  %9491 = vst [vmem:[%s10210_s18 + $0x1898] sm:$0xff] %v4881_v42 }
 0x182   : > { %v12406_v46 = vld [vmem:[%s10187_s14 + $0x4170] sm:$0xff]  ;;  %v4905_v51 = vpack.c.bf16 %v9498_v45, %v12322_v3  ;;  %v9501_v52 = vld [vmem:[%s10187_s14 + $0x3138] sm:$0xff]  ;;  %9494 = vst [vmem:[%s10210_s18 + $0x498] sm:$0xff] %v4889_v49 }
 0x183   : > { %v12409_v47 = vld [vmem:[%s10187_s14 + $0x2970] sm:$0xff]  ;;  %v9504_v53 = vld [vmem:[%s10187_s14 + $0x1938] sm:$0xff]  ;;  %v4913_v58 = vpack.c.bf16 %v9501_v52, %v12334_v10  ;;  %9497 = vst [vmem:[%s10210_s18 + $0x1098] sm:$0xff] %v4897_v50 }
 0x184   : > { %v12412_v48 = vld [vmem:[%s10187_s14 + $0x1170] sm:$0xff]  ;;  %v9507_v54 = vld [vmem:[%s10187_s14 + $0x138] sm:$0xff]  ;;  %v4921_v59 = vpack.c.bf16 %v9504_v53, %v12337_v11  ;;  %9500 = vst [vmem:[%s10210_s18 + $0x1c98] sm:$0xff] %v4905_v51 }
 0x185   : > { %v12424_v55 = vld [vmem:[%s10187_s14 + $0x3970] sm:$0xff]  ;;  %v4929_v60 = vpack.c.bf16 %v9507_v54, %v12340_v12  ;;  %v9510_v61 = vld [vmem:[%s10187_s14 + $0x4158] sm:$0xff]  ;;  %9503 = vst [vmem:[%s10210_s18 + $0x898] sm:$0xff] %v4913_v58 }
 0x186   : > { %v12427_v56 = vld [vmem:[%s10187_s14 + $0x2170] sm:$0xff]  ;;  %v9513_v62 = vld [vmem:[%s10187_s14 + $0x2958] sm:$0xff]  ;;  %v4937_v3 = vpack.c.bf16 %v9510_v61, %v12352_v19  ;;  %9506 = vst [vmem:[%s10210_s18 + $0x1498] sm:$0xff] %v4921_v59 }
 0x187   : > { %v12430_v57 = vld [vmem:[%s10187_s14 + $0x970] sm:$0xff]  ;;  %v9516_v63 = vld [vmem:[%s10187_s14 + $0x1158] sm:$0xff]  ;;  %v4945_v4 = vpack.c.bf16 %v9513_v62, %v12355_v20  ;;  %9509 = vst [vmem:[%s10210_s18 + $0x2098] sm:$0xff] %v4929_v60 }
 0x188   : > { %v12442_v0 = vld [vmem:[%s10187_s14 + $0x3170] sm:$0xff]  ;;  %v4953_v5 = vpack.c.bf16 %v9516_v63, %v12358_v21  ;;  %v9519_v6 = vld [vmem:[%s10187_s14 + $0x3958] sm:$0xff]  ;;  %9512 = vst [vmem:[%s10210_s18 + $0xa8] sm:$0xff] %v4937_v3 }
 0x189   : > { %v12445_v1 = vld [vmem:[%s10187_s14 + $0x1970] sm:$0xff]  ;;  %v9522_v7 = vld [vmem:[%s10187_s14 + $0x2158] sm:$0xff]  ;;  %v4961_v12 = vpack.c.bf16 %v9519_v6, %v12370_v28  ;;  %9515 = vst [vmem:[%s10210_s18 + $0xca8] sm:$0xff] %v4945_v4 }
 0x18a   : > { %v12448_v2 = vld [vmem:[%s10187_s14 + $0x170] sm:$0xff]  ;;  %v9525_v8 = vld [vmem:[%s10187_s14 + $0x958] sm:$0xff]  ;;  %v4969_v13 = vpack.c.bf16 %v9522_v7, %v12373_v29  ;;  %9518 = vst [vmem:[%s10210_s18 + $0x18a8] sm:$0xff] %v4953_v5 }
 0x18b   : > { %v12460_v9 = vld [vmem:[%s10187_s14 + $0x4190] sm:$0xff]  ;;  %v4977_v14 = vpack.c.bf16 %v9525_v8, %v12376_v30  ;;  %v9528_v15 = vld [vmem:[%s10187_s14 + $0x3158] sm:$0xff]  ;;  %9521 = vst [vmem:[%s10210_s18 + $0x4a8] sm:$0xff] %v4961_v12 }
 0x18c   : > { %v12463_v10 = vld [vmem:[%s10187_s14 + $0x2990] sm:$0xff]  ;;  %v9531_v16 = vld [vmem:[%s10187_s14 + $0x1958] sm:$0xff]  ;;  %v4985_v21 = vpack.c.bf16 %v9528_v15, %v12388_v37  ;;  %9524 = vst [vmem:[%s10210_s18 + $0x10a8] sm:$0xff] %v4969_v13 }
 0x18d   : > { %v12466_v11 = vld [vmem:[%s10187_s14 + $0x1190] sm:$0xff]  ;;  %v9534_v17 = vld [vmem:[%s10187_s14 + $0x158] sm:$0xff]  ;;  %v4993_v22 = vpack.c.bf16 %v9531_v16, %v12391_v38  ;;  %9527 = vst [vmem:[%s10210_s18 + $0x1ca8] sm:$0xff] %v4977_v14 }
 0x18e   : > { %v12478_v18 = vld [vmem:[%s10187_s14 + $0x3990] sm:$0xff]  ;;  %v5001_v23 = vpack.c.bf16 %v9534_v17, %v12394_v39  ;;  %v9537_v24 = vld [vmem:[%s10187_s14 + $0x4178] sm:$0xff]  ;;  %9530 = vst [vmem:[%s10210_s18 + $0x8a8] sm:$0xff] %v4985_v21 }
 0x18f   : > { %v12481_v19 = vld [vmem:[%s10187_s14 + $0x2190] sm:$0xff]  ;;  %v9540_v25 = vld [vmem:[%s10187_s14 + $0x2978] sm:$0xff]  ;;  %v5009_v30 = vpack.c.bf16 %v9537_v24, %v12406_v46  ;;  %9533 = vst [vmem:[%s10210_s18 + $0x14a8] sm:$0xff] %v4993_v22 }
 0x190   : > { %v12484_v20 = vld [vmem:[%s10187_s14 + $0x990] sm:$0xff]  ;;  %v9543_v26 = vld [vmem:[%s10187_s14 + $0x1178] sm:$0xff]  ;;  %v5017_v31 = vpack.c.bf16 %v9540_v25, %v12409_v47  ;;  %9536 = vst [vmem:[%s10210_s18 + $0x20a8] sm:$0xff] %v5001_v23 }
 0x191   : > { %v12496_v27 = vld [vmem:[%s10187_s14 + $0x3190] sm:$0xff]  ;;  %v5025_v32 = vpack.c.bf16 %v9543_v26, %v12412_v48  ;;  %v9546_v33 = vld [vmem:[%s10187_s14 + $0x3978] sm:$0xff]  ;;  %9539 = vst [vmem:[%s10210_s18 + $0xb8] sm:$0xff] %v5009_v30 }
 0x192   : > { %v12499_v28 = vld [vmem:[%s10187_s14 + $0x1990] sm:$0xff]  ;;  %v9549_v34 = vld [vmem:[%s10187_s14 + $0x2178] sm:$0xff]  ;;  %v5033_v39 = vpack.c.bf16 %v9546_v33, %v12424_v55  ;;  %9542 = vst [vmem:[%s10210_s18 + $0xcb8] sm:$0xff] %v5017_v31 }
 0x193   : > { %v12502_v29 = vld [vmem:[%s10187_s14 + $0x190] sm:$0xff]  ;;  %v9552_v35 = vld [vmem:[%s10187_s14 + $0x978] sm:$0xff]  ;;  %v5041_v40 = vpack.c.bf16 %v9549_v34, %v12427_v56  ;;  %9545 = vst [vmem:[%s10210_s18 + $0x18b8] sm:$0xff] %v5025_v32 }
 0x194   : > { %v12514_v36 = vld [vmem:[%s10187_s14 + $0x41b0] sm:$0xff]  ;;  %v5049_v41 = vpack.c.bf16 %v9552_v35, %v12430_v57  ;;  %v9555_v42 = vld [vmem:[%s10187_s14 + $0x3178] sm:$0xff]  ;;  %9548 = vst [vmem:[%s10210_s18 + $0x4b8] sm:$0xff] %v5033_v39 }
 0x195   : > { %v12517_v37 = vld [vmem:[%s10187_s14 + $0x29b0] sm:$0xff]  ;;  %v9558_v43 = vld [vmem:[%s10187_s14 + $0x1978] sm:$0xff]  ;;  %v5057_v48 = vpack.c.bf16 %v9555_v42, %v12442_v0  ;;  %9551 = vst [vmem:[%s10210_s18 + $0x10b8] sm:$0xff] %v5041_v40 }
 0x196   : > { %v12520_v38 = vld [vmem:[%s10187_s14 + $0x11b0] sm:$0xff]  ;;  %v9561_v44 = vld [vmem:[%s10187_s14 + $0x178] sm:$0xff]  ;;  %v5065_v49 = vpack.c.bf16 %v9558_v43, %v12445_v1  ;;  %9554 = vst [vmem:[%s10210_s18 + $0x1cb8] sm:$0xff] %v5049_v41 }
 0x197   : > { %v12532_v45 = vld [vmem:[%s10187_s14 + $0x39b0] sm:$0xff]  ;;  %v5073_v50 = vpack.c.bf16 %v9561_v44, %v12448_v2  ;;  %v9564_v51 = vld [vmem:[%s10187_s14 + $0x4198] sm:$0xff]  ;;  %9557 = vst [vmem:[%s10210_s18 + $0x8b8] sm:$0xff] %v5057_v48 }
 0x198   : > { %v12535_v46 = vld [vmem:[%s10187_s14 + $0x21b0] sm:$0xff]  ;;  %v9567_v52 = vld [vmem:[%s10187_s14 + $0x2998] sm:$0xff]  ;;  %v5081_v57 = vpack.c.bf16 %v9564_v51, %v12460_v9  ;;  %9560 = vst [vmem:[%s10210_s18 + $0x14b8] sm:$0xff] %v5065_v49 }
 0x199   : > { %v12538_v47 = vld [vmem:[%s10187_s14 + $0x9b0] sm:$0xff]  ;;  %v9570_v53 = vld [vmem:[%s10187_s14 + $0x1198] sm:$0xff]  ;;  %v5089_v58 = vpack.c.bf16 %v9567_v52, %v12463_v10  ;;  %9563 = vst [vmem:[%s10210_s18 + $0x20b8] sm:$0xff] %v5073_v50 }
 0x19a   : > { %v12550_v54 = vld [vmem:[%s10187_s14 + $0x31b0] sm:$0xff]  ;;  %v5097_v59 = vpack.c.bf16 %v9570_v53, %v12466_v11  ;;  %v9573_v60 = vld [vmem:[%s10187_s14 + $0x3998] sm:$0xff]  ;;  %9566 = vst [vmem:[%s10210_s18 + $0xc8] sm:$0xff] %v5081_v57 }
 0x19b   : > { %v12553_v55 = vld [vmem:[%s10187_s14 + $0x19b0] sm:$0xff]  ;;  %v9576_v61 = vld [vmem:[%s10187_s14 + $0x2198] sm:$0xff]  ;;  %v5105_v2 = vpack.c.bf16 %v9573_v60, %v12478_v18  ;;  %9569 = vst [vmem:[%s10210_s18 + $0xcc8] sm:$0xff] %v5089_v58 }
 0x19c   : > { %v12556_v56 = vld [vmem:[%s10187_s14 + $0x1b0] sm:$0xff]  ;;  %v9579_v62 = vld [vmem:[%s10187_s14 + $0x998] sm:$0xff]  ;;  %v5113_v3 = vpack.c.bf16 %v9576_v61, %v12481_v19  ;;  %9572 = vst [vmem:[%s10210_s18 + $0x18c8] sm:$0xff] %v5097_v59 }
 0x19d   : > { %v12568_v63 = vld [vmem:[%s10187_s14 + $0x41d0] sm:$0xff]  ;;  %v5121_v4 = vpack.c.bf16 %v9579_v62, %v12484_v20  ;;  %v9582_v5 = vld [vmem:[%s10187_s14 + $0x3198] sm:$0xff]  ;;  %9575 = vst [vmem:[%s10210_s18 + $0x4c8] sm:$0xff] %v5105_v2 }
 0x19e   : > { %v12571_v0 = vld [vmem:[%s10187_s14 + $0x29d0] sm:$0xff]  ;;  %v9585_v6 = vld [vmem:[%s10187_s14 + $0x1998] sm:$0xff]  ;;  %v5129_v11 = vpack.c.bf16 %v9582_v5, %v12496_v27  ;;  %9578 = vst [vmem:[%s10210_s18 + $0x10c8] sm:$0xff] %v5113_v3 }
 0x19f   : > { %v12574_v1 = vld [vmem:[%s10187_s14 + $0x11d0] sm:$0xff]  ;;  %v9588_v7 = vld [vmem:[%s10187_s14 + $0x198] sm:$0xff]  ;;  %v5137_v12 = vpack.c.bf16 %v9585_v6, %v12499_v28  ;;  %9581 = vst [vmem:[%s10210_s18 + $0x1cc8] sm:$0xff] %v5121_v4 }
 0x1a0   : > { %v12586_v8 = vld [vmem:[%s10187_s14 + $0x39d0] sm:$0xff]  ;;  %v5145_v13 = vpack.c.bf16 %v9588_v7, %v12502_v29  ;;  %v9591_v14 = vld [vmem:[%s10187_s14 + $0x41b8] sm:$0xff]  ;;  %9584 = vst [vmem:[%s10210_s18 + $0x8c8] sm:$0xff] %v5129_v11 }
 0x1a1   : > { %v12589_v9 = vld [vmem:[%s10187_s14 + $0x21d0] sm:$0xff]  ;;  %v9594_v15 = vld [vmem:[%s10187_s14 + $0x29b8] sm:$0xff]  ;;  %v5153_v20 = vpack.c.bf16 %v9591_v14, %v12514_v36  ;;  %9587 = vst [vmem:[%s10210_s18 + $0x14c8] sm:$0xff] %v5137_v12 }
 0x1a2   : > { %v12592_v10 = vld [vmem:[%s10187_s14 + $0x9d0] sm:$0xff]  ;;  %v9597_v16 = vld [vmem:[%s10187_s14 + $0x11b8] sm:$0xff]  ;;  %v5161_v21 = vpack.c.bf16 %v9594_v15, %v12517_v37  ;;  %9590 = vst [vmem:[%s10210_s18 + $0x20c8] sm:$0xff] %v5145_v13 }
 0x1a3   : > { %v12604_v17 = vld [vmem:[%s10187_s14 + $0x31d0] sm:$0xff]  ;;  %v5169_v22 = vpack.c.bf16 %v9597_v16, %v12520_v38  ;;  %v9600_v23 = vld [vmem:[%s10187_s14 + $0x39b8] sm:$0xff]  ;;  %9593 = vst [vmem:[%s10210_s18 + $0xd8] sm:$0xff] %v5153_v20 }
 0x1a4   : > { %v12607_v18 = vld [vmem:[%s10187_s14 + $0x19d0] sm:$0xff]  ;;  %v9603_v24 = vld [vmem:[%s10187_s14 + $0x21b8] sm:$0xff]  ;;  %v5177_v29 = vpack.c.bf16 %v9600_v23, %v12532_v45  ;;  %9596 = vst [vmem:[%s10210_s18 + $0xcd8] sm:$0xff] %v5161_v21 }
 0x1a5   : > { %v12610_v19 = vld [vmem:[%s10187_s14 + $0x1d0] sm:$0xff]  ;;  %v9606_v25 = vld [vmem:[%s10187_s14 + $0x9b8] sm:$0xff]  ;;  %v5185_v30 = vpack.c.bf16 %v9603_v24, %v12535_v46  ;;  %9599 = vst [vmem:[%s10210_s18 + $0x18d8] sm:$0xff] %v5169_v22 }
 0x1a6   : > { %v12622_v26 = vld [vmem:[%s10187_s14 + $0x41f0] sm:$0xff]  ;;  %v5193_v31 = vpack.c.bf16 %v9606_v25, %v12538_v47  ;;  %v9609_v32 = vld [vmem:[%s10187_s14 + $0x31b8] sm:$0xff]  ;;  %9602 = vst [vmem:[%s10210_s18 + $0x4d8] sm:$0xff] %v5177_v29 }
 0x1a7   : > { %v12625_v27 = vld [vmem:[%s10187_s14 + $0x29f0] sm:$0xff]  ;;  %v9612_v33 = vld [vmem:[%s10187_s14 + $0x19b8] sm:$0xff]  ;;  %v5201_v38 = vpack.c.bf16 %v9609_v32, %v12550_v54  ;;  %9605 = vst [vmem:[%s10210_s18 + $0x10d8] sm:$0xff] %v5185_v30 }
 0x1a8   : > { %v12628_v28 = vld [vmem:[%s10187_s14 + $0x11f0] sm:$0xff]  ;;  %v9615_v34 = vld [vmem:[%s10187_s14 + $0x1b8] sm:$0xff]  ;;  %v5209_v39 = vpack.c.bf16 %v9612_v33, %v12553_v55  ;;  %9608 = vst [vmem:[%s10210_s18 + $0x1cd8] sm:$0xff] %v5193_v31 }
 0x1a9   : > { %v12640_v35 = vld [vmem:[%s10187_s14 + $0x39f0] sm:$0xff]  ;;  %v5217_v40 = vpack.c.bf16 %v9615_v34, %v12556_v56  ;;  %v9618_v41 = vld [vmem:[%s10187_s14 + $0x41d8] sm:$0xff]  ;;  %9611 = vst [vmem:[%s10210_s18 + $0x8d8] sm:$0xff] %v5201_v38 }
 0x1aa   : > { %v12643_v36 = vld [vmem:[%s10187_s14 + $0x21f0] sm:$0xff]  ;;  %v9621_v42 = vld [vmem:[%s10187_s14 + $0x29d8] sm:$0xff]  ;;  %v5225_v47 = vpack.c.bf16 %v9618_v41, %v12568_v63  ;;  %9614 = vst [vmem:[%s10210_s18 + $0x14d8] sm:$0xff] %v5209_v39 }
 0x1ab   : > { %v12646_v37 = vld [vmem:[%s10187_s14 + $0x9f0] sm:$0xff]  ;;  %v9624_v43 = vld [vmem:[%s10187_s14 + $0x11d8] sm:$0xff]  ;;  %v5233_v48 = vpack.c.bf16 %v9621_v42, %v12571_v0  ;;  %9617 = vst [vmem:[%s10210_s18 + $0x20d8] sm:$0xff] %v5217_v40 }
 0x1ac   : > { %v12658_v44 = vld [vmem:[%s10187_s14 + $0x31f0] sm:$0xff]  ;;  %v5241_v49 = vpack.c.bf16 %v9624_v43, %v12574_v1  ;;  %v9627_v50 = vld [vmem:[%s10187_s14 + $0x39d8] sm:$0xff]  ;;  %9620 = vst [vmem:[%s10210_s18 + $0xe8] sm:$0xff] %v5225_v47 }
 0x1ad   : > { %v12661_v45 = vld [vmem:[%s10187_s14 + $0x19f0] sm:$0xff]  ;;  %v9630_v51 = vld [vmem:[%s10187_s14 + $0x21d8] sm:$0xff]  ;;  %v5249_v56 = vpack.c.bf16 %v9627_v50, %v12586_v8  ;;  %9623 = vst [vmem:[%s10210_s18 + $0xce8] sm:$0xff] %v5233_v48 }
 0x1ae   : > { %v12664_v46 = vld [vmem:[%s10187_s14 + $0x1f0] sm:$0xff]  ;;  %v9633_v52 = vld [vmem:[%s10187_s14 + $0x9d8] sm:$0xff]  ;;  %v5257_v57 = vpack.c.bf16 %v9630_v51, %v12589_v9  ;;  %9626 = vst [vmem:[%s10210_s18 + $0x18e8] sm:$0xff] %v5241_v49 }
 0x1af   : > { %v12676_v53 = vld [vmem:[%s10187_s14 + $0x4210] sm:$0xff]  ;;  %v5265_v58 = vpack.c.bf16 %v9633_v52, %v12592_v10  ;;  %v9636_v59 = vld [vmem:[%s10187_s14 + $0x31d8] sm:$0xff]  ;;  %9629 = vst [vmem:[%s10210_s18 + $0x4e8] sm:$0xff] %v5249_v56 }
 0x1b0   : > { %v12679_v54 = vld [vmem:[%s10187_s14 + $0x2a10] sm:$0xff]  ;;  %v9639_v60 = vld [vmem:[%s10187_s14 + $0x19d8] sm:$0xff]  ;;  %v5273_v1 = vpack.c.bf16 %v9636_v59, %v12604_v17  ;;  %9632 = vst [vmem:[%s10210_s18 + $0x10e8] sm:$0xff] %v5257_v57 }
 0x1b1   : > { %v12682_v55 = vld [vmem:[%s10187_s14 + $0x1210] sm:$0xff]  ;;  %v9642_v61 = vld [vmem:[%s10187_s14 + $0x1d8] sm:$0xff]  ;;  %v5281_v2 = vpack.c.bf16 %v9639_v60, %v12607_v18  ;;  %9635 = vst [vmem:[%s10210_s18 + $0x1ce8] sm:$0xff] %v5265_v58 }
 0x1b2   : > { %v12694_v62 = vld [vmem:[%s10187_s14 + $0x3a10] sm:$0xff]  ;;  %v5289_v3 = vpack.c.bf16 %v9642_v61, %v12610_v19  ;;  %v9645_v4 = vld [vmem:[%s10187_s14 + $0x41f8] sm:$0xff]  ;;  %9638 = vst [vmem:[%s10210_s18 + $0x8e8] sm:$0xff] %v5273_v1 }
 0x1b3   : > { %v12697_v63 = vld [vmem:[%s10187_s14 + $0x2210] sm:$0xff]  ;;  %v9648_v5 = vld [vmem:[%s10187_s14 + $0x29f8] sm:$0xff]  ;;  %v5297_v10 = vpack.c.bf16 %v9645_v4, %v12622_v26  ;;  %9641 = vst [vmem:[%s10210_s18 + $0x14e8] sm:$0xff] %v5281_v2 }
 0x1b4   : > { %v12700_v0 = vld [vmem:[%s10187_s14 + $0xa10] sm:$0xff]  ;;  %v9651_v6 = vld [vmem:[%s10187_s14 + $0x11f8] sm:$0xff]  ;;  %v5305_v11 = vpack.c.bf16 %v9648_v5, %v12625_v27  ;;  %9644 = vst [vmem:[%s10210_s18 + $0x20e8] sm:$0xff] %v5289_v3 }
 0x1b5   : > { %v12712_v7 = vld [vmem:[%s10187_s14 + $0x3210] sm:$0xff]  ;;  %v5313_v12 = vpack.c.bf16 %v9651_v6, %v12628_v28  ;;  %v9654_v13 = vld [vmem:[%s10187_s14 + $0x39f8] sm:$0xff]  ;;  %9647 = vst [vmem:[%s10210_s18 + $0xf8] sm:$0xff] %v5297_v10 }
 0x1b6   : > { %v12715_v8 = vld [vmem:[%s10187_s14 + $0x1a10] sm:$0xff]  ;;  %v9657_v14 = vld [vmem:[%s10187_s14 + $0x21f8] sm:$0xff]  ;;  %v5321_v19 = vpack.c.bf16 %v9654_v13, %v12640_v35  ;;  %9650 = vst [vmem:[%s10210_s18 + $0xcf8] sm:$0xff] %v5305_v11 }
 0x1b7   : > { %v12718_v9 = vld [vmem:[%s10187_s14 + $0x210] sm:$0xff]  ;;  %v9660_v15 = vld [vmem:[%s10187_s14 + $0x9f8] sm:$0xff]  ;;  %v5329_v20 = vpack.c.bf16 %v9657_v14, %v12643_v36  ;;  %9653 = vst [vmem:[%s10210_s18 + $0x18f8] sm:$0xff] %v5313_v12 }
 0x1b8   : > { %v12730_v16 = vld [vmem:[%s10187_s14 + $0x4230] sm:$0xff]  ;;  %v5337_v21 = vpack.c.bf16 %v9660_v15, %v12646_v37  ;;  %v9663_v22 = vld [vmem:[%s10187_s14 + $0x31f8] sm:$0xff]  ;;  %9656 = vst [vmem:[%s10210_s18 + $0x4f8] sm:$0xff] %v5321_v19 }
 0x1b9   : > { %v12733_v17 = vld [vmem:[%s10187_s14 + $0x2a30] sm:$0xff]  ;;  %v9666_v23 = vld [vmem:[%s10187_s14 + $0x19f8] sm:$0xff]  ;;  %v5345_v28 = vpack.c.bf16 %v9663_v22, %v12658_v44  ;;  %9659 = vst [vmem:[%s10210_s18 + $0x10f8] sm:$0xff] %v5329_v20 }
 0x1ba   : > { %v12736_v18 = vld [vmem:[%s10187_s14 + $0x1230] sm:$0xff]  ;;  %v9669_v24 = vld [vmem:[%s10187_s14 + $0x1f8] sm:$0xff]  ;;  %v5353_v29 = vpack.c.bf16 %v9666_v23, %v12661_v45  ;;  %9662 = vst [vmem:[%s10210_s18 + $0x1cf8] sm:$0xff] %v5337_v21 }
 0x1bb   : > { %v12748_v25 = vld [vmem:[%s10187_s14 + $0x3a30] sm:$0xff]  ;;  %v5361_v30 = vpack.c.bf16 %v9669_v24, %v12664_v46  ;;  %v9672_v31 = vld [vmem:[%s10187_s14 + $0x4218] sm:$0xff]  ;;  %9665 = vst [vmem:[%s10210_s18 + $0x8f8] sm:$0xff] %v5345_v28 }
 0x1bc   : > { %v12751_v26 = vld [vmem:[%s10187_s14 + $0x2230] sm:$0xff]  ;;  %v9675_v32 = vld [vmem:[%s10187_s14 + $0x2a18] sm:$0xff]  ;;  %v5369_v37 = vpack.c.bf16 %v9672_v31, %v12676_v53  ;;  %9668 = vst [vmem:[%s10210_s18 + $0x14f8] sm:$0xff] %v5353_v29 }
 0x1bd   : > { %v12754_v27 = vld [vmem:[%s10187_s14 + $0xa30] sm:$0xff]  ;;  %v9678_v33 = vld [vmem:[%s10187_s14 + $0x1218] sm:$0xff]  ;;  %v5377_v38 = vpack.c.bf16 %v9675_v32, %v12679_v54  ;;  %9671 = vst [vmem:[%s10210_s18 + $0x20f8] sm:$0xff] %v5361_v30 }
 0x1be   : > { %v12766_v34 = vld [vmem:[%s10187_s14 + $0x3230] sm:$0xff]  ;;  %v5385_v39 = vpack.c.bf16 %v9678_v33, %v12682_v55  ;;  %v9681_v40 = vld [vmem:[%s10187_s14 + $0x3a18] sm:$0xff]  ;;  %9674 = vst [vmem:[%s10210_s18 + $0x108] sm:$0xff] %v5369_v37 }
 0x1bf   : > { %v12769_v35 = vld [vmem:[%s10187_s14 + $0x1a30] sm:$0xff]  ;;  %v9684_v41 = vld [vmem:[%s10187_s14 + $0x2218] sm:$0xff]  ;;  %v5393_v46 = vpack.c.bf16 %v9681_v40, %v12694_v62  ;;  %9677 = vst [vmem:[%s10210_s18 + $0xd08] sm:$0xff] %v5377_v38 }
 0x1c0   : > { %v12772_v36 = vld [vmem:[%s10187_s14 + $0x230] sm:$0xff]  ;;  %v9687_v42 = vld [vmem:[%s10187_s14 + $0xa18] sm:$0xff]  ;;  %v5401_v47 = vpack.c.bf16 %v9684_v41, %v12697_v63  ;;  %9680 = vst [vmem:[%s10210_s18 + $0x1908] sm:$0xff] %v5385_v39 }
 0x1c1   : > { %v12784_v43 = vld [vmem:[%s10187_s14 + $0x4250] sm:$0xff]  ;;  %v5409_v48 = vpack.c.bf16 %v9687_v42, %v12700_v0  ;;  %v9690_v49 = vld [vmem:[%s10187_s14 + $0x3218] sm:$0xff]  ;;  %9683 = vst [vmem:[%s10210_s18 + $0x508] sm:$0xff] %v5393_v46 }
 0x1c2   : > { %v12787_v44 = vld [vmem:[%s10187_s14 + $0x2a50] sm:$0xff]  ;;  %v9693_v50 = vld [vmem:[%s10187_s14 + $0x1a18] sm:$0xff]  ;;  %v5417_v55 = vpack.c.bf16 %v9690_v49, %v12712_v7  ;;  %9686 = vst [vmem:[%s10210_s18 + $0x1108] sm:$0xff] %v5401_v47 }
 0x1c3   : > { %v12790_v45 = vld [vmem:[%s10187_s14 + $0x1250] sm:$0xff]  ;;  %v9696_v51 = vld [vmem:[%s10187_s14 + $0x218] sm:$0xff]  ;;  %v5425_v56 = vpack.c.bf16 %v9693_v50, %v12715_v8  ;;  %9689 = vst [vmem:[%s10210_s18 + $0x1d08] sm:$0xff] %v5409_v48 }
 0x1c4   : > { %v12802_v52 = vld [vmem:[%s10187_s14 + $0x3a50] sm:$0xff]  ;;  %v5433_v57 = vpack.c.bf16 %v9696_v51, %v12718_v9  ;;  %v9699_v58 = vld [vmem:[%s10187_s14 + $0x4238] sm:$0xff]  ;;  %9692 = vst [vmem:[%s10210_s18 + $0x908] sm:$0xff] %v5417_v55 }
 0x1c5   : > { %v12805_v53 = vld [vmem:[%s10187_s14 + $0x2250] sm:$0xff]  ;;  %v9702_v59 = vld [vmem:[%s10187_s14 + $0x2a38] sm:$0xff]  ;;  %v5441_v0 = vpack.c.bf16 %v9699_v58, %v12730_v16  ;;  %9695 = vst [vmem:[%s10210_s18 + $0x1508] sm:$0xff] %v5425_v56 }
 0x1c6   : > { %v12808_v54 = vld [vmem:[%s10187_s14 + $0xa50] sm:$0xff]  ;;  %v9705_v60 = vld [vmem:[%s10187_s14 + $0x1238] sm:$0xff]  ;;  %v5449_v1 = vpack.c.bf16 %v9702_v59, %v12733_v17  ;;  %9698 = vst [vmem:[%s10210_s18 + $0x2108] sm:$0xff] %v5433_v57 }
 0x1c7   : > { %v12820_v61 = vld [vmem:[%s10187_s14 + $0x3250] sm:$0xff]  ;;  %v5457_v2 = vpack.c.bf16 %v9705_v60, %v12736_v18  ;;  %v9708_v3 = vld [vmem:[%s10187_s14 + $0x3a38] sm:$0xff]  ;;  %9701 = vst [vmem:[%s10210_s18 + $0x118] sm:$0xff] %v5441_v0 }
 0x1c8   : > { %v12823_v62 = vld [vmem:[%s10187_s14 + $0x1a50] sm:$0xff]  ;;  %v9711_v4 = vld [vmem:[%s10187_s14 + $0x2238] sm:$0xff]  ;;  %v5465_v9 = vpack.c.bf16 %v9708_v3, %v12748_v25  ;;  %9704 = vst [vmem:[%s10210_s18 + $0xd18] sm:$0xff] %v5449_v1 }
 0x1c9   : > { %v12826_v63 = vld [vmem:[%s10187_s14 + $0x250] sm:$0xff]  ;;  %v9714_v5 = vld [vmem:[%s10187_s14 + $0xa38] sm:$0xff]  ;;  %v5473_v10 = vpack.c.bf16 %v9711_v4, %v12751_v26  ;;  %9707 = vst [vmem:[%s10210_s18 + $0x1918] sm:$0xff] %v5457_v2 }
 0x1ca   : > { %v12838_v6 = vld [vmem:[%s10187_s14 + $0x4270] sm:$0xff]  ;;  %v5481_v11 = vpack.c.bf16 %v9714_v5, %v12754_v27  ;;  %v9717_v12 = vld [vmem:[%s10187_s14 + $0x3238] sm:$0xff]  ;;  %9710 = vst [vmem:[%s10210_s18 + $0x518] sm:$0xff] %v5465_v9 }
 0x1cb   : > { %v12841_v7 = vld [vmem:[%s10187_s14 + $0x2a70] sm:$0xff]  ;;  %v9720_v13 = vld [vmem:[%s10187_s14 + $0x1a38] sm:$0xff]  ;;  %v5489_v18 = vpack.c.bf16 %v9717_v12, %v12766_v34  ;;  %9713 = vst [vmem:[%s10210_s18 + $0x1118] sm:$0xff] %v5473_v10 }
 0x1cc   : > { %v12844_v8 = vld [vmem:[%s10187_s14 + $0x1270] sm:$0xff]  ;;  %v9723_v14 = vld [vmem:[%s10187_s14 + $0x238] sm:$0xff]  ;;  %v5497_v19 = vpack.c.bf16 %v9720_v13, %v12769_v35  ;;  %9716 = vst [vmem:[%s10210_s18 + $0x1d18] sm:$0xff] %v5481_v11 }
 0x1cd   : > { %v12856_v15 = vld [vmem:[%s10187_s14 + $0x3a70] sm:$0xff]  ;;  %v5505_v20 = vpack.c.bf16 %v9723_v14, %v12772_v36  ;;  %v9726_v21 = vld [vmem:[%s10187_s14 + $0x4258] sm:$0xff]  ;;  %9719 = vst [vmem:[%s10210_s18 + $0x918] sm:$0xff] %v5489_v18 }
 0x1ce   : > { %v12859_v16 = vld [vmem:[%s10187_s14 + $0x2270] sm:$0xff]  ;;  %v9729_v22 = vld [vmem:[%s10187_s14 + $0x2a58] sm:$0xff]  ;;  %v5513_v27 = vpack.c.bf16 %v9726_v21, %v12784_v43  ;;  %9722 = vst [vmem:[%s10210_s18 + $0x1518] sm:$0xff] %v5497_v19 }
 0x1cf   : > { %v12862_v17 = vld [vmem:[%s10187_s14 + $0xa70] sm:$0xff]  ;;  %v9732_v23 = vld [vmem:[%s10187_s14 + $0x1258] sm:$0xff]  ;;  %v5521_v28 = vpack.c.bf16 %v9729_v22, %v12787_v44  ;;  %9725 = vst [vmem:[%s10210_s18 + $0x2118] sm:$0xff] %v5505_v20 }
 0x1d0   : > { %v12874_v24 = vld [vmem:[%s10187_s14 + $0x3270] sm:$0xff]  ;;  %v5529_v29 = vpack.c.bf16 %v9732_v23, %v12790_v45  ;;  %v9735_v30 = vld [vmem:[%s10187_s14 + $0x3a58] sm:$0xff]  ;;  %9728 = vst [vmem:[%s10210_s18 + $0x128] sm:$0xff] %v5513_v27 }
 0x1d1   : > { %v12877_v25 = vld [vmem:[%s10187_s14 + $0x1a70] sm:$0xff]  ;;  %v9738_v31 = vld [vmem:[%s10187_s14 + $0x2258] sm:$0xff]  ;;  %v5537_v36 = vpack.c.bf16 %v9735_v30, %v12802_v52  ;;  %9731 = vst [vmem:[%s10210_s18 + $0xd28] sm:$0xff] %v5521_v28 }
 0x1d2   : > { %v12880_v26 = vld [vmem:[%s10187_s14 + $0x270] sm:$0xff]  ;;  %v9741_v32 = vld [vmem:[%s10187_s14 + $0xa58] sm:$0xff]  ;;  %v5545_v37 = vpack.c.bf16 %v9738_v31, %v12805_v53  ;;  %9734 = vst [vmem:[%s10210_s18 + $0x1928] sm:$0xff] %v5529_v29 }
 0x1d3   : > { %v12892_v33 = vld [vmem:[%s10187_s14 + $0x4290] sm:$0xff]  ;;  %v5553_v38 = vpack.c.bf16 %v9741_v32, %v12808_v54  ;;  %v9744_v39 = vld [vmem:[%s10187_s14 + $0x3258] sm:$0xff]  ;;  %9737 = vst [vmem:[%s10210_s18 + $0x528] sm:$0xff] %v5537_v36 }
 0x1d4   : > { %v12895_v34 = vld [vmem:[%s10187_s14 + $0x2a90] sm:$0xff]  ;;  %v9747_v40 = vld [vmem:[%s10187_s14 + $0x1a58] sm:$0xff]  ;;  %v5561_v45 = vpack.c.bf16 %v9744_v39, %v12820_v61  ;;  %9740 = vst [vmem:[%s10210_s18 + $0x1128] sm:$0xff] %v5545_v37 }
 0x1d5   : > { %v12898_v35 = vld [vmem:[%s10187_s14 + $0x1290] sm:$0xff]  ;;  %v9750_v41 = vld [vmem:[%s10187_s14 + $0x258] sm:$0xff]  ;;  %v5569_v46 = vpack.c.bf16 %v9747_v40, %v12823_v62  ;;  %9743 = vst [vmem:[%s10210_s18 + $0x1d28] sm:$0xff] %v5553_v38 }
 0x1d6   : > { %v12910_v42 = vld [vmem:[%s10187_s14 + $0x3a90] sm:$0xff]  ;;  %v5577_v47 = vpack.c.bf16 %v9750_v41, %v12826_v63  ;;  %v9753_v48 = vld [vmem:[%s10187_s14 + $0x4278] sm:$0xff]  ;;  %9746 = vst [vmem:[%s10210_s18 + $0x928] sm:$0xff] %v5561_v45 }
 0x1d7   : > { %v12913_v43 = vld [vmem:[%s10187_s14 + $0x2290] sm:$0xff]  ;;  %v9756_v49 = vld [vmem:[%s10187_s14 + $0x2a78] sm:$0xff]  ;;  %v5585_v54 = vpack.c.bf16 %v9753_v48, %v12838_v6  ;;  %9749 = vst [vmem:[%s10210_s18 + $0x1528] sm:$0xff] %v5569_v46 }
 0x1d8   : > { %v12916_v44 = vld [vmem:[%s10187_s14 + $0xa90] sm:$0xff]  ;;  %v9759_v50 = vld [vmem:[%s10187_s14 + $0x1278] sm:$0xff]  ;;  %v5593_v55 = vpack.c.bf16 %v9756_v49, %v12841_v7  ;;  %9752 = vst [vmem:[%s10210_s18 + $0x2128] sm:$0xff] %v5577_v47 }
 0x1d9   : > { %v12928_v51 = vld [vmem:[%s10187_s14 + $0x3290] sm:$0xff]  ;;  %v5601_v56 = vpack.c.bf16 %v9759_v50, %v12844_v8  ;;  %v9762_v57 = vld [vmem:[%s10187_s14 + $0x3a78] sm:$0xff]  ;;  %9755 = vst [vmem:[%s10210_s18 + $0x138] sm:$0xff] %v5585_v54 }
 0x1da   : > { %v12931_v52 = vld [vmem:[%s10187_s14 + $0x1a90] sm:$0xff]  ;;  %v9765_v58 = vld [vmem:[%s10187_s14 + $0x2278] sm:$0xff]  ;;  %v5609_v63 = vpack.c.bf16 %v9762_v57, %v12856_v15  ;;  %9758 = vst [vmem:[%s10210_s18 + $0xd38] sm:$0xff] %v5593_v55 }
 0x1db   : > { %v12934_v53 = vld [vmem:[%s10187_s14 + $0x290] sm:$0xff]  ;;  %v9768_v59 = vld [vmem:[%s10187_s14 + $0xa78] sm:$0xff]  ;;  %v5617_v0 = vpack.c.bf16 %v9765_v58, %v12859_v16  ;;  %9761 = vst [vmem:[%s10210_s18 + $0x1938] sm:$0xff] %v5601_v56 }
 0x1dc   : > { %v12946_v60 = vld [vmem:[%s10187_s14 + $0x42b0] sm:$0xff]  ;;  %v5625_v1 = vpack.c.bf16 %v9768_v59, %v12862_v17  ;;  %v9771_v2 = vld [vmem:[%s10187_s14 + $0x3278] sm:$0xff]  ;;  %9764 = vst [vmem:[%s10210_s18 + $0x538] sm:$0xff] %v5609_v63 }
 0x1dd   : > { %v12949_v61 = vld [vmem:[%s10187_s14 + $0x2ab0] sm:$0xff]  ;;  %v9774_v3 = vld [vmem:[%s10187_s14 + $0x1a78] sm:$0xff]  ;;  %v5633_v8 = vpack.c.bf16 %v9771_v2, %v12874_v24  ;;  %9767 = vst [vmem:[%s10210_s18 + $0x1138] sm:$0xff] %v5617_v0 }
 0x1de   : > { %v12952_v62 = vld [vmem:[%s10187_s14 + $0x12b0] sm:$0xff]  ;;  %v9777_v4 = vld [vmem:[%s10187_s14 + $0x278] sm:$0xff]  ;;  %v5641_v9 = vpack.c.bf16 %v9774_v3, %v12877_v25  ;;  %9770 = vst [vmem:[%s10210_s18 + $0x1d38] sm:$0xff] %v5625_v1 }
 0x1df   : > { %v12964_v5 = vld [vmem:[%s10187_s14 + $0x3ab0] sm:$0xff]  ;;  %v5649_v10 = vpack.c.bf16 %v9777_v4, %v12880_v26  ;;  %v9780_v11 = vld [vmem:[%s10187_s14 + $0x4298] sm:$0xff]  ;;  %9773 = vst [vmem:[%s10210_s18 + $0x938] sm:$0xff] %v5633_v8 }
 0x1e0   : > { %v12967_v6 = vld [vmem:[%s10187_s14 + $0x22b0] sm:$0xff]  ;;  %v9783_v12 = vld [vmem:[%s10187_s14 + $0x2a98] sm:$0xff]  ;;  %v5657_v17 = vpack.c.bf16 %v9780_v11, %v12892_v33  ;;  %9776 = vst [vmem:[%s10210_s18 + $0x1538] sm:$0xff] %v5641_v9 }
 0x1e1   : > { %v12970_v7 = vld [vmem:[%s10187_s14 + $0xab0] sm:$0xff]  ;;  %v9786_v13 = vld [vmem:[%s10187_s14 + $0x1298] sm:$0xff]  ;;  %v5665_v18 = vpack.c.bf16 %v9783_v12, %v12895_v34  ;;  %9779 = vst [vmem:[%s10210_s18 + $0x2138] sm:$0xff] %v5649_v10 }
 0x1e2   : > { %v12982_v14 = vld [vmem:[%s10187_s14 + $0x32b0] sm:$0xff]  ;;  %v5673_v19 = vpack.c.bf16 %v9786_v13, %v12898_v35  ;;  %v9789_v20 = vld [vmem:[%s10187_s14 + $0x3a98] sm:$0xff]  ;;  %9782 = vst [vmem:[%s10210_s18 + $0x148] sm:$0xff] %v5657_v17 }
 0x1e3   : > { %v12985_v15 = vld [vmem:[%s10187_s14 + $0x1ab0] sm:$0xff]  ;;  %v9792_v21 = vld [vmem:[%s10187_s14 + $0x2298] sm:$0xff]  ;;  %v5681_v26 = vpack.c.bf16 %v9789_v20, %v12910_v42  ;;  %9785 = vst [vmem:[%s10210_s18 + $0xd48] sm:$0xff] %v5665_v18 }
 0x1e4   : > { %v12988_v16 = vld [vmem:[%s10187_s14 + $0x2b0] sm:$0xff]  ;;  %v9795_v22 = vld [vmem:[%s10187_s14 + $0xa98] sm:$0xff]  ;;  %v5689_v27 = vpack.c.bf16 %v9792_v21, %v12913_v43  ;;  %9788 = vst [vmem:[%s10210_s18 + $0x1948] sm:$0xff] %v5673_v19 }
 0x1e5   : > { %v13000_v23 = vld [vmem:[%s10187_s14 + $0x42d0] sm:$0xff]  ;;  %v5697_v28 = vpack.c.bf16 %v9795_v22, %v12916_v44  ;;  %v9798_v29 = vld [vmem:[%s10187_s14 + $0x3298] sm:$0xff]  ;;  %9791 = vst [vmem:[%s10210_s18 + $0x548] sm:$0xff] %v5681_v26 }
 0x1e6   : > { %v13003_v24 = vld [vmem:[%s10187_s14 + $0x2ad0] sm:$0xff]  ;;  %v9801_v30 = vld [vmem:[%s10187_s14 + $0x1a98] sm:$0xff]  ;;  %v5705_v35 = vpack.c.bf16 %v9798_v29, %v12928_v51  ;;  %9794 = vst [vmem:[%s10210_s18 + $0x1148] sm:$0xff] %v5689_v27 }
 0x1e7   : > { %v13006_v25 = vld [vmem:[%s10187_s14 + $0x12d0] sm:$0xff]  ;;  %v9804_v31 = vld [vmem:[%s10187_s14 + $0x298] sm:$0xff]  ;;  %v5713_v36 = vpack.c.bf16 %v9801_v30, %v12931_v52  ;;  %9797 = vst [vmem:[%s10210_s18 + $0x1d48] sm:$0xff] %v5697_v28 }
 0x1e8   : > { %v13018_v32 = vld [vmem:[%s10187_s14 + $0x3ad0] sm:$0xff]  ;;  %v5721_v37 = vpack.c.bf16 %v9804_v31, %v12934_v53  ;;  %v9807_v38 = vld [vmem:[%s10187_s14 + $0x42b8] sm:$0xff]  ;;  %9800 = vst [vmem:[%s10210_s18 + $0x948] sm:$0xff] %v5705_v35 }
 0x1e9   : > { %v13021_v33 = vld [vmem:[%s10187_s14 + $0x22d0] sm:$0xff]  ;;  %v9810_v39 = vld [vmem:[%s10187_s14 + $0x2ab8] sm:$0xff]  ;;  %v5729_v44 = vpack.c.bf16 %v9807_v38, %v12946_v60  ;;  %9803 = vst [vmem:[%s10210_s18 + $0x1548] sm:$0xff] %v5713_v36 }
 0x1ea   : > { %v13024_v34 = vld [vmem:[%s10187_s14 + $0xad0] sm:$0xff]  ;;  %v9813_v40 = vld [vmem:[%s10187_s14 + $0x12b8] sm:$0xff]  ;;  %v5737_v45 = vpack.c.bf16 %v9810_v39, %v12949_v61  ;;  %9806 = vst [vmem:[%s10210_s18 + $0x2148] sm:$0xff] %v5721_v37 }
 0x1eb   : > { %v13036_v41 = vld [vmem:[%s10187_s14 + $0x32d0] sm:$0xff]  ;;  %v5745_v46 = vpack.c.bf16 %v9813_v40, %v12952_v62  ;;  %v9816_v47 = vld [vmem:[%s10187_s14 + $0x3ab8] sm:$0xff]  ;;  %9809 = vst [vmem:[%s10210_s18 + $0x158] sm:$0xff] %v5729_v44 }
 0x1ec   : > { %v13039_v42 = vld [vmem:[%s10187_s14 + $0x1ad0] sm:$0xff]  ;;  %v9819_v48 = vld [vmem:[%s10187_s14 + $0x22b8] sm:$0xff]  ;;  %v5753_v53 = vpack.c.bf16 %v9816_v47, %v12964_v5  ;;  %9812 = vst [vmem:[%s10210_s18 + $0xd58] sm:$0xff] %v5737_v45 }
 0x1ed   : > { %v13042_v43 = vld [vmem:[%s10187_s14 + $0x2d0] sm:$0xff]  ;;  %v9822_v49 = vld [vmem:[%s10187_s14 + $0xab8] sm:$0xff]  ;;  %v5761_v54 = vpack.c.bf16 %v9819_v48, %v12967_v6  ;;  %9815 = vst [vmem:[%s10210_s18 + $0x1958] sm:$0xff] %v5745_v46 }
 0x1ee   : > { %v13054_v50 = vld [vmem:[%s10187_s14 + $0x42f0] sm:$0xff]  ;;  %v5769_v55 = vpack.c.bf16 %v9822_v49, %v12970_v7  ;;  %v9825_v56 = vld [vmem:[%s10187_s14 + $0x32b8] sm:$0xff]  ;;  %9818 = vst [vmem:[%s10210_s18 + $0x558] sm:$0xff] %v5753_v53 }
 0x1ef   : > { %v13057_v51 = vld [vmem:[%s10187_s14 + $0x2af0] sm:$0xff]  ;;  %v9828_v57 = vld [vmem:[%s10187_s14 + $0x1ab8] sm:$0xff]  ;;  %v5777_v62 = vpack.c.bf16 %v9825_v56, %v12982_v14  ;;  %9821 = vst [vmem:[%s10210_s18 + $0x1158] sm:$0xff] %v5761_v54 }
 0x1f0   : > { %v13060_v52 = vld [vmem:[%s10187_s14 + $0x12f0] sm:$0xff]  ;;  %v9831_v58 = vld [vmem:[%s10187_s14 + $0x2b8] sm:$0xff]  ;;  %v5785_v63 = vpack.c.bf16 %v9828_v57, %v12985_v15  ;;  %9824 = vst [vmem:[%s10210_s18 + $0x1d58] sm:$0xff] %v5769_v55 }
 0x1f1   : > { %v13072_v59 = vld [vmem:[%s10187_s14 + $0x3af0] sm:$0xff]  ;;  %v5793_v0 = vpack.c.bf16 %v9831_v58, %v12988_v16  ;;  %v9834_v1 = vld [vmem:[%s10187_s14 + $0x42d8] sm:$0xff]  ;;  %9827 = vst [vmem:[%s10210_s18 + $0x958] sm:$0xff] %v5777_v62 }
 0x1f2   : > { %v13075_v60 = vld [vmem:[%s10187_s14 + $0x22f0] sm:$0xff]  ;;  %v9837_v2 = vld [vmem:[%s10187_s14 + $0x2ad8] sm:$0xff]  ;;  %v5801_v7 = vpack.c.bf16 %v9834_v1, %v13000_v23  ;;  %9830 = vst [vmem:[%s10210_s18 + $0x1558] sm:$0xff] %v5785_v63 }
 0x1f3   : > { %v13078_v61 = vld [vmem:[%s10187_s14 + $0xaf0] sm:$0xff]  ;;  %v9840_v3 = vld [vmem:[%s10187_s14 + $0x12d8] sm:$0xff]  ;;  %v5809_v8 = vpack.c.bf16 %v9837_v2, %v13003_v24  ;;  %9833 = vst [vmem:[%s10210_s18 + $0x2158] sm:$0xff] %v5793_v0 }
 0x1f4   : > { %v13090_v4 = vld [vmem:[%s10187_s14 + $0x32f0] sm:$0xff]  ;;  %v5817_v9 = vpack.c.bf16 %v9840_v3, %v13006_v25  ;;  %v9843_v10 = vld [vmem:[%s10187_s14 + $0x3ad8] sm:$0xff]  ;;  %9836 = vst [vmem:[%s10210_s18 + $0x168] sm:$0xff] %v5801_v7 }
 0x1f5   : > { %v13093_v5 = vld [vmem:[%s10187_s14 + $0x1af0] sm:$0xff]  ;;  %v9846_v11 = vld [vmem:[%s10187_s14 + $0x22d8] sm:$0xff]  ;;  %v5825_v16 = vpack.c.bf16 %v9843_v10, %v13018_v32  ;;  %9839 = vst [vmem:[%s10210_s18 + $0xd68] sm:$0xff] %v5809_v8 }
 0x1f6   : > { %v13096_v6 = vld [vmem:[%s10187_s14 + $0x2f0] sm:$0xff]  ;;  %v9849_v12 = vld [vmem:[%s10187_s14 + $0xad8] sm:$0xff]  ;;  %v5833_v17 = vpack.c.bf16 %v9846_v11, %v13021_v33  ;;  %9842 = vst [vmem:[%s10210_s18 + $0x1968] sm:$0xff] %v5817_v9 }
 0x1f7   : > { %v13108_v13 = vld [vmem:[%s10187_s14 + $0x4310] sm:$0xff]  ;;  %v5841_v18 = vpack.c.bf16 %v9849_v12, %v13024_v34  ;;  %v9852_v19 = vld [vmem:[%s10187_s14 + $0x32d8] sm:$0xff]  ;;  %9845 = vst [vmem:[%s10210_s18 + $0x568] sm:$0xff] %v5825_v16 }
 0x1f8   : > { %v13111_v14 = vld [vmem:[%s10187_s14 + $0x2b10] sm:$0xff]  ;;  %v9855_v20 = vld [vmem:[%s10187_s14 + $0x1ad8] sm:$0xff]  ;;  %v5849_v25 = vpack.c.bf16 %v9852_v19, %v13036_v41  ;;  %9848 = vst [vmem:[%s10210_s18 + $0x1168] sm:$0xff] %v5833_v17 }
 0x1f9   : > { %v13114_v15 = vld [vmem:[%s10187_s14 + $0x1310] sm:$0xff]  ;;  %v9858_v21 = vld [vmem:[%s10187_s14 + $0x2d8] sm:$0xff]  ;;  %v5857_v26 = vpack.c.bf16 %v9855_v20, %v13039_v42  ;;  %9851 = vst [vmem:[%s10210_s18 + $0x1d68] sm:$0xff] %v5841_v18 }
 0x1fa   : > { %v13126_v22 = vld [vmem:[%s10187_s14 + $0x3b10] sm:$0xff]  ;;  %v5865_v27 = vpack.c.bf16 %v9858_v21, %v13042_v43  ;;  %v9861_v28 = vld [vmem:[%s10187_s14 + $0x42f8] sm:$0xff]  ;;  %9854 = vst [vmem:[%s10210_s18 + $0x968] sm:$0xff] %v5849_v25 }
 0x1fb   : > { %v13129_v23 = vld [vmem:[%s10187_s14 + $0x2310] sm:$0xff]  ;;  %v9864_v29 = vld [vmem:[%s10187_s14 + $0x2af8] sm:$0xff]  ;;  %v5873_v34 = vpack.c.bf16 %v9861_v28, %v13054_v50  ;;  %9857 = vst [vmem:[%s10210_s18 + $0x1568] sm:$0xff] %v5857_v26 }
 0x1fc   : > { %v13132_v24 = vld [vmem:[%s10187_s14 + $0xb10] sm:$0xff]  ;;  %v9867_v30 = vld [vmem:[%s10187_s14 + $0x12f8] sm:$0xff]  ;;  %v5881_v35 = vpack.c.bf16 %v9864_v29, %v13057_v51  ;;  %9860 = vst [vmem:[%s10210_s18 + $0x2168] sm:$0xff] %v5865_v27 }
 0x1fd   : > { %v13144_v31 = vld [vmem:[%s10187_s14 + $0x3310] sm:$0xff]  ;;  %v5889_v36 = vpack.c.bf16 %v9867_v30, %v13060_v52  ;;  %v9870_v37 = vld [vmem:[%s10187_s14 + $0x3af8] sm:$0xff]  ;;  %9863 = vst [vmem:[%s10210_s18 + $0x178] sm:$0xff] %v5873_v34 }
 0x1fe   : > { %v13147_v32 = vld [vmem:[%s10187_s14 + $0x1b10] sm:$0xff]  ;;  %v9873_v38 = vld [vmem:[%s10187_s14 + $0x22f8] sm:$0xff]  ;;  %v5897_v43 = vpack.c.bf16 %v9870_v37, %v13072_v59  ;;  %9866 = vst [vmem:[%s10210_s18 + $0xd78] sm:$0xff] %v5881_v35 }
 0x1ff   : > { %v13150_v33 = vld [vmem:[%s10187_s14 + $0x310] sm:$0xff]  ;;  %v9876_v39 = vld [vmem:[%s10187_s14 + $0xaf8] sm:$0xff]  ;;  %v5905_v44 = vpack.c.bf16 %v9873_v38, %v13075_v60  ;;  %9869 = vst [vmem:[%s10210_s18 + $0x1978] sm:$0xff] %v5889_v36 }
 0x200   : > { %v13162_v40 = vld [vmem:[%s10187_s14 + $0x4330] sm:$0xff]  ;;  %v5913_v45 = vpack.c.bf16 %v9876_v39, %v13078_v61  ;;  %v9879_v46 = vld [vmem:[%s10187_s14 + $0x32f8] sm:$0xff]  ;;  %9872 = vst [vmem:[%s10210_s18 + $0x578] sm:$0xff] %v5897_v43 }
 0x201   : > { %v13165_v41 = vld [vmem:[%s10187_s14 + $0x2b30] sm:$0xff]  ;;  %v9882_v47 = vld [vmem:[%s10187_s14 + $0x1af8] sm:$0xff]  ;;  %v5921_v52 = vpack.c.bf16 %v9879_v46, %v13090_v4  ;;  %9875 = vst [vmem:[%s10210_s18 + $0x1178] sm:$0xff] %v5905_v44 }
 0x202   : > { %v13168_v42 = vld [vmem:[%s10187_s14 + $0x1330] sm:$0xff]  ;;  %v9885_v48 = vld [vmem:[%s10187_s14 + $0x2f8] sm:$0xff]  ;;  %v5929_v53 = vpack.c.bf16 %v9882_v47, %v13093_v5  ;;  %9878 = vst [vmem:[%s10210_s18 + $0x1d78] sm:$0xff] %v5913_v45 }
 0x203   : > { %v13180_v49 = vld [vmem:[%s10187_s14 + $0x3b30] sm:$0xff]  ;;  %v5937_v54 = vpack.c.bf16 %v9885_v48, %v13096_v6  ;;  %v9888_v55 = vld [vmem:[%s10187_s14 + $0x4318] sm:$0xff]  ;;  %9881 = vst [vmem:[%s10210_s18 + $0x978] sm:$0xff] %v5921_v52 }
 0x204   : > { %v13183_v50 = vld [vmem:[%s10187_s14 + $0x2330] sm:$0xff]  ;;  %v9891_v56 = vld [vmem:[%s10187_s14 + $0x2b18] sm:$0xff]  ;;  %v5945_v61 = vpack.c.bf16 %v9888_v55, %v13108_v13  ;;  %9884 = vst [vmem:[%s10210_s18 + $0x1578] sm:$0xff] %v5929_v53 }
 0x205   : > { %v13186_v51 = vld [vmem:[%s10187_s14 + $0xb30] sm:$0xff]  ;;  %v9894_v57 = vld [vmem:[%s10187_s14 + $0x1318] sm:$0xff]  ;;  %v5953_v62 = vpack.c.bf16 %v9891_v56, %v13111_v14  ;;  %9887 = vst [vmem:[%s10210_s18 + $0x2178] sm:$0xff] %v5937_v54 }
 0x206   : > { %v13198_v58 = vld [vmem:[%s10187_s14 + $0x3330] sm:$0xff]  ;;  %v5961_v63 = vpack.c.bf16 %v9894_v57, %v13114_v15  ;;  %v9897_v0 = vld [vmem:[%s10187_s14 + $0x3b18] sm:$0xff]  ;;  %9890 = vst [vmem:[%s10210_s18 + $0x188] sm:$0xff] %v5945_v61 }
 0x207   : > { %v13201_v59 = vld [vmem:[%s10187_s14 + $0x1b30] sm:$0xff]  ;;  %v9900_v1 = vld [vmem:[%s10187_s14 + $0x2318] sm:$0xff]  ;;  %v5969_v6 = vpack.c.bf16 %v9897_v0, %v13126_v22  ;;  %9893 = vst [vmem:[%s10210_s18 + $0xd88] sm:$0xff] %v5953_v62 }
 0x208   : > { %v13204_v60 = vld [vmem:[%s10187_s14 + $0x330] sm:$0xff]  ;;  %v9903_v2 = vld [vmem:[%s10187_s14 + $0xb18] sm:$0xff]  ;;  %v5977_v7 = vpack.c.bf16 %v9900_v1, %v13129_v23  ;;  %9896 = vst [vmem:[%s10210_s18 + $0x1988] sm:$0xff] %v5961_v63 }
 0x209   : > { %v13216_v3 = vld [vmem:[%s10187_s14 + $0x4350] sm:$0xff]  ;;  %v5985_v8 = vpack.c.bf16 %v9903_v2, %v13132_v24  ;;  %v9906_v9 = vld [vmem:[%s10187_s14 + $0x3318] sm:$0xff]  ;;  %9899 = vst [vmem:[%s10210_s18 + $0x588] sm:$0xff] %v5969_v6 }
 0x20a   : > { %v13219_v4 = vld [vmem:[%s10187_s14 + $0x2b50] sm:$0xff]  ;;  %v9909_v10 = vld [vmem:[%s10187_s14 + $0x1b18] sm:$0xff]  ;;  %v5993_v15 = vpack.c.bf16 %v9906_v9, %v13144_v31  ;;  %9902 = vst [vmem:[%s10210_s18 + $0x1188] sm:$0xff] %v5977_v7 }
 0x20b   : > { %v13222_v5 = vld [vmem:[%s10187_s14 + $0x1350] sm:$0xff]  ;;  %v9912_v11 = vld [vmem:[%s10187_s14 + $0x318] sm:$0xff]  ;;  %v6001_v16 = vpack.c.bf16 %v9909_v10, %v13147_v32  ;;  %9905 = vst [vmem:[%s10210_s18 + $0x1d88] sm:$0xff] %v5985_v8 }
 0x20c   : > { %v13234_v12 = vld [vmem:[%s10187_s14 + $0x3b50] sm:$0xff]  ;;  %v6009_v17 = vpack.c.bf16 %v9912_v11, %v13150_v33  ;;  %v9915_v18 = vld [vmem:[%s10187_s14 + $0x4338] sm:$0xff]  ;;  %9908 = vst [vmem:[%s10210_s18 + $0x988] sm:$0xff] %v5993_v15 }
 0x20d   : > { %v13237_v13 = vld [vmem:[%s10187_s14 + $0x2350] sm:$0xff]  ;;  %v9918_v19 = vld [vmem:[%s10187_s14 + $0x2b38] sm:$0xff]  ;;  %v6017_v24 = vpack.c.bf16 %v9915_v18, %v13162_v40  ;;  %9911 = vst [vmem:[%s10210_s18 + $0x1588] sm:$0xff] %v6001_v16 }
 0x20e   : > { %v13240_v14 = vld [vmem:[%s10187_s14 + $0xb50] sm:$0xff]  ;;  %v9921_v20 = vld [vmem:[%s10187_s14 + $0x1338] sm:$0xff]  ;;  %v6025_v25 = vpack.c.bf16 %v9918_v19, %v13165_v41  ;;  %9914 = vst [vmem:[%s10210_s18 + $0x2188] sm:$0xff] %v6009_v17 }
 0x20f   : > { %v13252_v21 = vld [vmem:[%s10187_s14 + $0x3350] sm:$0xff]  ;;  %v6033_v26 = vpack.c.bf16 %v9921_v20, %v13168_v42  ;;  %v9924_v27 = vld [vmem:[%s10187_s14 + $0x3b38] sm:$0xff]  ;;  %9917 = vst [vmem:[%s10210_s18 + $0x198] sm:$0xff] %v6017_v24 }
 0x210   : > { %v13255_v22 = vld [vmem:[%s10187_s14 + $0x1b50] sm:$0xff]  ;;  %v9927_v28 = vld [vmem:[%s10187_s14 + $0x2338] sm:$0xff]  ;;  %v6041_v33 = vpack.c.bf16 %v9924_v27, %v13180_v49  ;;  %9920 = vst [vmem:[%s10210_s18 + $0xd98] sm:$0xff] %v6025_v25 }
 0x211   : > { %v13258_v23 = vld [vmem:[%s10187_s14 + $0x350] sm:$0xff]  ;;  %v9930_v29 = vld [vmem:[%s10187_s14 + $0xb38] sm:$0xff]  ;;  %v6049_v34 = vpack.c.bf16 %v9927_v28, %v13183_v50  ;;  %9923 = vst [vmem:[%s10210_s18 + $0x1998] sm:$0xff] %v6033_v26 }
 0x212   : > { %v13270_v30 = vld [vmem:[%s10187_s14 + $0x4370] sm:$0xff]  ;;  %v6057_v35 = vpack.c.bf16 %v9930_v29, %v13186_v51  ;;  %v9933_v36 = vld [vmem:[%s10187_s14 + $0x3338] sm:$0xff]  ;;  %9926 = vst [vmem:[%s10210_s18 + $0x598] sm:$0xff] %v6041_v33 }
 0x213   : > { %v13273_v31 = vld [vmem:[%s10187_s14 + $0x2b70] sm:$0xff]  ;;  %v9936_v37 = vld [vmem:[%s10187_s14 + $0x1b38] sm:$0xff]  ;;  %v6065_v42 = vpack.c.bf16 %v9933_v36, %v13198_v58  ;;  %9929 = vst [vmem:[%s10210_s18 + $0x1198] sm:$0xff] %v6049_v34 }
 0x214   : > { %v13276_v32 = vld [vmem:[%s10187_s14 + $0x1370] sm:$0xff]  ;;  %v9939_v38 = vld [vmem:[%s10187_s14 + $0x338] sm:$0xff]  ;;  %v6073_v43 = vpack.c.bf16 %v9936_v37, %v13201_v59  ;;  %9932 = vst [vmem:[%s10210_s18 + $0x1d98] sm:$0xff] %v6057_v35 }
 0x215   : > { %v13288_v39 = vld [vmem:[%s10187_s14 + $0x3b70] sm:$0xff]  ;;  %v6081_v44 = vpack.c.bf16 %v9939_v38, %v13204_v60  ;;  %v9942_v45 = vld [vmem:[%s10187_s14 + $0x4358] sm:$0xff]  ;;  %9935 = vst [vmem:[%s10210_s18 + $0x998] sm:$0xff] %v6065_v42 }
 0x216   : > { %v13291_v40 = vld [vmem:[%s10187_s14 + $0x2370] sm:$0xff]  ;;  %v9945_v46 = vld [vmem:[%s10187_s14 + $0x2b58] sm:$0xff]  ;;  %v6089_v51 = vpack.c.bf16 %v9942_v45, %v13216_v3  ;;  %9938 = vst [vmem:[%s10210_s18 + $0x1598] sm:$0xff] %v6073_v43 }
 0x217   : > { %v13294_v41 = vld [vmem:[%s10187_s14 + $0xb70] sm:$0xff]  ;;  %v9948_v47 = vld [vmem:[%s10187_s14 + $0x1358] sm:$0xff]  ;;  %v6097_v52 = vpack.c.bf16 %v9945_v46, %v13219_v4  ;;  %9941 = vst [vmem:[%s10210_s18 + $0x2198] sm:$0xff] %v6081_v44 }
 0x218   : > { %v13306_v48 = vld [vmem:[%s10187_s14 + $0x3370] sm:$0xff]  ;;  %v6105_v53 = vpack.c.bf16 %v9948_v47, %v13222_v5  ;;  %v9951_v54 = vld [vmem:[%s10187_s14 + $0x3b58] sm:$0xff]  ;;  %9944 = vst [vmem:[%s10210_s18 + $0x1a8] sm:$0xff] %v6089_v51 }
 0x219   : > { %v13309_v49 = vld [vmem:[%s10187_s14 + $0x1b70] sm:$0xff]  ;;  %v9954_v55 = vld [vmem:[%s10187_s14 + $0x2358] sm:$0xff]  ;;  %v6113_v60 = vpack.c.bf16 %v9951_v54, %v13234_v12  ;;  %9947 = vst [vmem:[%s10210_s18 + $0xda8] sm:$0xff] %v6097_v52 }
 0x21a   : > { %v13312_v50 = vld [vmem:[%s10187_s14 + $0x370] sm:$0xff]  ;;  %v9957_v56 = vld [vmem:[%s10187_s14 + $0xb58] sm:$0xff]  ;;  %v6121_v61 = vpack.c.bf16 %v9954_v55, %v13237_v13  ;;  %9950 = vst [vmem:[%s10210_s18 + $0x19a8] sm:$0xff] %v6105_v53 }
 0x21b   : > { %v13324_v57 = vld [vmem:[%s10187_s14 + $0x4390] sm:$0xff]  ;;  %v6129_v62 = vpack.c.bf16 %v9957_v56, %v13240_v14  ;;  %v9960_v63 = vld [vmem:[%s10187_s14 + $0x3358] sm:$0xff]  ;;  %9953 = vst [vmem:[%s10210_s18 + $0x5a8] sm:$0xff] %v6113_v60 }
 0x21c   : > { %v13327_v58 = vld [vmem:[%s10187_s14 + $0x2b90] sm:$0xff]  ;;  %v9963_v0 = vld [vmem:[%s10187_s14 + $0x1b58] sm:$0xff]  ;;  %v6137_v5 = vpack.c.bf16 %v9960_v63, %v13252_v21  ;;  %9956 = vst [vmem:[%s10210_s18 + $0x11a8] sm:$0xff] %v6121_v61 }
 0x21d   : > { %v13330_v59 = vld [vmem:[%s10187_s14 + $0x1390] sm:$0xff]  ;;  %v9966_v1 = vld [vmem:[%s10187_s14 + $0x358] sm:$0xff]  ;;  %v6145_v6 = vpack.c.bf16 %v9963_v0, %v13255_v22  ;;  %9959 = vst [vmem:[%s10210_s18 + $0x1da8] sm:$0xff] %v6129_v62 }
 0x21e   : > { %v13342_v2 = vld [vmem:[%s10187_s14 + $0x3b90] sm:$0xff]  ;;  %v6153_v7 = vpack.c.bf16 %v9966_v1, %v13258_v23  ;;  %v9969_v8 = vld [vmem:[%s10187_s14 + $0x4378] sm:$0xff]  ;;  %9962 = vst [vmem:[%s10210_s18 + $0x9a8] sm:$0xff] %v6137_v5 }
 0x21f   : > { %v13345_v3 = vld [vmem:[%s10187_s14 + $0x2390] sm:$0xff]  ;;  %v9972_v9 = vld [vmem:[%s10187_s14 + $0x2b78] sm:$0xff]  ;;  %v6161_v14 = vpack.c.bf16 %v9969_v8, %v13270_v30  ;;  %9965 = vst [vmem:[%s10210_s18 + $0x15a8] sm:$0xff] %v6145_v6 }
 0x220   : > { %v13348_v4 = vld [vmem:[%s10187_s14 + $0xb90] sm:$0xff]  ;;  %v9975_v10 = vld [vmem:[%s10187_s14 + $0x1378] sm:$0xff]  ;;  %v6169_v15 = vpack.c.bf16 %v9972_v9, %v13273_v31  ;;  %9968 = vst [vmem:[%s10210_s18 + $0x21a8] sm:$0xff] %v6153_v7 }
 0x221   : > { %v13360_v11 = vld [vmem:[%s10187_s14 + $0x3390] sm:$0xff]  ;;  %v6177_v16 = vpack.c.bf16 %v9975_v10, %v13276_v32  ;;  %v9978_v17 = vld [vmem:[%s10187_s14 + $0x3b78] sm:$0xff]  ;;  %9971 = vst [vmem:[%s10210_s18 + $0x1b8] sm:$0xff] %v6161_v14 }
 0x222   : > { %v13363_v12 = vld [vmem:[%s10187_s14 + $0x1b90] sm:$0xff]  ;;  %v9981_v18 = vld [vmem:[%s10187_s14 + $0x2378] sm:$0xff]  ;;  %v6185_v23 = vpack.c.bf16 %v9978_v17, %v13288_v39  ;;  %9974 = vst [vmem:[%s10210_s18 + $0xdb8] sm:$0xff] %v6169_v15 }
 0x223   : > { %v13366_v13 = vld [vmem:[%s10187_s14 + $0x390] sm:$0xff]  ;;  %v9984_v19 = vld [vmem:[%s10187_s14 + $0xb78] sm:$0xff]  ;;  %v6193_v24 = vpack.c.bf16 %v9981_v18, %v13291_v40  ;;  %9977 = vst [vmem:[%s10210_s18 + $0x19b8] sm:$0xff] %v6177_v16 }
 0x224   : > { %v13378_v20 = vld [vmem:[%s10187_s14 + $0x43b0] sm:$0xff]  ;;  %v6201_v25 = vpack.c.bf16 %v9984_v19, %v13294_v41  ;;  %v9987_v26 = vld [vmem:[%s10187_s14 + $0x3378] sm:$0xff]  ;;  %9980 = vst [vmem:[%s10210_s18 + $0x5b8] sm:$0xff] %v6185_v23 }
 0x225   : > { %v13381_v21 = vld [vmem:[%s10187_s14 + $0x2bb0] sm:$0xff]  ;;  %v9990_v27 = vld [vmem:[%s10187_s14 + $0x1b78] sm:$0xff]  ;;  %v6209_v32 = vpack.c.bf16 %v9987_v26, %v13306_v48  ;;  %9983 = vst [vmem:[%s10210_s18 + $0x11b8] sm:$0xff] %v6193_v24 }
 0x226   : > { %v13384_v22 = vld [vmem:[%s10187_s14 + $0x13b0] sm:$0xff]  ;;  %v9993_v28 = vld [vmem:[%s10187_s14 + $0x378] sm:$0xff]  ;;  %v6217_v33 = vpack.c.bf16 %v9990_v27, %v13309_v49  ;;  %9986 = vst [vmem:[%s10210_s18 + $0x1db8] sm:$0xff] %v6201_v25 }
 0x227   : > { %v13396_v29 = vld [vmem:[%s10187_s14 + $0x3bb0] sm:$0xff]  ;;  %v6225_v34 = vpack.c.bf16 %v9993_v28, %v13312_v50  ;;  %v9996_v35 = vld [vmem:[%s10187_s14 + $0x4398] sm:$0xff]  ;;  %9989 = vst [vmem:[%s10210_s18 + $0x9b8] sm:$0xff] %v6209_v32 }
 0x228   : > { %v13399_v30 = vld [vmem:[%s10187_s14 + $0x23b0] sm:$0xff]  ;;  %v9999_v36 = vld [vmem:[%s10187_s14 + $0x2b98] sm:$0xff]  ;;  %v6233_v41 = vpack.c.bf16 %v9996_v35, %v13324_v57  ;;  %9992 = vst [vmem:[%s10210_s18 + $0x15b8] sm:$0xff] %v6217_v33 }
 0x229   : > { %v13402_v31 = vld [vmem:[%s10187_s14 + $0xbb0] sm:$0xff]  ;;  %v10002_v37 = vld [vmem:[%s10187_s14 + $0x1398] sm:$0xff]  ;;  %v6241_v42 = vpack.c.bf16 %v9999_v36, %v13327_v58  ;;  %9995 = vst [vmem:[%s10210_s18 + $0x21b8] sm:$0xff] %v6225_v34 }
 0x22a   : > { %v13414_v38 = vld [vmem:[%s10187_s14 + $0x33b0] sm:$0xff]  ;;  %v6249_v43 = vpack.c.bf16 %v10002_v37, %v13330_v59  ;;  %v10005_v44 = vld [vmem:[%s10187_s14 + $0x3b98] sm:$0xff]  ;;  %9998 = vst [vmem:[%s10210_s18 + $0x1c8] sm:$0xff] %v6233_v41 }
 0x22b   : > { %v13417_v39 = vld [vmem:[%s10187_s14 + $0x1bb0] sm:$0xff]  ;;  %v10008_v45 = vld [vmem:[%s10187_s14 + $0x2398] sm:$0xff]  ;;  %v6257_v50 = vpack.c.bf16 %v10005_v44, %v13342_v2  ;;  %10001 = vst [vmem:[%s10210_s18 + $0xdc8] sm:$0xff] %v6241_v42 }
 0x22c   : > { %v13420_v40 = vld [vmem:[%s10187_s14 + $0x3b0] sm:$0xff]  ;;  %v10011_v46 = vld [vmem:[%s10187_s14 + $0xb98] sm:$0xff]  ;;  %v6265_v51 = vpack.c.bf16 %v10008_v45, %v13345_v3  ;;  %10004 = vst [vmem:[%s10210_s18 + $0x19c8] sm:$0xff] %v6249_v43 }
 0x22d   : > { %v13432_v47 = vld [vmem:[%s10187_s14 + $0x43d0] sm:$0xff]  ;;  %v6273_v52 = vpack.c.bf16 %v10011_v46, %v13348_v4  ;;  %v10014_v53 = vld [vmem:[%s10187_s14 + $0x3398] sm:$0xff]  ;;  %10007 = vst [vmem:[%s10210_s18 + $0x5c8] sm:$0xff] %v6257_v50 }
 0x22e   : > { %v13435_v48 = vld [vmem:[%s10187_s14 + $0x2bd0] sm:$0xff]  ;;  %v10017_v54 = vld [vmem:[%s10187_s14 + $0x1b98] sm:$0xff]  ;;  %v6281_v59 = vpack.c.bf16 %v10014_v53, %v13360_v11  ;;  %10010 = vst [vmem:[%s10210_s18 + $0x11c8] sm:$0xff] %v6265_v51 }
 0x22f   : > { %v13438_v49 = vld [vmem:[%s10187_s14 + $0x13d0] sm:$0xff]  ;;  %v10020_v55 = vld [vmem:[%s10187_s14 + $0x398] sm:$0xff]  ;;  %v6289_v60 = vpack.c.bf16 %v10017_v54, %v13363_v12  ;;  %10013 = vst [vmem:[%s10210_s18 + $0x1dc8] sm:$0xff] %v6273_v52 }
 0x230   : > { %v13450_v56 = vld [vmem:[%s10187_s14 + $0x3bd0] sm:$0xff]  ;;  %v6297_v61 = vpack.c.bf16 %v10020_v55, %v13366_v13  ;;  %v10023_v62 = vld [vmem:[%s10187_s14 + $0x43b8] sm:$0xff]  ;;  %10016 = vst [vmem:[%s10210_s18 + $0x9c8] sm:$0xff] %v6281_v59 }
 0x231   : > { %v13453_v57 = vld [vmem:[%s10187_s14 + $0x23d0] sm:$0xff]  ;;  %v10026_v63 = vld [vmem:[%s10187_s14 + $0x2bb8] sm:$0xff]  ;;  %v6305_v4 = vpack.c.bf16 %v10023_v62, %v13378_v20  ;;  %10019 = vst [vmem:[%s10210_s18 + $0x15c8] sm:$0xff] %v6289_v60 }
 0x232   : > { %v13456_v58 = vld [vmem:[%s10187_s14 + $0xbd0] sm:$0xff]  ;;  %v10029_v0 = vld [vmem:[%s10187_s14 + $0x13b8] sm:$0xff]  ;;  %v6313_v5 = vpack.c.bf16 %v10026_v63, %v13381_v21  ;;  %10022 = vst [vmem:[%s10210_s18 + $0x21c8] sm:$0xff] %v6297_v61 }
 0x233   : > { %v13468_v1 = vld [vmem:[%s10187_s14 + $0x33d0] sm:$0xff]  ;;  %v6321_v6 = vpack.c.bf16 %v10029_v0, %v13384_v22  ;;  %v10032_v7 = vld [vmem:[%s10187_s14 + $0x3bb8] sm:$0xff]  ;;  %10025 = vst [vmem:[%s10210_s18 + $0x1d8] sm:$0xff] %v6305_v4 }
 0x234   : > { %v13471_v2 = vld [vmem:[%s10187_s14 + $0x1bd0] sm:$0xff]  ;;  %v10035_v8 = vld [vmem:[%s10187_s14 + $0x23b8] sm:$0xff]  ;;  %v6329_v13 = vpack.c.bf16 %v10032_v7, %v13396_v29  ;;  %10028 = vst [vmem:[%s10210_s18 + $0xdd8] sm:$0xff] %v6313_v5 }
 0x235   : > { %v13474_v3 = vld [vmem:[%s10187_s14 + $0x3d0] sm:$0xff]  ;;  %v10038_v9 = vld [vmem:[%s10187_s14 + $0xbb8] sm:$0xff]  ;;  %v6337_v14 = vpack.c.bf16 %v10035_v8, %v13399_v30  ;;  %10031 = vst [vmem:[%s10210_s18 + $0x19d8] sm:$0xff] %v6321_v6 }
 0x236   : > { %v13486_v10 = vld [vmem:[%s10187_s14 + $0x43f0] sm:$0xff]  ;;  %v6345_v15 = vpack.c.bf16 %v10038_v9, %v13402_v31  ;;  %v10041_v16 = vld [vmem:[%s10187_s14 + $0x33b8] sm:$0xff]  ;;  %10034 = vst [vmem:[%s10210_s18 + $0x5d8] sm:$0xff] %v6329_v13 }
 0x237   : > { %v13489_v11 = vld [vmem:[%s10187_s14 + $0x2bf0] sm:$0xff]  ;;  %v10044_v17 = vld [vmem:[%s10187_s14 + $0x1bb8] sm:$0xff]  ;;  %v6353_v22 = vpack.c.bf16 %v10041_v16, %v13414_v38  ;;  %10037 = vst [vmem:[%s10210_s18 + $0x11d8] sm:$0xff] %v6337_v14 }
 0x238   : > { %v13492_v12 = vld [vmem:[%s10187_s14 + $0x13f0] sm:$0xff]  ;;  %v10047_v18 = vld [vmem:[%s10187_s14 + $0x3b8] sm:$0xff]  ;;  %v6361_v23 = vpack.c.bf16 %v10044_v17, %v13417_v39  ;;  %10040 = vst [vmem:[%s10210_s18 + $0x1dd8] sm:$0xff] %v6345_v15 }
 0x239   : > { %v13504_v19 = vld [vmem:[%s10187_s14 + $0x3bf0] sm:$0xff]  ;;  %v6369_v24 = vpack.c.bf16 %v10047_v18, %v13420_v40  ;;  %v10050_v25 = vld [vmem:[%s10187_s14 + $0x43d8] sm:$0xff]  ;;  %10043 = vst [vmem:[%s10210_s18 + $0x9d8] sm:$0xff] %v6353_v22 }
 0x23a   : > { %v13507_v20 = vld [vmem:[%s10187_s14 + $0x23f0] sm:$0xff]  ;;  %v10053_v26 = vld [vmem:[%s10187_s14 + $0x2bd8] sm:$0xff]  ;;  %v6377_v31 = vpack.c.bf16 %v10050_v25, %v13432_v47  ;;  %10046 = vst [vmem:[%s10210_s18 + $0x15d8] sm:$0xff] %v6361_v23 }
 0x23b   : > { %v13510_v21 = vld [vmem:[%s10187_s14 + $0xbf0] sm:$0xff]  ;;  %v10056_v27 = vld [vmem:[%s10187_s14 + $0x13d8] sm:$0xff]  ;;  %v6385_v32 = vpack.c.bf16 %v10053_v26, %v13435_v48  ;;  %10049 = vst [vmem:[%s10210_s18 + $0x21d8] sm:$0xff] %v6369_v24 }
 0x23c   : > { %v9237_v28 = vld [vmem:[%s10187_s14 + $0x33f0] sm:$0xff]  ;;  %v6393_v33 = vpack.c.bf16 %v10056_v27, %v13438_v49  ;;  %v10059_v34 = vld [vmem:[%s10187_s14 + $0x3bd8] sm:$0xff]  ;;  %10052 = vst [vmem:[%s10210_s18 + $0x1e8] sm:$0xff] %v6377_v31 }
 0x23d   : > { %v9238_v29 = vld [vmem:[%s10187_s14 + $0x1bf0] sm:$0xff]  ;;  %v10062_v35 = vld [vmem:[%s10187_s14 + $0x23d8] sm:$0xff]  ;;  %v6401_v37 = vpack.c.bf16 %v10059_v34, %v13450_v56  ;;  %10055 = vst [vmem:[%s10210_s18 + $0xde8] sm:$0xff] %v6385_v32 }
 0x23e   : > { %v9239_v30 = vld [vmem:[%s10187_s14 + $0x3f0] sm:$0xff]  ;;  %v10065_v36 = vld [vmem:[%s10187_s14 + $0xbd8] sm:$0xff]  ;;  %v6409_v38 = vpack.c.bf16 %v10062_v35, %v13453_v57  ;;  %10058 = vst [vmem:[%s10210_s18 + $0x19e8] sm:$0xff] %v6393_v33 }
 0x23f   : > { %v6417_v39 = vpack.c.bf16 %v10065_v36, %v13456_v58  ;;  %v10068_v40 = vld [vmem:[%s10187_s14 + $0x33d8] sm:$0xff]  ;;  %10061 = vst [vmem:[%s10210_s18 + $0x5e8] sm:$0xff] %v6401_v37 }
 0x240   : > { %v10071_v41 = vld [vmem:[%s10187_s14 + $0x1bd8] sm:$0xff]  ;;  %v6425_v43 = vpack.c.bf16 %v10068_v40, %v13468_v1  ;;  %10064 = vst [vmem:[%s10210_s18 + $0x11e8] sm:$0xff] %v6409_v38 }
 0x241   : > { %v10074_v42 = vld [vmem:[%s10187_s14 + $0x3d8] sm:$0xff]  ;;  %v6433_v44 = vpack.c.bf16 %v10071_v41, %v13471_v2  ;;  %10067 = vst [vmem:[%s10210_s18 + $0x1de8] sm:$0xff] %v6417_v39 }
 0x242   : > { %v6441_v45 = vpack.c.bf16 %v10074_v42, %v13474_v3  ;;  %v10077_v46 = vld [vmem:[%s10187_s14 + $0x43f8] sm:$0xff]  ;;  %10070 = vst [vmem:[%s10210_s18 + $0x9e8] sm:$0xff] %v6425_v43 }
 0x243   : > { %v10080_v47 = vld [vmem:[%s10187_s14 + $0x2bf8] sm:$0xff]  ;;  %v6449_v49 = vpack.c.bf16 %v10077_v46, %v13486_v10  ;;  %10073 = vst [vmem:[%s10210_s18 + $0x15e8] sm:$0xff] %v6433_v44 }
 0x244   : > { %v10083_v48 = vld [vmem:[%s10187_s14 + $0x13f8] sm:$0xff]  ;;  %v6457_v50 = vpack.c.bf16 %v10080_v47, %v13489_v11  ;;  %10076 = vst [vmem:[%s10210_s18 + $0x21e8] sm:$0xff] %v6441_v45 }
 0x245   : > { %v6465_v51 = vpack.c.bf16 %v10083_v48, %v13492_v12  ;;  %v10086_v52 = vld [vmem:[%s10187_s14 + $0x3bf8] sm:$0xff]  ;;  %10079 = vst [vmem:[%s10210_s18 + $0x1f8] sm:$0xff] %v6449_v49 }
 0x246   : > { %v10089_v53 = vld [vmem:[%s10187_s14 + $0x23f8] sm:$0xff]  ;;  %v6473_v55 = vpack.c.bf16 %v10086_v52, %v13504_v19  ;;  %10082 = vst [vmem:[%s10210_s18 + $0xdf8] sm:$0xff] %v6457_v50 }
 0x247   : > { %v10092_v54 = vld [vmem:[%s10187_s14 + $0xbf8] sm:$0xff]  ;;  %v6481_v56 = vpack.c.bf16 %v10089_v53, %v13507_v20  ;;  %10085 = vst [vmem:[%s10210_s18 + $0x19f8] sm:$0xff] %v6465_v51 }
 0x248   : > { %v6489_v57 = vpack.c.bf16 %v10092_v54, %v13510_v21  ;;  %v10095_v58 = vld [vmem:[%s10187_s14 + $0x33f8] sm:$0xff]  ;;  %10088 = vst [vmem:[%s10210_s18 + $0x5f8] sm:$0xff] %v6473_v55 }
 0x249   : > { %v10098_v59 = vld [vmem:[%s10187_s14 + $0x1bf8] sm:$0xff]  ;;  %v6497_v61 = vpack.c.bf16 %v10095_v58, %v9237_v28  ;;  %10091 = vst [vmem:[%s10210_s18 + $0x11f8] sm:$0xff] %v6481_v56 }
 0x24a   : > { %v10101_v60 = vld [vmem:[%s10187_s14 + $0x3f8] sm:$0xff]  ;;  %v6505_v62 = vpack.c.bf16 %v10098_v59, %v9238_v29  ;;  %10094 = vst [vmem:[%s10210_s18 + $0x1df8] sm:$0xff] %v6489_v57 }
 0x24b   : > { %v6513_v63 = vpack.c.bf16 %v10101_v60, %v9239_v30  ;;  %10097 = vst [vmem:[%s10210_s18 + $0x9f8] sm:$0xff] %v6497_v61 }
 0x24c   : > { %10100 = vst [vmem:[%s10210_s18 + $0x15f8] sm:$0xff] %v6505_v62 }
 0x24d   : > { %10103 = vst [vmem:[%s10210_s18 + $0x21f8] sm:$0xff] %v6513_v63 }
 0x24e PF: > { %s7_s8 = sadd.s32 1, %s10154_s8   ;;  %s13589_s6 = smov %s10150_s7 }
 0x24f   : > { %p4_p5 = scmp.ge.s32.totalorder %s7_s8, 4   ;;  %s13590_s7 = smov %s13592_s9 }
 0x251   :  { %6 = sbr.rel (!%p4_p5) target bundleno = 2 (0x2), region = 2919 }

// kernel: cnn_tsm_attn_forward.2
= control target key start
LH: loop header
LB: loop body
LE: loop exit
PB: predicated region body
PF: predicated region fallthrough
CT: control target
= control target key end

     0   :  { %s3684_s29 = smov 0   ;;  %s4666_s0 = inlined_call_operand.vmem [shape: bf16[16,4,512], index: 0, kind: input, shape index: {}]   ;;  %s4667_s1 = inlined_call_operand.vmem [shape: f32[512,32], index: 1, kind: input, shape index: {}]   ;;  %s4668_s2 = inlined_call_operand.vmem [shape: f32[1,32], index: 2, kind: input, shape index: {}]   ;;  %s4669_s3 = inlined_call_operand.vmem [shape: f32[32,512], index: 3, kind: input, shape index: {}]   ;;  %s4670_s4 = inlined_call_operand.vmem [shape: f32[1,512], index: 4, kind: input, shape index: {}]   ;;  %s4671_s5 = inlined_call_operand.vmem [shape: f32[4,4], index: 5, kind: input, shape index: {}]   ;;  %s4672_s6 = inlined_call_operand.vmem [shape: f32[4,4], index: 6, kind: input, shape index: {}]   ;;  %s4673_s7 = inlined_call_operand.<no memory space> [shape: f32[1], index: 7, kind: input, shape index: {}]   ;;  %s4674_s8 = inlined_call_operand.vmem [shape: f32[16,512], index: 8, kind: output, shape index: {}]  }
   0x1   :  { %13 = sst [smem:[#allocation2]] %s4673_s7 }
   0x2 LB: > { %s3690_s30 = sadd.s32 4294967295, %s3630_s29   ;;  %p3356_p0 = scmp.ge.s32.totalorder %s3630_s29, 1  ;;  %s3630_s29 = sphi %s3684_s29, %s19_s29  }
   0x3   : > { %p265_p1 = scmp.lt.s32.totalorder %s3630_s29, 3 }
   0x5   : > { %p266_p2 = pnand %p3356_p0, %p265_p1 }
   0x6   : > { %v658_v0 = vld [vmem:[%s4667_s1 + $0x80] sm:$0xff] (!%p266_p2)  ;;  %v659_v1 = vld [vmem:[%s4667_s1 + $0x88] sm:$0xff] (!%p266_p2)  ;;  %v660_v11 = vld [vmem:[%s4667_s1 + $0x90] sm:$0xff] (!%p266_p2)  ;;  %s3357_s17 = sshll.u32 (!%p266_p2), %s3690_s30, 3  ;;  %vm384_vm0 = vcmask (!%p266_p2), 1043456   ;;  %vm745_vm1 = vcmask (!%p266_p2), 1041409  }
   0x7   : > { %269 = sbr.rel (%p266_p2) target bundleno = 1399 (0x577), region = 52  ;;  %v642_v2 = vld [vmem:[%s4667_s1] sm:$0xff] (!%p266_p2)  ;;  %v3510_v3 = vpack.c.bf16 (!%p266_p2), %v659_v1, %v658_v0  ;;  %v643_v4 = vld [vmem:[%s4667_s1 + $0x8] sm:$0xff] (!%p266_p2)  ;;  %v661_v13 = vld [vmem:[%s4667_s1 + $0x98] sm:$0xff] (!%p266_p2)  ;;  %p3769_p3 = scmp.lt.s32.totalorder (!%p266_p2), %s3357_s17, 15  ;;  %vm747_vm2 = vcmask (!%p266_p2), 1042434  }
   0x8   : > { %v690_v5 = vld [vmem:[%s4667_s1 + $0x180] sm:$0xff] (!%p266_p2)  ;;  %v691_v6 = vld [vmem:[%s4667_s1 + $0x188] sm:$0xff] (!%p266_p2)  ;;  %v3512_v7 = vpack.c.bf16 (!%p266_p2), %v643_v4, %v642_v2  ;;  %v644_v14 = vld [vmem:[%s4667_s1 + $0x10] sm:$0xff] (!%p266_p2)  ;;  %v3514_v16 = vpack.c.bf16 (!%p266_p2), %v661_v13, %v660_v11  ;;  %vm749_vm3 = vcmask (!%p266_p2), 1043459   ;;  %vm751_vm4 = vcmask (!%p266_p2), 1044484   ;;  %s1862_s18 = sld [smem:[#allocation2]] (!%p266_p2) }
   0x9   : > { %v3542_v8 = vpack.c.bf16 (!%p266_p2), %v691_v6, %v690_v5  ;;  %v674_v9 = vld [vmem:[%s4667_s1 + $0x100] sm:$0xff] (!%p266_p2)  ;;  %v675_v10 = vld [vmem:[%s4667_s1 + $0x108] sm:$0xff] (!%p266_p2)  ;;  %3511 = vmatprep.subr.bf16.mxu0 (!%p266_p2), %v3510_v3  ;;  %v645_v15 = vld [vmem:[%s4667_s1 + $0x18] sm:$0xff] (!%p266_p2)  ;;  %vm753_vm5 = vcmask (!%p266_p2), 1045509   ;;  %vm755_vm6 = vcmask (!%p266_p2), 1046534   ;;  %vm757_vm7 = vcmask (!%p266_p2), 1047559  }
   0xa   : > { %v3544_v12 = vpack.c.bf16 (!%p266_p2), %v675_v10, %v674_v9  ;;  %3513 = vmatpush3.bf16.msra.mxu0 (!%p266_p2), %v3512_v7  ;;  %v3516_v17 = vpack.c.bf16 (!%p266_p2), %v645_v15, %v644_v14  ;;  %v692_v18 = vld [vmem:[%s4667_s1 + $0x190] sm:$0xff] (!%p266_p2)  ;;  %v693_v19 = vld [vmem:[%s4667_s1 + $0x198] sm:$0xff] (!%p266_p2)  ;;  %v662_v23 = vld [vmem:[%s4667_s1 + $0xa0] sm:$0xff] (!%p266_p2)  ;;  %vm963_vm8 = vcmask (!%p266_p2), 261120   ;;  %vm3635_vm9 = vmmov (!%p266_p2), 0   ;;  %p307_p4 = scmp.lt.s32.totalorder (!%p266_p2), %s3690_s30, 1 }
   0xb   : > { %3543 = vmatprep.subr.bf16.mxu1 (!%p266_p2), %v3542_v8  ;;  %v676_v20 = vld [vmem:[%s4667_s1 + $0x110] sm:$0xff] (!%p266_p2)  ;;  %v3546_v21 = vpack.c.bf16 (!%p266_p2), %v693_v19, %v692_v18  ;;  %v677_v22 = vld [vmem:[%s4667_s1 + $0x118] sm:$0xff] (!%p266_p2)  ;;  %v663_v24 = vld [vmem:[%s4667_s1 + $0xa8] sm:$0xff] (!%p266_p2)  ;;  %3515 = vmatprep.subr.bf16.mxu0 (!%p266_p2), %v3514_v16  ;;  %vm1640_vm10 = vcmask (!%p266_p2), 31744  }
   0xc   : > { %3545 = vmatpush3.bf16.msra.mxu1 (!%p266_p2), %v3544_v12  ;;  %v3548_v25 = vpack.c.bf16 (!%p266_p2), %v677_v22, %v676_v20  ;;  %v3518_v26 = vpack.c.bf16 (!%p266_p2), %v663_v24, %v662_v23  ;;  %v646_v27 = vld [vmem:[%s4667_s1 + $0x20] sm:$0xff] (!%p266_p2)  ;;  %v647_v28 = vld [vmem:[%s4667_s1 + $0x28] sm:$0xff] (!%p266_p2)  ;;  %v664_v35 = vld [vmem:[%s4667_s1 + $0xb0] sm:$0xff] (!%p266_p2) }
   0xd   : > { %v694_v29 = vld [vmem:[%s4667_s1 + $0x1a0] sm:$0xff] (!%p266_p2)  ;;  %3547 = vmatprep.subr.bf16.mxu1 (!%p266_p2), %v3546_v21  ;;  %v695_v30 = vld [vmem:[%s4667_s1 + $0x1a8] sm:$0xff] (!%p266_p2)  ;;  %v3520_v33 = vpack.c.bf16 (!%p266_p2), %v647_v28, %v646_v27  ;;  %v665_v36 = vld [vmem:[%s4667_s1 + $0xb8] sm:$0xff] (!%p266_p2) }
   0xe   : > { %v678_v31 = vld [vmem:[%s4667_s1 + $0x120] sm:$0xff]  ;;  %v679_v32 = vld [vmem:[%s4667_s1 + $0x128] sm:$0xff]  ;;  %3517 = vmatpush3.bf16.msra.mxu0 %v3516_v17  ;;  %v3550_v34 = vpack.c.bf16 %v695_v30, %v694_v29  ;;  %v648_v37 = vld [vmem:[%s4667_s1 + $0x30] sm:$0xff]  ;;  %v3522_v39 = vpack.c.bf16 %v665_v36, %v664_v35  ;;  %s4677_s17 = smov (!%p3769_p3, %s3357_s17), 15  ;;  %s4679_s30 = smov (!%p307_p4, %s3690_s30), 1 }
   0xf   : > { %3519 = vmatprep.subr.bf16.mxu0 %v3518_v26  ;;  %v3552_v38 = vpack.c.bf16 %v679_v32, %v678_v31  ;;  %v649_v40 = vld [vmem:[%s4667_s1 + $0x38] sm:$0xff]  ;;  %v696_v41 = vld [vmem:[%s4667_s1 + $0x1b0] sm:$0xff]  ;;  %v666_v46 = vld [vmem:[%s4667_s1 + $0xc0] sm:$0xff]  ;;  %s3424_s26 = sshll.u32 %s4677_s17, 3  ;;  %s3425_s19 = sshll.u32 %s4679_s30, 5 }
  0x10   : > { %3549 = vmatpush3.bf16.msra.mxu1 %v3548_v25  ;;  %v697_v42 = vld [vmem:[%s4667_s1 + $0x1b8] sm:$0xff]  ;;  %v680_v44 = vld [vmem:[%s4667_s1 + $0x130] sm:$0xff]  ;;  %v667_v47 = vld [vmem:[%s4667_s1 + $0xc8] sm:$0xff]  ;;  %v3524_v50 = vpack.c.bf16 %v649_v40, %v648_v37  ;;  %s3894_s27 = scalar_lea.vmem %s4666_s0, %s3424_s26  ;;  %s311_s30 = scalar_lea.vmem %s4674_s8, %s3425_s19 }
  0x11   : > { %3551 = vmatprep.subr.bf16.mxu1 %v3550_v34  ;;  %v3554_v43 = vpack.c.bf16 %v697_v42, %v696_v41  ;;  %v681_v45 = vld [vmem:[%s4667_s1 + $0x138] sm:$0xff]  ;;  %v650_v48 = vld [vmem:[%s4667_s1 + $0x40] sm:$0xff]  ;;  %v651_v49 = vld [vmem:[%s4667_s1 + $0x48] sm:$0xff]  ;;  %v3526_v55 = vpack.c.bf16 %v667_v47, %v666_v46 }
  0x12   : > { %3521 = vmatpush3.bf16.msra.mxu0 %v3520_v33  ;;  %v698_v51 = vld [vmem:[%s4667_s1 + $0x1c0] sm:$0xff]  ;;  %v699_v52 = vld [vmem:[%s4667_s1 + $0x1c8] sm:$0xff]  ;;  %v3556_v54 = vpack.c.bf16 %v681_v45, %v680_v44  ;;  %v668_v57 = vld [vmem:[%s4667_s1 + $0xd0] sm:$0xff]  ;;  %v3528_v2 = vpack.c.bf16 %v651_v49, %v650_v48 }
  0x13   : > { %v682_v53 = vld [vmem:[%s4667_s1 + $0x140] sm:$0xff]  ;;  %3523 = vmatprep.subr.bf16.mxu0 %v3522_v39  ;;  %v683_v56 = vld [vmem:[%s4667_s1 + $0x148] sm:$0xff]  ;;  %v669_v58 = vld [vmem:[%s4667_s1 + $0xd8] sm:$0xff]  ;;  %v3558_v59 = vpack.c.bf16 %v699_v52, %v698_v51 }
  0x14   : > { %3553 = vmatpush3.bf16.msra.mxu1 %v3552_v38  ;;  %v652_v60 = vld [vmem:[%s4667_s1 + $0x50] sm:$0xff]  ;;  %v653_v61 = vld [vmem:[%s4667_s1 + $0x58] sm:$0xff]  ;;  %v670_v3 = vld [vmem:[%s4667_s1 + $0xe0] sm:$0xff]  ;;  %v3560_v6 = vpack.c.bf16 %v683_v56, %v682_v53  ;;  %v3530_v7 = vpack.c.bf16 %v669_v58, %v668_v57 }
  0x15   : > { %3555 = vmatprep.subr.bf16.mxu1 %v3554_v43  ;;  %v700_v62 = vld [vmem:[%s4667_s1 + $0x1d0] sm:$0xff]  ;;  %v701_v63 = vld [vmem:[%s4667_s1 + $0x1d8] sm:$0xff]  ;;  %v671_v4 = vld [vmem:[%s4667_s1 + $0xe8] sm:$0xff]  ;;  %v3532_v15 = vpack.c.bf16 %v653_v61, %v652_v60 }
  0x16   : > { %v3848_v0 = vld [vmem:[%s4667_s1 + $0x150] sm:$0xff]  ;;  %v685_v1 = vld [vmem:[%s4667_s1 + $0x158] sm:$0xff]  ;;  %3525 = vmatpush3.bf16.msra.mxu0 %v3524_v50  ;;  %v3863_v5 = vld [vmem:[%s4667_s1 + $0x60] sm:$0xff]  ;;  %v3562_v11 = vpack.c.bf16 %v701_v63, %v700_v62  ;;  %v3534_v20 = vpack.c.bf16 %v671_v4, %v670_v3 }
  0x17   : > { %3527 = vmatprep.subr.bf16.mxu0 %v3526_v55  ;;  %v3868_v8 = vld [vmem:[%s4667_s1 + $0x68] sm:$0xff]  ;;  %v702_v9 = vld [vmem:[%s4667_s1 + $0x1e0] sm:$0xff]  ;;  %v3889_v14 = vld [vmem:[%s4667_s1 + $0xf0] sm:$0xff]  ;;  %v3564_v16 = vpack.c.bf16 %v685_v1, %v3848_v0 }
  0x18   : > { %3557 = vmatpush3.bf16.msra.mxu1 %v3556_v54  ;;  %v703_v10 = vld [vmem:[%s4667_s1 + $0x1e8] sm:$0xff]  ;;  %v3879_v12 = vld [vmem:[%s4667_s1 + $0x160] sm:$0xff]  ;;  %v673_v17 = vld [vmem:[%s4667_s1 + $0xf8] sm:$0xff]  ;;  %v3536_v21 = vpack.c.bf16 %v3868_v8, %v3863_v5 }
  0x19   : > { %3559 = vmatprep.subr.bf16.mxu1 %v3558_v59  ;;  %v3884_v13 = vld [vmem:[%s4667_s1 + $0x168] sm:$0xff]  ;;  %v3903_v18 = vld [vmem:[%s4667_s1 + $0x70] sm:$0xff]  ;;  %v3908_v19 = vld [vmem:[%s4667_s1 + $0x78] sm:$0xff]  ;;  %v3566_v22 = vpack.c.bf16 %v703_v10, %v702_v9  ;;  %v3538_v27 = vpack.c.bf16 %v673_v17, %v3889_v14 }
  0x1a   : > { %3529 = vmatpush3.bf16.msra.mxu0 %v3528_v2  ;;  %v3568_v23 = vpack.c.bf16 %v3884_v13, %v3879_v12  ;;  %v704_v24 = vld [vmem:[%s4667_s1 + $0x1f0] sm:$0xff]  ;;  %v705_v25 = vld [vmem:[%s4667_s1 + $0x1f8] sm:$0xff]  ;;  %v3540_v28 = vpack.c.bf16 %v3908_v19, %v3903_v18  ;;  %v312_v31 = vld [vmem:[%s3894_s27] sm:$0xff] }
  0x1b   : > { %v3923_v26 = vld [vmem:[%s4667_s1 + $0x170] sm:$0xff]  ;;  %3531 = vmatprep.subr.bf16.mxu0 %v3530_v7  ;;  %v3570_v29 = vpack.c.bf16 %v705_v25, %v704_v24  ;;  %v3931_v30 = vld [vmem:[%s4667_s1 + $0x178] sm:$0xff]  ;;  %v313_v32 = vld [vmem:[%s3894_s27 + $0x8] sm:$0xff]  ;;  %v3946_v37 = vunpack.c.l.bf16 %v312_v31  ;;  %v3950_v39 = vunpack.c.h.bf16 %v312_v31 }
  0x1c   : > { %3561 = vmatpush3.bf16.msra.mxu1 %v3560_v6  ;;  %v3572_v33 = vpack.c.bf16 %v3931_v30, %v3923_v26  ;;  %v3938_v34 = vld [vmem:[%s3894_s27 + $0x10] sm:$0xff]  ;;  %v3941_v35 = vld [vmem:[%s3894_s27 + $0x18] sm:$0xff]  ;;  %v3944_v36 = vld [vmem:[%s3894_s27 + $0x20] sm:$0xff]  ;;  %v3948_v38 = vunpack.c.l.bf16 %v313_v32  ;;  %v3970_v46 = vunpack.c.h.bf16 %v313_v32 }
  0x1d   : > { %3563 = vmatprep.subr.bf16.mxu1 %v3562_v11  ;;  %v3953_v40 = vld [vmem:[%s3894_s27 + $0x28] sm:$0xff]  ;;  %v3956_v41 = vld [vmem:[%s3894_s27 + $0x30] sm:$0xff]  ;;  %v3959_v42 = vld [vmem:[%s3894_s27 + $0x38] sm:$0xff]  ;;  %v3962_v43 = vunpack.c.l.bf16 %v3938_v34  ;;  %v3965_v44 = vunpack.c.l.bf16 %v3941_v35  ;;  %v3968_v45 = vunpack.c.l.bf16 %v3944_v36  ;;  %v352_v50 = vcombine.high %v3946_v37, %v3946_v37 }
  0x1e   : > { %3533 = vmatpush3.bf16.msra.mxu0 %v3532_v15  ;;  %v3973_v47 = vunpack.c.l.bf16 %v3953_v40  ;;  %v3976_v48 = vunpack.c.l.bf16 %v3956_v41  ;;  %v3979_v49 = vunpack.c.l.bf16 %v3959_v42  ;;  %v354_v51 = vcombine.high %v3948_v38, %v3948_v38 }
  0x1f   : > { %3535 = vmatprep.subr.bf16.mxu0 %v3534_v20  ;;  %v356_v52 = vcombine.high %v3962_v43, %v3962_v43  ;;  %v358_v53 = vcombine.high %v3965_v44, %v3965_v44  ;;  %v3991_v54 = vsel %vm384_vm0, %v3946_v37, 0.0  ;;  %v360_v55 = vcombine.high %v3968_v45, %v3968_v45 }
  0x20   : > { %3565 = vmatpush3.bf16.msra.mxu1 %v3564_v16  ;;  %v362_v56 = vcombine.high %v3973_v47, %v3973_v47  ;;  %v364_v57 = vcombine.high %v3976_v48, %v3976_v48  ;;  %v366_v58 = vcombine.high %v3979_v49, %v3979_v49  ;;  %v392_v59 = vsel %vm384_vm0, %v352_v50, 0.0 }
  0x21   : > { %3567 = vmatprep.subr.bf16.mxu1 %v3566_v22  ;;  %v420_v60 = vsel %vm384_vm0, %v354_v51, 0.0  ;;  %v448_v61 = vsel %vm384_vm0, %v356_v52, 0.0  ;;  %v476_v62 = vsel %vm384_vm0, %v358_v53, 0.0  ;;  %v393_v63 = vrot.slane %v392_v59, 4 }
  0x22   : > { %3537 = vmatpush3.bf16.msra.mxu0 %v3536_v21  ;;  %v421_v0 = vrot.slane %v420_v60, 4  ;;  %v449_v1 = vrot.slane %v448_v61, 4  ;;  %v477_v2 = vrot.slane %v476_v62, 4  ;;  %v504_v3 = vsel %vm384_vm0, %v360_v55, 0.0 }
  0x23   : > { %3539 = vmatprep.subr.bf16.mxu0 %v3538_v27  ;;  %v532_v4 = vsel %vm384_vm0, %v362_v56, 0.0  ;;  %v560_v5 = vsel %vm384_vm0, %v364_v57, 0.0  ;;  %v588_v6 = vsel %vm384_vm0, %v366_v58, 0.0  ;;  %v394_v7 = vadd.f32 %v393_v63, %v392_v59 }
  0x24   : > { %3569 = vmatpush3.bf16.msra.mxu1 %v3568_v23  ;;  %v422_v8 = vadd.f32 %v421_v0, %v420_v60  ;;  %v450_v9 = vadd.f32 %v449_v1, %v448_v61  ;;  %v478_v10 = vadd.f32 %v477_v2, %v476_v62  ;;  %v505_v11 = vrot.slane %v504_v3, 4 }
  0x25   : > { %3571 = vmatprep.subr.bf16.mxu1 %v3570_v29  ;;  %v533_v12 = vrot.slane %v532_v4, 4  ;;  %v561_v13 = vrot.slane %v560_v5, 4  ;;  %v589_v14 = vrot.slane %v588_v6, 4  ;;  %v395_v15 = vrot.slane %v394_v7, 2 }
  0x26   : > { %3541 = vmatpush3.bf16.msra.mxu0 %v3540_v28  ;;  %v423_v16 = vrot.slane %v422_v8, 2  ;;  %v451_v17 = vrot.slane %v450_v9, 2  ;;  %v479_v18 = vrot.slane %v478_v10, 2  ;;  %v506_v19 = vadd.f32 %v505_v11, %v504_v3 }
  0x27   : > { %v534_v20 = vadd.f32 %v533_v12, %v532_v4  ;;  %v562_v21 = vadd.f32 %v561_v13, %v560_v5  ;;  %v590_v22 = vadd.f32 %v589_v14, %v588_v6  ;;  %v396_v23 = vadd.f32 %v395_v15, %v394_v7 }
  0x28   : > { %3573 = vmatpush3.bf16.msra.mxu1 %v3572_v33  ;;  %v424_v24 = vadd.f32 %v423_v16, %v422_v8  ;;  %v452_v25 = vadd.f32 %v451_v17, %v450_v9  ;;  %v480_v26 = vadd.f32 %v479_v18, %v478_v10  ;;  %v507_v27 = vrot.slane %v506_v19, 2 }
  0x29   : > { %v535_v29 = vrot.slane %v534_v20, 2  ;;  %v563_v30 = vrot.slane %v562_v21, 2  ;;  %v591_v31 = vrot.slane %v590_v22, 2  ;;  %v397_v28 = vrot.slane %v396_v23, 1 }
  0x2a   : > { %v425_v32 = vrot.slane %v424_v24, 1  ;;  %v453_v50 = vrot.slane %v452_v25, 1  ;;  %v481_v51 = vrot.slane %v480_v26, 1  ;;  %v508_v33 = vadd.f32 %v507_v27, %v506_v19 }
  0x2b   : > { %v536_v52 = vadd.f32 %v535_v29, %v534_v20  ;;  %v564_v53 = vadd.f32 %v563_v30, %v562_v21  ;;  %v592_v55 = vadd.f32 %v591_v31, %v590_v22  ;;  %v398_v56 = vadd.f32 %v397_v28, %v396_v23 }
  0x2c   : > { %v426_v57 = vadd.f32 %v425_v32, %v424_v24  ;;  %v454_v58 = vadd.f32 %v453_v50, %v452_v25  ;;  %v482_v59 = vadd.f32 %v481_v51, %v480_v26  ;;  %v509_v60 = vrot.slane %v508_v33, 1 }
  0x2d   : > { %v537_v61 = vrot.slane %v536_v52, 1  ;;  %v565_v62 = vrot.slane %v564_v53, 1  ;;  %v593_v63 = vrot.slane %v592_v55, 1  ;;  %v611_v0 = vmul.f32 0.25, %v398_v56 }
  0x2e   : > { %v615_v1 = vmul.f32 0.25, %v426_v57  ;;  %v619_v2 = vmul.f32 0.25, %v454_v58  ;;  %v623_v3 = vmul.f32 0.25, %v482_v59  ;;  %v510_v4 = vadd.f32 %v509_v60, %v508_v33 }
  0x2f   : > { %v538_v5 = vadd.f32 %v537_v61, %v536_v52  ;;  %v566_v6 = vadd.f32 %v565_v62, %v564_v53  ;;  %v594_v7 = vadd.f32 %v593_v63, %v592_v55  ;;  %v386_v9 = vrot.slane %v3991_v54, 4 }
  0x30   : > { %v759_v8 = vsel %vm745_vm1, %v615_v1, %v611_v0  ;;  %v413_v10 = vsel %vm384_vm0, %v3948_v38, 0.0  ;;  %v441_v11 = vsel %vm384_vm0, %v3962_v43, 0.0  ;;  %v627_v12 = vmul.f32 0.25, %v510_v4 }
  0x31   : > { %v631_v13 = vmul.f32 0.25, %v538_v5  ;;  %v635_v14 = vmul.f32 0.25, %v566_v6  ;;  %v639_v15 = vmul.f32 0.25, %v594_v7  ;;  %v760_v16 = vsel %vm747_vm2, %v619_v2, %v759_v8 }
  0x32   : > { %v387_v17 = vadd.f32 %v386_v9, %v3991_v54  ;;  %v414_v18 = vrot.slane %v413_v10, 4  ;;  %v442_v19 = vrot.slane %v441_v11, 4  ;;  %v761_v20 = vsel %vm749_vm3, %v623_v3, %v760_v16 }
  0x33   : > { %v469_v21 = vsel %vm384_vm0, %v3965_v44, 0.0  ;;  %v497_v22 = vsel %vm384_vm0, %v3968_v45, 0.0  ;;  %v525_v23 = vsel %vm384_vm0, %v3973_v47, 0.0  ;;  %v762_v24 = vsel %vm751_vm4, %v627_v12, %v761_v20 }
  0x34   : > { %v388_v25 = vrot.slane %v387_v17, 2  ;;  %v415_v26 = vadd.f32 %v414_v18, %v413_v10  ;;  %v443_v27 = vadd.f32 %v442_v19, %v441_v11  ;;  %v763_v54 = vsel %vm753_vm5, %v631_v13, %v762_v24 }
  0x35   : > { %v470_v29 = vrot.slane %v469_v21, 4  ;;  %v498_v30 = vrot.slane %v497_v22, 4  ;;  %v526_v31 = vrot.slane %v525_v23, 4  ;;  %v764_v28 = vsel %vm755_vm6, %v635_v14, %v763_v54 }
  0x36   : > { %v389_v32 = vadd.f32 %v388_v25, %v387_v17  ;;  %v416_v50 = vrot.slane %v415_v26, 2  ;;  %v444_v51 = vrot.slane %v443_v27, 2  ;;  %v765_v33 = vsel %vm757_vm7, %v639_v15, %v764_v28 }
  0x37   : > { %v471_v52 = vadd.f32 %v470_v29, %v469_v21  ;;  %v499_v53 = vadd.f32 %v498_v30, %v497_v22  ;;  %v527_v55 = vadd.f32 %v526_v31, %v525_v23  ;;  %848 = vmatprep.mubr.f32.mxu0 %v765_v33  ;;  %v553_v59 = vsel %vm384_vm0, %v3976_v48, 0.0 }
  0x38   : > { %v390_v56 = vrot.slane %v389_v32, 1  ;;  %v417_v57 = vadd.f32 %v416_v50, %v415_v26  ;;  %v445_v58 = vadd.f32 %v444_v51, %v443_v27  ;;  %v554_v63 = vrot.slane %v553_v59, 4 }
  0x39   : > { %v472_v60 = vrot.slane %v471_v52, 2  ;;  %v500_v61 = vrot.slane %v499_v53, 2  ;;  %v528_v62 = vrot.slane %v527_v55, 2  ;;  %v581_v3 = vsel %vm384_vm0, %v3979_v49, 0.0 }
  0x3a   : > { %v391_v0 = vadd.f32 %v390_v56, %v389_v32  ;;  %v418_v1 = vrot.slane %v417_v57, 1  ;;  %v446_v2 = vrot.slane %v445_v58, 1  ;;  %v555_v7 = vadd.f32 %v554_v63, %v553_v59 }
  0x3b   : > { %v473_v4 = vadd.f32 %v472_v60, %v471_v52  ;;  %v501_v5 = vadd.f32 %v500_v61, %v499_v53  ;;  %v529_v6 = vadd.f32 %v528_v62, %v527_v55  ;;  %v582_v10 = vrot.slane %v581_v3, 4 }
  0x3c   : > { %v419_v8 = vadd.f32 %v418_v1, %v417_v57  ;;  %v447_v9 = vadd.f32 %v446_v2, %v445_v58  ;;  %v610_v11 = vmul.f32 0.25, %v391_v0  ;;  %v556_v15 = vrot.slane %v555_v7, 2 }
  0x3d   : > { %v474_v12 = vrot.slane %v473_v4, 1  ;;  %v502_v13 = vrot.slane %v501_v5, 1  ;;  %v530_v14 = vrot.slane %v529_v6, 1  ;;  %v583_v16 = vadd.f32 %v582_v10, %v581_v3 }
  0x3e   : > { %v614_v17 = vmul.f32 0.25, %v419_v8  ;;  %v618_v18 = vmul.f32 0.25, %v447_v9  ;;  %v4033_v19 = vunpack.c.h.bf16 %v3938_v34  ;;  %v557_v23 = vadd.f32 %v556_v15, %v555_v7 }
  0x3f   : > { %v475_v20 = vadd.f32 %v474_v12, %v473_v4  ;;  %v503_v21 = vadd.f32 %v502_v13, %v501_v5  ;;  %v531_v22 = vadd.f32 %v530_v14, %v529_v6  ;;  %v584_v24 = vrot.slane %v583_v16, 2 }
  0x40   : > { %v746_v25 = vsel %vm745_vm1, %v614_v17, %v610_v11  ;;  %v4037_v26 = vunpack.c.h.bf16 %v3941_v35  ;;  %v4040_v27 = vunpack.c.h.bf16 %v3944_v36  ;;  %v558_v54 = vrot.slane %v557_v23, 1 }
  0x41   : > { %v622_v29 = vmul.f32 0.25, %v475_v20  ;;  %v626_v30 = vmul.f32 0.25, %v503_v21  ;;  %v630_v31 = vmul.f32 0.25, %v531_v22  ;;  %v585_v28 = vadd.f32 %v584_v24, %v583_v16 }
  0x42   : > { %v748_v34 = vsel %vm747_vm2, %v618_v18, %v746_v25  ;;  %v4044_v32 = vunpack.c.h.bf16 %v3953_v40  ;;  %v4047_v50 = vunpack.c.h.bf16 %v3956_v41  ;;  %v559_v51 = vadd.f32 %v558_v54, %v557_v23 }
  0x43   : > { %v750_v35 = vsel %vm749_vm3, %v622_v29, %v748_v34  ;;  %v4051_v33 = vunpack.c.h.bf16 %v3959_v42  ;;  %v353_v36 = vcombine.high %v3950_v39, %v3950_v39  ;;  %v586_v52 = vrot.slane %v585_v28, 1 }
  0x44   : > { %v752_v53 = vsel %vm751_vm4, %v626_v30, %v750_v35  ;;  %v355_v55 = vcombine.high %v3970_v46, %v3970_v46  ;;  %v357_v40 = vcombine.high %v4033_v19, %v4033_v19  ;;  %v634_v41 = vmul.f32 0.25, %v559_v51 }
  0x45   : > { %v754_v56 = vsel %vm753_vm5, %v630_v31, %v752_v53  ;;  %v359_v57 = vcombine.high %v4037_v26, %v4037_v26  ;;  %v361_v42 = vcombine.high %v4040_v27, %v4040_v27  ;;  %v587_v58 = vadd.f32 %v586_v52, %v585_v28 }
  0x46   : > { %v363_v59 = vcombine.high %v4044_v32, %v4044_v32  ;;  %v365_v60 = vcombine.high %v4047_v50, %v4047_v50  ;;  %v367_v61 = vcombine.high %v4051_v33, %v4051_v33  ;;  %v756_v62 = vsel %vm755_vm6, %v634_v41, %v754_v56 }
  0x47   : > { %v406_v63 = vsel %vm384_vm0, %v353_v36, 0.0  ;;  %v434_v0 = vsel %vm384_vm0, %v355_v55, 0.0  ;;  %v462_v1 = vsel %vm384_vm0, %v357_v40, 0.0  ;;  %v638_v2 = vmul.f32 0.25, %v587_v58 }
  0x48   : > { %v407_v3 = vrot.slane %v406_v63, 4  ;;  %v435_v4 = vrot.slane %v434_v0, 4  ;;  %v463_v5 = vrot.slane %v462_v1, 4  ;;  %v490_v6 = vsel %vm384_vm0, %v359_v57, 0.0 }
  0x49   : > { %v518_v7 = vsel %vm384_vm0, %v361_v42, 0.0  ;;  %v546_v8 = vsel %vm384_vm0, %v363_v59, 0.0  ;;  %v574_v9 = vsel %vm384_vm0, %v365_v60, 0.0  ;;  %v758_v10 = vsel %vm757_vm7, %v638_v2, %v756_v62 }
  0x4a   : > { %v408_v11 = vadd.f32 %v407_v3, %v406_v63  ;;  %v436_v12 = vadd.f32 %v435_v4, %v434_v0  ;;  %v464_v13 = vadd.f32 %v463_v5, %v462_v1  ;;  %849 = vmatmul.mubr.f32.vlgmr.msra.gmra.mrb[0].mxu0 %v758_v10  ;;  %v491_v14 = vrot.slane %v490_v6, 4 }
  0x4b   : > { %v519_v15 = vrot.slane %v518_v7, 4  ;;  %v547_v16 = vrot.slane %v546_v8, 4  ;;  %v575_v17 = vrot.slane %v574_v9, 4  ;;  %v602_v22 = vsel %vm384_vm0, %v367_v61, 0.0 }
  0x4c   : > { %v409_v18 = vrot.slane %v408_v11, 2  ;;  %v437_v20 = vrot.slane %v436_v12, 2  ;;  %v465_v21 = vrot.slane %v464_v13, 2  ;;  %v492_v23 = vadd.f32 %v491_v14, %v490_v6 }
  0x4d   : > { %v520_v24 = vadd.f32 %v519_v15, %v518_v7  ;;  %v548_v25 = vadd.f32 %v547_v16, %v546_v8  ;;  %v576_v54 = vadd.f32 %v575_v17, %v574_v9  ;;  %v603_v28 = vrot.slane %v602_v22, 4 }
  0x4e   : > { %v410_v29 = vadd.f32 %v409_v18, %v408_v11  ;;  %v438_v30 = vadd.f32 %v437_v20, %v436_v12  ;;  %v466_v31 = vadd.f32 %v465_v21, %v464_v13  ;;  %v493_v34 = vrot.slane %v492_v23, 2 }
  0x4f   : > { %v521_v51 = vrot.slane %v520_v24, 2  ;;  %v549_v35 = vrot.slane %v548_v25, 2  ;;  %v577_v36 = vrot.slane %v576_v54, 2  ;;  %v604_v40 = vadd.f32 %v603_v28, %v602_v22 }
  0x50   : > { %v411_v52 = vrot.slane %v410_v29, 1  ;;  %v439_v53 = vrot.slane %v438_v30, 1  ;;  %v467_v55 = vrot.slane %v466_v31, 1  ;;  %v494_v41 = vadd.f32 %v493_v34, %v492_v23 }
  0x51   : > { %v522_v56 = vadd.f32 %v521_v51, %v520_v24  ;;  %v550_v57 = vadd.f32 %v549_v35, %v548_v25  ;;  %v578_v42 = vadd.f32 %v577_v36, %v576_v54  ;;  %v605_v61 = vrot.slane %v604_v40, 2 }
  0x52   : > { %v412_v58 = vadd.f32 %v411_v52, %v410_v29  ;;  %v440_v59 = vadd.f32 %v439_v53, %v438_v30  ;;  %v468_v60 = vadd.f32 %v467_v55, %v466_v31  ;;  %v495_v62 = vrot.slane %v494_v41, 1 }
  0x53   : > { %v523_v63 = vrot.slane %v522_v56, 1  ;;  %v551_v0 = vrot.slane %v550_v57, 1  ;;  %v579_v1 = vrot.slane %v578_v42, 1  ;;  %v606_v2 = vadd.f32 %v605_v61, %v604_v40 }
  0x54   : > { %v613_v3 = vmul.f32 0.25, %v412_v58  ;;  %v617_v4 = vmul.f32 0.25, %v440_v59  ;;  %v621_v5 = vmul.f32 0.25, %v468_v60  ;;  %v496_v6 = vadd.f32 %v495_v62, %v494_v41 }
  0x55   : > { %v524_v7 = vadd.f32 %v523_v63, %v522_v56  ;;  %v552_v8 = vadd.f32 %v551_v0, %v550_v57  ;;  %v580_v9 = vadd.f32 %v579_v1, %v578_v42  ;;  %v607_v10 = vrot.slane %v606_v2, 1 }
  0x56   : > { %v773_v11 = vsel %vm745_vm1, %v617_v4, %v613_v3  ;;  %v399_v12 = vsel %vm384_vm0, %v3950_v39, 0.0  ;;  %v427_v13 = vsel %vm384_vm0, %v3970_v46, 0.0  ;;  %v625_v14 = vmul.f32 0.25, %v496_v6 }
  0x57   : > { %v629_v15 = vmul.f32 0.25, %v524_v7  ;;  %v633_v16 = vmul.f32 0.25, %v552_v8  ;;  %v637_v17 = vmul.f32 0.25, %v580_v9  ;;  %v608_v18 = vadd.f32 %v607_v10, %v606_v2 }
  0x58   : > { %v774_v20 = vsel %vm747_vm2, %v621_v5, %v773_v11  ;;  %v400_v21 = vrot.slane %v399_v12, 4  ;;  %v428_v22 = vrot.slane %v427_v13, 4  ;;  %v455_v24 = vsel %vm384_vm0, %v4033_v19, 0.0 }
  0x59   : > { %v775_v23 = vsel %vm749_vm3, %v625_v14, %v774_v20  ;;  %v483_v25 = vsel %vm384_vm0, %v4037_v26, 0.0  ;;  %v511_v54 = vsel %vm384_vm0, %v4040_v27, 0.0  ;;  %v641_v29 = vmul.f32 0.25, %v608_v18 }
  0x5a   : > { %v776_v30 = vsel %vm751_vm4, %v629_v15, %v775_v23  ;;  %v401_v31 = vadd.f32 %v400_v21, %v399_v12  ;;  %v429_v28 = vadd.f32 %v428_v22, %v427_v13  ;;  %v456_v51 = vrot.slane %v455_v24, 4 }
  0x5b   : > { %v777_v34 = vsel %vm753_vm5, %v633_v16, %v776_v30  ;;  %v484_v35 = vrot.slane %v483_v25, 4  ;;  %v512_v36 = vrot.slane %v511_v54, 4  ;;  %v539_v40 = vsel %vm384_vm0, %v4044_v32, 0.0 }
  0x5c   : > { %v778_v52 = vsel %vm755_vm6, %v637_v17, %v777_v34  ;;  %v402_v53 = vrot.slane %v401_v31, 2  ;;  %v430_v55 = vrot.slane %v429_v28, 2  ;;  %v457_v56 = vadd.f32 %v456_v51, %v455_v24 }
  0x5d   : > { %v779_v41 = vsel %vm757_vm7, %v641_v29, %v778_v52  ;;  %v485_v57 = vadd.f32 %v484_v35, %v483_v25  ;;  %v513_v42 = vadd.f32 %v512_v36, %v511_v54  ;;  %v540_v60 = vrot.slane %v539_v40, 4 }
  0x5e   : > { %918 = vmatprep.mubr.f32.mxu1 %v779_v41  ;;  %v403_v58 = vadd.f32 %v402_v53, %v401_v31  ;;  %v431_v59 = vadd.f32 %v430_v55, %v429_v28  ;;  %v567_v61 = vsel %vm384_vm0, %v4047_v50, 0.0  ;;  %v458_v62 = vrot.slane %v457_v56, 2 }
  0x5f   : > { %v486_v63 = vrot.slane %v485_v57, 2  ;;  %v514_v0 = vrot.slane %v513_v42, 2  ;;  %v568_v1 = vrot.slane %v567_v61, 4  ;;  %v541_v4 = vadd.f32 %v540_v60, %v539_v40 }
  0x60   : > { %v404_v2 = vrot.slane %v403_v58, 1  ;;  %v432_v3 = vrot.slane %v431_v59, 1  ;;  %v595_v5 = vsel %vm384_vm0, %v4051_v33, 0.0  ;;  %v459_v6 = vadd.f32 %v458_v62, %v457_v56 }
  0x61   : > { %v487_v7 = vadd.f32 %v486_v63, %v485_v57  ;;  %v515_v8 = vadd.f32 %v514_v0, %v513_v42  ;;  %v569_v9 = vadd.f32 %v568_v1, %v567_v61  ;;  %v542_v12 = vrot.slane %v541_v4, 2  ;;  %v926_v63 = vld [vmem:[%s4669_s3 + $0x8] sm:$0xff]  ;;  %v928_v1 = vld [vmem:[%s4669_s3 + $0x18] sm:$0xff] }
  0x62   : > { %v405_v10 = vadd.f32 %v404_v2, %v403_v58  ;;  %v433_v11 = vadd.f32 %v432_v3, %v431_v59  ;;  %v596_v13 = vrot.slane %v595_v5, 4  ;;  %v460_v14 = vrot.slane %v459_v6, 1  ;;  %v930_v0 = vld [vmem:[%s4669_s3 + $0x28] sm:$0xff]  ;;  %v932_v3 = vld [vmem:[%s4669_s3 + $0x38] sm:$0xff] }
  0x63   : > { %v488_v15 = vrot.slane %v487_v7, 1  ;;  %v516_v16 = vrot.slane %v515_v8, 1  ;;  %v570_v17 = vrot.slane %v569_v9, 2  ;;  %v543_v18 = vadd.f32 %v542_v12, %v541_v4  ;;  %v925_v4 = vld [vmem:[%s4669_s3] sm:$0xff]  ;;  %v938_v12 = vld [vmem:[%s4669_s3 + $0x68] sm:$0xff] }
  0x64   : > { %v597_v20 = vadd.f32 %v596_v13, %v595_v5  ;;  %v612_v21 = vmul.f32 0.25, %v405_v10  ;;  %v616_v22 = vmul.f32 0.25, %v433_v11  ;;  %v461_v23 = vadd.f32 %v460_v14, %v459_v6  ;;  %v929_v5 = vld [vmem:[%s4669_s3 + $0x20] sm:$0xff]  ;;  %v934_v11 = vld [vmem:[%s4669_s3 + $0x48] sm:$0xff]  ;;  %v936_v13 = vld [vmem:[%s4669_s3 + $0x58] sm:$0xff] }
  0x65   : > { %v489_v24 = vadd.f32 %v488_v15, %v487_v7  ;;  %v517_v25 = vadd.f32 %v516_v16, %v515_v8  ;;  %v571_v54 = vadd.f32 %v570_v17, %v569_v9  ;;  %v544_v29 = vrot.slane %v543_v18, 1  ;;  %v927_v8 = vld [vmem:[%s4669_s3 + $0x10] sm:$0xff]  ;;  %v940_v15 = vld [vmem:[%s4669_s3 + $0x78] sm:$0xff]  ;;  %v933_v16 = vld [vmem:[%s4669_s3 + $0x40] sm:$0xff] }
  0x66   : > { %v598_v30 = vrot.slane %v597_v20, 2  ;;  %v766_v31 = vsel %vm745_vm1, %v616_v22, %v612_v21  ;;  %v620_v34 = vmul.f32 0.25, %v461_v23  ;;  %v3574_v2 = vpack.c.bf16 %v930_v0, %v926_v63  ;;  %v931_v9 = vld [vmem:[%s4669_s3 + $0x30] sm:$0xff]  ;;  %v937_v17 = vld [vmem:[%s4669_s3 + $0x60] sm:$0xff] }
  0x67   : > { %v572_v28 = vrot.slane %v571_v54, 1  ;;  %v624_v51 = vmul.f32 0.25, %v489_v24  ;;  %v628_v35 = vmul.f32 0.25, %v517_v25  ;;  %v545_v36 = vadd.f32 %v544_v29, %v543_v18  ;;  %v935_v21 = vld [vmem:[%s4669_s3 + $0x50] sm:$0xff] }
  0x68   : > { %v599_v52 = vadd.f32 %v598_v30, %v597_v20  ;;  %v767_v55 = vsel %vm747_vm2, %v620_v34, %v766_v31  ;;  %v3582_v6 = vpack.c.bf16 %v932_v3, %v928_v1  ;;  %v3576_v7 = vpack.c.bf16 %v929_v5, %v925_v4  ;;  %3575 = vmatprep.subr.bf16.mxu0 %v3574_v2  ;;  %v939_v22 = vld [vmem:[%s4669_s3 + $0x70] sm:$0xff]  ;;  %v3362_v30 = vld [vmem:[%s4668_s2] ss:$0 sm:$0xff] }
  0x69   : > { %v573_v53 = vadd.f32 %v572_v28, %v571_v54  ;;  %v632_v41 = vmul.f32 0.25, %v545_v36  ;;  %v768_v56 = vsel %vm749_vm3, %v624_v51, %v767_v55  ;;  %v3584_v10 = vpack.c.bf16 %v931_v9, %v927_v8 }
  0x6a   : > { %v600_v40 = vrot.slane %v599_v52, 1  ;;  %v769_v42 = vsel %vm751_vm4, %v628_v35, %v768_v56  ;;  %3583 = vmatprep.subr.bf16.mxu1 %v3582_v6  ;;  %3577 = vmatpush1.bf16.msra.mxu0 %v3576_v7  ;;  %v3578_v14 = vpack.c.bf16 %v938_v12, %v934_v11  ;;  %v3586_v18 = vpack.c.bf16 %v940_v15, %v936_v13 }
  0x6b   : > { %v636_v57 = vmul.f32 0.25, %v573_v53  ;;  %v770_v59 = vsel %vm753_vm5, %v632_v41, %v769_v42  ;;  %v3580_v20 = vpack.c.bf16 %v937_v17, %v933_v16  ;;  %v3588_v23 = vpack.c.bf16 %v939_v22, %v935_v21  ;;  %v1589_v53 = vld [vmem:[%s4671_s5] sm:$0xf] }
  0x6c   : > { %v601_v58 = vadd.f32 %v600_v40, %v599_v52  ;;  %3579 = vmatprep.subr.bf16.mxu0 %v3578_v14  ;;  %v3632_v24 = vmov 0.0   ;;  %v1590_v52 = vld [vmem:[%s4672_s6] sm:$0xf]  ;;  %v943_v55 = vlaneseq }
  0x6d   : > { %v771_v60 = vsel %vm755_vm6, %v636_v57, %v770_v59  ;;  %1031 = vmatprep.mubr.f32.mxu0 %v3632_v24  ;;  %v941_v57 = vld [vmem:[%s4670_s4] sm:$0xf] }
  0x6e   : > { %v640_v61 = vmul.f32 0.25, %v601_v58  ;;  %3581 = vmatpush1.bf16.msra.mxu0 %v3580_v20  ;;  %v4175_v40 = vshrl.u32 %v943_v55, 7  ;;  %v3633_v20 = vmov 1966171168  }
  0x6f   : > { %3500 = vmatprep.subr.mxu0 %v3632_v24  ;;  %v1142_v21 = vunpack.c.l.s4 %v3633_v20 }
  0x70   : > { %v772_v62 = vsel %vm757_vm7, %v640_v61, %v771_v60  ;;  %v4178_v41 = vsub.s32 0, %v4175_v40  ;;  %v4181_v56 = vsub.s32 2, %v4175_v40  ;;  %v4187_v42 = vsub.s32 1, %v4175_v40 }
  0x71   : > { %919 = vmatmul.mubr.f32.vlgmr.msra.gmra.mrb[0].mxu1 %v772_v62  ;;  %v4190_v58 = vsub.s32 3, %v4175_v40  ;;  %v1143_v22 = vunpack.c.0.s8 %v1142_v21 }
  0x72   : > { %3585 = vmatpush1.bf16.msra.mxu1 %v3584_v10  ;;  %1102 = vmatprep.mubr.f32.mxu1 %v3632_v24  ;;  %v946_v59 = vrot.slane %v941_v57, %v4178_v41  ;;  %v954_v60 = vrot.slane %v941_v57, %v4181_v56  ;;  %v950_v61 = vrot.slane %v941_v57, %v4187_v42 }
  0x73   : > { %3587 = vmatprep.subr.bf16.mxu1 %v3586_v18  ;;  %v958_v62 = vrot.slane %v941_v57, %v4190_v58 }
  0x76   : > { %3589 = vmatpush1.bf16.msra.mxu1 %v3588_v23 }
  0x77   : > { %3505 = vmatprep.subr.mxu1 %v3632_v24 }
 0x11d   : > { %v3458_v25 = vpop.f32.mrb[0].mxu0 }
 0x11e   : > { %v3459_v54 = vpop.f32.mrb[1].mxu0 }
 0x11f   : > { %v3460_v29 = vadd.f32 %v3459_v54, %v3458_v25  ;;  %v4197_v54 = vsub.s32 %v1143_v22, %v4175_v40 }
 0x121   : > { %v851_v31 = vadd.f32 %v3460_v29, %v3362_v30 }
 0x144   : > { %v3493_v28 = vpop.f32.mrb[0].mxu1 }
 0x145   : > { %v3494_v34 = vpop.f32.mrb[1].mxu1 }
 0x146   : > { %v3495_v51 = vadd.f32 %v3494_v34, %v3493_v28 }
 0x148   : > { %v921_v35 = vadd.f32 %v3495_v51, %v851_v31 }
 0x14a   : > { %v924_v36 = vmax.f32 %v921_v35, 0.0 }
 0x14c   : > { %3363 = vmatmul.mubr.msk.f32.vlgmr.msra.gmra.mrb[2].mxu0 %vm963_vm8, %v924_v36  ;;  %3364 = vmatmul.mubr.msk.f32.vlgmr.msra.gmra.mrb[2].mxu1 %vm963_vm8, %v924_v36 }
 0x14d   : > { %3501 = vmatpush3.msk.msra.mxu0 %vm384_vm0, %v1590_v52  ;;  %3506 = vmatpush3.msk.msra.mxu1 %vm384_vm0, %v1589_v53 }
 0x14e   : > { %3502 = vmatprep.mubr.msk.f32.mxu0 %vm3635_vm9, %v3632_v24  ;;  %3507 = vmatprep.mubr.msk.f32.mxu1 %vm3635_vm9, %v3632_v24 }
 0x21f   : > { %v1033_v63 = vpop.f32.mrb[2].mxu0  ;;  %v1104_v0 = vpop.f32.mrb[2].mxu1 }
 0x220   : > { %v1034_v1 = vadd.f32 %v1033_v63, %v946_v59  ;;  %v1105_v2 = vadd.f32 %v1104_v0, %v954_v60  ;;  %v1035_v3 = vpop.f32.mrb[3].mxu0  ;;  %v1106_v4 = vpop.f32.mrb[3].mxu1 }
 0x221   : > { %v1036_v5 = vadd.f32 %v1035_v3, %v950_v61  ;;  %v1107_v6 = vadd.f32 %v1106_v4, %v958_v62 }
 0x222   : > { %v3365_v7 = vmul.f32 -1.442695, %v1034_v1  ;;  %v3367_v8 = vmul.f32 -1.442695, %v1105_v2 }
 0x223   : > { %v3366_v9 = vmul.f32 -1.442695, %v1036_v5  ;;  %v3368_v10 = vmul.f32 -1.442695, %v1107_v6 }
 0x224   : > { %3604 = vpow2.f32 %v3365_v7 }
 0x225   : > { %3606 = vpow2.f32 %v3367_v8 }
 0x226   : > { %3608 = vpow2.f32 %v3366_v9 }
 0x227   : > { %3610 = vpow2.f32 %v3368_v10 }
 0x22e   : > { %v3605_v11 = vpop.eup %3604 }
 0x22f   : > { %v3607_v12 = vpop.eup %3606  ;;  %v1121_v13 = vadd.f32 1.0, %v3605_v11 }
 0x230   : > { %v3609_v14 = vpop.eup %3608  ;;  %v1123_v15 = vadd.f32 1.0, %v3607_v12 }
 0x231   : > { %v3611_v16 = vpop.eup %3610  ;;  %3612 = vrcp.f32 %v1121_v13  ;;  %v1122_v17 = vadd.f32 1.0, %v3609_v14 }
 0x232   : > { %3614 = vrcp.f32 %v1123_v15  ;;  %v1124_v18 = vadd.f32 1.0, %v3611_v16 }
 0x233   : > { %3616 = vrcp.f32 %v1122_v17 }
 0x234   : > { %3618 = vrcp.f32 %v1124_v18 }
 0x23b   : > { %v3613_v23 = vpop.eup %3612 }
 0x23c   : > { %v3615_v25 = vpop.eup %3614 }
 0x23d   : > { %v3617_v29 = vpop.eup %3616 }
 0x23e   : > { %v3619_v30 = vpop.eup %3618  ;;  %v1137_v31 = vcombine.low %v3613_v23, %v3617_v29  ;;  %v1138_v28 = vcombine.high %v3613_v23, %v3617_v29 }
 0x23f   : > { %v1139_v34 = vcombine.low %v3615_v25, %v3619_v30  ;;  %v1140_v51 = vcombine.high %v3615_v25, %v3619_v30 }
 0x240   : > { %v1147_v35 = vrot.slane %v1137_v31, %v4197_v54  ;;  %v1154_v36 = vrot.slane %v1138_v28, %v4197_v54 }
 0x241   : > { %v1161_v52 = vrot.slane %v1139_v34, %v4197_v54  ;;  %v1168_v53 = vrot.slane %v1140_v51, %v4197_v54 }
 0x243   : > { %v1169_v57 = vcombine.low %v1147_v35, %v1161_v52  ;;  %v1170_v59 = vcombine.high %v1147_v35, %v1161_v52  ;;  %v1171_v60 = vcombine.low %v1154_v36, %v1168_v53  ;;  %v1172_v61 = vcombine.high %v1154_v36, %v1168_v53 }
 0x245   : > { %v1179_v62 = vrot.slane %v1169_v57, %v4197_v54  ;;  %v4205_v63 = vrot.slane %v1170_v59, %v4197_v54  ;;  %v4208_v0 = vrot.slane %v1172_v61, %v4197_v54  ;;  %v4211_v1 = vrot.slane %v1171_v60, %v4197_v54 }
 0x247   : > { %v1208_v2 = vrot.slane %v1179_v62, %v4178_v41  ;;  %v1212_v3 = vrot.slane %v1179_v62, %v4187_v42  ;;  %v1216_v4 = vrot.slane %v1179_v62, %v4181_v56  ;;  %v1220_v5 = vrot.slane %v1179_v62, %v4190_v58 }
 0x248   : > { %v1288_v6 = vrot.slane %v4208_v0, %v4178_v41  ;;  %v1292_v7 = vrot.slane %v4208_v0, %v4187_v42  ;;  %v1296_v8 = vrot.slane %v4208_v0, %v4181_v56  ;;  %v1300_v9 = vrot.slane %v4208_v0, %v4190_v58 }
 0x249   : > { %v1333_v10 = vcombine.low %v1208_v2, %v1212_v3  ;;  %v1334_v11 = vcombine.low %v1216_v4, %v1220_v5  ;;  %v1224_v12 = vrot.slane %v4205_v63, %v4178_v41  ;;  %v1228_v13 = vrot.slane %v4205_v63, %v4187_v42 }
 0x24a   : > { %v1343_v14 = vcombine.low %v1288_v6, %v1292_v7  ;;  %v1344_v15 = vcombine.low %v1296_v8, %v1300_v9  ;;  %v1232_v16 = vrot.slane %v4205_v63, %v4181_v56  ;;  %v1236_v17 = vrot.slane %v4205_v63, %v4190_v58 }
 0x24b   : > { %v4234_v18 = vmul.f32 %v1333_v10, %v3946_v37  ;;  %v4237_v20 = vmul.f32 %v1334_v11, %v3950_v39  ;;  %v1335_v21 = vcombine.low %v1224_v12, %v1228_v13  ;;  %v1201_v29 = vcombine.high %v1179_v62, %v1179_v62 }
 0x24c   : > { %v4240_v22 = vmul.f32 %v1343_v14, %v3973_v47  ;;  %v4243_v23 = vmul.f32 %v1344_v15, %v4044_v32  ;;  %v1336_v25 = vcombine.low %v1232_v16, %v1236_v17  ;;  %v1272_v47 = vrot.slane %v4211_v1, %v4178_v41 }
 0x24d   : > { %v4247_v30 = vcombine.high %v4234_v18, %v4234_v18  ;;  %v4251_v37 = vcombine.high %v4237_v20, %v4237_v20  ;;  %v1387_v39 = vsel %vm384_vm0, %v4234_v18, 0.0  ;;  %v1390_v34 = vsel %vm384_vm0, %v4237_v20, 0.0 }
 0x24e   : > { %v4259_v32 = vcombine.high %v4240_v22, %v4240_v22  ;;  %v4263_v31 = vcombine.high %v4243_v23, %v4243_v23  ;;  %v1462_v28 = vsel %vm384_vm0, %v4240_v22, 0.0  ;;  %v1465_v51 = vsel %vm384_vm0, %v4243_v23, 0.0 }
 0x24f   : > { %3374 = vmatprep.subr.msk.mxu0 %vm384_vm0, %v4247_v30  ;;  %3377 = vmatprep.subr.msk.mxu1 %vm384_vm0, %v4251_v37  ;;  %v1388_v35 = vsel %vm384_vm0, %v4247_v30, 0.0  ;;  %v4278_v36 = vmul.f32 %v1335_v21, %v3948_v38  ;;  %v4281_v52 = vmul.f32 %v1336_v25, %v3970_v46  ;;  %v1392_v59 = vsel %vm384_vm0, %v4251_v37, 0.0 }
 0x250   : > { %v1463_v53 = vsel %vm384_vm0, %v4259_v32, 0.0  ;;  %v1389_v57 = vadd.f32 %v1388_v35, %v1387_v39  ;;  %v1240_v60 = vrot.slane %v1201_v29, %v4178_v41  ;;  %v1467_v62 = vsel %vm384_vm0, %v4263_v31, 0.0 }
 0x251   : > { %v1464_v61 = vadd.f32 %v1463_v53, %v1462_v28  ;;  %v4292_v38 = vcombine.high %v4278_v36, %v4278_v36  ;;  %v4296_v46 = vcombine.high %v4281_v52, %v4281_v52  ;;  %v1402_v3 = vsel %vm384_vm0, %v4278_v36, 0.0 }
 0x252   : > { %v1391_v2 = vadd.f32 %v1390_v34, %v1389_v57  ;;  %v1244_v4 = vrot.slane %v1201_v29, %v4187_v42  ;;  %v1248_v5 = vrot.slane %v1201_v29, %v4181_v56  ;;  %v1405_v8 = vsel %vm384_vm0, %v4281_v52, 0.0 }
 0x253   : > { %v1466_v6 = vadd.f32 %v1465_v51, %v1464_v61  ;;  %v1403_v7 = vsel %vm384_vm0, %v4292_v38, 0.0  ;;  %v1252_v9 = vrot.slane %v1201_v29, %v4190_v58  ;;  %v1276_v13 = vrot.slane %v4211_v1, %v4187_v42 }
 0x254   : > { %v1393_v10 = vadd.f32 %v1392_v59, %v1391_v2  ;;  %v1404_v11 = vadd.f32 %v1403_v7, %v1402_v3  ;;  %v1337_v12 = vcombine.low %v1240_v60, %v1244_v4  ;;  %v1280_v16 = vrot.slane %v4211_v1, %v4181_v56 }
 0x255   : > { %v1468_v14 = vadd.f32 %v1467_v62, %v1466_v6  ;;  %v1338_v15 = vcombine.low %v1248_v5, %v1252_v9  ;;  %v1284_v17 = vrot.slane %v4211_v1, %v4190_v58  ;;  %v1341_v29 = vcombine.low %v1272_v47, %v1276_v13 }
 0x256   : > { %1394 = vadd.xlane.f32.xlu0 %v1393_v10  ;;  %v1406_v21 = vadd.f32 %v1405_v8, %v1404_v11  ;;  %v4314_v25 = vmul.f32 %v1337_v12, %v3962_v43  ;;  %v1203_v39 = vcombine.high %v4205_v63, %v4205_v63  ;;  %v1407_v28 = vsel %vm384_vm0, %v4296_v46, 0.0 }
 0x257   : > { %1469 = vadd.xlane.f32.xlu1 %v1468_v14  ;;  %v4321_v34 = vmul.f32 %v1338_v15, %v4033_v19  ;;  %v1342_v51 = vcombine.low %v1280_v16, %v1284_v17  ;;  %v1202_v35 = vcombine.high %v4211_v1, %v4211_v1  ;;  %v4330_v47 = vmul.f32 %v1341_v29, %v3968_v45 }
 0x258   : > { %v1408_v53 = vadd.f32 %v1407_v28, %v1406_v21  ;;  %v4327_v43 = vcombine.high %v4314_v25, %v4314_v25  ;;  %v1204_v63 = vcombine.high %v4208_v0, %v4208_v0  ;;  %v1417_v19 = vsel %vm384_vm0, %v4314_v25, 0.0 }
 0x259   : > { %v4336_v57 = vcombine.high %v4321_v34, %v4321_v34  ;;  %v4341_v1 = vmul.f32 %v1342_v51, %v4040_v27  ;;  %v1256_v59 = vrot.slane %v1203_v39, %v4178_v41  ;;  %v1420_v60 = vsel %vm384_vm0, %v4321_v34, 0.0 }
 0x25a   : > { %1409 = vadd.xlane.f32.xlu0 %v1408_v53  ;;  %v1418_v45 = vsel %vm384_vm0, %v4327_v43, 0.0  ;;  %v4350_v0 = vcombine.high %v4330_v47, %v4330_v47  ;;  %v1260_v61 = vrot.slane %v1203_v39, %v4187_v42  ;;  %v1447_v3 = vsel %vm384_vm0, %v4330_v47, 0.0 }
 0x25b   : > { %v1419_v62 = vadd.f32 %v1418_v45, %v1417_v19  ;;  %v1422_v27 = vsel %vm384_vm0, %v4336_v57, 0.0  ;;  %v4357_v2 = vcombine.high %v4341_v1, %v4341_v1  ;;  %v1264_v5 = vrot.slane %v1203_v39, %v4181_v56 }
 0x25c   : > { %v1448_v4 = vsel %vm384_vm0, %v4350_v0, 0.0  ;;  %v1268_v6 = vrot.slane %v1203_v39, %v4190_v58  ;;  %v1339_v7 = vcombine.low %v1256_v59, %v1260_v61  ;;  %v1450_v10 = vsel %vm384_vm0, %v4341_v1, 0.0 }
 0x25d   : > { %v1421_v8 = vadd.f32 %v1420_v60, %v1419_v62  ;;  %v1449_v9 = vadd.f32 %v1448_v4, %v1447_v3  ;;  %v1304_v11 = vrot.slane %v1202_v35, %v4178_v41  ;;  %v1308_v14 = vrot.slane %v1202_v35, %v4187_v42 }
 0x25e   : > { %v1340_v12 = vcombine.low %v1264_v5, %v1268_v6  ;;  %v4369_v13 = vmul.f32 %v1339_v7, %v3965_v44  ;;  %v1312_v15 = vrot.slane %v1202_v35, %v4181_v56  ;;  %v1316_v21 = vrot.slane %v1202_v35, %v4190_v58 }
 0x25f   : > { %v1423_v16 = vadd.f32 %v1422_v27, %v1421_v8  ;;  %v1451_v17 = vadd.f32 %v1450_v10, %v1449_v9  ;;  %v1320_v29 = vrot.slane %v1204_v63, %v4178_v41  ;;  %v1452_v39 = vsel %vm384_vm0, %v4357_v2, 0.0 }
 0x260   : > { %v4378_v28 = vmul.f32 %v1340_v12, %v4037_v26  ;;  %v4382_v44 = vcombine.high %v4369_v13, %v4369_v13  ;;  %v1345_v51 = vcombine.low %v1304_v11, %v1308_v14  ;;  %v1346_v19 = vcombine.low %v1312_v15, %v1316_v21 }
 0x261   : > { %1424 = vadd.xlane.f32.xlu1 %v1423_v16  ;;  %v1453_v53 = vadd.f32 %v1452_v39, %v1451_v17  ;;  %v1324_v59 = vrot.slane %v1204_v63, %v4187_v42  ;;  %v1328_v35 = vrot.slane %v1204_v63, %v4181_v56  ;;  %v1432_v26 = vsel %vm384_vm0, %v4369_v13, 0.0 }
 0x262   : > { %v4388_v41 = vcombine.high %v4378_v28, %v4378_v28  ;;  %v1433_v45 = vsel %vm384_vm0, %v4382_v44, 0.0  ;;  %v4395_v60 = vmul.f32 %v1345_v51, %v3976_v48  ;;  %v4398_v62 = vmul.f32 %v1346_v19, %v4047_v50 }
 0x263   : > { %1454 = vadd.xlane.f32.xlu0 %v1453_v53  ;;  %v1434_v61 = vadd.f32 %v1433_v45, %v1432_v26  ;;  %v1332_v56 = vrot.slane %v1204_v63, %v4190_v58  ;;  %v1347_v42 = vcombine.low %v1320_v29, %v1324_v59  ;;  %v1435_v27 = vsel %vm384_vm0, %v4378_v28, 0.0 }
 0x264   : > { %v4405_v3 = vcombine.high %v4395_v60, %v4395_v60  ;;  %v1437_v48 = vsel %vm384_vm0, %v4388_v41, 0.0  ;;  %v4411_v5 = vcombine.high %v4398_v62, %v4398_v62  ;;  %v1477_v58 = vsel %vm384_vm0, %v4395_v60, 0.0 }
 0x265   : > { %v1436_v4 = vadd.f32 %v1435_v27, %v1434_v61  ;;  %v1348_v50 = vcombine.low %v1328_v35, %v1332_v56  ;;  %v4418_v6 = vmul.f32 %v1347_v42, %v3979_v49  ;;  %v1518_v7 = vsel %vm384_vm0, %v4247_v30, -inf }
 0x266   : > { %v1478_v63 = vsel %vm384_vm0, %v4405_v3, 0.0  ;;  %v1517_v11 = vsel %vm384_vm0, %v4234_v18, -inf  ;;  %v1480_v12 = vsel %vm384_vm0, %v4398_v62, 0.0  ;;  %v1520_v15 = vsel %vm384_vm0, %v4237_v20, -inf }
 0x267   : > { %v1438_v8 = vadd.f32 %v1437_v48, %v1436_v4  ;;  %v1479_v9 = vadd.f32 %v1478_v63, %v1477_v58  ;;  %v4423_v10 = vmul.f32 %v1348_v50, %v4051_v33  ;;  %v4431_v14 = vcombine.high %v4418_v6, %v4418_v6 }
 0x268   : > { %v1519_v49 = vmax.f32 %v1517_v11, %v1518_v7  ;;  %v1482_v33 = vsel %vm384_vm0, %v4411_v5, 0.0  ;;  %v1492_v17 = vsel %vm384_vm0, %v4418_v6, 0.0  ;;  %v1526_v39 = vsel %vm384_vm0, %v4278_v36, -inf }
 0x269   : > { %1439 = vadd.xlane.f32.xlu1 %v1438_v8  ;;  %v1481_v30 = vadd.f32 %v1480_v12, %v1479_v9  ;;  %v4439_v16 = vcombine.high %v4423_v10, %v4423_v10  ;;  %v1493_v21 = vsel %vm384_vm0, %v4431_v14, 0.0  ;;  %v1527_v51 = vsel %vm384_vm0, %v4292_v38, -inf }
 0x26a   : > { %v1521_v29 = vmax.f32 %v1519_v49, %v1520_v15  ;;  %v1494_v19 = vadd.f32 %v1493_v21, %v1492_v17  ;;  %v1528_v59 = vmax.f32 %v1526_v39, %v1527_v51  ;;  %v1495_v35 = vsel %vm384_vm0, %v4423_v10, 0.0 }
 0x26b   : > { %v1483_v53 = vadd.f32 %v1482_v33, %v1481_v30  ;;  %v1522_v26 = vsel %vm384_vm0, %v4251_v37, -inf  ;;  %v1553_v45 = vsel %vm384_vm0, %v4330_v47, -inf  ;;  %v1554_v61 = vsel %vm384_vm0, %v4350_v0, -inf }
 0x26c   : > { %v1496_v56 = vadd.f32 %v1495_v35, %v1494_v19  ;;  %v1497_v42 = vsel %vm384_vm0, %v4439_v16, 0.0  ;;  %v1529_v27 = vsel %vm384_vm0, %v4281_v52, -inf  ;;  %v1555_v4 = vmax.f32 %v1553_v45, %v1554_v61 }
 0x26d   : > { %1484 = vadd.xlane.f32.xlu0 %v1483_v53  ;;  %v1523_v48 = vmax.f32 %v1521_v29, %v1522_v26  ;;  %v1556_v50 = vsel %vm384_vm0, %v4341_v1, -inf  ;;  %v1562_v37 = vsel %vm384_vm0, %v4240_v22, -inf  ;;  %v1563_v58 = vsel %vm384_vm0, %v4259_v32, -inf }
 0x26e   : > { %v1498_v63 = vadd.f32 %v1497_v42, %v1496_v56  ;;  %v1530_v7 = vmax.f32 %v1528_v59, %v1529_v27  ;;  %v1557_v8 = vmax.f32 %v1555_v4, %v1556_v50  ;;  %v1564_v9 = vmax.f32 %v1562_v37, %v1563_v58 }
 0x26f   : > { %v1565_v11 = vsel %vm384_vm0, %v4243_v23, -inf  ;;  %v1535_v12 = vsel %vm384_vm0, %v4314_v25, -inf  ;;  %v1536_v49 = vsel %vm384_vm0, %v4327_v43, -inf  ;;  %v1531_v15 = vsel %vm384_vm0, %v4296_v46, -inf }
 0x270   : > { %1499 = vadd.xlane.f32.xlu1 %v1498_v63  ;;  %v1566_v30 = vmax.f32 %v1564_v9, %v1565_v11  ;;  %v1537_v33 = vmax.f32 %v1535_v12, %v1536_v49  ;;  %v1558_v17 = vsel %vm384_vm0, %v4357_v2, -inf  ;;  %v1538_v21 = vsel %vm384_vm0, %v4321_v34, -inf }
 0x271   : > { %1524 = vmax.xlane.f32.xlu0 %v1523_v48  ;;  %v1544_v29 = vsel %vm384_vm0, %v4369_v13, -inf  ;;  %v1545_v39 = vsel %vm384_vm0, %v4382_v44, -inf  ;;  %v1532_v51 = vmax.f32 %v1530_v7, %v1531_v15  ;;  %v1559_v53 = vmax.f32 %v1557_v8, %v1558_v17 }
 0x272   : > { %v1539_v19 = vmax.f32 %v1537_v33, %v1538_v21  ;;  %v1546_v59 = vmax.f32 %v1544_v29, %v1545_v39  ;;  %v1567_v35 = vsel %vm384_vm0, %v4263_v31, -inf  ;;  %v1540_v26 = vsel %vm384_vm0, %v4336_v57, -inf }
 0x273   : > { %v1571_v45 = vsel %vm384_vm0, %v4395_v60, -inf  ;;  %v1572_v61 = vsel %vm384_vm0, %v4405_v3, -inf  ;;  %v1568_v56 = vmax.f32 %v1566_v30, %v1567_v35  ;;  %v1547_v42 = vsel %vm384_vm0, %v4378_v28, -inf }
 0x274   : > { %1533 = vmax.xlane.f32.xlu1 %v1532_v51  ;;  %v1573_v27 = vmax.f32 %v1571_v45, %v1572_v61  ;;  %v1581_v4 = vsel %vm384_vm0, %v4431_v14, -inf  ;;  %v1541_v48 = vmax.f32 %v1539_v19, %v1540_v26  ;;  %v1574_v50 = vsel %vm384_vm0, %v4398_v62, -inf }
 0x275   : > { %1560 = vmax.xlane.f32.xlu0 %v1559_v53  ;;  %v1580_v37 = vsel %vm384_vm0, %v4418_v6, -inf  ;;  %v1548_v58 = vmax.f32 %v1546_v59, %v1547_v42  ;;  %v3634_v8 = vmov 0   ;;  %v1549_v9 = vsel %vm384_vm0, %v4388_v41, -inf }
 0x276   : > { %v1575_v63 = vmax.f32 %v1573_v27, %v1574_v50  ;;  %v1582_v7 = vmax.f32 %v1580_v37, %v1581_v4  ;;  %3602 = vset.pattern.permute.xlu0 %v3634_v8  ;;  %3603 = vset.pattern.permute.xlu1 %v3634_v8  ;;  %v1576_v11 = vsel %vm384_vm0, %v4411_v5, -inf  ;;  %v1583_v12 = vsel %vm384_vm0, %v4423_v10, -inf }
 0x277   : > { %v1550_v49 = vmax.f32 %v1548_v58, %v1549_v9  ;;  %v1585_v33 = vsel %vm384_vm0, %v4439_v16, -inf  ;;  %v1600_v42 = vand.u32 127, %v943_v55 }
 0x278   : > { %1569 = vmax.xlane.f32.xlu1 %v1568_v56  ;;  %v1577_v15 = vmax.f32 %v1575_v63, %v1576_v11  ;;  %v1584_v30 = vmax.f32 %v1582_v7, %v1583_v12 }
 0x279   : > { %1542 = vmax.xlane.f32.xlu0 %v1541_v48  ;;  %v1603_v50 = vsub.s32 %v1600_v42, %v4175_v40 }
 0x27a   : > { %v1586_v17 = vmax.f32 %v1584_v30, %v1585_v33 }
 0x27c   : > { %1551 = vmax.xlane.f32.xlu1 %v1550_v49 }
 0x27d   : > { %1578 = vmax.xlane.f32.xlu0 %v1577_v15 }
 0x280   : > { %1587 = vmax.xlane.f32.xlu1 %v1586_v17 }
 0x2e3   : > { %v1395_v21 = vpop.xlane.xlu0 %1394 }
 0x2e4   : > { %v1509_v29 = vmul.f32 0.001953125, %v1395_v21  ;;  %v1470_v53 = vpop.xlane.xlu1 %1469 }
 0x2e5   : > { %v1514_v26 = vmul.f32 0.001953125, %v1470_v53 }
 0x2e6   : > { %1725 = vperm.xlu0 %3602, %v1509_v29  }
 0x2e7   : > { %v1410_v39 = vpop.xlane.xlu0 %1409 }
 0x2e8   : > { %v1510_v51 = vmul.f32 0.001953125, %v1410_v39 }
 0x2ea   : > { %1728 = vperm.xlu1 %3603, %v1510_v51  }
 0x2ee   : > { %v1425_v35 = vpop.xlane.xlu1 %1424 }
 0x2ef   : > { %v1511_v61 = vmul.f32 0.001953125, %v1425_v35 }
 0x2f0   : > { %v1455_v19 = vpop.xlane.xlu0 %1454 }
 0x2f1   : > { %v1513_v59 = vmul.f32 0.001953125, %v1455_v19 }
 0x2f3   : > { %1737 = vperm.xlu1 %3603, %v1513_v59  }
 0x2f6   : > { %v1440_v45 = vpop.xlane.xlu1 %1439 }
 0x2f7   : > { %1740 = vperm.xlu1 %3603, %v1514_v26   ;;  %v1512_v27 = vmul.f32 0.001953125, %v1440_v45 }
 0x2fa   : > { %v1485_v56 = vpop.xlane.xlu0 %1484 }
 0x2fb   : > { %1731 = vperm.xlu1 %3603, %v1511_v61   ;;  %v1515_v37 = vmul.f32 0.001953125, %v1485_v56 }
 0x2fd   : > { %v1500_v4 = vpop.xlane.xlu1 %1499 }
 0x2fe   : > { %v1525_v48 = vpop.xlane.xlu0 %1524  ;;  %v1516_v7 = vmul.f32 0.001953125, %v1500_v4 }
 0x2ff   : > { %1734 = vperm.xlu1 %3603, %v1512_v27   ;;  %v1604_v8 = vrot.slane %v1525_v48, %v1603_v50 }
 0x301   : > { %v1534_v58 = vpop.xlane.xlu1 %1533 }
 0x302   : > { %v1561_v63 = vpop.xlane.xlu0 %1560  ;;  %v1608_v9 = vrot.slane %v1534_v58, %v1603_v50 }
 0x303   : > { %1743 = vperm.xlu1 %3603, %v1515_v37   ;;  %v1620_v21 = vrot.slane %v1561_v63, %v1603_v50 }
 0x304   : > { %v1633_v15 = vsel %vm745_vm1, %v1608_v9, %v1604_v8 }
 0x305   : > { %v1570_v11 = vpop.xlane.xlu1 %1569 }
 0x306   : > { %v1543_v12 = vpop.xlane.xlu0 %1542  ;;  %v1624_v29 = vrot.slane %v1570_v11, %v1603_v50 }
 0x307   : > { %v1612_v49 = vrot.slane %v1543_v12, %v1603_v50  ;;  %1746 = vperm.xlu1 %3603, %v1516_v7  }
 0x309   : > { %v1634_v55 = vsel %vm747_vm2, %v1612_v49, %v1633_v15  ;;  %v1552_v30 = vpop.xlane.xlu1 %1551 }
 0x30a   : > { %v1579_v33 = vpop.xlane.xlu0 %1578  ;;  %v1616_v17 = vrot.slane %v1552_v30, %v1603_v50 }
 0x30b   : > { %v1628_v40 = vrot.slane %v1579_v33, %v1603_v50 }
 0x30c   : > { %v1635_v39 = vsel %vm749_vm3, %v1616_v17, %v1634_v55 }
 0x30d   : > { %v1636_v51 = vsel %vm751_vm4, %v1620_v21, %v1635_v39  ;;  %v1588_v53 = vpop.xlane.xlu1 %1587  ;;  %v1863_v39 = vstv %s1862_s18 }
 0x30e   : > { %v1637_v19 = vsel %vm753_vm5, %v1624_v29, %v1636_v51  ;;  %v1632_v59 = vrot.slane %v1588_v53, %v1603_v50 }
 0x30f   : > { %v1638_v35 = vsel %vm755_vm6, %v1628_v40, %v1637_v19 }
 0x310   : > { %v1639_v26 = vsel %vm757_vm7, %v1632_v59, %v1638_v35 }
 0x311   : > { %3503 = vmatmul.mubr.msk.f32.vlgmr.msra.gmra.mrb[4].mxu0 %vm1640_vm10, %v1639_v26 }
 0x312   : > { %3375 = vmatpush1.msk.msra.mxu0 %vm384_vm0, %v4234_v18  ;;  %1995 = vmatprep.mubr.f32.mxu0 %v3632_v24 }
 0x313   : > { %3380 = vmatprep.subr.msk.mxu0 %vm384_vm0, %v4292_v38 }
 0x365   : > { %v1726_v42 = vpop.permute.xlu0 %1725 }
 0x366   : > { %v1751_v37 = vrot.slane %v1726_v42, %v1603_v50 }
 0x369   : > { %v1729_v45 = vpop.permute.xlu1 %1728 }
 0x36a   : > { %v1755_v4 = vrot.slane %v1729_v45, %v1603_v50 }
 0x36c   : > { %v1780_v63 = vsel %vm745_vm1, %v1755_v4, %v1751_v37 }
 0x372   : > { %v1738_v61 = vpop.permute.xlu1 %1737 }
 0x373   : > { %v1767_v8 = vrot.slane %v1738_v61, %v1603_v50 }
 0x376   : > { %v1741_v56 = vpop.permute.xlu1 %1740 }
 0x377   : > { %v1771_v12 = vrot.slane %v1741_v56, %v1603_v50 }
 0x37a   : > { %v1732_v27 = vpop.permute.xlu1 %1731 }
 0x37b   : > { %v1759_v48 = vrot.slane %v1732_v27, %v1603_v50 }
 0x37d   : > { %v1781_v18 = vsel %vm747_vm2, %v1759_v48, %v1780_v63 }
 0x37e   : > { %v1735_v58 = vpop.permute.xlu1 %1734 }
 0x37f   : > { %v1763_v7 = vrot.slane %v1735_v58, %v1603_v50 }
 0x381   : > { %v1782_v9 = vsel %vm749_vm3, %v1763_v7, %v1781_v18 }
 0x382   : > { %v1783_v11 = vsel %vm751_vm4, %v1767_v8, %v1782_v9  ;;  %v1744_v38 = vpop.permute.xlu1 %1743 }
 0x383   : > { %v1775_v49 = vrot.slane %v1744_v38, %v1603_v50  ;;  %v1784_v15 = vsel %vm753_vm5, %v1771_v12, %v1783_v11 }
 0x385   : > { %v1785_v33 = vsel %vm755_vm6, %v1775_v49, %v1784_v15 }
 0x386   : > { %v1747_v55 = vpop.permute.xlu1 %1746 }
 0x387   : > { %v1779_v30 = vrot.slane %v1747_v55, %v1603_v50 }
 0x389   : > { %v1786_v17 = vsel %vm757_vm7, %v1779_v30, %v1785_v33 }
 0x38a   : > { %3508 = vmatmul.mubr.msk.f32.vlgmr.msra.gmra.mrb[4].mxu1 %vm1640_vm10, %v1786_v17 }
 0x38b   : > { %3378 = vmatpush1.msk.msra.mxu1 %vm384_vm0, %v4237_v20  ;;  %2066 = vmatprep.mubr.f32.mxu1 %v3632_v24 }
 0x38c   : > { %3383 = vmatprep.subr.msk.mxu1 %vm384_vm0, %v4296_v46 }
 0x3e4   : > { %v1712_v21 = vpop.f32.mrb[4].mxu0 }
 0x3e5   : > { %v3504_v40 = vpop.f32.mrb[5].mxu0 }
 0x45d   : > { %v1858_v29 = vpop.f32.mrb[4].mxu1 }
 0x45e   : > { %v1859_v50 = vadd.f32 %v1858_v29, %v1712_v21  ;;  %v3509_v51 = vpop.f32.mrb[5].mxu1 }
 0x460   : > { %v1864_v53 = vadd.f32 %v1863_v39, %v1859_v50 }
 0x462   : > { %v3373_v19 = vmul.f32 -1.442695, %v1864_v53 }
 0x464   : > { %3620 = vpow2.f32 %v3373_v19 }
 0x46e   : > { %v3621_v59 = vpop.eup %3620 }
 0x46f   : > { %v1868_v35 = vadd.f32 1.0, %v3621_v59 }
 0x471   : > { %3622 = vrcp.f32 %v1868_v35 }
 0x47b   : > { %v3623_v26 = vpop.eup %3622 }
 0x47c   : > { %v1879_v20 = vrot.slane %v3623_v26, %v4197_v54 }
 0x47e   : > { %v1895_v45 = vrot.slane %v1879_v20, %v4197_v54  ;;  %v1887_v61 = vcombine.high %v1879_v20, %v1879_v20 }
 0x480   : > { %3376 = vmatmul.mubr.msk.f32.vlgmr.msra.gmra.mrb[6].mxu0 %vm1640_vm10, %v1895_v45  ;;  %3379 = vmatmul.mubr.msk.f32.vlgmr.msra.gmra.mrb[6].mxu1 %vm1640_vm10, %v1895_v45  ;;  %v1909_v46 = vrot.slane %v1887_v61, %v4197_v54 }
 0x481   : > { %3381 = vmatpush1.msk.msra.mxu0 %vm384_vm0, %v4278_v36  ;;  %3384 = vmatpush1.msk.msra.mxu1 %vm384_vm0, %v4281_v52  ;;  %v1917_v36 = vcombine.high %v1895_v45, %v1895_v45  ;;  %v1872_v52 = vcombine.high %v3623_v26, %v3623_v26 }
 0x482   : > { %3386 = vmatprep.subr.msk.mxu0 %vm384_vm0, %v4327_v43  ;;  %3389 = vmatprep.subr.msk.mxu1 %vm384_vm0, %v4336_v57 }
 0x483   : > { %2147 = vmatprep.mubr.f32.mxu0 %v3632_v24  ;;  %2218 = vmatprep.mubr.f32.mxu1 %v3632_v24 }
 0x484   : > { %3382 = vmatmul.mubr.msk.f32.vlgmr.msra.gmra.mrb[8].mxu0 %vm1640_vm10, %v1909_v46  ;;  %3385 = vmatmul.mubr.msk.f32.vlgmr.msra.gmra.mrb[8].mxu1 %vm1640_vm10, %v1909_v46 }
 0x485   : > { %3387 = vmatpush1.msk.msra.mxu0 %vm384_vm0, %v4314_v25  ;;  %3390 = vmatpush1.msk.msra.mxu1 %vm384_vm0, %v4321_v34  ;;  %v1919_v25 = vcombine.high %v1909_v46, %v1909_v46  ;;  %v1886_v34 = vrot.slane %v1872_v52, %v4197_v54 }
 0x486   : > { %3392 = vmatprep.subr.msk.mxu0 %vm384_vm0, %v4382_v44  ;;  %3395 = vmatprep.subr.msk.mxu1 %vm384_vm0, %v4388_v41 }
 0x487   : > { %2299 = vmatprep.mubr.f32.mxu0 %v3632_v24  ;;  %2370 = vmatprep.mubr.f32.mxu1 %v3632_v24  ;;  %v1902_v43 = vrot.slane %v1886_v34, %v4197_v54  ;;  %v1888_v57 = vcombine.high %v1886_v34, %v1886_v34 }
 0x488   : > { %3388 = vmatmul.mubr.msk.f32.vlgmr.msra.gmra.mrb[10].mxu0 %vm1640_vm10, %v1917_v36  ;;  %3391 = vmatmul.mubr.msk.f32.vlgmr.msra.gmra.mrb[10].mxu1 %vm1640_vm10, %v1917_v36 }
 0x489   : > { %3393 = vmatpush1.msk.msra.mxu0 %vm384_vm0, %v4369_v13  ;;  %3396 = vmatpush1.msk.msra.mxu1 %vm384_vm0, %v4378_v28 }
 0x48a   : > { %3398 = vmatprep.subr.msk.mxu0 %vm384_vm0, %v4350_v0  ;;  %3401 = vmatprep.subr.msk.mxu1 %vm384_vm0, %v4357_v2 }
 0x48b   : > { %2451 = vmatprep.mubr.f32.mxu0 %v3632_v24  ;;  %2522 = vmatprep.mubr.f32.mxu1 %v3632_v24 }
 0x48c   : > { %3394 = vmatmul.mubr.msk.f32.vlgmr.msra.gmra.mrb[12].mxu0 %vm1640_vm10, %v1919_v25  ;;  %3397 = vmatmul.mubr.msk.f32.vlgmr.msra.gmra.mrb[12].mxu1 %vm1640_vm10, %v1919_v25 }
 0x48d   : > { %3399 = vmatpush1.msk.msra.mxu0 %vm384_vm0, %v4330_v47  ;;  %3402 = vmatpush1.msk.msra.mxu1 %vm384_vm0, %v4341_v1 }
 0x48e   : > { %3404 = vmatprep.subr.msk.mxu0 %vm384_vm0, %v4259_v32  ;;  %3407 = vmatprep.subr.msk.mxu1 %vm384_vm0, %v4263_v31  ;;  %v1916_v32 = vrot.slane %v1888_v57, %v4197_v54  ;;  %v1918_v54 = vcombine.high %v1902_v43, %v1902_v43 }
 0x48f   : > { %2603 = vmatprep.mubr.f32.mxu0 %v3632_v24  ;;  %2674 = vmatprep.mubr.f32.mxu1 %v3632_v24 }
 0x490   : > { %3400 = vmatmul.mubr.msk.f32.vlgmr.msra.gmra.mrb[14].mxu0 %vm1640_vm10, %v1902_v43  ;;  %3403 = vmatmul.mubr.msk.f32.vlgmr.msra.gmra.mrb[14].mxu1 %vm1640_vm10, %v1902_v43 }
 0x491   : > { %3405 = vmatpush1.msk.msra.mxu0 %vm384_vm0, %v4240_v22  ;;  %3408 = vmatpush1.msk.msra.mxu1 %vm384_vm0, %v4243_v23  ;;  %v1920_v22 = vcombine.high %v1916_v32, %v1916_v32 }
 0x492   : > { %3410 = vmatprep.subr.msk.mxu0 %vm384_vm0, %v4405_v3  ;;  %3413 = vmatprep.subr.msk.mxu1 %vm384_vm0, %v4411_v5 }
 0x493   : > { %2755 = vmatprep.mubr.f32.mxu0 %v3632_v24  ;;  %2826 = vmatprep.mubr.f32.mxu1 %v3632_v24 }
 0x494   : > { %3406 = vmatmul.mubr.msk.f32.vlgmr.msra.gmra.mrb[16].mxu0 %vm1640_vm10, %v1916_v32  ;;  %3409 = vmatmul.mubr.msk.f32.vlgmr.msra.gmra.mrb[16].mxu1 %vm1640_vm10, %v1916_v32 }
 0x495   : > { %3411 = vmatpush1.msk.msra.mxu0 %vm384_vm0, %v4395_v60  ;;  %3414 = vmatpush1.msk.msra.mxu1 %vm384_vm0, %v4398_v62 }
 0x496   : > { %3416 = vmatprep.subr.msk.mxu0 %vm384_vm0, %v4431_v14  ;;  %3419 = vmatprep.subr.msk.mxu1 %vm384_vm0, %v4439_v16 }
 0x497   : > { %2907 = vmatprep.mubr.f32.mxu0 %v3632_v24  ;;  %2978 = vmatprep.mubr.f32.mxu1 %v3632_v24 }
 0x498   : > { %3412 = vmatmul.mubr.msk.f32.vlgmr.msra.gmra.mrb[18].mxu0 %vm1640_vm10, %v1918_v54  ;;  %3415 = vmatmul.mubr.msk.f32.vlgmr.msra.gmra.mrb[18].mxu1 %vm1640_vm10, %v1918_v54 }
 0x499   : > { %3417 = vmatpush1.msk.msra.mxu0 %vm384_vm0, %v4418_v6  ;;  %3420 = vmatpush1.msk.msra.mxu1 %vm384_vm0, %v4423_v10 }
 0x49a   : > { %3059 = vmatprep.mubr.f32.mxu0 %v3632_v24  ;;  %3130 = vmatprep.mubr.f32.mxu1 %v3632_v24 }
 0x49c   : > { %3418 = vmatmul.mubr.msk.f32.vlgmr.msra.gmra.mrb[20].mxu0 %vm1640_vm10, %v1920_v22  ;;  %3421 = vmatmul.mubr.msk.f32.vlgmr.msra.gmra.mrb[20].mxu1 %vm1640_vm10, %v1920_v22 }
 0x553   : > { %v1997_v23 = vpop.f32.mrb[6].mxu0  ;;  %v2068_v31 = vpop.f32.mrb[6].mxu1 }
 0x554   : > { %v1999_v47 = vpop.f32.mrb[7].mxu0  ;;  %v2070_v1 = vpop.f32.mrb[7].mxu1  ;;  %v3169_v3 = vmul.f32 0.25, %v1997_v23  ;;  %v3171_v5 = vmul.f32 0.25, %v2068_v31 }
 0x555   : > { %v3170_v10 = vmul.f32 0.25, %v1999_v47  ;;  %v3172_v14 = vmul.f32 0.25, %v2070_v1 }
 0x557   : > { %v2149_v0 = vpop.f32.mrb[8].mxu0  ;;  %v2220_v2 = vpop.f32.mrb[8].mxu1 }
 0x558   : > { %v3173_v13 = vmul.f32 0.25, %v2149_v0  ;;  %v3175_v28 = vmul.f32 0.25, %v2220_v2  ;;  %v2151_v44 = vpop.f32.mrb[9].mxu0  ;;  %v2222_v41 = vpop.f32.mrb[9].mxu1 }
 0x559   : > { %v3174_v60 = vmul.f32 0.25, %v2151_v44  ;;  %v3176_v62 = vmul.f32 0.25, %v2222_v41 }
 0x55a   : > { %v3233_v24 = vrot.slane %v3173_v13, 7  ;;  %v3261_v6 = vrot.slane %v3175_v28, 7 }
 0x55b   : > { %v3247_v16 = vrot.slane %v3174_v60, 7  ;;  %v3275_v56 = vrot.slane %v3176_v62, 7  ;;  %v2301_v42 = vpop.f32.mrb[10].mxu0  ;;  %v2372_v27 = vpop.f32.mrb[10].mxu1 }
 0x55c   : > { %v3234_v4 = vsel %vm745_vm1, %v3233_v24, %v3169_v3  ;;  %v3262_v48 = vsel %vm745_vm1, %v3261_v6, %v3171_v5  ;;  %v3177_v37 = vmul.f32 0.25, %v2301_v42  ;;  %v3179_v58 = vmul.f32 0.25, %v2372_v27  ;;  %v2303_v63 = vpop.f32.mrb[11].mxu0  ;;  %v2374_v7 = vpop.f32.mrb[11].mxu1 }
 0x55d   : > { %v3248_v8 = vsel %vm745_vm1, %v3247_v16, %v3170_v10  ;;  %v3276_v18 = vsel %vm745_vm1, %v3275_v56, %v3172_v14  ;;  %v3178_v9 = vmul.f32 0.25, %v2303_v63  ;;  %v3180_v11 = vmul.f32 0.25, %v2374_v7 }
 0x55e   : > { %v3235_v38 = vrot.slane %v3177_v37, 6  ;;  %v3263_v12 = vrot.slane %v3179_v58, 6 }
 0x55f   : > { %v3249_v49 = vrot.slane %v3178_v9, 6  ;;  %v3277_v15 = vrot.slane %v3180_v11, 6  ;;  %v2453_v55 = vpop.f32.mrb[12].mxu0  ;;  %v2524_v30 = vpop.f32.mrb[12].mxu1 }
 0x560   : > { %v3236_v33 = vsel %vm747_vm2, %v3235_v38, %v3234_v4  ;;  %v3264_v17 = vsel %vm747_vm2, %v3263_v12, %v3262_v48  ;;  %v3181_v21 = vmul.f32 0.25, %v2453_v55  ;;  %v3183_v40 = vmul.f32 0.25, %v2524_v30  ;;  %v2455_v29 = vpop.f32.mrb[13].mxu0  ;;  %v2526_v39 = vpop.f32.mrb[13].mxu1 }
 0x561   : > { %v3250_v50 = vsel %vm747_vm2, %v3249_v49, %v3248_v8  ;;  %v3278_v51 = vsel %vm747_vm2, %v3277_v15, %v3276_v18  ;;  %v3182_v53 = vmul.f32 0.25, %v2455_v29  ;;  %v3184_v19 = vmul.f32 0.25, %v2526_v39 }
 0x562   : > { %v3237_v59 = vrot.slane %v3181_v21, 5  ;;  %v3265_v35 = vrot.slane %v3183_v40, 5 }
 0x563   : > { %v3251_v26 = vrot.slane %v3182_v53, 5  ;;  %v3279_v20 = vrot.slane %v3184_v19, 5  ;;  %v2605_v45 = vpop.f32.mrb[14].mxu0  ;;  %v2676_v61 = vpop.f32.mrb[14].mxu1 }
 0x564   : > { %v3238_v46 = vsel %vm749_vm3, %v3237_v59, %v3236_v33  ;;  %v3266_v36 = vsel %vm749_vm3, %v3265_v35, %v3264_v17  ;;  %v3185_v52 = vmul.f32 0.25, %v2605_v45  ;;  %v3187_v25 = vmul.f32 0.25, %v2676_v61  ;;  %v2607_v34 = vpop.f32.mrb[15].mxu0  ;;  %v2678_v43 = vpop.f32.mrb[15].mxu1 }
 0x565   : > { %v3252_v57 = vsel %vm749_vm3, %v3251_v26, %v3250_v50  ;;  %v3280_v32 = vsel %vm749_vm3, %v3279_v20, %v3278_v51  ;;  %v3186_v54 = vmul.f32 0.25, %v2607_v34  ;;  %v3188_v22 = vmul.f32 0.25, %v2678_v43 }
 0x566   : > { %v3239_v23 = vrot.slane %v3185_v52, 4  ;;  %v3267_v31 = vrot.slane %v3187_v25, 4 }
 0x567   : > { %v3253_v47 = vrot.slane %v3186_v54, 4  ;;  %v3281_v1 = vrot.slane %v3188_v22, 4  ;;  %v2757_v0 = vpop.f32.mrb[16].mxu0  ;;  %v2828_v2 = vpop.f32.mrb[16].mxu1 }
 0x568   : > { %v3240_v13 = vsel %vm751_vm4, %v3239_v23, %v3238_v46  ;;  %v3268_v28 = vsel %vm751_vm4, %v3267_v31, %v3266_v36  ;;  %v3189_v44 = vmul.f32 0.25, %v2757_v0  ;;  %v3191_v41 = vmul.f32 0.25, %v2828_v2  ;;  %v2759_v60 = vpop.f32.mrb[17].mxu0  ;;  %v2830_v62 = vpop.f32.mrb[17].mxu1 }
 0x569   : > { %v3254_v3 = vsel %vm751_vm4, %v3253_v47, %v3252_v57  ;;  %v3282_v5 = vsel %vm751_vm4, %v3281_v1, %v3280_v32  ;;  %v3190_v24 = vmul.f32 0.25, %v2759_v60  ;;  %v3192_v6 = vmul.f32 0.25, %v2830_v62 }
 0x56a   : > { %v3241_v10 = vrot.slane %v3189_v44, 3  ;;  %v3269_v14 = vrot.slane %v3191_v41, 3 }
 0x56b   : > { %v3255_v16 = vrot.slane %v3190_v24, 3  ;;  %v3283_v56 = vrot.slane %v3192_v6, 3  ;;  %v2909_v42 = vpop.f32.mrb[18].mxu0  ;;  %v2980_v27 = vpop.f32.mrb[18].mxu1 }
 0x56c   : > { %v3242_v4 = vsel %vm753_vm5, %v3241_v10, %v3240_v13  ;;  %v3270_v48 = vsel %vm753_vm5, %v3269_v14, %v3268_v28  ;;  %v3193_v37 = vmul.f32 0.25, %v2909_v42  ;;  %v3195_v58 = vmul.f32 0.25, %v2980_v27  ;;  %v2911_v63 = vpop.f32.mrb[19].mxu0  ;;  %v2982_v7 = vpop.f32.mrb[19].mxu1 }
 0x56d   : > { %v3256_v8 = vsel %vm753_vm5, %v3255_v16, %v3254_v3  ;;  %v3284_v18 = vsel %vm753_vm5, %v3283_v56, %v3282_v5  ;;  %v3194_v9 = vmul.f32 0.25, %v2911_v63  ;;  %v3196_v11 = vmul.f32 0.25, %v2982_v7 }
 0x56e   : > { %v3243_v38 = vrot.slane %v3193_v37, 2  ;;  %v3271_v12 = vrot.slane %v3195_v58, 2 }
 0x56f   : > { %v3257_v49 = vrot.slane %v3194_v9, 2  ;;  %v3285_v15 = vrot.slane %v3196_v11, 2  ;;  %v3061_v55 = vpop.f32.mrb[20].mxu0  ;;  %v3132_v30 = vpop.f32.mrb[20].mxu1 }
 0x570   : > { %v3244_v33 = vsel %vm755_vm6, %v3243_v38, %v3242_v4  ;;  %v3272_v17 = vsel %vm755_vm6, %v3271_v12, %v3270_v48  ;;  %v3197_v21 = vmul.f32 0.25, %v3061_v55  ;;  %v3199_v40 = vmul.f32 0.25, %v3132_v30  ;;  %v3063_v29 = vpop.f32.mrb[21].mxu0  ;;  %v3134_v39 = vpop.f32.mrb[21].mxu1 }
 0x571   : > { %v3258_v50 = vsel %vm755_vm6, %v3257_v49, %v3256_v8  ;;  %v3286_v51 = vsel %vm755_vm6, %v3285_v15, %v3284_v18  ;;  %v3198_v53 = vmul.f32 0.25, %v3063_v29  ;;  %v3200_v19 = vmul.f32 0.25, %v3134_v39 }
 0x572   : > { %v3245_v59 = vrot.slane %v3197_v21, 1  ;;  %v3273_v35 = vrot.slane %v3199_v40, 1 }
 0x573   : > { %v3259_v26 = vrot.slane %v3198_v53, 1  ;;  %v3287_v20 = vrot.slane %v3200_v19, 1 }
 0x574   : > { %v3246_v45 = vsel %vm757_vm7, %v3245_v59, %v3244_v33  ;;  %v3274_v61 = vsel %vm757_vm7, %v3273_v35, %v3272_v17 }
 0x575   : > { %3293 = vst [vmem:[%s311_s30] sm:$0xff] %v3246_v45  ;;  %3295 = vst [vmem:[%s311_s30 + $0x10] sm:$0xff] %v3274_v61  ;;  %v3260_v46 = vsel %vm757_vm7, %v3259_v26, %v3258_v50  ;;  %v3288_v36 = vsel %vm757_vm7, %v3287_v20, %v3286_v51 }
 0x576   : > { %3294 = vst [vmem:[%s311_s30 + $0x8] sm:$0xff] %v3260_v46  ;;  %3296 = vst [vmem:[%s311_s30 + $0x18] sm:$0xff] %v3288_v36 }
 0x577 PF: > { %s19_s29 = sadd.s32 1, %s3630_s29  }
 0x578   : > { %p16_p5 = scmp.ge.s32.totalorder %s19_s29, 4  }
 0x57a   :  { %18 = sbr.rel (!%p16_p5) target bundleno = 2 (0x2), region = 82 }

// kernel: cnn_tsm_attn_forward.3
= control target key start
LH: loop header
LB: loop body
LE: loop exit
PB: predicated region body
PF: predicated region fallthrough
CT: control target
= control target key end

     0   :  { %s6157_s26 = smov 0   ;;  %s8042_s0 = inlined_call_operand.vmem [shape: f32[2,8,512], index: 0, kind: input, shape index: {}]   ;;  %s8043_s1 = inlined_call_operand.vmem [shape: bf16[512,1536], index: 1, kind: input, shape index: {}]   ;;  %s8044_s2 = inlined_call_operand.vmem [shape: f32[1,1536], index: 2, kind: input, shape index: {}]   ;;  %s8045_s3 = inlined_call_operand.vmem [shape: bf16[512,512], index: 3, kind: input, shape index: {}]   ;;  %s8046_s4 = inlined_call_operand.vmem [shape: f32[1,512], index: 4, kind: input, shape index: {}]   ;;  %s8047_s5 = inlined_call_operand.vmem [shape: f32[512,1], index: 5, kind: input, shape index: {}]   ;;  %s8048_s6 = inlined_call_operand.<no memory space> [shape: f32[1,1], index: 6, kind: input, shape index: {}]   ;;  %s8049_s7 = inlined_call_operand.vmem [shape: f32[2,1,1], index: 7, kind: output, shape index: {}]  }
   0x1   :  { %v12_v0 = vstv %s8048_s6 }
   0x2   :  { %13 = vst [vmem:[#allocation2] sm:$0x1] %v12_v0 }
   0x3 LB: > { %s4619_s27 = sadd.s32 4294967295, %s6111_s26   ;;  %p4623_p0 = scmp.ge.s32.totalorder %s6111_s26, 1  ;;  %s6111_s26 = sphi %s6157_s26, %s19_s26  }
   0x4   : > { %p239_p1 = scmp.lt.s32.totalorder %s6111_s26, 3 }
   0x6   : > { %p240_p2 = pnand %p4623_p0, %p239_p1 }
   0x7   : > { %v5325_v1 = vld [vmem:[%s8043_s1 + $0x4] ss:$48 sps:$4 sm:$0xff] (!%p240_p2)   ;;  %v5327_v2 = vld [vmem:[%s8043_s1 + $0xc] ss:$48 sps:$4 sm:$0xff] (!%p240_p2)   ;;  %v5329_v3 = vld [vmem:[%s8043_s1] ss:$48 sps:$4 sm:$0xff] (!%p240_p2)  }
   0x8   : > { %243 = sbr.rel (%p240_p2) target bundleno = 1783 (0x6f7), region = 48  ;;  %2654 = vmatprep.subr.bf16.mxu0 (!%p240_p2), %v5325_v1  ;;  %v5330_v4 = vld [vmem:[%s8043_s1 + $0x8] ss:$48 sps:$4 sm:$0xff] (!%p240_p2)   ;;  %2736 = vmatprep.subr.bf16.mxu1 (!%p240_p2), %v5327_v2  ;;  %v5331_v5 = vld [vmem:[%s8043_s1 + $0x64] ss:$48 sps:$4 sm:$0xff] (!%p240_p2)   ;;  %p269_p3 = scmp.lt.s32.totalorder (!%p240_p2), %s4619_s27, 1 }
   0x9   : > { %2655 = vmatpush1.bf16.msra.mxu0 (!%p240_p2), %v5329_v3  ;;  %2737 = vmatpush1.bf16.msra.mxu1 (!%p240_p2), %v5330_v4  ;;  %v5333_v6 = vld [vmem:[%s8043_s1 + $0x6c] ss:$48 sps:$4 sm:$0xff] (!%p240_p2)   ;;  %v5335_v7 = vld [vmem:[%s8043_s1 + $0x60] ss:$48 sps:$4 sm:$0xff] (!%p240_p2)   ;;  %v5336_v8 = vld [vmem:[%s8043_s1 + $0x68] ss:$48 sps:$4 sm:$0xff] (!%p240_p2)  }
   0xa   : > { %2656 = vmatprep.subr.bf16.mxu0 (!%p240_p2), %v5331_v5  ;;  %2738 = vmatprep.subr.bf16.mxu1 (!%p240_p2), %v5333_v6  ;;  %v5337_v9 = vld [vmem:[%s8043_s1 + $0xc4] ss:$48 sps:$4 sm:$0xff] (!%p240_p2)   ;;  %v5339_v10 = vld [vmem:[%s8043_s1 + $0xcc] ss:$48 sps:$4 sm:$0xff] (!%p240_p2)   ;;  %v5341_v11 = vld [vmem:[%s8043_s1 + $0xc0] ss:$48 sps:$4 sm:$0xff] (!%p240_p2)  }
   0xb   : > { %v5342_v12 = vld [vmem:[%s8043_s1 + $0xc8] ss:$48 sps:$4 sm:$0xff] (!%p240_p2)   ;;  %v5343_v13 = vld [vmem:[%s8043_s1 + $0x124] ss:$48 sps:$4 sm:$0xff] (!%p240_p2)   ;;  %v5345_v14 = vld [vmem:[%s8043_s1 + $0x12c] ss:$48 sps:$4 sm:$0xff] (!%p240_p2)  }
   0xc   : > { %v5347_v15 = vld [vmem:[%s8043_s1 + $0x120] ss:$48 sps:$4 sm:$0xff] (!%p240_p2)   ;;  %v5348_v16 = vld [vmem:[%s8043_s1 + $0x128] ss:$48 sps:$4 sm:$0xff] (!%p240_p2)   ;;  %v5349_v17 = vld [vmem:[%s8043_s1 + $0x184] ss:$48 sps:$4 sm:$0xff] (!%p240_p2)  }
   0xd   : > { %2657 = vmatpush1.bf16.msra.mxu0 (!%p240_p2), %v5335_v7  ;;  %2739 = vmatpush1.bf16.msra.mxu1 (!%p240_p2), %v5336_v8  ;;  %v5351_v18 = vld [vmem:[%s8043_s1 + $0x18c] ss:$48 sps:$4 sm:$0xff] (!%p240_p2)   ;;  %v5353_v19 = vld [vmem:[%s8043_s1 + $0x180] ss:$48 sps:$4 sm:$0xff] (!%p240_p2)   ;;  %v5354_v20 = vld [vmem:[%s8043_s1 + $0x188] ss:$48 sps:$4 sm:$0xff] (!%p240_p2)  }
   0xe   : > { %2658 = vmatprep.subr.bf16.mxu0 (!%p240_p2), %v5337_v9  ;;  %2740 = vmatprep.subr.bf16.mxu1 (!%p240_p2), %v5339_v10  ;;  %v5355_v21 = vld [vmem:[%s8043_s1 + $0x1e4] ss:$48 sps:$4 sm:$0xff] (!%p240_p2)   ;;  %v5357_v22 = vld [vmem:[%s8043_s1 + $0x1ec] ss:$48 sps:$4 sm:$0xff] (!%p240_p2)   ;;  %v5359_v23 = vld [vmem:[%s8043_s1 + $0x1e0] ss:$48 sps:$4 sm:$0xff] (!%p240_p2)  }
   0xf   : > { %v5360_v24 = vld [vmem:[%s8043_s1 + $0x1e8] ss:$48 sps:$4 sm:$0xff]   ;;  %v5361_v25 = vld [vmem:[%s8043_s1 + $0x244] ss:$48 sps:$4 sm:$0xff]   ;;  %v5363_v26 = vld [vmem:[%s8043_s1 + $0x24c] ss:$48 sps:$4 sm:$0xff]  }
  0x10   : > { %v5365_v27 = vld [vmem:[%s8043_s1 + $0x240] ss:$48 sps:$4 sm:$0xff]   ;;  %v5366_v28 = vld [vmem:[%s8043_s1 + $0x248] ss:$48 sps:$4 sm:$0xff]   ;;  %v5367_v29 = vld [vmem:[%s8043_s1 + $0x2a4] ss:$48 sps:$4 sm:$0xff]  }
  0x11   : > { %2659 = vmatpush1.bf16.msra.mxu0 %v5341_v11  ;;  %2741 = vmatpush1.bf16.msra.mxu1 %v5342_v12  ;;  %v5369_v30 = vld [vmem:[%s8043_s1 + $0x2ac] ss:$48 sps:$4 sm:$0xff]   ;;  %v5371_v31 = vld [vmem:[%s8043_s1 + $0x2a0] ss:$48 sps:$4 sm:$0xff]   ;;  %v5372_v32 = vld [vmem:[%s8043_s1 + $0x2a8] ss:$48 sps:$4 sm:$0xff]  }
  0x12   : > { %2660 = vmatprep.subr.bf16.mxu0 %v5343_v13  ;;  %2742 = vmatprep.subr.bf16.mxu1 %v5345_v14  ;;  %v5373_v33 = vld [vmem:[%s8043_s1 + $0x304] ss:$48 sps:$4 sm:$0xff]   ;;  %v5375_v34 = vld [vmem:[%s8043_s1 + $0x30c] ss:$48 sps:$4 sm:$0xff]   ;;  %v5377_v35 = vld [vmem:[%s8043_s1 + $0x300] ss:$48 sps:$4 sm:$0xff]  }
  0x13   : > { %v5378_v36 = vld [vmem:[%s8043_s1 + $0x308] ss:$48 sps:$4 sm:$0xff]   ;;  %v5379_v37 = vld [vmem:[%s8043_s1 + $0x364] ss:$48 sps:$4 sm:$0xff]   ;;  %s8051_s27 = smov (!%p269_p3, %s4619_s27), 1  ;;  %vm3210_vm0 = vcmask 1043456  }
  0x14   : > { %v5381_v38 = vld [vmem:[%s8043_s1 + $0x36c] ss:$48 sps:$4 sm:$0xff]   ;;  %v5383_v39 = vld [vmem:[%s8043_s1 + $0x360] ss:$48 sps:$4 sm:$0xff]   ;;  %v5384_v40 = vld [vmem:[%s8043_s1 + $0x368] ss:$48 sps:$4 sm:$0xff]   ;;  %s276_s10 = scalar_lea.vmem %s8049_s7, %s8051_s27 }
  0x15   : > { %2661 = vmatpush1.bf16.msra.mxu0 %v5347_v15  ;;  %2743 = vmatpush1.bf16.msra.mxu1 %v5348_v16  ;;  %v5385_v41 = vld [vmem:[%s8043_s1 + $0x3c4] ss:$48 sps:$4 sm:$0xff]   ;;  %s5145_s20 = sshll.u32 %s8051_s27, 5  ;;  %v5387_v42 = vld [vmem:[%s8043_s1 + $0x3cc] ss:$48 sps:$4 sm:$0xff]   ;;  %vm3194_vm1 = vcmask 64512  }
  0x16   : > { %2662 = vmatprep.subr.bf16.mxu0 %v5349_v17  ;;  %2744 = vmatprep.subr.bf16.mxu1 %v5351_v18  ;;  %v5389_v43 = vld [vmem:[%s8043_s1 + $0x3c0] ss:$48 sps:$4 sm:$0xff]   ;;  %v5390_v44 = vld [vmem:[%s8043_s1 + $0x3c8] ss:$48 sps:$4 sm:$0xff]   ;;  %s6307_s30 = scalar_lea.vmem %s8042_s0, %s5145_s20  ;;  %v5391_v45 = vld [vmem:[%s8043_s1 + $0x424] ss:$48 sps:$4 sm:$0xff]  }
  0x17   : > { %v5393_v46 = vld [vmem:[%s8043_s1 + $0x42c] ss:$48 sps:$4 sm:$0xff]   ;;  %v5395_v48 = vld [vmem:[%s8043_s1 + $0x420] ss:$48 sps:$4 sm:$0xff]   ;;  %v5396_v50 = vld [vmem:[%s8043_s1 + $0x428] ss:$48 sps:$4 sm:$0xff]  }
  0x18   : > { %v279_v47 = vld [vmem:[%s6307_s30 + $0x8] sm:$0xff]  ;;  %v5397_v51 = vld [vmem:[%s8043_s1 + $0x484] ss:$48 sps:$4 sm:$0xff]   ;;  %v5401_v53 = vld [vmem:[%s8043_s1 + $0x480] ss:$48 sps:$4 sm:$0xff]   ;;  %vm4570_vm2 = vcmask 0  }
  0x19   : > { %2663 = vmatpush1.bf16.msra.mxu0 %v5353_v19  ;;  %2745 = vmatpush1.bf16.msra.mxu1 %v5354_v20  ;;  %v6319_v49 = vpack.c.bf16 %v279_v47, %v279_v47  ;;  %v5399_v52 = vld [vmem:[%s8043_s1 + $0x48c] ss:$48 sps:$4 sm:$0xff]   ;;  %v5402_v54 = vld [vmem:[%s8043_s1 + $0x488] ss:$48 sps:$4 sm:$0xff]   ;;  %v5403_v55 = vld [vmem:[%s8043_s1 + $0x4e4] ss:$48 sps:$4 sm:$0xff]  }
  0x1a   : > { %2664 = vmatprep.subr.bf16.mxu0 %v5355_v21  ;;  %2746 = vmatprep.subr.bf16.mxu1 %v5357_v22  ;;  %v5405_v56 = vld [vmem:[%s8043_s1 + $0x4ec] ss:$48 sps:$4 sm:$0xff]   ;;  %v5407_v57 = vld [vmem:[%s8043_s1 + $0x4e0] ss:$48 sps:$4 sm:$0xff]   ;;  %v5408_v58 = vld [vmem:[%s8043_s1 + $0x4e8] ss:$48 sps:$4 sm:$0xff]  }
  0x1b   : > { %2686 = vmatprep.mubr.bf16.mxu0 %v6319_v49  ;;  %2768 = vmatprep.mubr.bf16.mxu1 %v6319_v49  ;;  %v5409_v59 = vld [vmem:[%s8043_s1 + $0x544] ss:$48 sps:$4 sm:$0xff]   ;;  %v5411_v60 = vld [vmem:[%s8043_s1 + $0x54c] ss:$48 sps:$4 sm:$0xff]   ;;  %v5413_v61 = vld [vmem:[%s8043_s1 + $0x540] ss:$48 sps:$4 sm:$0xff]  }
  0x1c   : > { %v5414_v62 = vld [vmem:[%s8043_s1 + $0x548] ss:$48 sps:$4 sm:$0xff]   ;;  %v5415_v63 = vld [vmem:[%s8043_s1 + $0x5a4] ss:$48 sps:$4 sm:$0xff]   ;;  %v5417_v0 = vld [vmem:[%s8043_s1 + $0x5ac] ss:$48 sps:$4 sm:$0xff]  }
  0x1d   : > { %2665 = vmatpush1.bf16.msra.mxu0 %v5359_v23  ;;  %2747 = vmatpush1.bf16.msra.mxu1 %v5360_v24  ;;  %v5419_v1 = vld [vmem:[%s8043_s1 + $0x5a0] ss:$48 sps:$4 sm:$0xff]   ;;  %v5420_v2 = vld [vmem:[%s8043_s1 + $0x5a8] ss:$48 sps:$4 sm:$0xff]   ;;  %v5423_v4 = vld [vmem:[%s8043_s1 + $0x604] ss:$48 sps:$4 sm:$0xff]  }
  0x1e   : > { %2666 = vmatprep.subr.bf16.mxu0 %v5361_v25  ;;  %2748 = vmatprep.subr.bf16.mxu1 %v5363_v26  ;;  %v278_v3 = vld [vmem:[%s6307_s30] sm:$0xff]  ;;  %v5426_v5 = vld [vmem:[%s8043_s1 + $0x60c] ss:$48 sps:$4 sm:$0xff]   ;;  %v5424_v8 = vld [vmem:[%s8043_s1 + $0x608] ss:$48 sps:$4 sm:$0xff]  }
  0x1f   : > { %v6381_v6 = vpack.c.bf16 %v278_v3, %v278_v3  ;;  %v5421_v7 = vld [vmem:[%s8043_s1 + $0x600] ss:$48 sps:$4 sm:$0xff]   ;;  %v5429_v9 = vld [vmem:[%s8043_s1 + $0x664] ss:$48 sps:$4 sm:$0xff]   ;;  %v5432_v10 = vld [vmem:[%s8043_s1 + $0x66c] ss:$48 sps:$4 sm:$0xff]  }
  0x20   : > { %v5427_v11 = vld [vmem:[%s8043_s1 + $0x660] ss:$48 sps:$4 sm:$0xff]   ;;  %v5430_v12 = vld [vmem:[%s8043_s1 + $0x668] ss:$48 sps:$4 sm:$0xff]   ;;  %v5435_v13 = vld [vmem:[%s8043_s1 + $0x6c4] ss:$48 sps:$4 sm:$0xff]  }
  0x21   : > { %2667 = vmatpush1.bf16.msra.mxu0 %v5365_v27  ;;  %2749 = vmatpush1.bf16.msra.mxu1 %v5366_v28  ;;  %v5438_v14 = vld [vmem:[%s8043_s1 + $0x6cc] ss:$48 sps:$4 sm:$0xff]   ;;  %v5433_v15 = vld [vmem:[%s8043_s1 + $0x6c0] ss:$48 sps:$4 sm:$0xff]   ;;  %v5436_v16 = vld [vmem:[%s8043_s1 + $0x6c8] ss:$48 sps:$4 sm:$0xff]  }
  0x22   : > { %2668 = vmatprep.subr.bf16.mxu0 %v5367_v29  ;;  %2750 = vmatprep.subr.bf16.mxu1 %v5369_v30  ;;  %v5441_v17 = vld [vmem:[%s8043_s1 + $0x724] ss:$48 sps:$4 sm:$0xff]   ;;  %v5444_v18 = vld [vmem:[%s8043_s1 + $0x72c] ss:$48 sps:$4 sm:$0xff]   ;;  %v5439_v19 = vld [vmem:[%s8043_s1 + $0x720] ss:$48 sps:$4 sm:$0xff]  }
  0x23   : > { %v5442_v20 = vld [vmem:[%s8043_s1 + $0x728] ss:$48 sps:$4 sm:$0xff]   ;;  %v5447_v21 = vld [vmem:[%s8043_s1 + $0x784] ss:$48 sps:$4 sm:$0xff]   ;;  %v5450_v22 = vld [vmem:[%s8043_s1 + $0x78c] ss:$48 sps:$4 sm:$0xff]  }
  0x24   : > { %v5445_v23 = vld [vmem:[%s8043_s1 + $0x780] ss:$48 sps:$4 sm:$0xff]   ;;  %v5448_v24 = vld [vmem:[%s8043_s1 + $0x788] ss:$48 sps:$4 sm:$0xff]   ;;  %v5453_v25 = vld [vmem:[%s8043_s1 + $0x7e4] ss:$48 sps:$4 sm:$0xff]  }
  0x25   : > { %2669 = vmatpush1.bf16.msra.mxu0 %v5371_v31  ;;  %2751 = vmatpush1.bf16.msra.mxu1 %v5372_v32  ;;  %v5456_v26 = vld [vmem:[%s8043_s1 + $0x7ec] ss:$48 sps:$4 sm:$0xff]   ;;  %v5451_v27 = vld [vmem:[%s8043_s1 + $0x7e0] ss:$48 sps:$4 sm:$0xff]   ;;  %v5454_v28 = vld [vmem:[%s8043_s1 + $0x7e8] ss:$48 sps:$4 sm:$0xff]  }
  0x26   : > { %2670 = vmatprep.subr.bf16.mxu0 %v5373_v33  ;;  %2752 = vmatprep.subr.bf16.mxu1 %v5375_v34  ;;  %v5459_v29 = vld [vmem:[%s8043_s1 + $0x844] ss:$48 sps:$4 sm:$0xff]   ;;  %v5462_v30 = vld [vmem:[%s8043_s1 + $0x84c] ss:$48 sps:$4 sm:$0xff]   ;;  %v5457_v32 = vld [vmem:[%s8043_s1 + $0x840] ss:$48 sps:$4 sm:$0xff]  }
  0x27   : > { %v281_v31 = vld [vmem:[%s6307_s30 + $0x18] sm:$0xff]  ;;  %v5483_v47 = vld [vmem:[%s8043_s1 + $0x9c4] ss:$48 sps:$4 sm:$0xff]  }
  0x28   : > { %v5460_v33 = vld [vmem:[%s8043_s1 + $0x848] ss:$48 sps:$4 sm:$0xff]   ;;  %v6464_v34 = vpack.c.bf16 %v281_v31, %v281_v31  ;;  %v5549_v31 = vld [vmem:[%s8043_s1 + $0x1f4] ss:$48 sps:$4 sm:$0xff]  }
  0x29   : > { %2671 = vmatpush1.bf16.msra.mxu0 %v5377_v35  ;;  %2753 = vmatpush1.bf16.msra.mxu1 %v5378_v36  ;;  %v5465_v35 = vld [vmem:[%s8043_s1 + $0x8a4] ss:$48 sps:$4 sm:$0xff]   ;;  %v5468_v36 = vld [vmem:[%s8043_s1 + $0x8ac] ss:$48 sps:$4 sm:$0xff]   ;;  %v5508_v3 = vld [vmem:[%s8043_s1 + $0xb48] ss:$48 sps:$4 sm:$0xff]  }
  0x2a   : > { %2672 = vmatprep.subr.bf16.mxu0 %v5379_v37  ;;  %2754 = vmatprep.subr.bf16.mxu1 %v5381_v38  ;;  %v5463_v37 = vld [vmem:[%s8043_s1 + $0x8a0] ss:$48 sps:$4 sm:$0xff]   ;;  %v5466_v38 = vld [vmem:[%s8043_s1 + $0x8a8] ss:$48 sps:$4 sm:$0xff]  }
  0x2d   : > { %2673 = vmatpush1.bf16.msra.mxu0 %v5383_v39  ;;  %2755 = vmatpush1.bf16.msra.mxu1 %v5384_v40  ;;  %v5471_v39 = vld [vmem:[%s8043_s1 + $0x904] ss:$48 sps:$4 sm:$0xff]   ;;  %v5474_v40 = vld [vmem:[%s8043_s1 + $0x90c] ss:$48 sps:$4 sm:$0xff]  }
  0x2e   : > { %2674 = vmatprep.subr.bf16.mxu0 %v5385_v41  ;;  %2756 = vmatprep.subr.bf16.mxu1 %v5387_v42  ;;  %v5469_v41 = vld [vmem:[%s8043_s1 + $0x900] ss:$48 sps:$4 sm:$0xff]   ;;  %v5472_v42 = vld [vmem:[%s8043_s1 + $0x908] ss:$48 sps:$4 sm:$0xff]  }
  0x31   : > { %2675 = vmatpush1.bf16.msra.mxu0 %v5389_v43  ;;  %2757 = vmatpush1.bf16.msra.mxu1 %v5390_v44  ;;  %v5477_v43 = vld [vmem:[%s8043_s1 + $0x964] ss:$48 sps:$4 sm:$0xff]   ;;  %v5480_v44 = vld [vmem:[%s8043_s1 + $0x96c] ss:$48 sps:$4 sm:$0xff]  }
  0x32   : > { %2676 = vmatprep.subr.bf16.mxu0 %v5391_v45  ;;  %2758 = vmatprep.subr.bf16.mxu1 %v5393_v46  ;;  %v5475_v45 = vld [vmem:[%s8043_s1 + $0x960] ss:$48 sps:$4 sm:$0xff]   ;;  %v5478_v46 = vld [vmem:[%s8043_s1 + $0x968] ss:$48 sps:$4 sm:$0xff]  }
  0x35   : > { %2677 = vmatpush1.bf16.msra.mxu0 %v5395_v48  ;;  %2759 = vmatpush1.bf16.msra.mxu1 %v5396_v50  ;;  %v5486_v48 = vld [vmem:[%s8043_s1 + $0x9cc] ss:$48 sps:$4 sm:$0xff]   ;;  %v5481_v50 = vld [vmem:[%s8043_s1 + $0x9c0] ss:$48 sps:$4 sm:$0xff]  }
  0x36   : > { %2678 = vmatprep.subr.bf16.mxu0 %v5397_v51  ;;  %2760 = vmatprep.subr.bf16.mxu1 %v5399_v52  ;;  %v5484_v51 = vld [vmem:[%s8043_s1 + $0x9c8] ss:$48 sps:$4 sm:$0xff]   ;;  %v5489_v52 = vld [vmem:[%s8043_s1 + $0xa24] ss:$48 sps:$4 sm:$0xff]  }
  0x39   : > { %2679 = vmatpush1.bf16.msra.mxu0 %v5401_v53  ;;  %2761 = vmatpush1.bf16.msra.mxu1 %v5402_v54  ;;  %v5492_v53 = vld [vmem:[%s8043_s1 + $0xa2c] ss:$48 sps:$4 sm:$0xff]   ;;  %v5487_v54 = vld [vmem:[%s8043_s1 + $0xa20] ss:$48 sps:$4 sm:$0xff]  }
  0x3a   : > { %2680 = vmatprep.subr.bf16.mxu0 %v5403_v55  ;;  %2762 = vmatprep.subr.bf16.mxu1 %v5405_v56  ;;  %v5490_v55 = vld [vmem:[%s8043_s1 + $0xa28] ss:$48 sps:$4 sm:$0xff]   ;;  %v5495_v56 = vld [vmem:[%s8043_s1 + $0xa84] ss:$48 sps:$4 sm:$0xff]  }
  0x3d   : > { %2681 = vmatpush1.bf16.msra.mxu0 %v5407_v57  ;;  %2763 = vmatpush1.bf16.msra.mxu1 %v5408_v58  ;;  %v5498_v57 = vld [vmem:[%s8043_s1 + $0xa8c] ss:$48 sps:$4 sm:$0xff]   ;;  %v5493_v58 = vld [vmem:[%s8043_s1 + $0xa80] ss:$48 sps:$4 sm:$0xff]  }
  0x3e   : > { %2682 = vmatprep.subr.bf16.mxu0 %v5409_v59  ;;  %2764 = vmatprep.subr.bf16.mxu1 %v5411_v60  ;;  %v5496_v59 = vld [vmem:[%s8043_s1 + $0xa88] ss:$48 sps:$4 sm:$0xff]   ;;  %v5501_v60 = vld [vmem:[%s8043_s1 + $0xae4] ss:$48 sps:$4 sm:$0xff]  }
  0x41   : > { %2683 = vmatpush1.bf16.msra.mxu0 %v5413_v61  ;;  %2765 = vmatpush1.bf16.msra.mxu1 %v5414_v62  ;;  %v5504_v61 = vld [vmem:[%s8043_s1 + $0xaec] ss:$48 sps:$4 sm:$0xff]   ;;  %v5499_v62 = vld [vmem:[%s8043_s1 + $0xae0] ss:$48 sps:$4 sm:$0xff]  }
  0x42   : > { %2684 = vmatprep.subr.bf16.mxu0 %v5415_v63  ;;  %2766 = vmatprep.subr.bf16.mxu1 %v5417_v0  ;;  %v5502_v63 = vld [vmem:[%s8043_s1 + $0xae8] ss:$48 sps:$4 sm:$0xff]   ;;  %v5507_v0 = vld [vmem:[%s8043_s1 + $0xb44] ss:$48 sps:$4 sm:$0xff]  }
  0x45   : > { %2685 = vmatpush1.bf16.msra.mxu0 %v5419_v1  ;;  %2767 = vmatpush1.bf16.msra.mxu1 %v5420_v2  ;;  %v5510_v1 = vld [vmem:[%s8043_s1 + $0xb4c] ss:$48 sps:$4 sm:$0xff]   ;;  %v5505_v2 = vld [vmem:[%s8043_s1 + $0xb40] ss:$48 sps:$4 sm:$0xff]  }
  0x46   : > { %2695 = vmatprep.subr.bf16.mxu0 %v5423_v4  ;;  %2777 = vmatprep.subr.bf16.mxu1 %v5426_v5  ;;  %v5513_v4 = vld [vmem:[%s8043_s1 + $0xba4] ss:$48 sps:$4 sm:$0xff]   ;;  %v5516_v5 = vld [vmem:[%s8043_s1 + $0xbac] ss:$48 sps:$4 sm:$0xff]  }
  0x48   : > { %2687 = vmatmul.mubr.bf16.vlgmr.msra.gmra.mrb[0].mxu0 %v6381_v6  ;;  %2769 = vmatmul.mubr.bf16.vlgmr.msra.gmra.mrb[0].mxu1 %v6381_v6 }
  0x49   : > { %2696 = vmatpush1.bf16.msra.mxu0 %v5421_v7  ;;  %2778 = vmatpush1.bf16.msra.mxu1 %v5424_v8  ;;  %v5511_v7 = vld [vmem:[%s8043_s1 + $0xba0] ss:$48 sps:$4 sm:$0xff]   ;;  %v5514_v8 = vld [vmem:[%s8043_s1 + $0xba8] ss:$48 sps:$4 sm:$0xff]  }
  0x4a   : > { %2697 = vmatprep.subr.bf16.mxu0 %v5429_v9  ;;  %2779 = vmatprep.subr.bf16.mxu1 %v5432_v10  ;;  %v280_v9 = vld [vmem:[%s6307_s30 + $0x10] sm:$0xff] }
  0x4b   : > { %2727 = vmatprep.mubr.bf16.mxu0 %v6464_v34  ;;  %2809 = vmatprep.mubr.bf16.mxu1 %v6464_v34  ;;  %v5519_v10 = vld [vmem:[%s8043_s1 + $0x14] ss:$48 sps:$4 sm:$0xff]  }
  0x4d   : > { %2698 = vmatpush1.bf16.msra.mxu0 %v5427_v11  ;;  %2780 = vmatpush1.bf16.msra.mxu1 %v5430_v12  ;;  %v5522_v11 = vld [vmem:[%s8043_s1 + $0x1c] ss:$48 sps:$4 sm:$0xff]   ;;  %v6583_v12 = vpack.c.bf16 %v280_v9, %v280_v9  ;;  %v5604_v9 = vld [vmem:[%s8043_s1 + $0x558] ss:$48 sps:$4 sm:$0xff]  }
  0x4e   : > { %2699 = vmatprep.subr.bf16.mxu0 %v5435_v13  ;;  %2781 = vmatprep.subr.bf16.mxu1 %v5438_v14  ;;  %v5517_v13 = vld [vmem:[%s8043_s1 + $0x10] ss:$48 sps:$4 sm:$0xff]   ;;  %v5520_v14 = vld [vmem:[%s8043_s1 + $0x18] ss:$48 sps:$4 sm:$0xff]  }
  0x51   : > { %2700 = vmatpush1.bf16.msra.mxu0 %v5433_v15  ;;  %2782 = vmatpush1.bf16.msra.mxu1 %v5436_v16  ;;  %v5525_v15 = vld [vmem:[%s8043_s1 + $0x74] ss:$48 sps:$4 sm:$0xff]   ;;  %v5528_v16 = vld [vmem:[%s8043_s1 + $0x7c] ss:$48 sps:$4 sm:$0xff]  }
  0x52   : > { %2701 = vmatprep.subr.bf16.mxu0 %v5441_v17  ;;  %2783 = vmatprep.subr.bf16.mxu1 %v5444_v18  ;;  %v5523_v17 = vld [vmem:[%s8043_s1 + $0x70] ss:$48 sps:$4 sm:$0xff]   ;;  %v5526_v18 = vld [vmem:[%s8043_s1 + $0x78] ss:$48 sps:$4 sm:$0xff]  }
  0x55   : > { %2702 = vmatpush1.bf16.msra.mxu0 %v5439_v19  ;;  %2784 = vmatpush1.bf16.msra.mxu1 %v5442_v20  ;;  %v5531_v19 = vld [vmem:[%s8043_s1 + $0xd4] ss:$48 sps:$4 sm:$0xff]   ;;  %v5534_v20 = vld [vmem:[%s8043_s1 + $0xdc] ss:$48 sps:$4 sm:$0xff]  }
  0x56   : > { %2703 = vmatprep.subr.bf16.mxu0 %v5447_v21  ;;  %2785 = vmatprep.subr.bf16.mxu1 %v5450_v22  ;;  %v5529_v21 = vld [vmem:[%s8043_s1 + $0xd0] ss:$48 sps:$4 sm:$0xff]   ;;  %v5532_v22 = vld [vmem:[%s8043_s1 + $0xd8] ss:$48 sps:$4 sm:$0xff]  }
  0x59   : > { %2704 = vmatpush1.bf16.msra.mxu0 %v5445_v23  ;;  %2786 = vmatpush1.bf16.msra.mxu1 %v5448_v24  ;;  %v5537_v23 = vld [vmem:[%s8043_s1 + $0x134] ss:$48 sps:$4 sm:$0xff]   ;;  %v5540_v24 = vld [vmem:[%s8043_s1 + $0x13c] ss:$48 sps:$4 sm:$0xff]  }
  0x5a   : > { %2705 = vmatprep.subr.bf16.mxu0 %v5453_v25  ;;  %2787 = vmatprep.subr.bf16.mxu1 %v5456_v26  ;;  %v5535_v25 = vld [vmem:[%s8043_s1 + $0x130] ss:$48 sps:$4 sm:$0xff]   ;;  %v5538_v26 = vld [vmem:[%s8043_s1 + $0x138] ss:$48 sps:$4 sm:$0xff]  }
  0x5d   : > { %2706 = vmatpush1.bf16.msra.mxu0 %v5451_v27  ;;  %2788 = vmatpush1.bf16.msra.mxu1 %v5454_v28  ;;  %v5543_v27 = vld [vmem:[%s8043_s1 + $0x194] ss:$48 sps:$4 sm:$0xff]   ;;  %v5546_v28 = vld [vmem:[%s8043_s1 + $0x19c] ss:$48 sps:$4 sm:$0xff]  }
  0x5e   : > { %2707 = vmatprep.subr.bf16.mxu0 %v5459_v29  ;;  %2789 = vmatprep.subr.bf16.mxu1 %v5462_v30  ;;  %v5541_v29 = vld [vmem:[%s8043_s1 + $0x190] ss:$48 sps:$4 sm:$0xff]   ;;  %v5544_v30 = vld [vmem:[%s8043_s1 + $0x198] ss:$48 sps:$4 sm:$0xff]  }
  0x61   : > { %2708 = vmatpush1.bf16.msra.mxu0 %v5457_v32  ;;  %2790 = vmatpush1.bf16.msra.mxu1 %v5460_v33  ;;  %v5552_v32 = vld [vmem:[%s8043_s1 + $0x1fc] ss:$48 sps:$4 sm:$0xff]   ;;  %v5547_v33 = vld [vmem:[%s8043_s1 + $0x1f0] ss:$48 sps:$4 sm:$0xff]  }
  0x62   : > { %2709 = vmatprep.subr.bf16.mxu0 %v5465_v35  ;;  %2791 = vmatprep.subr.bf16.mxu1 %v5468_v36  ;;  %v5550_v35 = vld [vmem:[%s8043_s1 + $0x1f8] ss:$48 sps:$4 sm:$0xff]   ;;  %v5555_v36 = vld [vmem:[%s8043_s1 + $0x254] ss:$48 sps:$4 sm:$0xff]  }
  0x65   : > { %2710 = vmatpush1.bf16.msra.mxu0 %v5463_v37  ;;  %2792 = vmatpush1.bf16.msra.mxu1 %v5466_v38  ;;  %v5558_v37 = vld [vmem:[%s8043_s1 + $0x25c] ss:$48 sps:$4 sm:$0xff]   ;;  %v5553_v38 = vld [vmem:[%s8043_s1 + $0x250] ss:$48 sps:$4 sm:$0xff]  }
  0x66   : > { %2711 = vmatprep.subr.bf16.mxu0 %v5471_v39  ;;  %2793 = vmatprep.subr.bf16.mxu1 %v5474_v40  ;;  %v5556_v39 = vld [vmem:[%s8043_s1 + $0x258] ss:$48 sps:$4 sm:$0xff]   ;;  %v5561_v40 = vld [vmem:[%s8043_s1 + $0x2b4] ss:$48 sps:$4 sm:$0xff]  }
  0x69   : > { %2712 = vmatpush1.bf16.msra.mxu0 %v5469_v41  ;;  %2794 = vmatpush1.bf16.msra.mxu1 %v5472_v42  ;;  %v5564_v41 = vld [vmem:[%s8043_s1 + $0x2bc] ss:$48 sps:$4 sm:$0xff]   ;;  %v5559_v42 = vld [vmem:[%s8043_s1 + $0x2b0] ss:$48 sps:$4 sm:$0xff]  }
  0x6a   : > { %2713 = vmatprep.subr.bf16.mxu0 %v5477_v43  ;;  %2795 = vmatprep.subr.bf16.mxu1 %v5480_v44  ;;  %v5562_v43 = vld [vmem:[%s8043_s1 + $0x2b8] ss:$48 sps:$4 sm:$0xff]   ;;  %v5567_v44 = vld [vmem:[%s8043_s1 + $0x314] ss:$48 sps:$4 sm:$0xff]  }
  0x6d   : > { %2714 = vmatpush1.bf16.msra.mxu0 %v5475_v45  ;;  %2796 = vmatpush1.bf16.msra.mxu1 %v5478_v46  ;;  %v5570_v45 = vld [vmem:[%s8043_s1 + $0x31c] ss:$48 sps:$4 sm:$0xff]   ;;  %v5565_v46 = vld [vmem:[%s8043_s1 + $0x310] ss:$48 sps:$4 sm:$0xff]  }
  0x6e   : > { %2715 = vmatprep.subr.bf16.mxu0 %v5483_v47  ;;  %2797 = vmatprep.subr.bf16.mxu1 %v5486_v48  ;;  %v5568_v47 = vld [vmem:[%s8043_s1 + $0x318] ss:$48 sps:$4 sm:$0xff]   ;;  %v5573_v48 = vld [vmem:[%s8043_s1 + $0x374] ss:$48 sps:$4 sm:$0xff]  }
  0x71   : > { %2716 = vmatpush1.bf16.msra.mxu0 %v5481_v50  ;;  %2798 = vmatpush1.bf16.msra.mxu1 %v5484_v51  ;;  %v5576_v50 = vld [vmem:[%s8043_s1 + $0x37c] ss:$48 sps:$4 sm:$0xff]   ;;  %v5571_v51 = vld [vmem:[%s8043_s1 + $0x370] ss:$48 sps:$4 sm:$0xff]  }
  0x72   : > { %2717 = vmatprep.subr.bf16.mxu0 %v5489_v52  ;;  %2799 = vmatprep.subr.bf16.mxu1 %v5492_v53  ;;  %v5574_v52 = vld [vmem:[%s8043_s1 + $0x378] ss:$48 sps:$4 sm:$0xff]   ;;  %v5579_v53 = vld [vmem:[%s8043_s1 + $0x3d4] ss:$48 sps:$4 sm:$0xff]  }
  0x75   : > { %2718 = vmatpush1.bf16.msra.mxu0 %v5487_v54  ;;  %2800 = vmatpush1.bf16.msra.mxu1 %v5490_v55  ;;  %v5582_v54 = vld [vmem:[%s8043_s1 + $0x3dc] ss:$48 sps:$4 sm:$0xff]   ;;  %v5577_v55 = vld [vmem:[%s8043_s1 + $0x3d0] ss:$48 sps:$4 sm:$0xff]  }
  0x76   : > { %2719 = vmatprep.subr.bf16.mxu0 %v5495_v56  ;;  %2801 = vmatprep.subr.bf16.mxu1 %v5498_v57  ;;  %v5580_v56 = vld [vmem:[%s8043_s1 + $0x3d8] ss:$48 sps:$4 sm:$0xff]   ;;  %v5585_v57 = vld [vmem:[%s8043_s1 + $0x434] ss:$48 sps:$4 sm:$0xff]  }
  0x79   : > { %2720 = vmatpush1.bf16.msra.mxu0 %v5493_v58  ;;  %2802 = vmatpush1.bf16.msra.mxu1 %v5496_v59  ;;  %v5588_v58 = vld [vmem:[%s8043_s1 + $0x43c] ss:$48 sps:$4 sm:$0xff]   ;;  %v5583_v59 = vld [vmem:[%s8043_s1 + $0x430] ss:$48 sps:$4 sm:$0xff]  }
  0x7a   : > { %2721 = vmatprep.subr.bf16.mxu0 %v5501_v60  ;;  %2803 = vmatprep.subr.bf16.mxu1 %v5504_v61  ;;  %v5586_v60 = vld [vmem:[%s8043_s1 + $0x438] ss:$48 sps:$4 sm:$0xff]   ;;  %v5591_v61 = vld [vmem:[%s8043_s1 + $0x494] ss:$48 sps:$4 sm:$0xff]  }
  0x7d   : > { %2722 = vmatpush1.bf16.msra.mxu0 %v5499_v62  ;;  %2804 = vmatpush1.bf16.msra.mxu1 %v5502_v63  ;;  %v5594_v62 = vld [vmem:[%s8043_s1 + $0x49c] ss:$48 sps:$4 sm:$0xff]   ;;  %v5589_v63 = vld [vmem:[%s8043_s1 + $0x490] ss:$48 sps:$4 sm:$0xff]  }
  0x7e   : > { %2723 = vmatprep.subr.bf16.mxu0 %v5507_v0  ;;  %2805 = vmatprep.subr.bf16.mxu1 %v5510_v1  ;;  %v5592_v0 = vld [vmem:[%s8043_s1 + $0x498] ss:$48 sps:$4 sm:$0xff]   ;;  %v5597_v1 = vld [vmem:[%s8043_s1 + $0x4f4] ss:$48 sps:$4 sm:$0xff]  }
  0x81   : > { %2724 = vmatpush1.bf16.msra.mxu0 %v5505_v2  ;;  %2806 = vmatpush1.bf16.msra.mxu1 %v5508_v3  ;;  %v5600_v2 = vld [vmem:[%s8043_s1 + $0x4fc] ss:$48 sps:$4 sm:$0xff]   ;;  %v5595_v3 = vld [vmem:[%s8043_s1 + $0x4f0] ss:$48 sps:$4 sm:$0xff]  }
  0x82   : > { %2725 = vmatprep.subr.bf16.mxu0 %v5513_v4  ;;  %2807 = vmatprep.subr.bf16.mxu1 %v5516_v5  ;;  %v5598_v4 = vld [vmem:[%s8043_s1 + $0x4f8] ss:$48 sps:$4 sm:$0xff]   ;;  %v5603_v5 = vld [vmem:[%s8043_s1 + $0x554] ss:$48 sps:$4 sm:$0xff]  }
  0x85   : > { %2726 = vmatpush1.bf16.msra.mxu0 %v5511_v7  ;;  %2808 = vmatpush1.bf16.msra.mxu1 %v5514_v8  ;;  %v5606_v7 = vld [vmem:[%s8043_s1 + $0x55c] ss:$48 sps:$4 sm:$0xff]   ;;  %v5601_v8 = vld [vmem:[%s8043_s1 + $0x550] ss:$48 sps:$4 sm:$0xff]  }
  0x86   : > { %2818 = vmatprep.subr.bf16.mxu0 %v5519_v10  ;;  %2900 = vmatprep.subr.bf16.mxu1 %v5522_v11  ;;  %v5609_v10 = vld [vmem:[%s8043_s1 + $0x5b4] ss:$48 sps:$4 sm:$0xff]   ;;  %v5612_v11 = vld [vmem:[%s8043_s1 + $0x5bc] ss:$48 sps:$4 sm:$0xff]  }
  0x88   : > { %2728 = vmatmul.mubr.bf16.vlgmr.msra.gmra.mrb[0].mxu0 %v6583_v12  ;;  %2810 = vmatmul.mubr.bf16.vlgmr.msra.gmra.mrb[0].mxu1 %v6583_v12 }
  0x89   : > { %2819 = vmatpush1.bf16.msra.mxu0 %v5517_v13  ;;  %2901 = vmatpush1.bf16.msra.mxu1 %v5520_v14  ;;  %v5607_v13 = vld [vmem:[%s8043_s1 + $0x5b0] ss:$48 sps:$4 sm:$0xff]   ;;  %v5610_v14 = vld [vmem:[%s8043_s1 + $0x5b8] ss:$48 sps:$4 sm:$0xff]  }
  0x8a   : > { %2820 = vmatprep.subr.bf16.mxu0 %v5525_v15  ;;  %2902 = vmatprep.subr.bf16.mxu1 %v5528_v16  ;;  %v5615_v15 = vld [vmem:[%s8043_s1 + $0x614] ss:$48 sps:$4 sm:$0xff]   ;;  %v5618_v16 = vld [vmem:[%s8043_s1 + $0x61c] ss:$48 sps:$4 sm:$0xff]  }
  0x8b   : > { %2850 = vmatprep.mubr.bf16.mxu0 %v6319_v49  ;;  %2932 = vmatprep.mubr.bf16.mxu1 %v6319_v49 }
  0x8d   : > { %2821 = vmatpush1.bf16.msra.mxu0 %v5523_v17  ;;  %2903 = vmatpush1.bf16.msra.mxu1 %v5526_v18  ;;  %v5613_v17 = vld [vmem:[%s8043_s1 + $0x610] ss:$48 sps:$4 sm:$0xff]   ;;  %v5616_v18 = vld [vmem:[%s8043_s1 + $0x618] ss:$48 sps:$4 sm:$0xff]  }
  0x8e   : > { %2822 = vmatprep.subr.bf16.mxu0 %v5531_v19  ;;  %2904 = vmatprep.subr.bf16.mxu1 %v5534_v20  ;;  %v5621_v19 = vld [vmem:[%s8043_s1 + $0x674] ss:$48 sps:$4 sm:$0xff]   ;;  %v5624_v20 = vld [vmem:[%s8043_s1 + $0x67c] ss:$48 sps:$4 sm:$0xff]  }
  0x91   : > { %2823 = vmatpush1.bf16.msra.mxu0 %v5529_v21  ;;  %2905 = vmatpush1.bf16.msra.mxu1 %v5532_v22  ;;  %v5619_v21 = vld [vmem:[%s8043_s1 + $0x670] ss:$48 sps:$4 sm:$0xff]   ;;  %v5622_v22 = vld [vmem:[%s8043_s1 + $0x678] ss:$48 sps:$4 sm:$0xff]  }
  0x92   : > { %2824 = vmatprep.subr.bf16.mxu0 %v5537_v23  ;;  %2906 = vmatprep.subr.bf16.mxu1 %v5540_v24  ;;  %v5627_v23 = vld [vmem:[%s8043_s1 + $0x6d4] ss:$48 sps:$4 sm:$0xff]   ;;  %v5630_v24 = vld [vmem:[%s8043_s1 + $0x6dc] ss:$48 sps:$4 sm:$0xff]  }
  0x95   : > { %2825 = vmatpush1.bf16.msra.mxu0 %v5535_v25  ;;  %2907 = vmatpush1.bf16.msra.mxu1 %v5538_v26  ;;  %v5625_v25 = vld [vmem:[%s8043_s1 + $0x6d0] ss:$48 sps:$4 sm:$0xff]   ;;  %v5628_v26 = vld [vmem:[%s8043_s1 + $0x6d8] ss:$48 sps:$4 sm:$0xff]  }
  0x96   : > { %2826 = vmatprep.subr.bf16.mxu0 %v5543_v27  ;;  %2908 = vmatprep.subr.bf16.mxu1 %v5546_v28  ;;  %v5633_v27 = vld [vmem:[%s8043_s1 + $0x734] ss:$48 sps:$4 sm:$0xff]   ;;  %v5636_v28 = vld [vmem:[%s8043_s1 + $0x73c] ss:$48 sps:$4 sm:$0xff]  }
  0x99   : > { %2827 = vmatpush1.bf16.msra.mxu0 %v5541_v29  ;;  %2909 = vmatpush1.bf16.msra.mxu1 %v5544_v30  ;;  %v5631_v29 = vld [vmem:[%s8043_s1 + $0x730] ss:$48 sps:$4 sm:$0xff]   ;;  %v5634_v30 = vld [vmem:[%s8043_s1 + $0x738] ss:$48 sps:$4 sm:$0xff]  }
  0x9a   : > { %2828 = vmatprep.subr.bf16.mxu0 %v5549_v31  ;;  %2910 = vmatprep.subr.bf16.mxu1 %v5552_v32  ;;  %v5639_v31 = vld [vmem:[%s8043_s1 + $0x794] ss:$48 sps:$4 sm:$0xff]   ;;  %v5642_v32 = vld [vmem:[%s8043_s1 + $0x79c] ss:$48 sps:$4 sm:$0xff]  }
  0x9d   : > { %2829 = vmatpush1.bf16.msra.mxu0 %v5547_v33  ;;  %2911 = vmatpush1.bf16.msra.mxu1 %v5550_v35  ;;  %v5637_v33 = vld [vmem:[%s8043_s1 + $0x790] ss:$48 sps:$4 sm:$0xff]   ;;  %v5640_v35 = vld [vmem:[%s8043_s1 + $0x798] ss:$48 sps:$4 sm:$0xff]  }
  0x9e   : > { %2830 = vmatprep.subr.bf16.mxu0 %v5555_v36  ;;  %2912 = vmatprep.subr.bf16.mxu1 %v5558_v37  ;;  %v5645_v36 = vld [vmem:[%s8043_s1 + $0x7f4] ss:$48 sps:$4 sm:$0xff]   ;;  %v5648_v37 = vld [vmem:[%s8043_s1 + $0x7fc] ss:$48 sps:$4 sm:$0xff]  }
  0xa1   : > { %2831 = vmatpush1.bf16.msra.mxu0 %v5553_v38  ;;  %2913 = vmatpush1.bf16.msra.mxu1 %v5556_v39  ;;  %v5643_v38 = vld [vmem:[%s8043_s1 + $0x7f0] ss:$48 sps:$4 sm:$0xff]   ;;  %v5646_v39 = vld [vmem:[%s8043_s1 + $0x7f8] ss:$48 sps:$4 sm:$0xff]  }
  0xa2   : > { %2832 = vmatprep.subr.bf16.mxu0 %v5561_v40  ;;  %2914 = vmatprep.subr.bf16.mxu1 %v5564_v41  ;;  %v5651_v40 = vld [vmem:[%s8043_s1 + $0x854] ss:$48 sps:$4 sm:$0xff]   ;;  %v5654_v41 = vld [vmem:[%s8043_s1 + $0x85c] ss:$48 sps:$4 sm:$0xff]  }
  0xa5   : > { %2833 = vmatpush1.bf16.msra.mxu0 %v5559_v42  ;;  %2915 = vmatpush1.bf16.msra.mxu1 %v5562_v43  ;;  %v5649_v42 = vld [vmem:[%s8043_s1 + $0x850] ss:$48 sps:$4 sm:$0xff]   ;;  %v5652_v43 = vld [vmem:[%s8043_s1 + $0x858] ss:$48 sps:$4 sm:$0xff]  }
  0xa6   : > { %2834 = vmatprep.subr.bf16.mxu0 %v5567_v44  ;;  %2916 = vmatprep.subr.bf16.mxu1 %v5570_v45  ;;  %v5657_v44 = vld [vmem:[%s8043_s1 + $0x8b4] ss:$48 sps:$4 sm:$0xff]   ;;  %v5660_v45 = vld [vmem:[%s8043_s1 + $0x8bc] ss:$48 sps:$4 sm:$0xff]  }
  0xa9   : > { %2835 = vmatpush1.bf16.msra.mxu0 %v5565_v46  ;;  %2917 = vmatpush1.bf16.msra.mxu1 %v5568_v47  ;;  %v5655_v46 = vld [vmem:[%s8043_s1 + $0x8b0] ss:$48 sps:$4 sm:$0xff]   ;;  %v5658_v47 = vld [vmem:[%s8043_s1 + $0x8b8] ss:$48 sps:$4 sm:$0xff]  }
  0xaa   : > { %2836 = vmatprep.subr.bf16.mxu0 %v5573_v48  ;;  %2918 = vmatprep.subr.bf16.mxu1 %v5576_v50  ;;  %v5663_v48 = vld [vmem:[%s8043_s1 + $0x914] ss:$48 sps:$4 sm:$0xff]   ;;  %v5666_v50 = vld [vmem:[%s8043_s1 + $0x91c] ss:$48 sps:$4 sm:$0xff]  }
  0xad   : > { %2837 = vmatpush1.bf16.msra.mxu0 %v5571_v51  ;;  %2919 = vmatpush1.bf16.msra.mxu1 %v5574_v52  ;;  %v5661_v51 = vld [vmem:[%s8043_s1 + $0x910] ss:$48 sps:$4 sm:$0xff]   ;;  %v5664_v52 = vld [vmem:[%s8043_s1 + $0x918] ss:$48 sps:$4 sm:$0xff]  }
  0xae   : > { %2838 = vmatprep.subr.bf16.mxu0 %v5579_v53  ;;  %2920 = vmatprep.subr.bf16.mxu1 %v5582_v54  ;;  %v5669_v53 = vld [vmem:[%s8043_s1 + $0x974] ss:$48 sps:$4 sm:$0xff]   ;;  %v5672_v54 = vld [vmem:[%s8043_s1 + $0x97c] ss:$48 sps:$4 sm:$0xff]  }
  0xb1   : > { %2839 = vmatpush1.bf16.msra.mxu0 %v5577_v55  ;;  %2921 = vmatpush1.bf16.msra.mxu1 %v5580_v56  ;;  %v5667_v55 = vld [vmem:[%s8043_s1 + $0x970] ss:$48 sps:$4 sm:$0xff]   ;;  %v5670_v56 = vld [vmem:[%s8043_s1 + $0x978] ss:$48 sps:$4 sm:$0xff]  }
  0xb2   : > { %2840 = vmatprep.subr.bf16.mxu0 %v5585_v57  ;;  %2922 = vmatprep.subr.bf16.mxu1 %v5588_v58  ;;  %v5675_v57 = vld [vmem:[%s8043_s1 + $0x9d4] ss:$48 sps:$4 sm:$0xff]   ;;  %v5678_v58 = vld [vmem:[%s8043_s1 + $0x9dc] ss:$48 sps:$4 sm:$0xff]  }
  0xb5   : > { %2841 = vmatpush1.bf16.msra.mxu0 %v5583_v59  ;;  %2923 = vmatpush1.bf16.msra.mxu1 %v5586_v60  ;;  %v5673_v59 = vld [vmem:[%s8043_s1 + $0x9d0] ss:$48 sps:$4 sm:$0xff]   ;;  %v5676_v60 = vld [vmem:[%s8043_s1 + $0x9d8] ss:$48 sps:$4 sm:$0xff]  }
  0xb6   : > { %2842 = vmatprep.subr.bf16.mxu0 %v5591_v61  ;;  %2924 = vmatprep.subr.bf16.mxu1 %v5594_v62  ;;  %v5681_v61 = vld [vmem:[%s8043_s1 + $0xa34] ss:$48 sps:$4 sm:$0xff]   ;;  %v5684_v62 = vld [vmem:[%s8043_s1 + $0xa3c] ss:$48 sps:$4 sm:$0xff]  }
  0xb9   : > { %2843 = vmatpush1.bf16.msra.mxu0 %v5589_v63  ;;  %2925 = vmatpush1.bf16.msra.mxu1 %v5592_v0  ;;  %v5679_v63 = vld [vmem:[%s8043_s1 + $0xa30] ss:$48 sps:$4 sm:$0xff]   ;;  %v5682_v0 = vld [vmem:[%s8043_s1 + $0xa38] ss:$48 sps:$4 sm:$0xff]  }
  0xba   : > { %2844 = vmatprep.subr.bf16.mxu0 %v5597_v1  ;;  %2926 = vmatprep.subr.bf16.mxu1 %v5600_v2  ;;  %v5687_v1 = vld [vmem:[%s8043_s1 + $0xa94] ss:$48 sps:$4 sm:$0xff]   ;;  %v5690_v2 = vld [vmem:[%s8043_s1 + $0xa9c] ss:$48 sps:$4 sm:$0xff]  }
  0xbd   : > { %2845 = vmatpush1.bf16.msra.mxu0 %v5595_v3  ;;  %2927 = vmatpush1.bf16.msra.mxu1 %v5598_v4  ;;  %v5685_v3 = vld [vmem:[%s8043_s1 + $0xa90] ss:$48 sps:$4 sm:$0xff]   ;;  %v5688_v4 = vld [vmem:[%s8043_s1 + $0xa98] ss:$48 sps:$4 sm:$0xff]  }
  0xbe   : > { %2846 = vmatprep.subr.bf16.mxu0 %v5603_v5  ;;  %2928 = vmatprep.subr.bf16.mxu1 %v5606_v7  ;;  %v5693_v5 = vld [vmem:[%s8043_s1 + $0xaf4] ss:$48 sps:$4 sm:$0xff]   ;;  %v5696_v7 = vld [vmem:[%s8043_s1 + $0xafc] ss:$48 sps:$4 sm:$0xff]  }
  0xc1   : > { %2847 = vmatpush1.bf16.msra.mxu0 %v5601_v8  ;;  %2929 = vmatpush1.bf16.msra.mxu1 %v5604_v9  ;;  %v5691_v8 = vld [vmem:[%s8043_s1 + $0xaf0] ss:$48 sps:$4 sm:$0xff]   ;;  %v5694_v9 = vld [vmem:[%s8043_s1 + $0xaf8] ss:$48 sps:$4 sm:$0xff]  }
  0xc2   : > { %2848 = vmatprep.subr.bf16.mxu0 %v5609_v10  ;;  %2930 = vmatprep.subr.bf16.mxu1 %v5612_v11  ;;  %v5699_v10 = vld [vmem:[%s8043_s1 + $0xb54] ss:$48 sps:$4 sm:$0xff]   ;;  %v5702_v11 = vld [vmem:[%s8043_s1 + $0xb5c] ss:$48 sps:$4 sm:$0xff]  }
  0xc5   : > { %2849 = vmatpush1.bf16.msra.mxu0 %v5607_v13  ;;  %2931 = vmatpush1.bf16.msra.mxu1 %v5610_v14  ;;  %v5697_v13 = vld [vmem:[%s8043_s1 + $0xb50] ss:$48 sps:$4 sm:$0xff]   ;;  %v5700_v14 = vld [vmem:[%s8043_s1 + $0xb58] ss:$48 sps:$4 sm:$0xff]  }
  0xc6   : > { %2859 = vmatprep.subr.bf16.mxu0 %v5615_v15  ;;  %2941 = vmatprep.subr.bf16.mxu1 %v5618_v16  ;;  %v5705_v15 = vld [vmem:[%s8043_s1 + $0xbb4] ss:$48 sps:$4 sm:$0xff]   ;;  %v5708_v16 = vld [vmem:[%s8043_s1 + $0xbbc] ss:$48 sps:$4 sm:$0xff]  }
  0xc8   : > { %2851 = vmatmul.mubr.bf16.vlgmr.msra.gmra.mrb[4].mxu0 %v6381_v6  ;;  %2933 = vmatmul.mubr.bf16.vlgmr.msra.gmra.mrb[4].mxu1 %v6381_v6 }
  0xc9   : > { %2860 = vmatpush1.bf16.msra.mxu0 %v5613_v17  ;;  %2942 = vmatpush1.bf16.msra.mxu1 %v5616_v18  ;;  %v5703_v17 = vld [vmem:[%s8043_s1 + $0xbb0] ss:$48 sps:$4 sm:$0xff]   ;;  %v5706_v18 = vld [vmem:[%s8043_s1 + $0xbb8] ss:$48 sps:$4 sm:$0xff]  }
  0xca   : > { %2861 = vmatprep.subr.bf16.mxu0 %v5621_v19  ;;  %2943 = vmatprep.subr.bf16.mxu1 %v5624_v20  ;;  %v5711_v19 = vld [vmem:[%s8043_s1 + $0x24] ss:$48 sps:$4 sm:$0xff]   ;;  %v5709_v20 = vld [vmem:[%s8043_s1 + $0x20] ss:$48 sps:$4 sm:$0xff]  }
  0xcb   : > { %2891 = vmatprep.mubr.bf16.mxu0 %v6464_v34  ;;  %2973 = vmatprep.mubr.bf16.mxu1 %v6464_v34 }
  0xcd   : > { %2862 = vmatpush1.bf16.msra.mxu0 %v5619_v21  ;;  %2944 = vmatpush1.bf16.msra.mxu1 %v5622_v22  ;;  %v5714_v21 = vld [vmem:[%s8043_s1 + $0x84] ss:$48 sps:$4 sm:$0xff]   ;;  %v5712_v22 = vld [vmem:[%s8043_s1 + $0x80] ss:$48 sps:$4 sm:$0xff]  }
  0xce   : > { %2863 = vmatprep.subr.bf16.mxu0 %v5627_v23  ;;  %2945 = vmatprep.subr.bf16.mxu1 %v5630_v24  ;;  %v5717_v23 = vld [vmem:[%s8043_s1 + $0xe4] ss:$48 sps:$4 sm:$0xff]   ;;  %v5715_v24 = vld [vmem:[%s8043_s1 + $0xe0] ss:$48 sps:$4 sm:$0xff]  }
  0xd1   : > { %2864 = vmatpush1.bf16.msra.mxu0 %v5625_v25  ;;  %2946 = vmatpush1.bf16.msra.mxu1 %v5628_v26  ;;  %v5720_v25 = vld [vmem:[%s8043_s1 + $0x144] ss:$48 sps:$4 sm:$0xff]   ;;  %v5718_v26 = vld [vmem:[%s8043_s1 + $0x140] ss:$48 sps:$4 sm:$0xff]  }
  0xd2   : > { %2865 = vmatprep.subr.bf16.mxu0 %v5633_v27  ;;  %2947 = vmatprep.subr.bf16.mxu1 %v5636_v28  ;;  %v5723_v27 = vld [vmem:[%s8043_s1 + $0x1a4] ss:$48 sps:$4 sm:$0xff]  }
  0xd3   : > { %v5726_v28 = vld [vmem:[%s8043_s1 + $0x204] ss:$48 sps:$4 sm:$0xff]  }
  0xd5   : > { %2866 = vmatpush1.bf16.msra.mxu0 %v5631_v29  ;;  %2948 = vmatpush1.bf16.msra.mxu1 %v5634_v30  ;;  %v5724_v29 = vld [vmem:[%s8043_s1 + $0x200] ss:$48 sps:$4 sm:$0xff]   ;;  %v5729_v30 = vld [vmem:[%s8043_s1 + $0x264] ss:$48 sps:$4 sm:$0xff]  }
  0xd6   : > { %2867 = vmatprep.subr.bf16.mxu0 %v5639_v31  ;;  %2949 = vmatprep.subr.bf16.mxu1 %v5642_v32  ;;  %v5727_v31 = vld [vmem:[%s8043_s1 + $0x260] ss:$48 sps:$4 sm:$0xff]   ;;  %v5732_v32 = vld [vmem:[%s8043_s1 + $0x2c4] ss:$48 sps:$4 sm:$0xff]  }
  0xd9   : > { %2868 = vmatpush1.bf16.msra.mxu0 %v5637_v33  ;;  %2950 = vmatpush1.bf16.msra.mxu1 %v5640_v35  ;;  %v5730_v33 = vld [vmem:[%s8043_s1 + $0x2c0] ss:$48 sps:$4 sm:$0xff]   ;;  %v5735_v35 = vld [vmem:[%s8043_s1 + $0x324] ss:$48 sps:$4 sm:$0xff]  }
  0xda   : > { %2869 = vmatprep.subr.bf16.mxu0 %v5645_v36  ;;  %2951 = vmatprep.subr.bf16.mxu1 %v5648_v37  ;;  %v5733_v36 = vld [vmem:[%s8043_s1 + $0x320] ss:$48 sps:$4 sm:$0xff]   ;;  %v5738_v37 = vld [vmem:[%s8043_s1 + $0x384] ss:$48 sps:$4 sm:$0xff]  }
  0xdd   : > { %2870 = vmatpush1.bf16.msra.mxu0 %v5643_v38  ;;  %2952 = vmatpush1.bf16.msra.mxu1 %v5646_v39  ;;  %v5736_v38 = vld [vmem:[%s8043_s1 + $0x380] ss:$48 sps:$4 sm:$0xff]   ;;  %v5741_v39 = vld [vmem:[%s8043_s1 + $0x3e4] ss:$48 sps:$4 sm:$0xff]  }
  0xde   : > { %2871 = vmatprep.subr.bf16.mxu0 %v5651_v40  ;;  %2953 = vmatprep.subr.bf16.mxu1 %v5654_v41  ;;  %v5739_v40 = vld [vmem:[%s8043_s1 + $0x3e0] ss:$48 sps:$4 sm:$0xff]   ;;  %v5744_v41 = vld [vmem:[%s8043_s1 + $0x444] ss:$48 sps:$4 sm:$0xff]  }
  0xe1   : > { %2872 = vmatpush1.bf16.msra.mxu0 %v5649_v42  ;;  %2954 = vmatpush1.bf16.msra.mxu1 %v5652_v43  ;;  %v5742_v42 = vld [vmem:[%s8043_s1 + $0x440] ss:$48 sps:$4 sm:$0xff]   ;;  %v5747_v43 = vld [vmem:[%s8043_s1 + $0x4a4] ss:$48 sps:$4 sm:$0xff]  }
  0xe2   : > { %2873 = vmatprep.subr.bf16.mxu0 %v5657_v44  ;;  %2955 = vmatprep.subr.bf16.mxu1 %v5660_v45  ;;  %v5745_v44 = vld [vmem:[%s8043_s1 + $0x4a0] ss:$48 sps:$4 sm:$0xff]   ;;  %v5750_v45 = vld [vmem:[%s8043_s1 + $0x504] ss:$48 sps:$4 sm:$0xff]  }
  0xe5   : > { %2874 = vmatpush1.bf16.msra.mxu0 %v5655_v46  ;;  %2956 = vmatpush1.bf16.msra.mxu1 %v5658_v47  ;;  %v5748_v46 = vld [vmem:[%s8043_s1 + $0x500] ss:$48 sps:$4 sm:$0xff]   ;;  %v5753_v47 = vld [vmem:[%s8043_s1 + $0x564] ss:$48 sps:$4 sm:$0xff]  }
  0xe6   : > { %2875 = vmatprep.subr.bf16.mxu0 %v5663_v48  ;;  %2957 = vmatprep.subr.bf16.mxu1 %v5666_v50  ;;  %v5751_v48 = vld [vmem:[%s8043_s1 + $0x560] ss:$48 sps:$4 sm:$0xff]   ;;  %v5756_v50 = vld [vmem:[%s8043_s1 + $0x5c4] ss:$48 sps:$4 sm:$0xff]  }
  0xe9   : > { %2876 = vmatpush1.bf16.msra.mxu0 %v5661_v51  ;;  %2958 = vmatpush1.bf16.msra.mxu1 %v5664_v52  ;;  %v5754_v51 = vld [vmem:[%s8043_s1 + $0x5c0] ss:$48 sps:$4 sm:$0xff]   ;;  %v5759_v52 = vld [vmem:[%s8043_s1 + $0x624] ss:$48 sps:$4 sm:$0xff]  }
  0xea   : > { %2877 = vmatprep.subr.bf16.mxu0 %v5669_v53  ;;  %2959 = vmatprep.subr.bf16.mxu1 %v5672_v54  ;;  %v5757_v53 = vld [vmem:[%s8043_s1 + $0x620] ss:$48 sps:$4 sm:$0xff]   ;;  %v5762_v54 = vld [vmem:[%s8043_s1 + $0x684] ss:$48 sps:$4 sm:$0xff]  }
  0xed   : > { %2878 = vmatpush1.bf16.msra.mxu0 %v5667_v55  ;;  %2960 = vmatpush1.bf16.msra.mxu1 %v5670_v56  ;;  %v5760_v55 = vld [vmem:[%s8043_s1 + $0x680] ss:$48 sps:$4 sm:$0xff]   ;;  %v5765_v56 = vld [vmem:[%s8043_s1 + $0x6e4] ss:$48 sps:$4 sm:$0xff]  }
  0xee   : > { %2879 = vmatprep.subr.bf16.mxu0 %v5675_v57  ;;  %2961 = vmatprep.subr.bf16.mxu1 %v5678_v58  ;;  %v5763_v57 = vld [vmem:[%s8043_s1 + $0x6e0] ss:$48 sps:$4 sm:$0xff]   ;;  %v5768_v58 = vld [vmem:[%s8043_s1 + $0x744] ss:$48 sps:$4 sm:$0xff]  }
  0xf1   : > { %2880 = vmatpush1.bf16.msra.mxu0 %v5673_v59  ;;  %2962 = vmatpush1.bf16.msra.mxu1 %v5676_v60  ;;  %v5766_v59 = vld [vmem:[%s8043_s1 + $0x740] ss:$48 sps:$4 sm:$0xff]   ;;  %v5771_v60 = vld [vmem:[%s8043_s1 + $0x7a4] ss:$48 sps:$4 sm:$0xff]  }
  0xf2   : > { %2881 = vmatprep.subr.bf16.mxu0 %v5681_v61  ;;  %2963 = vmatprep.subr.bf16.mxu1 %v5684_v62  ;;  %v5769_v61 = vld [vmem:[%s8043_s1 + $0x7a0] ss:$48 sps:$4 sm:$0xff]   ;;  %v5774_v62 = vld [vmem:[%s8043_s1 + $0x804] ss:$48 sps:$4 sm:$0xff]  }
  0xf5   : > { %2882 = vmatpush1.bf16.msra.mxu0 %v5679_v63  ;;  %2964 = vmatpush1.bf16.msra.mxu1 %v5682_v0  ;;  %v5772_v63 = vld [vmem:[%s8043_s1 + $0x800] ss:$48 sps:$4 sm:$0xff]   ;;  %v5777_v0 = vld [vmem:[%s8043_s1 + $0x864] ss:$48 sps:$4 sm:$0xff]  }
  0xf6   : > { %2883 = vmatprep.subr.bf16.mxu0 %v5687_v1  ;;  %2965 = vmatprep.subr.bf16.mxu1 %v5690_v2 }
  0xf9   : > { %2884 = vmatpush1.bf16.msra.mxu0 %v5685_v3  ;;  %2966 = vmatpush1.bf16.msra.mxu1 %v5688_v4 }
  0xfa   : > { %2885 = vmatprep.subr.bf16.mxu0 %v5693_v5  ;;  %2967 = vmatprep.subr.bf16.mxu1 %v5696_v7 }
  0xfd   : > { %2886 = vmatpush1.bf16.msra.mxu0 %v5691_v8  ;;  %2968 = vmatpush1.bf16.msra.mxu1 %v5694_v9  ;;  %v5775_v8 = vld [vmem:[%s8043_s1 + $0x860] ss:$48 sps:$4 sm:$0xff]  }
  0xfe   : > { %2887 = vmatprep.subr.bf16.mxu0 %v5699_v10  ;;  %2969 = vmatprep.subr.bf16.mxu1 %v5702_v11  ;;  %v5780_v11 = vld [vmem:[%s8043_s1 + $0x8c4] ss:$48 sps:$4 sm:$0xff]  }
 0x101   : > { %2888 = vmatpush1.bf16.msra.mxu0 %v5697_v13  ;;  %2970 = vmatpush1.bf16.msra.mxu1 %v5700_v14  ;;  %v5778_v13 = vld [vmem:[%s8043_s1 + $0x8c0] ss:$48 sps:$4 sm:$0xff]   ;;  %v5783_v14 = vld [vmem:[%s8043_s1 + $0x924] ss:$48 sps:$4 sm:$0xff]  }
 0x102   : > { %2889 = vmatprep.subr.bf16.mxu0 %v5705_v15  ;;  %2971 = vmatprep.subr.bf16.mxu1 %v5708_v16  ;;  %v5781_v15 = vld [vmem:[%s8043_s1 + $0x920] ss:$48 sps:$4 sm:$0xff]   ;;  %v5786_v16 = vld [vmem:[%s8043_s1 + $0x984] ss:$48 sps:$4 sm:$0xff]  }
 0x105   : > { %2890 = vmatpush1.bf16.msra.mxu0 %v5703_v17  ;;  %2972 = vmatpush1.bf16.msra.mxu1 %v5706_v18  ;;  %v5784_v17 = vld [vmem:[%s8043_s1 + $0x980] ss:$48 sps:$4 sm:$0xff]   ;;  %v5789_v18 = vld [vmem:[%s8043_s1 + $0x9e4] ss:$48 sps:$4 sm:$0xff]  }
 0x106   : > { %2982 = vmatprep.subr.bf16.mxu0 %v5711_v19  ;;  %v5787_v19 = vld [vmem:[%s8043_s1 + $0x9e0] ss:$48 sps:$4 sm:$0xff]  }
 0x108   : > { %2892 = vmatmul.mubr.bf16.vlgmr.msra.gmra.mrb[4].mxu0 %v6583_v12  ;;  %2974 = vmatmul.mubr.bf16.vlgmr.msra.gmra.mrb[4].mxu1 %v6583_v12 }
 0x109   : > { %2983 = vmatpush1.bf16.msra.mxu0 %v5709_v20  ;;  %3014 = vmatprep.mubr.bf16.mxu0 %v6319_v49  ;;  %v5792_v20 = vld [vmem:[%s8043_s1 + $0xa44] ss:$48 sps:$4 sm:$0xff]  }
 0x10a   : > { %2984 = vmatprep.subr.bf16.mxu0 %v5714_v21  ;;  %3096 = vmatprep.mubr.bf16.mxu1 %v6319_v49  ;;  %v5721_v49 = vld [vmem:[%s8043_s1 + $0x1a0] ss:$48 sps:$4 sm:$0xff]   ;;  %v674_v21 = vlaneseq }
 0x10d   : > { %2985 = vmatpush1.bf16.msra.mxu0 %v5712_v22  ;;  %v5790_v22 = vld [vmem:[%s8043_s1 + $0xa40] ss:$48 sps:$4 sm:$0xff]  }
 0x10e   : > { %2986 = vmatprep.subr.bf16.mxu0 %v5717_v23  ;;  %v5805_v23 = vld [vmem:[%s8043_s1 + $0x28] ss:$48 sps:$4 sm:$0xff]  }
 0x111   : > { %2987 = vmatpush1.bf16.msra.mxu0 %v5715_v24  ;;  %v5807_v24 = vld [vmem:[%s8043_s1 + $0x2c] ss:$48 sps:$4 sm:$0xff]  }
 0x112   : > { %2988 = vmatprep.subr.bf16.mxu0 %v5720_v25  ;;  %v5795_v25 = vld [vmem:[%s8043_s1 + $0xaa4] ss:$48 sps:$4 sm:$0xff]   ;;  %3064 = vmatprep.subr.bf16.mxu1 %v5807_v24  ;;  %v5876_v24 = vld [vmem:[%s8043_s1 + $0x8cc] ss:$48 sps:$4 sm:$0xff]  }
 0x113   : > { %3065 = vmatpush1.bf16.msra.mxu1 %v5805_v23  ;;  %v5871_v23 = vld [vmem:[%s8043_s1 + $0x868] ss:$48 sps:$4 sm:$0xff]  }
 0x115   : > { %2989 = vmatpush1.bf16.msra.mxu0 %v5718_v26  ;;  %v5810_v26 = vld [vmem:[%s8043_s1 + $0x8c] ss:$48 sps:$4 sm:$0xff]  }
 0x116   : > { %2990 = vmatprep.subr.bf16.mxu0 %v5723_v27  ;;  %v7165_v27 = vshrl.u32 %v674_v21, 7  ;;  %3066 = vmatprep.subr.bf16.mxu1 %v5810_v26  ;;  %v5868_v21 = vld [vmem:[%s8043_s1 + $0x808] ss:$48 sps:$4 sm:$0xff]   ;;  %v5879_v26 = vld [vmem:[%s8043_s1 + $0x92c] ss:$48 sps:$4 sm:$0xff]  }
 0x119   : > { %2991 = vmatpush1.bf16.msra.mxu0 %v5721_v49  ;;  %v5808_v49 = vld [vmem:[%s8043_s1 + $0x88] ss:$48 sps:$4 sm:$0xff]  }
 0x11a   : > { %2992 = vmatprep.subr.bf16.mxu0 %v5726_v28  ;;  %v5793_v28 = vld [vmem:[%s8043_s1 + $0xaa0] ss:$48 sps:$4 sm:$0xff]   ;;  %3067 = vmatpush1.bf16.msra.mxu1 %v5808_v49  ;;  %v5877_v49 = vld [vmem:[%s8043_s1 + $0x928] ss:$48 sps:$4 sm:$0xff]  }
 0x11d   : > { %2993 = vmatpush1.bf16.msra.mxu0 %v5724_v29  ;;  %v5813_v29 = vld [vmem:[%s8043_s1 + $0xec] ss:$48 sps:$4 sm:$0xff]  }
 0x11e   : > { %2994 = vmatprep.subr.bf16.mxu0 %v5729_v30  ;;  %v5798_v30 = vld [vmem:[%s8043_s1 + $0xb04] ss:$48 sps:$4 sm:$0xff]   ;;  %3068 = vmatprep.subr.bf16.mxu1 %v5813_v29  ;;  %v692_v29 = vsub.s32 4, %v7165_v27 }
 0x121   : > { %2995 = vmatpush1.bf16.msra.mxu0 %v5727_v31  ;;  %v7180_v31 = vsub.s32 1, %v7165_v27 }
 0x122   : > { %2996 = vmatprep.subr.bf16.mxu0 %v5732_v32  ;;  %v7185_v32 = vld [vmem:[%s8044_s2] sm:$0xff] }
 0x125   : > { %2997 = vmatpush1.bf16.msra.mxu0 %v5730_v33  ;;  %v5811_v33 = vld [vmem:[%s8043_s1 + $0xe8] ss:$48 sps:$4 sm:$0xff]  }
 0x126   : > { %2998 = vmatprep.subr.bf16.mxu0 %v5735_v35  ;;  %v5796_v35 = vld [vmem:[%s8043_s1 + $0xb00] ss:$48 sps:$4 sm:$0xff]   ;;  %3069 = vmatpush1.bf16.msra.mxu1 %v5811_v33  ;;  %v696_v33 = vsub.s32 5, %v7165_v27 }
 0x129   : > { %2999 = vmatpush1.bf16.msra.mxu0 %v5733_v36  ;;  %v5816_v36 = vld [vmem:[%s8043_s1 + $0x14c] ss:$48 sps:$4 sm:$0xff]  }
 0x12a   : > { %3000 = vmatprep.subr.bf16.mxu0 %v5738_v37  ;;  %v5801_v37 = vld [vmem:[%s8043_s1 + $0xb64] ss:$48 sps:$4 sm:$0xff]   ;;  %3070 = vmatprep.subr.bf16.mxu1 %v5816_v36  ;;  %v5885_v36 = vld [vmem:[%s8043_s1 + $0x9ec] ss:$48 sps:$4 sm:$0xff]  }
 0x12d   : > { %3001 = vmatpush1.bf16.msra.mxu0 %v5736_v38  ;;  %v681_v38 = vrot.slane %v7185_v32, %v7180_v31 }
 0x12e   : > { %3002 = vmatprep.subr.bf16.mxu0 %v5741_v39  ;;  %v5814_v39 = vld [vmem:[%s8043_s1 + $0x148] ss:$48 sps:$4 sm:$0xff]  }
 0x12f   : > { %3071 = vmatpush1.bf16.msra.mxu1 %v5814_v39  ;;  %v693_v39 = vrot.slane %v7185_v32, %v692_v29 }
 0x131   : > { %3003 = vmatpush1.bf16.msra.mxu0 %v5739_v40  ;;  %v5799_v40 = vld [vmem:[%s8043_s1 + $0xb60] ss:$48 sps:$4 sm:$0xff]  }
 0x132   : > { %3004 = vmatprep.subr.bf16.mxu0 %v5744_v41  ;;  %v5819_v41 = vld [vmem:[%s8043_s1 + $0x1ac] ss:$48 sps:$4 sm:$0xff]  }
 0x133   : > { %3072 = vmatprep.subr.bf16.mxu1 %v5819_v41  ;;  %v697_v41 = vrot.slane %v7185_v32, %v696_v33 }
 0x135   : > { %3005 = vmatpush1.bf16.msra.mxu0 %v5742_v42  ;;  %v5804_v42 = vld [vmem:[%s8043_s1 + $0xbc4] ss:$48 sps:$4 sm:$0xff]  }
 0x136   : > { %3006 = vmatprep.subr.bf16.mxu0 %v5747_v43 }
 0x139   : > { %3007 = vmatpush1.bf16.msra.mxu0 %v5745_v44  ;;  %v5817_v44 = vld [vmem:[%s8043_s1 + $0x1a8] ss:$48 sps:$4 sm:$0xff]  }
 0x13a   : > { %3008 = vmatprep.subr.bf16.mxu0 %v5750_v45  ;;  %v5802_v45 = vld [vmem:[%s8043_s1 + $0xbc0] ss:$48 sps:$4 sm:$0xff]   ;;  %3073 = vmatpush1.bf16.msra.mxu1 %v5817_v44 }
 0x13d   : > { %3009 = vmatpush1.bf16.msra.mxu0 %v5748_v46  ;;  %v5822_v46 = vld [vmem:[%s8043_s1 + $0x20c] ss:$48 sps:$4 sm:$0xff]  }
 0x13e   : > { %3010 = vmatprep.subr.bf16.mxu0 %v5753_v47  ;;  %3074 = vmatprep.subr.bf16.mxu1 %v5822_v46 }
 0x141   : > { %3011 = vmatpush1.bf16.msra.mxu0 %v5751_v48  ;;  %v5820_v48 = vld [vmem:[%s8043_s1 + $0x208] ss:$48 sps:$4 sm:$0xff]  }
 0x142   : > { %3012 = vmatprep.subr.bf16.mxu0 %v5756_v50  ;;  %v5825_v50 = vld [vmem:[%s8043_s1 + $0x26c] ss:$48 sps:$4 sm:$0xff]   ;;  %3075 = vmatpush1.bf16.msra.mxu1 %v5820_v48 }
 0x143   : > { %3076 = vmatprep.subr.bf16.mxu1 %v5825_v50  ;;  %v700_v50 = vsub.s32 6, %v7165_v27 }
 0x145   : > { %3013 = vmatpush1.bf16.msra.mxu0 %v5754_v51 }
 0x146   : > { %3023 = vmatprep.subr.bf16.mxu0 %v5759_v52  ;;  %v5823_v52 = vld [vmem:[%s8043_s1 + $0x268] ss:$48 sps:$4 sm:$0xff]  }
 0x147   : > { %3077 = vmatpush1.bf16.msra.mxu1 %v5823_v52 }
 0x148   : > { %3015 = vmatmul.mubr.bf16.vlgmr.msra.gmra.mrb[8].mxu0 %v6381_v6 }
 0x149   : > { %3024 = vmatpush1.bf16.msra.mxu0 %v5757_v53  ;;  %3055 = vmatprep.mubr.bf16.mxu0 %v6464_v34  ;;  %v5828_v53 = vld [vmem:[%s8043_s1 + $0x2cc] ss:$48 sps:$4 sm:$0xff]  }
 0x14a   : > { %3025 = vmatprep.subr.bf16.mxu0 %v5762_v54  ;;  %v5826_v54 = vld [vmem:[%s8043_s1 + $0x2c8] ss:$48 sps:$4 sm:$0xff]   ;;  %3078 = vmatprep.subr.bf16.mxu1 %v5828_v53 }
 0x14b   : > { %3079 = vmatpush1.bf16.msra.mxu1 %v5826_v54  ;;  %v5886_v53 = vld [vmem:[%s8043_s1 + $0xa48] ss:$48 sps:$4 sm:$0xff]  }
 0x14d   : > { %3026 = vmatpush1.bf16.msra.mxu0 %v5760_v55  ;;  %v5831_v55 = vld [vmem:[%s8043_s1 + $0x32c] ss:$48 sps:$4 sm:$0xff]  }
 0x14e   : > { %3027 = vmatprep.subr.bf16.mxu0 %v5765_v56  ;;  %v5829_v56 = vld [vmem:[%s8043_s1 + $0x328] ss:$48 sps:$4 sm:$0xff]   ;;  %3080 = vmatprep.subr.bf16.mxu1 %v5831_v55 }
 0x14f   : > { %3081 = vmatpush1.bf16.msra.mxu1 %v5829_v56 }
 0x151   : > { %3028 = vmatpush1.bf16.msra.mxu0 %v5763_v57  ;;  %v5834_v57 = vld [vmem:[%s8043_s1 + $0x38c] ss:$48 sps:$4 sm:$0xff]  }
 0x152   : > { %3029 = vmatprep.subr.bf16.mxu0 %v5768_v58  ;;  %v5832_v58 = vld [vmem:[%s8043_s1 + $0x388] ss:$48 sps:$4 sm:$0xff]   ;;  %3082 = vmatprep.subr.bf16.mxu1 %v5834_v57 }
 0x153   : > { %3083 = vmatpush1.bf16.msra.mxu1 %v5832_v58  ;;  %v5891_v58 = vld [vmem:[%s8043_s1 + $0xaac] ss:$48 sps:$4 sm:$0xff]  }
 0x155   : > { %3030 = vmatpush1.bf16.msra.mxu0 %v5766_v59  ;;  %v5837_v59 = vld [vmem:[%s8043_s1 + $0x3ec] ss:$48 sps:$4 sm:$0xff]  }
 0x156   : > { %3031 = vmatprep.subr.bf16.mxu0 %v5771_v60  ;;  %v5835_v60 = vld [vmem:[%s8043_s1 + $0x3e8] ss:$48 sps:$4 sm:$0xff]   ;;  %3084 = vmatprep.subr.bf16.mxu1 %v5837_v59 }
 0x157   : > { %3085 = vmatpush1.bf16.msra.mxu1 %v5835_v60 }
 0x159   : > { %3032 = vmatpush1.bf16.msra.mxu0 %v5769_v61  ;;  %v5840_v61 = vld [vmem:[%s8043_s1 + $0x44c] ss:$48 sps:$4 sm:$0xff]  }
 0x15a   : > { %3033 = vmatprep.subr.bf16.mxu0 %v5774_v62  ;;  %v5838_v62 = vld [vmem:[%s8043_s1 + $0x448] ss:$48 sps:$4 sm:$0xff]   ;;  %3086 = vmatprep.subr.bf16.mxu1 %v5840_v61 }
 0x15b   : > { %v7112_v1 = vpop.f32.mrb[0].mxu0  ;;  %v7114_v2 = vpop.f32.mrb[0].mxu1  ;;  %3087 = vmatpush1.bf16.msra.mxu1 %v5838_v62  ;;  %v7383_v62 = vsub.s32 2, %v7165_v27 }
 0x15c   : > { %v7116_v3 = vpop.f32.mrb[1].mxu0  ;;  %v7118_v4 = vpop.f32.mrb[1].mxu1 }
 0x15d   : > { %v2733_v5 = vpop.f32.mrb[2].mxu0  ;;  %v2815_v7 = vpop.f32.mrb[2].mxu1  ;;  %3034 = vmatpush1.bf16.msra.mxu0 %v5772_v63  ;;  %v5281_v43 = vadd.f32 %v7116_v3, %v681_v38  ;;  %v5843_v63 = vld [vmem:[%s8043_s1 + $0x4ac] ss:$48 sps:$4 sm:$0xff]   ;;  %v7359_v38 = vsub.s32 3, %v7165_v27 }
 0x15e   : > { %v2734_v9 = vpop.f32.mrb[3].mxu0  ;;  %v2816_v10 = vpop.f32.mrb[3].mxu1  ;;  %3035 = vmatprep.subr.bf16.mxu0 %v5777_v0  ;;  %v5841_v0 = vld [vmem:[%s8043_s1 + $0x4a8] ss:$48 sps:$4 sm:$0xff]   ;;  %3088 = vmatprep.subr.bf16.mxu1 %v5843_v63  ;;  %v5846_v3 = vld [vmem:[%s8043_s1 + $0x50c] ss:$48 sps:$4 sm:$0xff]  }
 0x15f   : > { %v3147_v47 = vmul.f32 0.0625, %v5281_v43  ;;  %3089 = vmatpush1.bf16.msra.mxu1 %v5841_v0  ;;  %v5844_v5 = vld [vmem:[%s8043_s1 + $0x508] ss:$48 sps:$4 sm:$0xff]   ;;  %v5849_v7 = vld [vmem:[%s8043_s1 + $0x56c] ss:$48 sps:$4 sm:$0xff]  }
 0x160   : > { %3090 = vmatprep.subr.bf16.mxu1 %v5846_v3  ;;  %v5852_v9 = vld [vmem:[%s8043_s1 + $0x5cc] ss:$48 sps:$4 sm:$0xff]   ;;  %v5850_v10 = vld [vmem:[%s8043_s1 + $0x5c8] ss:$48 sps:$4 sm:$0xff]  }
 0x161   : > { %3036 = vmatpush1.bf16.msra.mxu0 %v5775_v8  ;;  %v3149_v51 = vpack.c.bf16 %v3147_v47, %v3147_v47  ;;  %v5847_v8 = vld [vmem:[%s8043_s1 + $0x568] ss:$48 sps:$4 sm:$0xff]   ;;  %v5888_v43 = vld [vmem:[%s8043_s1 + $0xa4c] ss:$48 sps:$4 sm:$0xff]   ;;  %v689_v47 = vrot.slane %v7185_v32, %v7359_v38 }
 0x162   : > { %3037 = vmatprep.subr.bf16.mxu0 %v5780_v11  ;;  %v5855_v11 = vld [vmem:[%s8043_s1 + $0x62c] ss:$48 sps:$4 sm:$0xff]  }
 0x163   : > { %3091 = vmatpush1.bf16.msra.mxu1 %v5844_v5  ;;  %v5283_v0 = vadd.f32 %v7118_v4, %v689_v47  ;;  %v701_v5 = vrot.slane %v7185_v32, %v700_v50  ;;  %v685_v4 = vrot.slane %v7185_v32, %v7383_v62 }
 0x164   : > { %3092 = vmatprep.subr.bf16.mxu1 %v5849_v7  ;;  %v5889_v7 = vld [vmem:[%s8043_s1 + $0xaa8] ss:$48 sps:$4 sm:$0xff]  }
 0x165   : > { %3038 = vmatpush1.bf16.msra.mxu0 %v5778_v13  ;;  %v5853_v13 = vld [vmem:[%s8043_s1 + $0x628] ss:$48 sps:$4 sm:$0xff]  }
 0x166   : > { %3039 = vmatprep.subr.bf16.mxu0 %v5783_v14  ;;  %v5858_v14 = vld [vmem:[%s8043_s1 + $0x68c] ss:$48 sps:$4 sm:$0xff]  }
 0x167   : > { %3093 = vmatpush1.bf16.msra.mxu1 %v5847_v8 }
 0x168   : > { %3094 = vmatprep.subr.bf16.mxu1 %v5852_v9  ;;  %v3325_v9 = vmul.f32 0.0625, %v5283_v0  ;;  %v6113_v0 = vmov 0  }
 0x169   : > { %3040 = vmatpush1.bf16.msra.mxu0 %v5781_v15  ;;  %v5856_v15 = vld [vmem:[%s8043_s1 + $0x688] ss:$48 sps:$4 sm:$0xff]  }
 0x16a   : > { %3041 = vmatprep.subr.bf16.mxu0 %v5786_v16  ;;  %v5861_v16 = vld [vmem:[%s8043_s1 + $0x6ec] ss:$48 sps:$4 sm:$0xff]  }
 0x16b   : > { %3095 = vmatpush1.bf16.msra.mxu1 %v5850_v10 }
 0x16c   : > { %3105 = vmatprep.subr.bf16.mxu1 %v5855_v11  ;;  %v5892_v11 = vld [vmem:[%s8043_s1 + $0xb08] ss:$48 sps:$4 sm:$0xff]  }
 0x16d   : > { %3042 = vmatpush1.bf16.msra.mxu0 %v5784_v17  ;;  %v5859_v17 = vld [vmem:[%s8043_s1 + $0x6e8] ss:$48 sps:$4 sm:$0xff]  }
 0x16e   : > { %3043 = vmatprep.subr.bf16.mxu0 %v5789_v18  ;;  %3097 = vmatmul.mubr.bf16.vlgmr.msra.gmra.mrb[8].mxu1 %v6381_v6  ;;  %v5864_v6 = vld [vmem:[%s8043_s1 + $0x74c] ss:$48 sps:$4 sm:$0xff]  }
 0x16f   : > { %3106 = vmatpush1.bf16.msra.mxu1 %v5853_v13  ;;  %3137 = vmatprep.mubr.bf16.mxu1 %v6464_v34  ;;  %v5862_v34 = vld [vmem:[%s8043_s1 + $0x748] ss:$48 sps:$4 sm:$0xff]   ;;  %v5867_v18 = vld [vmem:[%s8043_s1 + $0x7ac] ss:$48 sps:$4 sm:$0xff]  }
 0x170   : > { %3107 = vmatprep.subr.bf16.mxu1 %v5858_v14  ;;  %v5897_v13 = vld [vmem:[%s8043_s1 + $0xb6c] ss:$48 sps:$4 sm:$0xff]  }
 0x171   : > { %3044 = vmatpush1.bf16.msra.mxu0 %v5787_v19  ;;  %v5865_v19 = vld [vmem:[%s8043_s1 + $0x7a8] ss:$48 sps:$4 sm:$0xff]  }
 0x172   : > { %3045 = vmatprep.subr.bf16.mxu0 %v5792_v20  ;;  %v5870_v20 = vld [vmem:[%s8043_s1 + $0x80c] ss:$48 sps:$4 sm:$0xff]  }
 0x173   : > { %3108 = vmatpush1.bf16.msra.mxu1 %v5856_v15  ;;  %v5282_v15 = vadd.f32 %v7114_v2, %v685_v4  ;;  %v5898_v2 = vld [vmem:[%s8043_s1 + $0xbc8] ss:$48 sps:$4 sm:$0xff]   ;;  %v5921_v4 = vld [vmem:[%s8045_s3 + $0x264] ss:$16 sps:$4 sm:$0xff]  }
 0x174   : > { %3109 = vmatprep.subr.bf16.mxu1 %v5861_v16  ;;  %v3327_v16 = vpack.c.bf16 %v3325_v9, %v3325_v9  ;;  %v5919_v9 = vld [vmem:[%s8045_s3 + $0x260] ss:$16 sps:$4 sm:$0xff]  }
 0x175   : > { %3046 = vmatpush1.bf16.msra.mxu0 %v5790_v22  ;;  %v5873_v22 = vld [vmem:[%s8043_s1 + $0x86c] ss:$48 sps:$4 sm:$0xff]  }
 0x176   : > { %3047 = vmatprep.subr.bf16.mxu0 %v5795_v25  ;;  %v5874_v25 = vld [vmem:[%s8043_s1 + $0x8c8] ss:$48 sps:$4 sm:$0xff]  }
 0x177   : > { %3110 = vmatpush1.bf16.msra.mxu1 %v5859_v17 }
 0x178   : > { %3111 = vmatprep.subr.bf16.mxu1 %v5864_v6  ;;  %v5900_v6 = vld [vmem:[%s8043_s1 + $0xbcc] ss:$48 sps:$4 sm:$0xff]  }
 0x179   : > { %3048 = vmatpush1.bf16.msra.mxu0 %v5793_v28  ;;  %v5882_v28 = vld [vmem:[%s8043_s1 + $0x98c] ss:$48 sps:$4 sm:$0xff]  }
 0x17a   : > { %3049 = vmatprep.subr.bf16.mxu0 %v5798_v30  ;;  %v5880_v30 = vld [vmem:[%s8043_s1 + $0x988] ss:$48 sps:$4 sm:$0xff]  }
 0x17b   : > { %3112 = vmatpush1.bf16.msra.mxu1 %v5862_v34  ;;  %v3324_v34 = vmul.f32 0.0625, %v5282_v15  ;;  %v5939_v15 = vld [vmem:[%s8045_s3 + $0x2c4] ss:$16 sps:$4 sm:$0xff]  }
 0x17c   : > { %3113 = vmatprep.subr.bf16.mxu1 %v5867_v18 }
 0x17d   : > { %3050 = vmatpush1.bf16.msra.mxu0 %v5796_v35  ;;  %v704_v35 = vsub.s32 7, %v7165_v27  ;;  %v3326_v18 = vpack.c.bf16 %v3324_v34, %v3324_v34  ;;  %v5949_v34 = vld [vmem:[%s8045_s3 + $0x300] ss:$16 sps:$4 sm:$0xff]  }
 0x17e   : > { %3051 = vmatprep.subr.bf16.mxu0 %v5801_v37  ;;  %v7356_v37 = vsub.s32 0, %v7165_v27 }
 0x17f   : > { %3114 = vmatpush1.bf16.msra.mxu1 %v5865_v19  ;;  %v7415_v19 = vld [vmem:[%s8044_s2 + $0x8] sm:$0xf] }
 0x180   : > { %3115 = vmatprep.subr.bf16.mxu1 %v5870_v20  ;;  %v677_v44 = vrot.slane %v7185_v32, %v7356_v37  ;;  %v709_v20 = vrot.slane %v7415_v19, %v7356_v37 }
 0x181   : > { %3052 = vmatpush1.bf16.msra.mxu0 %v5799_v40  ;;  %v5883_v40 = vld [vmem:[%s8043_s1 + $0x9e8] ss:$48 sps:$4 sm:$0xff]  }
 0x182   : > { %3053 = vmatprep.subr.bf16.mxu0 %v5804_v42  ;;  %v705_v42 = vrot.slane %v7185_v32, %v704_v35  ;;  %v5280_v61 = vadd.f32 %v7112_v1, %v677_v44  ;;  %v5894_v1 = vld [vmem:[%s8043_s1 + $0xb0c] ss:$48 sps:$4 sm:$0xff]   ;;  %v5895_v32 = vld [vmem:[%s8043_s1 + $0xb68] ss:$48 sps:$4 sm:$0xff]  }
 0x183   : > { %3116 = vmatpush1.bf16.msra.mxu1 %v5868_v21  ;;  %v713_v21 = vrot.slane %v7415_v19, %v7180_v31 }
 0x184   : > { %3117 = vmatprep.subr.bf16.mxu1 %v5873_v22  ;;  %v3146_v27 = vmul.f32 0.0625, %v5280_v61 }
 0x185   : > { %3054 = vmatpush1.bf16.msra.mxu0 %v5802_v45 }
 0x186   : > { %v3148_v14 = vpack.c.bf16 %v3146_v27, %v3146_v27  ;;  %v5913_v27 = vld [vmem:[%s8045_s3 + $0x240] ss:$16 sps:$4 sm:$0xff]  }
 0x187   : > { %3118 = vmatpush1.bf16.msra.mxu1 %v5871_v23 }
 0x188   : > { %3056 = vmatmul.mubr.bf16.vlgmr.msra.gmra.mrb[8].mxu0 %v6583_v12  ;;  %3119 = vmatprep.subr.bf16.mxu1 %v5876_v24 }
 0x189   : > { %3186 = vmatprep.mubr.bf16.mxu0 %v3149_v51 }
 0x18b   : > { %3120 = vmatpush1.bf16.msra.mxu1 %v5874_v25 }
 0x18c   : > { %3121 = vmatprep.subr.bf16.mxu1 %v5879_v26 }
 0x18f   : > { %3122 = vmatpush1.bf16.msra.mxu1 %v5877_v49 }
 0x190   : > { %3123 = vmatprep.subr.bf16.mxu1 %v5882_v28 }
 0x193   : > { %3124 = vmatpush1.bf16.msra.mxu1 %v5880_v30 }
 0x194   : > { %3125 = vmatprep.subr.bf16.mxu1 %v5885_v36 }
 0x197   : > { %3126 = vmatpush1.bf16.msra.mxu1 %v5883_v40 }
 0x198   : > { %3127 = vmatprep.subr.bf16.mxu1 %v5888_v43 }
 0x19b   : > { %3128 = vmatpush1.bf16.msra.mxu1 %v5886_v53 }
 0x19c   : > { %3129 = vmatprep.subr.bf16.mxu1 %v5891_v58 }
 0x19f   : > { %3130 = vmatpush1.bf16.msra.mxu1 %v5889_v7  ;;  %v5909_v7 = vld [vmem:[%s8045_s3 + $0x224] ss:$16 sps:$4 sm:$0xff]  }
 0x1a0   : > { %3131 = vmatprep.subr.bf16.mxu1 %v5894_v1  ;;  %v5915_v1 = vld [vmem:[%s8045_s3 + $0x244] ss:$16 sps:$4 sm:$0xff]  }
 0x1a3   : > { %3132 = vmatpush1.bf16.msra.mxu1 %v5892_v11  ;;  %v5925_v11 = vld [vmem:[%s8045_s3 + $0x280] ss:$16 sps:$4 sm:$0xff]  }
 0x1a4   : > { %3133 = vmatprep.subr.bf16.mxu1 %v5897_v13  ;;  %v5933_v13 = vld [vmem:[%s8045_s3 + $0x2a4] ss:$16 sps:$4 sm:$0xff]  }
 0x1a7   : > { %3134 = vmatpush1.bf16.msra.mxu1 %v5895_v32  ;;  %v5943_v32 = vld [vmem:[%s8045_s3 + $0x2e0] ss:$16 sps:$4 sm:$0xff]  }
 0x1a8   : > { %3135 = vmatprep.subr.bf16.mxu1 %v5900_v6  ;;  %v5951_v6 = vld [vmem:[%s8045_s3 + $0x304] ss:$16 sps:$4 sm:$0xff]  }
 0x1ab   : > { %3136 = vmatpush1.bf16.msra.mxu1 %v5898_v2  ;;  %v5957_v2 = vld [vmem:[%s8045_s3 + $0x324] ss:$16 sps:$4 sm:$0xff]  }
 0x1ae   : > { %3138 = vmatmul.mubr.bf16.vlgmr.msra.gmra.mrb[8].mxu1 %v6583_v12 }
 0x1af   : > { %3249 = vmatprep.mubr.bf16.mxu1 %v6113_v0 }
 0x1db   : > { %v2893_v45 = vpop.f32.mrb[4].mxu0  ;;  %v2975_v46 = vpop.f32.mrb[4].mxu1 }
 0x1dc   : > { %v5284_v48 = vadd.f32 %v2893_v45, %v693_v39  ;;  %v2895_v51 = vpop.f32.mrb[5].mxu0  ;;  %v2977_v52 = vpop.f32.mrb[5].mxu1  ;;  %v5286_v10 = vadd.f32 %v2975_v46, %v701_v5  ;;  %v721_v46 = vrot.slane %v7415_v19, %v7359_v38  ;;  %v5903_v5 = vld [vmem:[%s8045_s3 + $0x204] ss:$16 sps:$4 sm:$0xff]  }
 0x1dd   : > { %v5285_v54 = vadd.f32 %v2895_v51, %v697_v41  ;;  %v5287_v55 = vadd.f32 %v2977_v52, %v705_v42  ;;  %v2897_v56 = vpop.f32.mrb[6].mxu0  ;;  %v2979_v57 = vpop.f32.mrb[6].mxu1 }
 0x1de   : > { %v2898_v59 = vpop.f32.mrb[7].mxu0  ;;  %v2980_v60 = vpop.f32.mrb[7].mxu1  ;;  %v3150_v3 = vpack.c.bf16 %v5284_v48, %v5284_v48  ;;  %v3328_v17 = vpack.c.bf16 %v5286_v10, %v5286_v10  ;;  %v5927_v10 = vld [vmem:[%s8045_s3 + $0x284] ss:$16 sps:$4 sm:$0xff]  }
 0x1df   : > { %v3151_v63 = vpack.c.bf16 %v5285_v54, %v5285_v54  ;;  %v3329_v8 = vpack.c.bf16 %v5287_v55, %v5287_v55 }
 0x1e1   : > { %3154 = vmatprep.subr.bf16.mxu0 %v3151_v63 }
 0x1e2   : > { %3155 = vmatpush1.bf16.xpose.msra.mxu0 %v3150_v3  ;;  %v5901_v3 = vld [vmem:[%s8045_s3 + $0x200] ss:$16 sps:$4 sm:$0xff]  }
 0x1e3   : > { %3332 = vmatprep.subr.bf16.mxu0 %v3329_v8  ;;  %v5907_v8 = vld [vmem:[%s8045_s3 + $0x220] ss:$16 sps:$4 sm:$0xff]  }
 0x1e9   : > { %3187 = vmatmul.mubr.bf16.vlgmr.msra.gmra.mrb[12].mxu0 %v3148_v14  ;;  %v5931_v14 = vld [vmem:[%s8045_s3 + $0x2a0] ss:$16 sps:$4 sm:$0xff]  }
 0x1ea   : > { %3333 = vmatpush1.bf16.xpose.msra.mxu0 %v3328_v17  ;;  %3364 = vmatprep.mubr.bf16.mxu0 %v3327_v16  ;;  %v5937_v16 = vld [vmem:[%s8045_s3 + $0x2c0] ss:$16 sps:$4 sm:$0xff]   ;;  %v5945_v17 = vld [vmem:[%s8045_s3 + $0x2e4] ss:$16 sps:$4 sm:$0xff]  }
 0x1eb   : > { %3820 = vmatprep.subr.bf16.mxu0 %v5903_v5  ;;  %v5970_v5 = vld [vmem:[%s8045_s3 + $0x368] ss:$16 sps:$4 sm:$0xff]  }
 0x1f1   : > { %3365 = vmatmul.mubr.bf16.vlgmr.msra.gmra.mrb[16].mxu0 %v3326_v18  ;;  %v5955_v18 = vld [vmem:[%s8045_s3 + $0x320] ss:$16 sps:$4 sm:$0xff]  }
 0x1f2   : > { %3821 = vmatpush1.bf16.msra.mxu0 %v5901_v3  ;;  %v5972_v3 = vld [vmem:[%s8045_s3 + $0x36c] ss:$16 sps:$4 sm:$0xff]  }
 0x1f3   : > { %3822 = vmatprep.subr.bf16.mxu0 %v5909_v7  ;;  %v5978_v7 = vld [vmem:[%s8045_s3 + $0x38c] ss:$16 sps:$4 sm:$0xff]  }
 0x1f6   : > { %3823 = vmatpush1.bf16.msra.mxu0 %v5907_v8  ;;  %v5976_v8 = vld [vmem:[%s8045_s3 + $0x388] ss:$16 sps:$4 sm:$0xff]  }
 0x1f7   : > { %3824 = vmatprep.subr.bf16.mxu0 %v5915_v1  ;;  %v5981_v1 = vld [vmem:[%s8045_s3 + $0x3a4] ss:$16 sps:$4 sm:$0xff]  }
 0x1fa   : > { %3825 = vmatpush1.bf16.msra.mxu0 %v5913_v27  ;;  %v5984_v27 = vld [vmem:[%s8045_s3 + $0x3ac] ss:$16 sps:$4 sm:$0xff]  }
 0x1fb   : > { %3826 = vmatprep.subr.bf16.mxu0 %v5921_v4  ;;  %v5979_v4 = vld [vmem:[%s8045_s3 + $0x3a0] ss:$16 sps:$4 sm:$0xff]  }
 0x1fe   : > { %3827 = vmatpush1.bf16.msra.mxu0 %v5919_v9  ;;  %v5982_v9 = vld [vmem:[%s8045_s3 + $0x3a8] ss:$16 sps:$4 sm:$0xff]  }
 0x1ff   : > { %3828 = vmatprep.subr.bf16.mxu0 %v5927_v10  ;;  %v5985_v10 = vld [vmem:[%s8045_s3 + $0x3c0] ss:$16 sps:$4 sm:$0xff]  }
 0x202   : > { %3829 = vmatpush1.bf16.msra.mxu0 %v5925_v11  ;;  %v5987_v11 = vld [vmem:[%s8045_s3 + $0x3c4] ss:$16 sps:$4 sm:$0xff]  }
 0x203   : > { %3830 = vmatprep.subr.bf16.mxu0 %v5933_v13  ;;  %v5988_v13 = vld [vmem:[%s8045_s3 + $0x3c8] ss:$16 sps:$4 sm:$0xff]  }
 0x206   : > { %3831 = vmatpush1.bf16.msra.mxu0 %v5931_v14  ;;  %v5990_v14 = vld [vmem:[%s8045_s3 + $0x3cc] ss:$16 sps:$4 sm:$0xff]  }
 0x207   : > { %3832 = vmatprep.subr.bf16.mxu0 %v5939_v15  ;;  %v5993_v15 = vld [vmem:[%s8045_s3 + $0x3e4] ss:$16 sps:$4 sm:$0xff]  }
 0x20a   : > { %3833 = vmatpush1.bf16.msra.mxu0 %v5937_v16  ;;  %v5996_v16 = vld [vmem:[%s8045_s3 + $0x3ec] ss:$16 sps:$4 sm:$0xff]  }
 0x20b   : > { %3834 = vmatprep.subr.bf16.mxu0 %v5945_v17  ;;  %v5991_v17 = vld [vmem:[%s8045_s3 + $0x3e0] ss:$16 sps:$4 sm:$0xff]  }
 0x20e   : > { %3835 = vmatpush1.bf16.msra.mxu0 %v5943_v32  ;;  %v5994_v32 = vld [vmem:[%s8045_s3 + $0x3e8] ss:$16 sps:$4 sm:$0xff]  }
 0x20f   : > { %3836 = vmatprep.subr.bf16.mxu0 %v5951_v6  ;;  %v5999_v6 = vld [vmem:[%s8045_s3 + $0x4] ss:$16 sps:$4 sm:$0xff]  }
 0x212   : > { %3837 = vmatpush1.bf16.msra.mxu0 %v5949_v34  ;;  %v6002_v34 = vld [vmem:[%s8045_s3 + $0xc] ss:$16 sps:$4 sm:$0xff]  }
 0x213   : > { %3838 = vmatprep.subr.bf16.mxu0 %v5957_v2 }
 0x216   : > { %3839 = vmatpush1.bf16.msra.mxu0 %v5955_v18 }
 0x25b   : > { %v3057_v22 = vpop.f32.mrb[8].mxu0 }
 0x25c   : > { %v5288_v23 = vadd.f32 %v3057_v22, %v709_v20  ;;  %v3059_v24 = vpop.f32.mrb[9].mxu0  ;;  %v5963_v20 = vld [vmem:[%s8045_s3 + $0x344] ss:$16 sps:$4 sm:$0xff]  }
 0x25d   : > { %v5289_v25 = vadd.f32 %v3059_v24, %v713_v21  ;;  %v3061_v26 = vpop.f32.mrb[10].mxu0  ;;  %v5961_v21 = vld [vmem:[%s8045_s3 + $0x340] ss:$16 sps:$4 sm:$0xff]   ;;  %3840 = vmatprep.subr.bf16.mxu0 %v5963_v20  ;;  %v5969_v22 = vld [vmem:[%s8045_s3 + $0x364] ss:$16 sps:$4 sm:$0xff]  }
 0x25e   : > { %v3152_v49 = vpack.c.bf16 %v5288_v23, %v5288_v23  ;;  %v3062_v28 = vpop.f32.mrb[11].mxu0  ;;  %3841 = vmatpush1.bf16.msra.mxu0 %v5961_v21  ;;  %v5967_v23 = vld [vmem:[%s8045_s3 + $0x360] ss:$16 sps:$4 sm:$0xff]   ;;  %v5975_v24 = vld [vmem:[%s8045_s3 + $0x384] ss:$16 sps:$4 sm:$0xff]  }
 0x25f   : > { %v3153_v12 = vpack.c.bf16 %v5289_v25, %v5289_v25  ;;  %3842 = vmatprep.subr.bf16.mxu0 %v5969_v22  ;;  %v5973_v25 = vld [vmem:[%s8045_s3 + $0x380] ss:$16 sps:$4 sm:$0xff]  }
 0x260   : > { %v3212_v29 = vsel %vm3210_vm0, %v3152_v49, 0  ;;  %v717_v49 = vrot.slane %v7415_v19, %v7383_v62 }
 0x261   : > { %5010 = vmatprep.subr.msk.bf16.mxu1 %vm3210_vm0, %v3153_v12 }
 0x262   : > { %3218 = vmatpush1.bf16.msra.mxu1 %v3212_v29  ;;  %3843 = vmatpush1.bf16.msra.mxu0 %v5967_v23 }
 0x263   : > { %3844 = vmatprep.subr.bf16.mxu0 %v5975_v24 }
 0x266   : > { %3845 = vmatpush1.bf16.msra.mxu0 %v5973_v25 }
 0x267   : > { %3846 = vmatprep.subr.bf16.mxu0 %v5981_v1  ;;  %v6056_v1 = vld [vmem:[%s8045_s3 + $0x12c] ss:$16 sps:$4 sm:$0xff]  }
 0x26a   : > { %3847 = vmatpush1.bf16.msra.mxu0 %v5979_v4  ;;  %v6054_v4 = vld [vmem:[%s8045_s3 + $0x128] ss:$16 sps:$4 sm:$0xff]  }
 0x26b   : > { %3848 = vmatprep.subr.bf16.mxu0 %v5987_v11  ;;  %v6057_v11 = vld [vmem:[%s8045_s3 + $0x140] ss:$16 sps:$4 sm:$0xff]  }
 0x26e   : > { %3849 = vmatpush1.bf16.msra.mxu0 %v5985_v10  ;;  %v6062_v10 = vld [vmem:[%s8045_s3 + $0x14c] ss:$16 sps:$4 sm:$0xff]  }
 0x26f   : > { %3850 = vmatprep.subr.bf16.mxu0 %v5993_v15  ;;  %v6068_v15 = vld [vmem:[%s8045_s3 + $0x16c] ss:$16 sps:$4 sm:$0xff]  }
 0x272   : > { %3851 = vmatpush1.bf16.msra.mxu0 %v5991_v17  ;;  %v6066_v17 = vld [vmem:[%s8045_s3 + $0x168] ss:$16 sps:$4 sm:$0xff]  }
 0x273   : > { %4222 = vmatprep.subr.bf16.mxu0 %v5999_v6  ;;  %v6074_v6 = vld [vmem:[%s8045_s3 + $0x18c] ss:$16 sps:$4 sm:$0xff]  }
 0x281   : > { %v7425_v45 = vpop.f32.mrb[8].mxu1 }
 0x282   : > { %v3141_v47 = vpop.f32.mrb[9].mxu1  ;;  %v5290_v28 = vadd.f32 %v7425_v45, %v717_v49  ;;  %v5918_v45 = vld [vmem:[%s8045_s3 + $0x24c] ss:$16 sps:$4 sm:$0xff]   ;;  %v6000_v49 = vld [vmem:[%s8045_s3 + $0x8] ss:$16 sps:$4 sm:$0xff]  }
 0x283   : > { %v5291_v48 = vadd.f32 %v3141_v47, %v721_v46  ;;  %v3143_v50 = vpop.f32.mrb[10].mxu1  ;;  %v5916_v46 = vld [vmem:[%s8045_s3 + $0x248] ss:$16 sps:$4 sm:$0xff]   ;;  %v5924_v47 = vld [vmem:[%s8045_s3 + $0x26c] ss:$16 sps:$4 sm:$0xff]  }
 0x284   : > { %v3144_v51 = vpop.f32.mrb[11].mxu1  ;;  %v5930_v50 = vld [vmem:[%s8045_s3 + $0x28c] ss:$16 sps:$4 sm:$0xff]  }
 0x285   : > { %v3331_v52 = vpack.c.bf16 %v5291_v48, %v5291_v48  ;;  %v5922_v48 = vld [vmem:[%s8045_s3 + $0x268] ss:$16 sps:$4 sm:$0xff]  }
 0x286   : > { %v5928_v51 = vld [vmem:[%s8045_s3 + $0x288] ss:$16 sps:$4 sm:$0xff]  }
 0x287   : > { %5012 = vmatprep.subr.msk.bf16.mxu1 %vm3210_vm0, %v3331_v52  ;;  %v5936_v52 = vld [vmem:[%s8045_s3 + $0x2ac] ss:$16 sps:$4 sm:$0xff]  }
 0x2bc   : > { %v3188_v30 = vpop.f32.mrb[12].mxu0 }
 0x2bd   : > { %v3190_v33 = vpop.f32.mrb[13].mxu0  ;;  %v3195_v35 = vsel %vm3194_vm1, %v3188_v30, -inf }
 0x2be   : > { %3196 = vmax.xlane.f32.xlu0 %v3195_v35  ;;  %v3191_v36 = vpop.f32.mrb[14].mxu0 }
 0x2bf   : > { %v3192_v39 = vpop.f32.mrb[15].mxu0  ;;  %v5906_v36 = vld [vmem:[%s8045_s3 + $0x20c] ss:$16 sps:$4 sm:$0xff]  }
 0x2c4   : > { %v3366_v40 = vpop.f32.mrb[16].mxu0 }
 0x2c5   : > { %v3368_v41 = vpop.f32.mrb[17].mxu0  ;;  %v3372_v42 = vsel %vm3194_vm1, %v3366_v40, -inf }
 0x2c6   : > { %3373 = vmax.xlane.f32.xlu0 %v3372_v42  ;;  %v3369_v43 = vpop.f32.mrb[18].mxu0  ;;  %v5904_v41 = vld [vmem:[%s8045_s3 + $0x208] ss:$16 sps:$4 sm:$0xff]  }
 0x2c7   : > { %v3370_v44 = vpop.f32.mrb[19].mxu0  ;;  %v5912_v43 = vld [vmem:[%s8045_s3 + $0x22c] ss:$16 sps:$4 sm:$0xff]  }
 0x2c8   : > { %v5910_v44 = vld [vmem:[%s8045_s3 + $0x228] ss:$16 sps:$4 sm:$0xff]  }
 0x34b   : > { %v3197_v53 = vpop.xlane.xlu0 %3196 }
 0x34c   : > { %v3198_v54 = vsub.f32 %v3188_v30, %v3197_v53  ;;  %v3330_v30 = vpack.c.bf16 %v5290_v28, %v5290_v28  ;;  %v5934_v53 = vld [vmem:[%s8045_s3 + $0x2a8] ss:$16 sps:$4 sm:$0xff]  }
 0x34e   : > { %v3199_v55 = vmul.f32 1.442695, %v3198_v54  ;;  %v3388_v39 = vsel %vm3210_vm0, %v3330_v30, 0  ;;  %v5942_v54 = vld [vmem:[%s8045_s3 + $0x2cc] ss:$16 sps:$4 sm:$0xff]  }
 0x34f   : > { %v6008_v30 = vld [vmem:[%s8045_s3 + $0x2c] ss:$16 sps:$4 sm:$0xff]  }
 0x350   : > { %6093 = vpow2.f32 %v3199_v55  ;;  %v5940_v55 = vld [vmem:[%s8045_s3 + $0x2c8] ss:$16 sps:$4 sm:$0xff]  }
 0x353   : > { %v3374_v56 = vpop.xlane.xlu0 %3373 }
 0x354   : > { %v3375_v57 = vsub.f32 %v3366_v40, %v3374_v56  ;;  %v5948_v56 = vld [vmem:[%s8045_s3 + $0x2ec] ss:$16 sps:$4 sm:$0xff]  }
 0x356   : > { %v3376_v58 = vmul.f32 1.442695, %v3375_v57  ;;  %v5946_v57 = vld [vmem:[%s8045_s3 + $0x2e8] ss:$16 sps:$4 sm:$0xff]  }
 0x358   : > { %6095 = vpow2.f32 %v3376_v58  ;;  %v5954_v58 = vld [vmem:[%s8045_s3 + $0x30c] ss:$16 sps:$4 sm:$0xff]  }
 0x35a   : > { %v7430_v59 = vpop.eup %6093 }
 0x35b   : > { %v3201_v60 = vsel %vm3194_vm1, %v7430_v59, 0.0 }
 0x35c   : > { %3202 = vadd.xlane.f32.xlu1 %v3201_v60  ;;  %v5960_v60 = vld [vmem:[%s8045_s3 + $0x32c] ss:$16 sps:$4 sm:$0xff]  }
 0x362   : > { %v7434_v61 = vpop.eup %6095 }
 0x363   : > { %v3378_v63 = vsel %vm3194_vm1, %v7434_v61, 0.0 }
 0x364   : > { %3379 = vadd.xlane.f32.xlu1 %v3378_v63  ;;  %v5966_v63 = vld [vmem:[%s8045_s3 + $0x34c] ss:$16 sps:$4 sm:$0xff]  }
 0x3e9   : > { %v3203_v26 = vpop.xlane.xlu1 %3202 }
 0x3ea   : > { %6097 = vrcp.f32 %v3203_v26  ;;  %v5997_v26 = vld [vmem:[%s8045_s3] ss:$16 sps:$4 sm:$0xff]  }
 0x3f1   : > { %v3380_v12 = vpop.xlane.xlu1 %3379 }
 0x3f2   : > { %6099 = vrcp.f32 %v3380_v12 }
 0x3f4   : > { %v6098_v29 = vpop.eup %6097 }
 0x3f5   : > { %v3205_v33 = vmul.f32 %v6098_v29, %v7430_v59  ;;  %v5952_v59 = vld [vmem:[%s8045_s3 + $0x308] ss:$16 sps:$4 sm:$0xff]   ;;  %v6005_v29 = vld [vmem:[%s8045_s3 + $0x24] ss:$16 sps:$4 sm:$0xff]  }
 0x3f7   : > { %v3206_v35 = vpack.c.bf16 %v3205_v33, %v3205_v33 }
 0x3f9   : > { %5011 = vmatmul.mubr.msk.bf16.vlgmr.msra.gmra.mrb[12].mxu1 %vm3194_vm1, %v3206_v35  ;;  %v6003_v35 = vld [vmem:[%s8045_s3 + $0x20] ss:$16 sps:$4 sm:$0xff]  }
 0x3fa   : > { %3394 = vmatpush1.bf16.msra.mxu1 %v3388_v39  ;;  %3425 = vmatprep.mubr.bf16.mxu1 %v6113_v0  ;;  %v5964_v0 = vld [vmem:[%s8045_s3 + $0x348] ss:$16 sps:$4 sm:$0xff]   ;;  %v6011_v39 = vld [vmem:[%s8045_s3 + $0x44] ss:$16 sps:$4 sm:$0xff]  }
 0x3fb   : > { %3861 = vmatprep.subr.bf16.mxu1 %v5906_v36  ;;  %v6006_v36 = vld [vmem:[%s8045_s3 + $0x28] ss:$16 sps:$4 sm:$0xff]  }
 0x3fc   : > { %v6100_v19 = vpop.eup %6099 }
 0x3fd   : > { %v3382_v40 = vmul.f32 %v6100_v19, %v7434_v61  ;;  %v5958_v61 = vld [vmem:[%s8045_s3 + $0x328] ss:$16 sps:$4 sm:$0xff]   ;;  %v6014_v19 = vld [vmem:[%s8045_s3 + $0x4c] ss:$16 sps:$4 sm:$0xff]  }
 0x3ff   : > { %v3383_v42 = vpack.c.bf16 %v3382_v40, %v3382_v40  ;;  %v6009_v40 = vld [vmem:[%s8045_s3 + $0x40] ss:$16 sps:$4 sm:$0xff]  }
 0x401   : > { %5013 = vmatmul.mubr.msk.bf16.vlgmr.msra.gmra.mrb[16].mxu1 %vm3194_vm1, %v3383_v42  ;;  %v6017_v42 = vld [vmem:[%s8045_s3 + $0x64] ss:$16 sps:$4 sm:$0xff]  }
 0x402   : > { %3862 = vmatpush1.bf16.msra.mxu1 %v5904_v41  ;;  %v6012_v41 = vld [vmem:[%s8045_s3 + $0x48] ss:$16 sps:$4 sm:$0xff]  }
 0x403   : > { %3863 = vmatprep.subr.bf16.mxu1 %v5912_v43  ;;  %v6020_v43 = vld [vmem:[%s8045_s3 + $0x6c] ss:$16 sps:$4 sm:$0xff]  }
 0x406   : > { %3864 = vmatpush1.bf16.msra.mxu1 %v5910_v44  ;;  %v6015_v44 = vld [vmem:[%s8045_s3 + $0x60] ss:$16 sps:$4 sm:$0xff]  }
 0x407   : > { %3865 = vmatprep.subr.bf16.mxu1 %v5918_v45  ;;  %v6018_v45 = vld [vmem:[%s8045_s3 + $0x68] ss:$16 sps:$4 sm:$0xff]  }
 0x40a   : > { %3866 = vmatpush1.bf16.msra.mxu1 %v5916_v46  ;;  %v6023_v46 = vld [vmem:[%s8045_s3 + $0x84] ss:$16 sps:$4 sm:$0xff]  }
 0x40b   : > { %3867 = vmatprep.subr.bf16.mxu1 %v5924_v47  ;;  %v6026_v47 = vld [vmem:[%s8045_s3 + $0x8c] ss:$16 sps:$4 sm:$0xff]  }
 0x40e   : > { %3868 = vmatpush1.bf16.msra.mxu1 %v5922_v48  ;;  %v6021_v48 = vld [vmem:[%s8045_s3 + $0x80] ss:$16 sps:$4 sm:$0xff]  }
 0x40f   : > { %3869 = vmatprep.subr.bf16.mxu1 %v5930_v50  ;;  %v6024_v50 = vld [vmem:[%s8045_s3 + $0x88] ss:$16 sps:$4 sm:$0xff]  }
 0x412   : > { %3870 = vmatpush1.bf16.msra.mxu1 %v5928_v51  ;;  %v6029_v51 = vld [vmem:[%s8045_s3 + $0xa4] ss:$16 sps:$4 sm:$0xff]  }
 0x413   : > { %3871 = vmatprep.subr.bf16.mxu1 %v5936_v52  ;;  %v6032_v52 = vld [vmem:[%s8045_s3 + $0xac] ss:$16 sps:$4 sm:$0xff]  }
 0x416   : > { %3872 = vmatpush1.bf16.msra.mxu1 %v5934_v53  ;;  %v6027_v53 = vld [vmem:[%s8045_s3 + $0xa0] ss:$16 sps:$4 sm:$0xff]  }
 0x417   : > { %3873 = vmatprep.subr.bf16.mxu1 %v5942_v54  ;;  %v6030_v54 = vld [vmem:[%s8045_s3 + $0xa8] ss:$16 sps:$4 sm:$0xff]  }
 0x41a   : > { %3874 = vmatpush1.bf16.msra.mxu1 %v5940_v55  ;;  %v6035_v55 = vld [vmem:[%s8045_s3 + $0xc4] ss:$16 sps:$4 sm:$0xff]  }
 0x41b   : > { %3875 = vmatprep.subr.bf16.mxu1 %v5948_v56  ;;  %v6038_v56 = vld [vmem:[%s8045_s3 + $0xcc] ss:$16 sps:$4 sm:$0xff]  }
 0x41e   : > { %3876 = vmatpush1.bf16.msra.mxu1 %v5946_v57  ;;  %v6033_v57 = vld [vmem:[%s8045_s3 + $0xc0] ss:$16 sps:$4 sm:$0xff]  }
 0x41f   : > { %3877 = vmatprep.subr.bf16.mxu1 %v5954_v58  ;;  %v6036_v58 = vld [vmem:[%s8045_s3 + $0xc8] ss:$16 sps:$4 sm:$0xff]  }
 0x422   : > { %3878 = vmatpush1.bf16.msra.mxu1 %v5952_v59  ;;  %v6041_v59 = vld [vmem:[%s8045_s3 + $0xe4] ss:$16 sps:$4 sm:$0xff]  }
 0x423   : > { %3879 = vmatprep.subr.bf16.mxu1 %v5960_v60  ;;  %v6044_v60 = vld [vmem:[%s8045_s3 + $0xec] ss:$16 sps:$4 sm:$0xff]  }
 0x426   : > { %3880 = vmatpush1.bf16.msra.mxu1 %v5958_v61  ;;  %v6039_v61 = vld [vmem:[%s8045_s3 + $0xe0] ss:$16 sps:$4 sm:$0xff]  }
 0x427   : > { %3881 = vmatprep.subr.bf16.mxu1 %v5966_v63  ;;  %v6042_v63 = vld [vmem:[%s8045_s3 + $0xe8] ss:$16 sps:$4 sm:$0xff]  }
 0x42a   : > { %3882 = vmatpush1.bf16.msra.mxu1 %v5964_v0  ;;  %v6047_v0 = vld [vmem:[%s8045_s3 + $0x104] ss:$16 sps:$4 sm:$0xff]  }
 0x42b   : > { %3883 = vmatprep.subr.bf16.mxu1 %v5972_v3  ;;  %v6050_v3 = vld [vmem:[%s8045_s3 + $0x10c] ss:$16 sps:$4 sm:$0xff]  }
 0x42e   : > { %3884 = vmatpush1.bf16.msra.mxu1 %v5970_v5  ;;  %v6045_v5 = vld [vmem:[%s8045_s3 + $0x100] ss:$16 sps:$4 sm:$0xff]  }
 0x42f   : > { %3885 = vmatprep.subr.bf16.mxu1 %v5978_v7  ;;  %v6048_v7 = vld [vmem:[%s8045_s3 + $0x108] ss:$16 sps:$4 sm:$0xff]  }
 0x432   : > { %3886 = vmatpush1.bf16.msra.mxu1 %v5976_v8  ;;  %v6053_v8 = vld [vmem:[%s8045_s3 + $0x124] ss:$16 sps:$4 sm:$0xff]  }
 0x433   : > { %3887 = vmatprep.subr.bf16.mxu1 %v5984_v27  ;;  %v6051_v27 = vld [vmem:[%s8045_s3 + $0x120] ss:$16 sps:$4 sm:$0xff]  }
 0x436   : > { %3888 = vmatpush1.bf16.msra.mxu1 %v5982_v9  ;;  %v6059_v9 = vld [vmem:[%s8045_s3 + $0x144] ss:$16 sps:$4 sm:$0xff]  }
 0x437   : > { %3889 = vmatprep.subr.bf16.mxu1 %v5990_v14  ;;  %v6065_v14 = vld [vmem:[%s8045_s3 + $0x164] ss:$16 sps:$4 sm:$0xff]  }
 0x43a   : > { %3890 = vmatpush1.bf16.msra.mxu1 %v5988_v13  ;;  %v6060_v13 = vld [vmem:[%s8045_s3 + $0x148] ss:$16 sps:$4 sm:$0xff]  }
 0x43b   : > { %3891 = vmatprep.subr.bf16.mxu1 %v5996_v16  ;;  %v6063_v16 = vld [vmem:[%s8045_s3 + $0x160] ss:$16 sps:$4 sm:$0xff]  }
 0x43e   : > { %3892 = vmatpush1.bf16.msra.mxu1 %v5994_v32  ;;  %v6071_v32 = vld [vmem:[%s8045_s3 + $0x184] ss:$16 sps:$4 sm:$0xff]  }
 0x43f   : > { %4263 = vmatprep.subr.bf16.mxu1 %v6002_v34  ;;  %v6069_v34 = vld [vmem:[%s8045_s3 + $0x180] ss:$16 sps:$4 sm:$0xff]  }
 0x4cc   : > { %v7646_v2 = vpop.f32.mrb[12].mxu1 }
 0x4cd   : > { %v3253_v18 = vpop.f32.mrb[13].mxu1 }
 0x4ce   : > { %v3255_v20 = vpop.f32.mrb[14].mxu1  ;;  %v3259_v33 = vpack.c.bf16 %v3253_v18, %v3253_v18  ;;  %v6072_v18 = vld [vmem:[%s8045_s3 + $0x188] ss:$16 sps:$4 sm:$0xff]  }
 0x4cf   : > { %v3256_v21 = vpop.f32.mrb[15].mxu1  ;;  %v6077_v20 = vld [vmem:[%s8045_s3 + $0x1a4] ss:$16 sps:$4 sm:$0xff]  }
 0x4d0   : > { %v6080_v21 = vld [vmem:[%s8045_s3 + $0x1ac] ss:$16 sps:$4 sm:$0xff]  }
 0x4d4   : > { %v3427_v22 = vpop.f32.mrb[16].mxu1 }
 0x4d5   : > { %v3429_v23 = vpop.f32.mrb[17].mxu1  ;;  %v3434_v28 = vpack.c.bf16 %v3427_v22, %v3427_v22  ;;  %v6075_v22 = vld [vmem:[%s8045_s3 + $0x1a0] ss:$16 sps:$4 sm:$0xff]  }
 0x4d6   : > { %v3435_v24 = vpack.c.bf16 %v3429_v23, %v3429_v23  ;;  %v3431_v25 = vpop.f32.mrb[18].mxu1  ;;  %v6078_v23 = vld [vmem:[%s8045_s3 + $0x1a8] ss:$16 sps:$4 sm:$0xff]  }
 0x4d7   : > { %v3432_v12 = vpop.f32.mrb[19].mxu1  ;;  %v6086_v25 = vld [vmem:[%s8045_s3 + $0x1cc] ss:$16 sps:$4 sm:$0xff]  }
 0x4d8   : > { %3852 = vmatprep.mubr.bf16.mxu0 %v3435_v24  ;;  %3893 = vmatprep.mubr.bf16.mxu1 %v3435_v24  ;;  %v6083_v24 = vld [vmem:[%s8045_s3 + $0x1c4] ss:$16 sps:$4 sm:$0xff]   ;;  %v6092_v12 = vld [vmem:[%s8045_s3 + $0x1ec] ss:$16 sps:$4 sm:$0xff]  }
 0x4d9   : > { %3853 = vmatmul.mubr.bf16.vlgmr.msra.gmra.mrb[20].mxu0 %v3434_v28  ;;  %3894 = vmatmul.mubr.bf16.vlgmr.msra.gmra.mrb[20].mxu1 %v3434_v28  ;;  %v6089_v28 = vld [vmem:[%s8045_s3 + $0x1e4] ss:$16 sps:$4 sm:$0xff]  }
 0x4da   : > { %4223 = vmatpush1.bf16.msra.mxu0 %v5997_v26  ;;  %4264 = vmatpush1.bf16.msra.mxu1 %v6000_v49  ;;  %v6081_v26 = vld [vmem:[%s8045_s3 + $0x1c0] ss:$16 sps:$4 sm:$0xff]   ;;  %v6084_v49 = vld [vmem:[%s8045_s3 + $0x1c8] ss:$16 sps:$4 sm:$0xff]  }
 0x4db   : > { %4254 = vmatprep.mubr.bf16.mxu0 %v3259_v33  ;;  %4295 = vmatprep.mubr.bf16.mxu1 %v3259_v33  ;;  %v3258_v33 = vpack.c.bf16 %v7646_v2, %v7646_v2  ;;  %v4359_v2 = vld [vmem:[%s8047_s5] sm:$0xff] }
 0x4dc   : > { %4224 = vmatprep.subr.bf16.mxu0 %v6005_v29  ;;  %4265 = vmatprep.subr.bf16.mxu1 %v6008_v30  ;;  %v6087_v29 = vld [vmem:[%s8045_s3 + $0x1e0] ss:$16 sps:$4 sm:$0xff]   ;;  %v6090_v30 = vld [vmem:[%s8045_s3 + $0x1e8] ss:$16 sps:$4 sm:$0xff]  }
 0x4de   : > { %4225 = vmatpush1.bf16.msra.mxu0 %v6003_v35  ;;  %4266 = vmatpush1.bf16.msra.mxu1 %v6006_v36  ;;  %v4375_v35 = vld [vmem:[%s8047_s5 + $0x80] sm:$0xff]  ;;  %v4376_v36 = vld [vmem:[%s8047_s5 + $0x88] sm:$0xff] }
 0x4df   : > { %4226 = vmatprep.subr.bf16.mxu0 %v6011_v39  ;;  %4267 = vmatprep.subr.bf16.mxu1 %v6014_v19  ;;  %v4407_v39 = vld [vmem:[%s8047_s5 + $0x180] sm:$0xff]  ;;  %v5216_v19 = vpack.c.bf16 %v4376_v36, %v4375_v35  ;;  %v4385_v35 = vld [vmem:[%s8047_s5 + $0xd0] sm:$0xff]  ;;  %v4386_v36 = vld [vmem:[%s8047_s5 + $0xd8] sm:$0xff] }
 0x4e2   : > { %4227 = vmatpush1.bf16.msra.mxu0 %v6009_v40  ;;  %4268 = vmatpush1.bf16.msra.mxu1 %v6012_v41  ;;  %v4408_v40 = vld [vmem:[%s8047_s5 + $0x188] sm:$0xff] }
 0x4e3   : > { %4228 = vmatprep.subr.bf16.mxu0 %v6017_v42  ;;  %4269 = vmatprep.subr.bf16.mxu1 %v6020_v43  ;;  %v4360_v41 = vld [vmem:[%s8047_s5 + $0x8] sm:$0xff]  ;;  %v5248_v42 = vpack.c.bf16 %v4408_v40, %v4407_v39  ;;  %v4417_v39 = vld [vmem:[%s8047_s5 + $0x1d0] sm:$0xff]  ;;  %v4418_v40 = vld [vmem:[%s8047_s5 + $0x1d8] sm:$0xff] }
 0x4e4   : > { %v5218_v43 = vpack.c.bf16 %v4360_v41, %v4359_v2  ;;  %v4369_v2 = vld [vmem:[%s8047_s5 + $0x50] sm:$0xff]  ;;  %v4370_v41 = vld [vmem:[%s8047_s5 + $0x58] sm:$0xff] }
 0x4e6   : > { %4229 = vmatpush1.bf16.msra.mxu0 %v6015_v44  ;;  %4270 = vmatpush1.bf16.msra.mxu1 %v6018_v45  ;;  %v4391_v44 = vld [vmem:[%s8047_s5 + $0x100] sm:$0xff]  ;;  %v4392_v45 = vld [vmem:[%s8047_s5 + $0x108] sm:$0xff] }
 0x4e7   : > { %4230 = vmatprep.subr.bf16.mxu0 %v6023_v46  ;;  %4271 = vmatprep.subr.bf16.mxu1 %v6026_v47  ;;  %v4377_v46 = vld [vmem:[%s8047_s5 + $0x90] sm:$0xff]  ;;  %v5250_v47 = vpack.c.bf16 %v4392_v45, %v4391_v44  ;;  %v4402_v45 = vld [vmem:[%s8047_s5 + $0x158] sm:$0xff] }
 0x4e8   : > { %v4401_v44 = vld [vmem:[%s8047_s5 + $0x150] sm:$0xff] }
 0x4ea   : > { %4231 = vmatpush1.bf16.msra.mxu0 %v6021_v48  ;;  %4272 = vmatpush1.bf16.msra.mxu1 %v6024_v50  ;;  %v4378_v48 = vld [vmem:[%s8047_s5 + $0x98] sm:$0xff]  ;;  %v4409_v50 = vld [vmem:[%s8047_s5 + $0x190] sm:$0xff] }
 0x4eb   : > { %4232 = vmatprep.subr.bf16.mxu0 %v6029_v51  ;;  %4273 = vmatprep.subr.bf16.mxu1 %v6032_v52  ;;  %v4410_v51 = vld [vmem:[%s8047_s5 + $0x198] sm:$0xff]  ;;  %v5220_v52 = vpack.c.bf16 %v4378_v48, %v4377_v46  ;;  %v5270_v46 = vpack.c.bf16 %v4402_v45, %v4401_v44  ;;  %v4388_v48 = vld [vmem:[%s8047_s5 + $0xe8] sm:$0xff] }
 0x4ee   : > { %4233 = vmatpush1.bf16.msra.mxu0 %v6027_v53  ;;  %4274 = vmatpush1.bf16.msra.mxu1 %v6030_v54  ;;  %v5252_v53 = vpack.c.bf16 %v4410_v51, %v4409_v50  ;;  %v4361_v54 = vld [vmem:[%s8047_s5 + $0x10] sm:$0xff]  ;;  %v4419_v50 = vld [vmem:[%s8047_s5 + $0x1e0] sm:$0xff] }
 0x4ef   : > { %4234 = vmatprep.subr.bf16.mxu0 %v6035_v55  ;;  %4275 = vmatprep.subr.bf16.mxu1 %v6038_v56  ;;  %v4362_v55 = vld [vmem:[%s8047_s5 + $0x18] sm:$0xff]  ;;  %v4393_v56 = vld [vmem:[%s8047_s5 + $0x110] sm:$0xff] }
 0x4f2   : > { %4235 = vmatpush1.bf16.msra.mxu0 %v6033_v57  ;;  %4276 = vmatpush1.bf16.msra.mxu1 %v6036_v58  ;;  %v5222_v57 = vpack.c.bf16 %v4362_v55, %v4361_v54  ;;  %v4394_v58 = vld [vmem:[%s8047_s5 + $0x118] sm:$0xff]  ;;  %v4372_v54 = vld [vmem:[%s8047_s5 + $0x68] sm:$0xff] }
 0x4f3   : > { %4236 = vmatprep.subr.bf16.mxu0 %v6041_v59  ;;  %4277 = vmatprep.subr.bf16.mxu1 %v6044_v60  ;;  %v4379_v59 = vld [vmem:[%s8047_s5 + $0xa0] sm:$0xff]  ;;  %v4380_v60 = vld [vmem:[%s8047_s5 + $0xa8] sm:$0xff] }
 0x4f6   : > { %4237 = vmatpush1.bf16.msra.mxu0 %v6039_v61  ;;  %4278 = vmatpush1.bf16.msra.mxu1 %v6042_v63  ;;  %v5254_v61 = vpack.c.bf16 %v4394_v58, %v4393_v56  ;;  %v5224_v63 = vpack.c.bf16 %v4380_v60, %v4379_v59  ;;  %v4404_v58 = vld [vmem:[%s8047_s5 + $0x168] sm:$0xff]  ;;  %v4389_v60 = vld [vmem:[%s8047_s5 + $0xf0] sm:$0xff] }
 0x4f7   : > { %4238 = vmatprep.subr.bf16.mxu0 %v6047_v0  ;;  %4279 = vmatprep.subr.bf16.mxu1 %v6050_v3  ;;  %v4411_v0 = vld [vmem:[%s8047_s5 + $0x1a0] sm:$0xff]  ;;  %v4412_v3 = vld [vmem:[%s8047_s5 + $0x1a8] sm:$0xff] }
 0x4fa   : > { %4239 = vmatpush1.bf16.msra.mxu0 %v6045_v5  ;;  %4280 = vmatpush1.bf16.msra.mxu1 %v6048_v7  ;;  %v4363_v5 = vld [vmem:[%s8047_s5 + $0x20] sm:$0xff]  ;;  %v5256_v7 = vpack.c.bf16 %v4412_v3, %v4411_v0  ;;  %v4422_v3 = vld [vmem:[%s8047_s5 + $0x1f8] sm:$0xff] }
 0x4fb   : > { %4240 = vmatprep.subr.bf16.mxu0 %v6053_v8  ;;  %4281 = vmatprep.subr.bf16.mxu1 %v6056_v1  ;;  %v4364_v8 = vld [vmem:[%s8047_s5 + $0x28] sm:$0xff]  ;;  %v4395_v1 = vld [vmem:[%s8047_s5 + $0x120] sm:$0xff] }
 0x4fe   : > { %4241 = vmatpush1.bf16.msra.mxu0 %v6051_v27  ;;  %4282 = vmatpush1.bf16.msra.mxu1 %v6054_v4  ;;  %v4396_v27 = vld [vmem:[%s8047_s5 + $0x128] sm:$0xff]  ;;  %v5226_v4 = vpack.c.bf16 %v4364_v8, %v4363_v5  ;;  %v4373_v5 = vld [vmem:[%s8047_s5 + $0x70] sm:$0xff] }
 0x4ff   : > { %4242 = vmatprep.subr.bf16.mxu0 %v6059_v9  ;;  %4283 = vmatprep.subr.bf16.mxu1 %v6062_v10  ;;  %v5258_v9 = vpack.c.bf16 %v4396_v27, %v4395_v1  ;;  %v4381_v10 = vld [vmem:[%s8047_s5 + $0xb0] sm:$0xff] }
 0x500   : > { %v4405_v27 = vld [vmem:[%s8047_s5 + $0x170] sm:$0xff] }
 0x502   : > { %4243 = vmatpush1.bf16.msra.mxu0 %v6057_v11  ;;  %4284 = vmatpush1.bf16.msra.mxu1 %v6060_v13  ;;  %v4382_v11 = vld [vmem:[%s8047_s5 + $0xb8] sm:$0xff]  ;;  %v4413_v13 = vld [vmem:[%s8047_s5 + $0x1b0] sm:$0xff] }
 0x503   : > { %4244 = vmatprep.subr.bf16.mxu0 %v6065_v14  ;;  %4285 = vmatprep.subr.bf16.mxu1 %v6068_v15  ;;  %v5228_v14 = vpack.c.bf16 %v4382_v11, %v4381_v10  ;;  %v4414_v15 = vld [vmem:[%s8047_s5 + $0x1b8] sm:$0xff] }
 0x506   : > { %4245 = vmatpush1.bf16.msra.mxu0 %v6063_v16  ;;  %4286 = vmatpush1.bf16.msra.mxu1 %v6066_v17  ;;  %v4365_v16 = vld [vmem:[%s8047_s5 + $0x30] sm:$0xff]  ;;  %v4366_v17 = vld [vmem:[%s8047_s5 + $0x38] sm:$0xff] }
 0x507   : > { %4246 = vmatprep.subr.bf16.mxu0 %v6071_v32  ;;  %4287 = vmatprep.subr.bf16.mxu1 %v6074_v6  ;;  %v5260_v32 = vpack.c.bf16 %v4414_v15, %v4413_v13  ;;  %v5230_v6 = vpack.c.bf16 %v4366_v17, %v4365_v16 }
 0x50a   : > { %4247 = vmatpush1.bf16.msra.mxu0 %v6069_v34  ;;  %4288 = vmatpush1.bf16.msra.mxu1 %v6072_v18  ;;  %v4397_v34 = vld [vmem:[%s8047_s5 + $0x130] sm:$0xff]  ;;  %v4398_v18 = vld [vmem:[%s8047_s5 + $0x138] sm:$0xff] }
 0x50b   : > { %4248 = vmatprep.subr.bf16.mxu0 %v6077_v20  ;;  %4289 = vmatprep.subr.bf16.mxu1 %v6080_v21  ;;  %v5262_v20 = vpack.c.bf16 %v4398_v18, %v4397_v34  ;;  %v4383_v21 = vld [vmem:[%s8047_s5 + $0xc0] sm:$0xff] }
 0x50e   : > { %4249 = vmatpush1.bf16.msra.mxu0 %v6075_v22  ;;  %4290 = vmatpush1.bf16.msra.mxu1 %v6078_v23  ;;  %v4384_v22 = vld [vmem:[%s8047_s5 + $0xc8] sm:$0xff]  ;;  %v4415_v23 = vld [vmem:[%s8047_s5 + $0x1c0] sm:$0xff] }
 0x50f   : > { %4250 = vmatprep.subr.bf16.mxu0 %v6083_v24  ;;  %4291 = vmatprep.subr.bf16.mxu1 %v6086_v25  ;;  %v5232_v24 = vpack.c.bf16 %v4384_v22, %v4383_v21  ;;  %v4416_v25 = vld [vmem:[%s8047_s5 + $0x1c8] sm:$0xff] }
 0x512   : > { %4251 = vmatpush1.bf16.msra.mxu0 %v6081_v26  ;;  %4292 = vmatpush1.bf16.msra.mxu1 %v6084_v49  ;;  %v4367_v26 = vld [vmem:[%s8047_s5 + $0x40] sm:$0xff]  ;;  %v4368_v49 = vld [vmem:[%s8047_s5 + $0x48] sm:$0xff] }
 0x513   : > { %4252 = vmatprep.subr.bf16.mxu0 %v6089_v28  ;;  %4293 = vmatprep.subr.bf16.mxu1 %v6092_v12  ;;  %v5264_v28 = vpack.c.bf16 %v4416_v25, %v4415_v23  ;;  %v5234_v12 = vpack.c.bf16 %v4368_v49, %v4367_v26 }
 0x516   : > { %4253 = vmatpush1.bf16.msra.mxu0 %v6087_v29  ;;  %4294 = vmatpush1.bf16.msra.mxu1 %v6090_v30  ;;  %v4399_v29 = vld [vmem:[%s8047_s5 + $0x140] sm:$0xff]  ;;  %v4400_v30 = vld [vmem:[%s8047_s5 + $0x148] sm:$0xff] }
 0x517   : > { %5217 = vmatprep.subr.bf16.mxu0 %v5216_v19  ;;  %5249 = vmatprep.subr.bf16.mxu1 %v5248_v42  ;;  %v5236_v19 = vpack.c.bf16 %v4386_v36, %v4385_v35  ;;  %v5268_v42 = vpack.c.bf16 %v4418_v40, %v4417_v39 }
 0x519   : > { %4255 = vmatmul.mubr.bf16.vlgmr.msra.gmra.mrb[24].mxu0 %v3258_v33  ;;  %4296 = vmatmul.mubr.bf16.vlgmr.msra.gmra.mrb[24].mxu1 %v3258_v33  ;;  %v5266_v33 = vpack.c.bf16 %v4400_v30, %v4399_v29 }
 0x51a   : > { %5219 = vmatpush3.bf16.msra.mxu0 %v5218_v43  ;;  %5251 = vmatpush3.bf16.msra.mxu1 %v5250_v47  ;;  %v5238_v43 = vpack.c.bf16 %v4370_v41, %v4369_v2  ;;  %v4387_v47 = vld [vmem:[%s8047_s5 + $0xe0] sm:$0xff] }
 0x51b   : > { %5221 = vmatprep.subr.bf16.mxu0 %v5220_v52  ;;  %5253 = vmatprep.subr.bf16.mxu1 %v5252_v53  ;;  %v5240_v51 = vpack.c.bf16 %v4388_v48, %v4387_v47  ;;  %v4420_v52 = vld [vmem:[%s8047_s5 + $0x1e8] sm:$0xff]  ;;  %v4371_v53 = vld [vmem:[%s8047_s5 + $0x60] sm:$0xff] }
 0x51c   : > { %v5272_v55 = vpack.c.bf16 %v4420_v52, %v4419_v50  ;;  %v5242_v56 = vpack.c.bf16 %v4372_v54, %v4371_v53 }
 0x51e   : > { %5223 = vmatpush3.bf16.msra.mxu0 %v5222_v57  ;;  %5255 = vmatpush3.bf16.msra.mxu1 %v5254_v61  ;;  %v4403_v57 = vld [vmem:[%s8047_s5 + $0x160] sm:$0xff]  ;;  %v4390_v61 = vld [vmem:[%s8047_s5 + $0xf8] sm:$0xff] }
 0x51f   : > { %5225 = vmatprep.subr.bf16.mxu0 %v5224_v63  ;;  %5257 = vmatprep.subr.bf16.mxu1 %v5256_v7  ;;  %v5274_v59 = vpack.c.bf16 %v4404_v58, %v4403_v57  ;;  %v4421_v63 = vld [vmem:[%s8047_s5 + $0x1f0] sm:$0xff]  ;;  %v5244_v0 = vpack.c.bf16 %v4390_v61, %v4389_v60  ;;  %v4374_v7 = vld [vmem:[%s8047_s5 + $0x78] sm:$0xff] }
 0x520   : > { %v5276_v8 = vpack.c.bf16 %v4422_v3, %v4421_v63  ;;  %v5246_v1 = vpack.c.bf16 %v4374_v7, %v4373_v5 }
 0x522   : > { %5227 = vmatpush3.bf16.msra.mxu0 %v5226_v4  ;;  %5259 = vmatpush3.bf16.msra.mxu1 %v5258_v9  ;;  %v4406_v4 = vld [vmem:[%s8047_s5 + $0x178] sm:$0xff] }
 0x523   : > { %5229 = vmatprep.subr.bf16.mxu0 %v5228_v14  ;;  %5261 = vmatprep.subr.bf16.mxu1 %v5260_v32  ;;  %v5278_v9 = vpack.c.bf16 %v4406_v4, %v4405_v27 }
 0x526   : > { %5231 = vmatpush3.bf16.msra.mxu0 %v5230_v6  ;;  %5263 = vmatpush3.bf16.msra.mxu1 %v5262_v20  ;;  %v4304_v6 = vld [vmem:[%s8046_s4] sm:$0xf] }
 0x527   : > { %5233 = vmatprep.subr.bf16.mxu0 %v5232_v24  ;;  %5265 = vmatprep.subr.bf16.mxu1 %v5264_v28  ;;  %v4309_v34 = vrot.slane %v4304_v6, %v7356_v37  ;;  %v4317_v18 = vrot.slane %v4304_v6, %v7383_v62  ;;  %v4313_v22 = vrot.slane %v4304_v6, %v7180_v31 }
 0x528   : > { %v4321_v23 = vrot.slane %v4304_v6, %v7359_v38 }
 0x52a   : > { %5235 = vmatpush3.bf16.msra.mxu0 %v5234_v12  ;;  %5267 = vmatpush3.bf16.msra.mxu1 %v5266_v33 }
 0x52b   : > { %5237 = vmatprep.subr.bf16.mxu0 %v5236_v19  ;;  %5269 = vmatprep.subr.bf16.mxu1 %v5268_v42 }
 0x52e   : > { %5239 = vmatpush3.bf16.msra.mxu0 %v5238_v43  ;;  %5271 = vmatpush3.bf16.msra.mxu1 %v5270_v46 }
 0x52f   : > { %5241 = vmatprep.subr.bf16.mxu0 %v5240_v51  ;;  %5273 = vmatprep.subr.bf16.mxu1 %v5272_v55 }
 0x532   : > { %5243 = vmatpush3.bf16.msra.mxu0 %v5242_v56  ;;  %5275 = vmatpush3.bf16.msra.mxu1 %v5274_v59 }
 0x533   : > { %5245 = vmatprep.subr.bf16.mxu0 %v5244_v0  ;;  %5277 = vmatprep.subr.bf16.mxu1 %v5276_v8  ;;  %v4423_v8 = vld [vmem:[#allocation2] sm:$0x1] }
 0x536   : > { %5247 = vmatpush3.bf16.msra.mxu0 %v5246_v1  ;;  %5279 = vmatpush3.bf16.msra.mxu1 %v5278_v9 }
 0x5ac   : > { %v3854_v10 = vpop.f32.mrb[20].mxu0  ;;  %v3895_v11 = vpop.f32.mrb[20].mxu1 }
 0x5ad   : > { %v3856_v13 = vpop.f32.mrb[21].mxu0  ;;  %v3897_v14 = vpop.f32.mrb[21].mxu1 }
 0x5ae   : > { %v3858_v15 = vpop.f32.mrb[22].mxu0  ;;  %v3899_v16 = vpop.f32.mrb[22].mxu1 }
 0x5af   : > { %v3859_v17 = vpop.f32.mrb[23].mxu0  ;;  %v3900_v32 = vpop.f32.mrb[23].mxu1 }
 0x5ec   : > { %v4256_v20 = vpop.f32.mrb[24].mxu0  ;;  %v4297_v21 = vpop.f32.mrb[24].mxu1 }
 0x5ed   : > { %v4257_v24 = vadd.f32 %v4256_v20, %v3854_v10  ;;  %v4298_v25 = vadd.f32 %v4297_v21, %v3895_v11  ;;  %v4258_v26 = vpop.f32.mrb[25].mxu0  ;;  %v4299_v49 = vpop.f32.mrb[25].mxu1 }
 0x5ee   : > { %v4259_v28 = vadd.f32 %v4258_v26, %v3856_v13  ;;  %v4300_v12 = vadd.f32 %v4299_v49, %v3897_v14  ;;  %v4260_v29 = vpop.f32.mrb[26].mxu0  ;;  %v4301_v30 = vpop.f32.mrb[26].mxu1 }
 0x5ef   : > { %v4326_v33 = vadd.f32 %v4309_v34, %v4257_v24  ;;  %v4328_v35 = vadd.f32 %v4317_v18, %v4298_v25  ;;  %v4261_v36 = vpop.f32.mrb[27].mxu0  ;;  %v4302_v37 = vpop.f32.mrb[27].mxu1 }
 0x5f0   : > { %v4327_v39 = vadd.f32 %v4313_v22, %v4259_v28  ;;  %v4329_v62 = vadd.f32 %v4321_v23, %v4300_v12 }
 0x5f1   : > { %v4330_v19 = vrot.slane %v4326_v33, 4  ;;  %v4342_v40 = vrot.slane %v4328_v35, 4 }
 0x5f2   : > { %v4336_v2 = vrot.slane %v4327_v39, 4  ;;  %v4348_v31 = vrot.slane %v4329_v62, 4 }
 0x5f3   : > { %v4331_v41 = vadd.f32 %v4330_v19, %v4326_v33  ;;  %v4343_v38 = vadd.f32 %v4342_v40, %v4328_v35 }
 0x5f4   : > { %v4337_v42 = vadd.f32 %v4336_v2, %v4327_v39  ;;  %v4349_v43 = vadd.f32 %v4348_v31, %v4329_v62 }
 0x5f5   : > { %v4332_v44 = vrot.slane %v4331_v41, 2  ;;  %v4344_v45 = vrot.slane %v4343_v38, 2 }
 0x5f6   : > { %v4338_v46 = vrot.slane %v4337_v42, 2  ;;  %v4350_v47 = vrot.slane %v4349_v43, 2 }
 0x5f7   : > { %v4333_v48 = vadd.f32 %v4332_v44, %v4331_v41  ;;  %v4345_v50 = vadd.f32 %v4344_v45, %v4343_v38 }
 0x5f8   : > { %v4339_v51 = vadd.f32 %v4338_v46, %v4337_v42  ;;  %v4351_v52 = vadd.f32 %v4350_v47, %v4349_v43 }
 0x5f9   : > { %v4334_v53 = vrot.slane %v4333_v48, 1  ;;  %v4346_v54 = vrot.slane %v4345_v50, 1 }
 0x5fa   : > { %v4340_v55 = vrot.slane %v4339_v51, 1  ;;  %v4352_v56 = vrot.slane %v4351_v52, 1 }
 0x5fb   : > { %v4335_v57 = vadd.f32 %v4334_v53, %v4333_v48  ;;  %v4347_v58 = vadd.f32 %v4346_v54, %v4345_v50 }
 0x5fc   : > { %v4341_v59 = vadd.f32 %v4340_v55, %v4339_v51  ;;  %v4353_v60 = vadd.f32 %v4352_v56, %v4351_v52 }
 0x5fd   : > { %v4355_v0 = vmul.f32 0.125, %v4335_v57  ;;  %v4357_v3 = vmul.f32 0.125, %v4347_v58 }
 0x5fe   : > { %v4356_v61 = vmul.f32 0.125, %v4341_v59  ;;  %v4358_v63 = vmul.f32 0.125, %v4353_v60 }
 0x600   : > { %4488 = vmatprep.mubr.f32.mxu0 %v4356_v61  ;;  %4558 = vmatprep.mubr.f32.mxu1 %v4358_v63 }
 0x601   : > { %4489 = vmatmul.mubr.f32.vlgmr.msra.gmra.mrb[28].mxu0 %v4355_v0  ;;  %4559 = vmatmul.mubr.f32.vlgmr.msra.gmra.mrb[28].mxu1 %v4357_v3 }
 0x6d4   : > { %v5178_v5 = vpop.f32.mrb[28].mxu0  ;;  %v5213_v7 = vpop.f32.mrb[28].mxu1 }
 0x6d5   : > { %v5179_v1 = vpop.f32.mrb[29].mxu0  ;;  %v5214_v27 = vpop.f32.mrb[29].mxu1 }
 0x6d6   : > { %v5180_v4 = vadd.f32 %v5179_v1, %v5178_v5  ;;  %v5215_v9 = vadd.f32 %v5214_v27, %v5213_v7 }
 0x6d8   : > { %v4491_v10 = vadd.f32 %v5180_v4, %v4423_v8 }
 0x6da   : > { %v4561_v11 = vadd.f32 %v5215_v9, %v4491_v10 }
 0x6dc   : > { %v5142_v13 = vmul.f32 -1.442695, %v4561_v11 }
 0x6de   : > { %6101 = vpow2.f32 %v5142_v13 }
 0x6e8   : > { %v6102_v14 = vpop.eup %6101 }
 0x6e9   : > { %v4567_v15 = vadd.f32 1.0, %v6102_v14 }
 0x6eb   : > { %6103 = vrcp.f32 %v4567_v15 }
 0x6f5   : > { %v6104_v16 = vpop.eup %6103 }
 0x6f6   : > { %4571 = vst.msk [vmem:[%s276_s10] sm:$0x1] %vm4570_vm2, %v6104_v16 }
 0x6f7 PF: > { %s19_s26 = sadd.s32 1, %s6111_s26  }
 0x6f8   : > { %p16_p4 = scmp.ge.s32.totalorder %s19_s26, 4  }
 0x6fa   :  { %18 = sbr.rel (!%p16_p4) target bundleno = 3 (0x3), region = 78 }

</bundles_post_ra>
